<compile_context>
chip_gen: v5e
topology: v5e:2x2
jax: 0.10.0
libtpu: 0.0.40
codegen_flags: <defaults>
</compile_context>

<pallas_src>
import functools

import jax
import jax.numpy as jnp
from jax.experimental import pallas as pl
from jax.experimental.pallas import tpu as pltpu

K_LATENT = 1000   # self.k in the PyTorch module
K_PAD = 1024      # k padded to a 128-lane multiple (aligned split, dense stores)
A_PAD = 128       # decoder output padded to one full vreg lane width


def _vib_kernel(s_ref, eps_ref,
                w1_ref, b1_ref, w2_ref, b2_ref,
                w3_ref, b3_ref, wd_ref, bd_ref,
                logit_ref, mu_ref, std_ref):
    bf16 = jnp.bfloat16
    f32 = jnp.float32

    s = s_ref[...].astype(bf16)

    # encoder: Linear -> ReLU -> Linear -> ReLU -> Linear (2*K_PAD wide)
    h1 = jnp.dot(s, w1_ref[...], preferred_element_type=f32) + b1_ref[...]
    h1 = jnp.maximum(h1, 0.0).astype(bf16)
    h2 = jnp.dot(h1, w2_ref[...], preferred_element_type=f32) + b2_ref[...]
    h2 = jnp.maximum(h2, 0.0).astype(bf16)

    latent = jnp.dot(h2, w3_ref[...], preferred_element_type=f32) + b3_ref[...]

    k_pad = w3_ref.shape[1] // 2          # 1024: vreg-aligned split point

    mu = latent[:, :k_pad]                # lane-aligned (free) slices
    pre = latent[:, k_pad:] - 5.0
    # numerically-stable softplus (beta=1): max(x,0) + log(1 + exp(-|x|))
    std = jnp.maximum(pre, 0.0) + jnp.log(1.0 + jnp.exp(-jnp.abs(pre)))

    # reparametrize_n with n=1: eps supplied by the wrapper; keep the
    # mu + eps*std accumulation in f32, cast once for the decoder MXU matmul.
    enc = (mu + eps_ref[...] * std).astype(bf16)

    # decoder: Linear(k -> a_dim), padded to A_PAD lanes; padded latent lanes
    # hit zero rows of Wd, padded output lanes are zero columns.
    logit = jnp.dot(enc, wd_ref[...], preferred_element_type=f32) + bd_ref[...]

    # Lane-dense stores (block widths are multiples of 128); the narrow
    # k=1000 / a_dim slices happen outside the kernel.
    logit_ref[...] = logit
    mu_ref[...] = mu
    std_ref[...] = std


def prepare_params(params, k=K_LATENT, k_pad=K_PAD, a_pad=A_PAD):
    """One-time parameter glue, OUTSIDE the per-step forward.

    Casts weights to bf16 and repacks the 2k-wide third linear as
    [mu | 0pad | std | 0pad] (width 2*k_pad) so the mu/std split is
    128-lane aligned inside the kernel.  The decoder weight gets zero rows
    for the padded latent lanes and zero columns for the padded output lanes,
    so padding can never affect the logits.
    """
    w1, b1, w2, b2, w3, b3, wd, bd = params
    h_dim = w1.shape[1]
    a_dim = wd.shape[1]
    assert a_dim <= a_pad

    w3p = jnp.zeros((h_dim, 2 * k_pad), jnp.float32)
    w3p = w3p.at[:, :k].set(w3[:, :k]).at[:, k_pad:k_pad + k].set(w3[:, k:])
    b3p = jnp.zeros((1, 2 * k_pad), jnp.float32)
    b3p = b3p.at[:, :k].set(b3[:, :k]).at[:, k_pad:k_pad + k].set(b3[:, k:])
    wdp = jnp.zeros((k_pad, a_pad), jnp.float32).at[:k, :a_dim].set(wd)
    bdp = jnp.zeros((1, a_pad), jnp.float32).at[:, :a_dim].set(bd)

    return (w1.astype(jnp.bfloat16), b1.astype(jnp.float32),
            w2.astype(jnp.bfloat16), b2.astype(jnp.float32),
            w3p.astype(jnp.bfloat16), b3p.astype(jnp.float32),
            wdp.astype(jnp.bfloat16), bdp.astype(jnp.float32))


def _prefer_split_grid():
    """True on chips with >1 TensorCore behind one device (v7x, v4/v5p
    megacore), where a grid of >= 2 parallel steps feeds both cores.  On
    single-TC v5e/v6e (and CPU interpret) the grid is a serial loop, so a
    single big tile is better."""
    try:
        kind = jax.devices()[0].device_kind.lower()
    except Exception:
        return False
    return any(tag in kind for tag in ("v7", "v4", "v5p"))


def _pick_block_b(batch, *, split_grid, max_block=512,
                  bytes_per_row=48 * 1024, vmem_budget=24 << 20):
    """Generation-aware batch tile under an explicit VMEM budget
    (~48 KB/row: 2*K_PAD f32 latent + several K_PAD f32 temporaries + the
    double-buffered mu/std/logit output blocks)."""
    cap = min(batch, max_block,
              max(8, ((vmem_budget // bytes_per_row) // 8) * 8))
    cands = [d for d in range(8, cap + 1, 8) if batch % d == 0]
    if not cands:
        return batch                      # tiny / odd batch: one full block
    if split_grid:
        even = [d for d in cands if (batch // d) >= 2 and (batch // d) % 2 == 0]
        if even:
            return max(even)
        multi = [d for d in cands if batch // d >= 2]
        if multi:
            return max(multi)
    return max(cands)


@functools.partial(jax.jit, static_argnames=("a_dim", "block_b"))
def vib_forward(s, params, eps, a_dim, block_b=None):
    """nn_vib forward (num_sample=1). `params` must come from prepare_params.
    `eps` is N(0,1) noise of shape (B, K_PAD).  Returns (logit, (mu, std))."""
    w1, b1, w2, b2, w3p, b3p, wdp, bdp = params
    B, s_dim = s.shape
    h_dim = w1.shape[1]
    k2p = w3p.shape[1]                    # 2 * K_PAD
    a_pad = wdp.shape[1]                  # A_PAD
    k = K_LATENT

    if block_b is None:
        block_b = _pick_block_b(B, split_grid=_prefer_split_grid())
    assert B % block_b == 0, (B, block_b)
    grid = (B // block_b,)

    def batch_spec(d):
        return pl.BlockSpec((block_b, d), lambda i: (i, 0))

    def const_spec(shape):
        # Grid-invariant weights/biases (constant index_map -> fetched once).
        # Total well under 1 MB at these shapes; for much larger h_dim/k on
        # v7x consider pipeline_mode=pl.Buffered(1) here to halve residency.
        return pl.BlockSpec(shape, lambda i: (0, 0))

    # Advisory cost hint: this kernel is EUP-bound (softplus ~= exp + log per
    # element over B x K_PAD), which XLA cannot infer from the custom call.
    mm_flops = 2 * B * (s_dim * h_dim + h_dim * h_dim + h_dim * k2p + K_PAD * a_pad)
    cost = pl.CostEstimate(
        flops=mm_flops,
        transcendentals=2 * B * K_PAD,
        bytes_accessed=(4 * B * (s_dim + K_PAD)                       # s, eps
                        + 2 * (s_dim * h_dim + h_dim * h_dim
                               + h_dim * k2p + K_PAD * a_pad)         # bf16 W
                        + 4 * (2 * h_dim + k2p + a_pad)               # biases
                        + 4 * B * (a_pad + 2 * K_PAD)))               # outputs

    out_shapes = (
        jax.ShapeDtypeStruct((B, a_pad), jnp.float32),   # logit (padded)
        jax.ShapeDtypeStruct((B, K_PAD), jnp.float32),   # mu    (padded)
        jax.ShapeDtypeStruct((B, K_PAD), jnp.float32),   # std   (padded)
    )

    logit_p, mu_p, std_p = pl.pallas_call(
        _vib_kernel,
        out_shape=out_shapes,
        grid=grid,
        in_specs=[
            batch_spec(s_dim),            # s
            batch_spec(K_PAD),            # eps
            const_spec((s_dim, h_dim)),   # w1   (bf16)
            const_spec((1, h_dim)),       # b1   (f32)
            const_spec((h_dim, h_dim)),   # w2   (bf16)
            const_spec((1, h_dim)),       # b2   (f32)
            const_spec((h_dim, k2p)),     # w3   (bf16, [mu|pad|std|pad])
            const_spec((1, k2p)),         # b3   (f32, same packing)
            const_spec((K_PAD, a_pad)),   # wd   (bf16, zero pad rows/cols)
            const_spec((1, a_pad)),       # bd   (f32, zero pad cols)
        ],
        out_specs=(
            batch_spec(a_pad),            # logit
            batch_spec(K_PAD),            # mu
            batch_spec(K_PAD),            # std
        ),
        compiler_params=pltpu.CompilerParams(
            dimension_semantics=("parallel",),
        ),
        cost_estimate=cost,
    )(s, eps, w1, b1, w2, b2, w3p, b3p, wdp, bdp)

    # Narrow slices happen here (cheap XLA slice), not in the kernel; padded
    # std lanes are softplus(-5) != 0 so they must not be exposed.
    return logit_p[:, :a_dim], (mu_p[:, :k], std_p[:, :k])


def init_params(key, s_dim, h_dim, a_dim, k=K_LATENT):
    """Deterministic init mimicking nn.Linear defaults (U[-1/sqrt(fan_in), +])."""
    ks = jax.random.split(key, 8)

    def lin(kw, kb, fan_in, fan_out):
        bound = 1.0 / jnp.sqrt(fan_in)
        w = jax.random.uniform(kw, (fan_in, fan_out), jnp.float32, -bound, bound)
        b = jax.random.uniform(kb, (1, fan_out), jnp.float32, -bound, bound)
        return w, b

    w1, b1 = lin(ks[0], ks[1], s_dim, h_dim)
    w2, b2 = lin(ks[2], ks[3], h_dim, h_dim)
    w3, b3 = lin(ks[4], ks[5], h_dim, 2 * k)
    wd, bd = lin(ks[6], ks[7], k, a_dim)
    return (w1, b1, w2, b2, w3, b3, wd, bd)


def _reference(s, packed, eps, a_dim, k=K_LATENT):
    """Pure-JAX reference with the same bf16-weight / f32-accumulate precision
    and the same externally supplied eps (fully deterministic check)."""
    w1, b1, w2, b2, w3p, b3p, wdp, bdp = packed
    bf16 = jnp.bfloat16

    def mm(x, w):
        return jnp.dot(x.astype(bf16), w, preferred_element_type=jnp.float32)

    h1 = jnp.maximum(mm(s, w1) + b1, 0.0)
    h2 = jnp.maximum(mm(h1, w2) + b2, 0.0)
    latent = mm(h2, w3p) + b3p
    k_pad = w3p.shape[1] // 2
    mu = latent[:, :k_pad]
    std = jax.nn.softplus(latent[:, k_pad:] - 5.0)
    enc = mu + eps * std
    logit = mm(enc, wdp) + bdp
    return logit[:, :a_dim], mu[:, :k], std[:, :k]


if __name__ == "__main__":
    # Small shapes consistent with the module's forward(); batch chosen so
    # that v7x gets 2 parallel 128-row tiles while v5e/v6e run 1x256.
    B, S_DIM, H_DIM, A_DIM = 256, 64, 64, 8

    key = jax.random.PRNGKey(0)
    k_s, k_p, k_e = jax.random.split(key, 3)

    s = jax.random.normal(k_s, (B, S_DIM), jnp.float32)
    raw_params = init_params(k_p, S_DIM, H_DIM, A_DIM)
    params = prepare_params(raw_params)      # one-time glue, off the hot path
    eps = jax.random.normal(k_e, (B, K_PAD), jnp.float32)   # reparam noise

    logit, (mu, std) = vib_forward(s, params, eps, a_dim=A_DIM)
    jax.block_until_ready((logit, mu, std))

    assert logit.shape == (B, A_DIM)
    assert mu.shape == (B, K_LATENT) and std.shape == (B, K_LATENT)

    ref_logit, ref_mu, ref_std = _reference(s, params, eps, A_DIM)
    assert bool(jnp.all(jnp.isfinite(logit)))
    assert jnp.allclose(mu, ref_mu, atol=1e-2, rtol=1e-2), \
        float(jnp.max(jnp.abs(mu - ref_mu)))
    assert jnp.allclose(std, ref_std, atol=1e-2, rtol=1e-2), \
        float(jnp.max(jnp.abs(std - ref_std)))
    assert jnp.allclose(logit, ref_logit, atol=2e-2, rtol=2e-2), \
        float(jnp.max(jnp.abs(logit - ref_logit)))
    assert bool(jnp.all(std > 0.0))

    print("KERNEL_OK")
</pallas_src>

<mosaic_0001>
module attributes {stable_mosaic.version = 11 : i64} {
  func.func @_vib_kernel(%arg0: i32, %arg1: memref<256x64xf32, #tpu.memory_space<vmem>>, %arg2: memref<256x1024xf32, #tpu.memory_space<vmem>>, %arg3: memref<64x64xbf16, #tpu.memory_space<vmem>>, %arg4: memref<1x64xf32, #tpu.memory_space<vmem>>, %arg5: memref<64x64xbf16, #tpu.memory_space<vmem>>, %arg6: memref<1x64xf32, #tpu.memory_space<vmem>>, %arg7: memref<64x2048xbf16, #tpu.memory_space<vmem>>, %arg8: memref<1x2048xf32, #tpu.memory_space<vmem>>, %arg9: memref<1024x128xbf16, #tpu.memory_space<vmem>>, %arg10: memref<1x128xf32, #tpu.memory_space<vmem>>, %arg11: memref<256x128xf32, #tpu.memory_space<vmem>>, %arg12: memref<256x1024xf32, #tpu.memory_space<vmem>>, %arg13: memref<256x1024xf32, #tpu.memory_space<vmem>>) attributes {dimension_semantics = [#tpu.dimension_semantics<parallel>], iteration_bounds = array<i64: 1>, scalar_prefetch = 0 : i64, scratch_operands = 0 : i64, tpu.core_type = #tpu.core_type<tc>, window_params = [{transform_indices = @transform_0, window_bounds = array<i64: 256, 64>}, {transform_indices = @transform_1, window_bounds = array<i64: 256, 1024>}, {pipeline_mode = #tpu.pipeline_mode<synchronous>, transform_indices = @transform_2, window_bounds = array<i64: 64, 64>}, {pipeline_mode = #tpu.pipeline_mode<synchronous>, transform_indices = @transform_3, window_bounds = array<i64: 1, 64>}, {pipeline_mode = #tpu.pipeline_mode<synchronous>, transform_indices = @transform_4, window_bounds = array<i64: 64, 64>}, {pipeline_mode = #tpu.pipeline_mode<synchronous>, transform_indices = @transform_5, window_bounds = array<i64: 1, 64>}, {pipeline_mode = #tpu.pipeline_mode<synchronous>, transform_indices = @transform_6, window_bounds = array<i64: 64, 2048>}, {pipeline_mode = #tpu.pipeline_mode<synchronous>, transform_indices = @transform_7, window_bounds = array<i64: 1, 2048>}, {pipeline_mode = #tpu.pipeline_mode<synchronous>, transform_indices = @transform_8, window_bounds = array<i64: 1024, 128>}, {pipeline_mode = #tpu.pipeline_mode<synchronous>, transform_indices = @transform_9, window_bounds = array<i64: 1, 128>}, {transform_indices = @transform_10, window_bounds = array<i64: 256, 128>}, {transform_indices = @transform_11, window_bounds = array<i64: 256, 1024>}, {transform_indices = @transform_12, window_bounds = array<i64: 256, 1024>}]} {
    %c0 = arith.constant 0 : index
    %c0_0 = arith.constant 0 : index
    %0 = vector.load %arg1[%c0, %c0_0] : memref<256x64xf32, #tpu.memory_space<vmem>>, vector<256x64xf32>
    %1 = arith.truncf %0 : vector<256x64xf32> to vector<256x64xbf16>
    %c0_1 = arith.constant 0 : index
    %c0_2 = arith.constant 0 : index
    %2 = vector.load %arg3[%c0_1, %c0_2] : memref<64x64xbf16, #tpu.memory_space<vmem>>, vector<64x64xbf16>
    %cst = arith.constant dense<0.000000e+00> : vector<256x64xf32>
    %3 = tpu.matmul %1, %2, %cst {dimension_numbers = #tpu.dot_dimension_numbers<[1], [0], [0], [1], [0, 0, 1, 1], [], []>} : vector<256x64xbf16>, vector<64x64xbf16>, vector<256x64xf32> -> vector<256x64xf32>
    %c0_3 = arith.constant 0 : index
    %c0_4 = arith.constant 0 : index
    %4 = vector.load %arg4[%c0_3, %c0_4] : memref<1x64xf32, #tpu.memory_space<vmem>>, vector<1x64xf32>
    %5 = vector.broadcast %4 : vector<1x64xf32> to vector<256x64xf32>
    %6 = arith.addf %3, %5 : vector<256x64xf32>
    %cst_5 = arith.constant 0.000000e+00 : f32
    %7 = vector.broadcast %cst_5 : f32 to vector<256x64xf32>
    %8 = arith.maximumf %6, %7 : vector<256x64xf32>
    %9 = arith.truncf %8 : vector<256x64xf32> to vector<256x64xbf16>
    %c0_6 = arith.constant 0 : index
    %c0_7 = arith.constant 0 : index
    %10 = vector.load %arg5[%c0_6, %c0_7] : memref<64x64xbf16, #tpu.memory_space<vmem>>, vector<64x64xbf16>
    %cst_8 = arith.constant dense<0.000000e+00> : vector<256x64xf32>
    %11 = tpu.matmul %9, %10, %cst_8 {dimension_numbers = #tpu.dot_dimension_numbers<[1], [0], [0], [1], [0, 0, 1, 1], [], []>} : vector<256x64xbf16>, vector<64x64xbf16>, vector<256x64xf32> -> vector<256x64xf32>
    %c0_9 = arith.constant 0 : index
    %c0_10 = arith.constant 0 : index
    %12 = vector.load %arg6[%c0_9, %c0_10] : memref<1x64xf32, #tpu.memory_space<vmem>>, vector<1x64xf32>
    %13 = vector.broadcast %12 : vector<1x64xf32> to vector<256x64xf32>
    %14 = arith.addf %11, %13 : vector<256x64xf32>
    %cst_11 = arith.constant 0.000000e+00 : f32
    %15 = vector.broadcast %cst_11 : f32 to vector<256x64xf32>
    %16 = arith.maximumf %14, %15 : vector<256x64xf32>
    %17 = arith.truncf %16 : vector<256x64xf32> to vector<256x64xbf16>
    %c0_12 = arith.constant 0 : index
    %c0_13 = arith.constant 0 : index
    %18 = vector.load %arg7[%c0_12, %c0_13] : memref<64x2048xbf16, #tpu.memory_space<vmem>>, vector<64x2048xbf16>
    %cst_14 = arith.constant dense<0.000000e+00> : vector<256x2048xf32>
    %19 = tpu.matmul %17, %18, %cst_14 {dimension_numbers = #tpu.dot_dimension_numbers<[1], [0], [0], [1], [0, 0, 1, 1], [], []>} : vector<256x64xbf16>, vector<64x2048xbf16>, vector<256x2048xf32> -> vector<256x2048xf32>
    %c0_15 = arith.constant 0 : index
    %c0_16 = arith.constant 0 : index
    %20 = vector.load %arg8[%c0_15, %c0_16] : memref<1x2048xf32, #tpu.memory_space<vmem>>, vector<1x2048xf32>
    %21 = vector.broadcast %20 : vector<1x2048xf32> to vector<256x2048xf32>
    %22 = arith.addf %19, %21 : vector<256x2048xf32>
    %23 = vector.extract_strided_slice %22 {offsets = [0, 0], sizes = [256, 1024], strides = [1, 1]} : vector<256x2048xf32> to vector<256x1024xf32>
    %24 = vector.extract_strided_slice %22 {offsets = [0, 1024], sizes = [256, 1024], strides = [1, 1]} : vector<256x2048xf32> to vector<256x1024xf32>
    %cst_17 = arith.constant 5.000000e+00 : f32
    %25 = vector.broadcast %cst_17 : f32 to vector<256x1024xf32>
    %26 = arith.subf %24, %25 : vector<256x1024xf32>
    %cst_18 = arith.constant 0.000000e+00 : f32
    %27 = vector.broadcast %cst_18 : f32 to vector<256x1024xf32>
    %28 = arith.maximumf %26, %27 : vector<256x1024xf32>
    %29 = math.absf %26 : vector<256x1024xf32>
    %cst_19 = arith.constant 0.000000e+00 : f32
    %30 = vector.broadcast %cst_19 : f32 to vector<256x1024xf32>
    %31 = arith.subf %30, %29 : vector<256x1024xf32>
    %32 = math.exp %31 : vector<256x1024xf32>
    %cst_20 = arith.constant 1.000000e+00 : f32
    %33 = vector.broadcast %cst_20 : f32 to vector<256x1024xf32>
    %34 = arith.addf %33, %32 : vector<256x1024xf32>
    %35 = math.log %34 : vector<256x1024xf32>
    %36 = arith.addf %28, %35 : vector<256x1024xf32>
    %c0_21 = arith.constant 0 : index
    %c0_22 = arith.constant 0 : index
    %37 = vector.load %arg2[%c0_21, %c0_22] : memref<256x1024xf32, #tpu.memory_space<vmem>>, vector<256x1024xf32>
    %38 = arith.mulf %37, %36 : vector<256x1024xf32>
    %39 = arith.addf %23, %38 : vector<256x1024xf32>
    %40 = arith.truncf %39 : vector<256x1024xf32> to vector<256x1024xbf16>
    %c0_23 = arith.constant 0 : index
    %c0_24 = arith.constant 0 : index
    %41 = vector.load %arg9[%c0_23, %c0_24] : memref<1024x128xbf16, #tpu.memory_space<vmem>>, vector<1024x128xbf16>
    %cst_25 = arith.constant dense<0.000000e+00> : vector<256x128xf32>
    %42 = tpu.matmul %40, %41, %cst_25 {dimension_numbers = #tpu.dot_dimension_numbers<[1], [0], [0], [1], [0, 0, 1, 1], [], []>} : vector<256x1024xbf16>, vector<1024x128xbf16>, vector<256x128xf32> -> vector<256x128xf32>
    %c0_26 = arith.constant 0 : index
    %c0_27 = arith.constant 0 : index
    %43 = vector.load %arg10[%c0_26, %c0_27] : memref<1x128xf32, #tpu.memory_space<vmem>>, vector<1x128xf32>
    %44 = vector.broadcast %43 : vector<1x128xf32> to vector<256x128xf32>
    %45 = arith.addf %42, %44 : vector<256x128xf32>
    %c0_28 = arith.constant 0 : index
    %c0_29 = arith.constant 0 : index
    %46 = vector.load %arg11[%c0_28, %c0_29] : memref<256x128xf32, #tpu.memory_space<vmem>>, vector<256x128xf32>
    tpu.vector_store %arg11[%c0_28, %c0_29], %45 {strides = array<i32>} : memref<256x128xf32, #tpu.memory_space<vmem>>, vector<256x128xf32>,
    %c0_30 = arith.constant 0 : index
    %c0_31 = arith.constant 0 : index
    %47 = vector.load %arg12[%c0_30, %c0_31] : memref<256x1024xf32, #tpu.memory_space<vmem>>, vector<256x1024xf32>
    tpu.vector_store %arg12[%c0_30, %c0_31], %23 {strides = array<i32>} : memref<256x1024xf32, #tpu.memory_space<vmem>>, vector<256x1024xf32>,
    %c0_32 = arith.constant 0 : index
    %c0_33 = arith.constant 0 : index
    %48 = vector.load %arg13[%c0_32, %c0_33] : memref<256x1024xf32, #tpu.memory_space<vmem>>, vector<256x1024xf32>
    tpu.vector_store %arg13[%c0_32, %c0_33], %36 {strides = array<i32>} : memref<256x1024xf32, #tpu.memory_space<vmem>>, vector<256x1024xf32>,
    return
  }
  func.func @transform_0(%arg0: i32) -> (i32, i32) {
    %c0_i32 = arith.constant 0 : i32
    %c0_i32_0 = arith.constant 0 : i32
    return %arg0, %c0_i32 : i32, i32
  }
  func.func @transform_1(%arg0: i32) -> (i32, i32) {
    %c0_i32 = arith.constant 0 : i32
    %c0_i32_0 = arith.constant 0 : i32
    return %arg0, %c0_i32 : i32, i32
  }
  func.func @transform_2(%arg0: i32) -> (i32, i32) {
    %c0_i32 = arith.constant 0 : i32
    %c0_i32_0 = arith.constant 0 : i32
    %c0_i32_1 = arith.constant 0 : i32
    return %c0_i32, %c0_i32_0 : i32, i32
  }
  func.func @transform_3(%arg0: i32) -> (i32, i32) {
    %c0_i32 = arith.constant 0 : i32
    %c0_i32_0 = arith.constant 0 : i32
    %c0_i32_1 = arith.constant 0 : i32
    return %c0_i32, %c0_i32_0 : i32, i32
  }
  func.func @transform_4(%arg0: i32) -> (i32, i32) {
    %c0_i32 = arith.constant 0 : i32
    %c0_i32_0 = arith.constant 0 : i32
    %c0_i32_1 = arith.constant 0 : i32
    return %c0_i32, %c0_i32_0 : i32, i32
  }
  func.func @transform_5(%arg0: i32) -> (i32, i32) {
    %c0_i32 = arith.constant 0 : i32
    %c0_i32_0 = arith.constant 0 : i32
    %c0_i32_1 = arith.constant 0 : i32
    return %c0_i32, %c0_i32_0 : i32, i32
  }
  func.func @transform_6(%arg0: i32) -> (i32, i32) {
    %c0_i32 = arith.constant 0 : i32
    %c0_i32_0 = arith.constant 0 : i32
    %c0_i32_1 = arith.constant 0 : i32
    return %c0_i32, %c0_i32_0 : i32, i32
  }
  func.func @transform_7(%arg0: i32) -> (i32, i32) {
    %c0_i32 = arith.constant 0 : i32
    %c0_i32_0 = arith.constant 0 : i32
    %c0_i32_1 = arith.constant 0 : i32
    return %c0_i32, %c0_i32_0 : i32, i32
  }
  func.func @transform_8(%arg0: i32) -> (i32, i32) {
    %c0_i32 = arith.constant 0 : i32
    %c0_i32_0 = arith.constant 0 : i32
    %c0_i32_1 = arith.constant 0 : i32
    return %c0_i32, %c0_i32_0 : i32, i32
  }
  func.func @transform_9(%arg0: i32) -> (i32, i32) {
    %c0_i32 = arith.constant 0 : i32
    %c0_i32_0 = arith.constant 0 : i32
    %c0_i32_1 = arith.constant 0 : i32
    return %c0_i32, %c0_i32_0 : i32, i32
  }
  func.func @transform_10(%arg0: i32) -> (i32, i32) {
    %c0_i32 = arith.constant 0 : i32
    %c0_i32_0 = arith.constant 0 : i32
    return %arg0, %c0_i32 : i32, i32
  }
  func.func @transform_11(%arg0: i32) -> (i32, i32) {
    %c0_i32 = arith.constant 0 : i32
    %c0_i32_0 = arith.constant 0 : i32
    return %arg0, %c0_i32 : i32, i32
  }
  func.func @transform_12(%arg0: i32) -> (i32, i32) {
    %c0_i32 = arith.constant 0 : i32
    %c0_i32_0 = arith.constant 0 : i32
    return %arg0, %c0_i32 : i32, i32
  }
}

</mosaic_0001>

<bundles_post_ra>
// kernel: vib_forward.1
= control target key start
LH: loop header
LB: loop body
LE: loop exit
PB: predicated region body
PF: predicated region fallthrough
CT: control target
= control target key end

     0   :  { %18 = vsyncpa [#allocation3], 0  ;;  %s16902_s0 = inlined_call_operand.vmem [shape: f32[256,64], index: 0, kind: input, shape index: {}]   ;;  %s16903_s1 = inlined_call_operand.hbm [shape: f32[256,1024], index: 1, kind: input, shape index: {}]   ;;  %s16904_s2 = inlined_call_operand.vmem [shape: bf16[64,64], index: 2, kind: input, shape index: {}]   ;;  %s16905_s3 = inlined_call_operand.vmem [shape: f32[1,64], index: 3, kind: input, shape index: {}]   ;;  %s16906_s4 = inlined_call_operand.vmem [shape: bf16[64,64], index: 4, kind: input, shape index: {}]   ;;  %s16907_s5 = inlined_call_operand.vmem [shape: f32[1,64], index: 5, kind: input, shape index: {}]   ;;  %s16908_s6 = inlined_call_operand.hbm [shape: bf16[64,2048], index: 6, kind: input, shape index: {}]   ;;  %s16909_s7 = inlined_call_operand.vmem [shape: f32[1,2048], index: 7, kind: input, shape index: {}]   ;;  %s16910_s8 = inlined_call_operand.hbm [shape: bf16[1024,128], index: 8, kind: input, shape index: {}]   ;;  %s16911_s9 = inlined_call_operand.vmem [shape: f32[1,128], index: 9, kind: input, shape index: {}]   ;;  %s16912_s10 = inlined_call_operand.vmem [shape: f32[256,128], index: 10, kind: output, shape index: {0}]   ;;  %s16913_s11 = inlined_call_operand.vmem [shape: f32[256,1024], index: 11, kind: output, shape index: {1}]   ;;  %s16914_s12 = inlined_call_operand.vmem [shape: f32[256,1024], index: 12, kind: output, shape index: {2}]  }
   0x1   :  { %19 = vsyncpa [#allocation5], 0  ;;  %s47_s23 = sshll.u32 %s16908_s6, 4  ;;  %s10567_s24 = smov [#allocation4]   ;;  %s48_s23 = int_to_ptr.hbm [resolvable:$true] %s47_s23 }
   0x2   :  { %s49_s25 = sshll.u32 %s10567_s24, 4  ;;  %s26_s28 = sshll.u32 %s16903_s1, 4  ;;  %s50_s25 = int_to_ptr.vmem [resolvable:$true] %s49_s25  ;;  %s27_s28 = int_to_ptr.hbm [resolvable:$true] %s26_s28 }
   0x3   :  { %s10568_s29 = smov 1024   ;;  %s10569_s30 = smov 64  }
   0x4   :  { %55 = dma.hbm_to_vmem [thread:$0]  %s48_s23, 8192, %s50_s25, [#allocation5], %s10568_s29, %s10568_s29, %s10569_s30  }
   0x5   :  { %s10570_s13 = smov [#allocation2]   ;;  %s62_s17 = sshll.u32 %s16910_s8, 4  ;;  %s63_s17 = int_to_ptr.hbm [resolvable:$true] %s62_s17 }
   0x6   :  { %s28_s14 = sshll.u32 %s10570_s13, 4  ;;  %s10571_s6 = smov [#allocation6]   ;;  %s29_s14 = int_to_ptr.vmem [resolvable:$true] %s28_s14 }
   0x7   :  { %34 = dma.hbm_to_vmem [thread:$0]  %s27_s28, 32768, %s29_s14, [#allocation3], %s10568_s29, %s10568_s29, %s10569_s30  }
   0x8   :  { %s64_s18 = sshll.u32 %s10571_s6, 4  ;;  %s10572_s19 = smov 4   ;;  %s65_s18 = int_to_ptr.vmem [resolvable:$true] %s64_s18 }
   0x9   :  { %70 = dma.hbm_to_vmem [thread:$0]  %s63_s17, 8192, %s65_s18, [#allocation5], %s10569_s30, %s10569_s30, %s10572_s19  }
   0xa   :  { %10563 = dma.done.wait [#allocation3], 32768  }
   0xb   :  { %10564 = vsyncadd [#allocation3], 4294934528 }
   0xc   :  { %10565 = dma.done.wait [#allocation5], 16384  }
   0xd   :  { %10566 = vsyncadd [#allocation5], 4294950912  ;;  %v8802_v0 = vld [vmem:[%s16904_s2 + $0x18] sm:$0xff]  ;;  %v8801_v1 = vld [vmem:[%s16904_s2 + $0x10] sm:$0xff]  ;;  %vm170_vm0 = vcmask 523264  }
   0xe   :  { %223 = vmatpush.bf16.msra.mxu0 %v8802_v0  ;;  %8935 = vmatpush.bf16.msra.mxu2 %v8802_v0  ;;  %v8800_v2 = vld [vmem:[%s16904_s2 + $0x8] sm:$0xff]  ;;  %v8799_v3 = vld [vmem:[%s16904_s2] sm:$0xff]  ;;  %v88_v10 = vld [vmem:[%s16902_s0 + $0x10] sm:$0xff] }
   0xf   :  { %v86_v4 = vld [vmem:[%s16902_s0] sm:$0xff]  ;;  %v87_v5 = vld [vmem:[%s16902_s0 + $0x8] sm:$0xff]  ;;  %v89_v11 = vld [vmem:[%s16902_s0 + $0x18] sm:$0xff] }
  0x10   :  { %v102_v6 = vld [vmem:[%s16902_s0 + $0x80] sm:$0xff]  ;;  %v103_v7 = vld [vmem:[%s16902_s0 + $0x88] sm:$0xff]  ;;  %v118_v8 = vpack.c.bf16 %v87_v5, %v86_v4  ;;  %v104_v12 = vld [vmem:[%s16902_s0 + $0x90] sm:$0xff]  ;;  %v119_v14 = vpack.c.bf16 %v89_v11, %v88_v10 }
  0x11   :  { %v126_v9 = vpack.c.bf16 %v103_v7, %v102_v6  ;;  %v105_v13 = vld [vmem:[%s16902_s0 + $0x98] sm:$0xff]  ;;  %v90_v16 = vld [vmem:[%s16902_s0 + $0x20] sm:$0xff]  ;;  %v91_v17 = vld [vmem:[%s16902_s0 + $0x28] sm:$0xff] }
  0x12   :  { %224 = vmatpush.bf16.msra.mxu0 %v8801_v1  ;;  %8936 = vmatpush.bf16.msra.mxu2 %v8801_v1  ;;  %v127_v15 = vpack.c.bf16 %v105_v13, %v104_v12  ;;  %v106_v18 = vld [vmem:[%s16902_s0 + $0xa0] sm:$0xff]  ;;  %v107_v19 = vld [vmem:[%s16902_s0 + $0xa8] sm:$0xff]  ;;  %v120_v20 = vpack.c.bf16 %v91_v17, %v90_v16  ;;  %v92_v22 = vld [vmem:[%s16902_s0 + $0x30] sm:$0xff] }
  0x13   :  { %v128_v21 = vpack.c.bf16 %v107_v19, %v106_v18  ;;  %v93_v23 = vld [vmem:[%s16902_s0 + $0x38] sm:$0xff]  ;;  %v108_v24 = vld [vmem:[%s16902_s0 + $0xb0] sm:$0xff]  ;;  %v94_v28 = vld [vmem:[%s16902_s0 + $0x40] sm:$0xff] }
  0x14   :  { %v109_v25 = vld [vmem:[%s16902_s0 + $0xb8] sm:$0xff]  ;;  %v121_v26 = vpack.c.bf16 %v93_v23, %v92_v22  ;;  %v95_v29 = vld [vmem:[%s16902_s0 + $0x48] sm:$0xff]  ;;  %v110_v30 = vld [vmem:[%s16902_s0 + $0xc0] sm:$0xff] }
  0x15   :  { %v129_v27 = vpack.c.bf16 %v109_v25, %v108_v24  ;;  %v111_v31 = vld [vmem:[%s16902_s0 + $0xc8] sm:$0xff]  ;;  %v122_v32 = vpack.c.bf16 %v95_v29, %v94_v28  ;;  %v96_v34 = vld [vmem:[%s16902_s0 + $0x50] sm:$0xff]  ;;  %v97_v35 = vld [vmem:[%s16902_s0 + $0x58] sm:$0xff] }
  0x16   :  { %225 = vmatpush.bf16.msra.mxu0 %v8800_v2  ;;  %8937 = vmatpush.bf16.msra.mxu2 %v8800_v2  ;;  %v130_v33 = vpack.c.bf16 %v111_v31, %v110_v30  ;;  %v112_v36 = vld [vmem:[%s16902_s0 + $0xd0] sm:$0xff]  ;;  %v113_v37 = vld [vmem:[%s16902_s0 + $0xd8] sm:$0xff]  ;;  %v123_v38 = vpack.c.bf16 %v97_v35, %v96_v34  ;;  %v98_v40 = vld [vmem:[%s16902_s0 + $0x60] sm:$0xff] }
  0x17   :  { %v131_v39 = vpack.c.bf16 %v113_v37, %v112_v36  ;;  %v99_v41 = vld [vmem:[%s16902_s0 + $0x68] sm:$0xff]  ;;  %v114_v42 = vld [vmem:[%s16902_s0 + $0xe0] sm:$0xff]  ;;  %v8806_v44 = vld [vmem:[%s16906_s4 + $0x18] sm:$0xff] }
  0x18   :  { %v115_v43 = vld [vmem:[%s16902_s0 + $0xe8] sm:$0xff]  ;;  %v124_v45 = vpack.c.bf16 %v99_v41, %v98_v40  ;;  %444 = vmatpush.bf16.msra.mxu1 %v8806_v44  ;;  %8939 = vmatpush.bf16.msra.mxu3 %v8806_v44  ;;  %v8805_v47 = vld [vmem:[%s16906_s4 + $0x10] sm:$0xff]  ;;  %v8803_v49 = vld [vmem:[%s16906_s4] sm:$0xff] }
  0x19   :  { %v132_v46 = vpack.c.bf16 %v115_v43, %v114_v42  ;;  %v8804_v48 = vld [vmem:[%s16906_s4 + $0x8] sm:$0xff]  ;;  %v100_v50 = vld [vmem:[%s16902_s0 + $0x70] sm:$0xff]  ;;  %v101_v51 = vld [vmem:[%s16902_s0 + $0x78] sm:$0xff] }
  0x1a   :  { %226 = vmatpush.bf16.msra.mxu0 %v8799_v3  ;;  %8938 = vmatpush.bf16.msra.mxu2 %v8799_v3  ;;  %v116_v52 = vld [vmem:[%s16902_s0 + $0xf0] sm:$0xff]  ;;  %v117_v53 = vld [vmem:[%s16902_s0 + $0xf8] sm:$0xff]  ;;  %v125_v54 = vpack.c.bf16 %v101_v51, %v100_v50  ;;  %v7969_v56 = vld [vmem:[#allocation4 + $0x180] sm:$0xf] }
  0x1b   :  { %v133_v55 = vpack.c.bf16 %v117_v53, %v116_v52  ;;  %v8863_v57 = vld [vmem:[#allocation4 + $0x1bc] sm:$0xf0]  ;;  %v8855_v58 = vld [vmem:[#allocation4 + $0x184] sm:$0xf]  ;;  %v7977_v0 = vld [vmem:[#allocation4 + $0x188] sm:$0xf] }
  0x1c   :  { %445 = vmatpush.bf16.msra.mxu1 %v8805_v47  ;;  %8940 = vmatpush.bf16.msra.mxu3 %v8805_v47  ;;  %v7970_v59 = vor.u32 %v8863_v57, %v7969_v56  ;;  %v7971_v60 = vld [vmem:[#allocation4 + $0x1c0] sm:$0xf0]  ;;  %v10786_v63 = vld [vmem:[%s16905_s3] ss:$0 sm:$0xff]  ;;  %v8864_v1 = vld [vmem:[#allocation4 + $0x1c4] sm:$0xf0] }
  0x1d   :  { %7727 = vmatmul.msk.bf16.vlgmr.msra.gmra.mxu0 %vm170_vm0, %v118_v8  ;;  %7735 = vmatmul.msk.bf16.vlgmr.msra.gmra.mxu2 %vm170_vm0, %v126_v9  ;;  %v7974_v61 = vor.u32 %v8855_v58, %v7971_v60  ;;  %v7978_v3 = vor.u32 %v8864_v1, %v7977_v0  ;;  %v8856_v7 = vld [vmem:[#allocation4 + $0x18c] sm:$0xf]  ;;  %v8847_v28 = vld [vmem:[#allocation4 + $0x13c] sm:$0xf0]  ;;  %v8839_v30 = vld [vmem:[#allocation4 + $0x104] sm:$0xf] }
  0x1e   :  { %1049 = vmatpush.bf16.msrb.mxu2 %v7970_v59  ;;  %v7979_v8 = vld [vmem:[#allocation4 + $0x1c8] sm:$0xf0]  ;;  %v7907_v31 = vld [vmem:[#allocation4 + $0x140] sm:$0xf0]  ;;  %v7913_v40 = vld [vmem:[#allocation4 + $0x108] sm:$0xf] }
  0x1f   :  { %1227 = vmatpush.bf16.msrb.mxu0 %v7978_v3  ;;  %v7982_v9 = vor.u32 %v8856_v7, %v7979_v8  ;;  %v8848_v41 = vld [vmem:[#allocation4 + $0x144] sm:$0xf0]  ;;  %v8840_v47 = vld [vmem:[#allocation4 + $0x10c] sm:$0xf]  ;;  %v8823_v7 = vld [vmem:[#allocation4 + $0x84] sm:$0xf] }
  0x20   :  { %446 = vmatpush.bf16.msra.mxu1 %v8804_v48  ;;  %8941 = vmatpush.bf16.msra.mxu3 %v8804_v48  ;;  %v7914_v43 = vor.u32 %v8848_v41, %v7913_v40  ;;  %v7915_v48 = vld [vmem:[#allocation4 + $0x148] sm:$0xf0]  ;;  %v7843_v8 = vld [vmem:[#allocation4 + $0xc0] sm:$0xf0] }
  0x23   :  { %1228 = vmatpush.bf16.msrb.mxu0 %v7914_v43 }
  0x24   :  { %447 = vmatpush.bf16.msra.mxu1 %v8803_v49  ;;  %8942 = vmatpush.bf16.msra.mxu3 %v8803_v49  ;;  %v7918_v49 = vor.u32 %v8840_v47, %v7915_v48  ;;  %v8807_v47 = vld [vmem:[#allocation4 + $0x4] sm:$0xf] }
  0x25   :  { %v7779_v48 = vld [vmem:[#allocation4 + $0x40] sm:$0xf0] }
  0x28   :  { %1138 = vmatpush.bf16.msrb.mxu3 %v7974_v61  ;;  %1316 = vmatpush.bf16.msrb.mxu1 %v7982_v9 }
  0x2c   :  { %1317 = vmatpush.bf16.msrb.mxu1 %v7918_v49 }
  0x2d   :  { %7728 = vmatmul.msk.bf16.gmra.mxu0 %vm170_vm0, %v119_v14  ;;  %7736 = vmatmul.msk.bf16.gmra.mxu2 %vm170_vm0, %v127_v15 }
  0x3d   :  { %7729 = vmatmul.msk.bf16.gmra.mxu0 %vm170_vm0, %v120_v20  ;;  %7737 = vmatmul.msk.bf16.gmra.mxu2 %vm170_vm0, %v128_v21 }
  0x4d   :  { %7730 = vmatmul.msk.bf16.gmra.mxu0 %vm170_vm0, %v121_v26  ;;  %7738 = vmatmul.msk.bf16.gmra.mxu2 %vm170_vm0, %v129_v27  ;;  %v7905_v27 = vld [vmem:[#allocation4 + $0x100] sm:$0xf] }
  0x4e   :  { %v7906_v29 = vor.u32 %v8847_v28, %v7905_v27 }
  0x50   :  { %1050 = vmatpush.bf16.msrb.mxu2 %v7906_v29 }
  0x5d   :  { %7731 = vmatmul.msk.bf16.gmra.mxu0 %vm170_vm0, %v122_v32  ;;  %7739 = vmatmul.msk.bf16.gmra.mxu2 %vm170_vm0, %v130_v33  ;;  %v7910_v33 = vor.u32 %v8839_v30, %v7907_v31 }
  0x5f   :  { %1139 = vmatpush.bf16.msrb.mxu3 %v7910_v33 }
  0x6d   :  { %7732 = vmatmul.msk.bf16.gmra.mxu0 %vm170_vm0, %v123_v38  ;;  %7740 = vmatmul.msk.bf16.gmra.mxu2 %vm170_vm0, %v131_v39 }
  0x7d   :  { %7733 = vmatmul.msk.bf16.gmra.mxu0 %vm170_vm0, %v124_v45  ;;  %7741 = vmatmul.msk.bf16.gmra.mxu2 %vm170_vm0, %v132_v46 }
  0x8d   :  { %7734 = vmatmul.msk.bf16.gmra.mxu0 %vm170_vm0, %v125_v54  ;;  %7742 = vmatmul.msk.bf16.gmra.mxu2 %vm170_vm0, %v133_v55 }
  0x9a   :  { %v228_v62 = vpop.f32.mrf.mxu0 }
  0x9b   :  { %v229_v4 = vadd.f32 %v10786_v63, %v228_v62 }
  0x9d   :  { %v308_v10 = vmax.f32 %v229_v4, 0.0  ;;  %v7841_v4 = vld [vmem:[#allocation4 + $0x80] sm:$0xf] }
  0xa0   :  { %v268_v2 = vpop.f32.mrf.mxu2 }
  0xa1   :  { %v269_v11 = vadd.f32 %v10786_v63, %v268_v2 }
  0xa2   :  { %v230_v5 = vpop.f32.mrf.mxu0 }
  0xa3   :  { %v231_v6 = vadd.f32 %v10786_v63, %v230_v5  ;;  %v324_v15 = vmax.f32 %v269_v11, 0.0  ;;  %v8831_v5 = vld [vmem:[#allocation4 + $0xbc] sm:$0xf0] }
  0xa5   :  { %v309_v12 = vmax.f32 %v231_v6, 0.0  ;;  %v7842_v6 = vor.u32 %v8831_v5, %v7841_v4 }
  0xa7   :  { %v340_v13 = vpack.c.bf16 %v309_v12, %v308_v10  ;;  %v7846_v10 = vor.u32 %v8823_v7, %v7843_v8  ;;  %1051 = vmatpush.bf16.msrb.mxu2 %v7842_v6 }
  0xa8   :  { %v270_v14 = vpop.f32.mrf.mxu2 }
  0xa9   :  { %v271_v16 = vadd.f32 %v10786_v63, %v270_v14  ;;  %7759 = vmatmul.msk.bf16.vlgmr.msra.gmra.mxu1 %vm170_vm0, %v340_v13  ;;  %1140 = vmatpush.bf16.msrb.mxu3 %v7846_v10 }
  0xaa   :  { %v233_v17 = vpop.f32.mrf.mxu0 }
  0xab   :  { %v325_v18 = vmax.f32 %v271_v16, 0.0  ;;  %v234_v21 = vadd.f32 %v10786_v63, %v233_v17  ;;  %v7849_v17 = vld [vmem:[#allocation4 + $0x88] sm:$0xf] }
  0xad   :  { %v348_v19 = vpack.c.bf16 %v325_v18, %v324_v15  ;;  %v310_v24 = vmax.f32 %v234_v21, 0.0  ;;  %v8832_v18 = vld [vmem:[#allocation4 + $0xc4] sm:$0xf0] }
  0xaf   :  { %7767 = vmatmul.msk.bf16.vlgmr.msra.gmra.mxu3 %vm170_vm0, %v348_v19 }
  0xb0   :  { %v273_v20 = vpop.f32.mrf.mxu2 }
  0xb1   :  { %v274_v25 = vadd.f32 %v10786_v63, %v273_v20  ;;  %v7850_v20 = vor.u32 %v8832_v18, %v7849_v17 }
  0xb2   :  { %v235_v22 = vpop.f32.mrf.mxu0 }
  0xb3   :  { %v236_v23 = vadd.f32 %v10786_v63, %v235_v22  ;;  %v326_v35 = vmax.f32 %v274_v25, 0.0  ;;  %1229 = vmatpush.bf16.msrb.mxu0 %v7850_v20  ;;  %v7851_v25 = vld [vmem:[#allocation4 + $0xc8] sm:$0xf0] }
  0xb5   :  { %v311_v26 = vmax.f32 %v236_v23, 0.0 }
  0xb7   :  { %v341_v32 = vpack.c.bf16 %v311_v26, %v310_v24  ;;  %v8824_v24 = vld [vmem:[#allocation4 + $0x8c] sm:$0xf] }
  0xb8   :  { %v275_v34 = vpop.f32.mrf.mxu2  ;;  %v7854_v26 = vor.u32 %v8824_v24, %v7851_v25 }
  0xb9   :  { %v276_v36 = vadd.f32 %v10786_v63, %v275_v34  ;;  %7760 = vmatmul.msk.bf16.gmra.mxu1 %vm170_vm0, %v341_v32 }
  0xba   :  { %v238_v37 = vpop.f32.mrf.mxu0  ;;  %1318 = vmatpush.bf16.msrb.mxu1 %v7854_v26 }
  0xbb   :  { %v327_v38 = vmax.f32 %v276_v36, 0.0  ;;  %v239_v44 = vadd.f32 %v10786_v63, %v238_v37 }
  0xbd   :  { %v349_v39 = vpack.c.bf16 %v327_v38, %v326_v35  ;;  %v312_v50 = vmax.f32 %v239_v44, 0.0  ;;  %v7777_v44 = vld [vmem:[#allocation4] sm:$0xf] }
  0xbf   :  { %7768 = vmatmul.msk.bf16.gmra.mxu3 %vm170_vm0, %v349_v39 }
  0xc0   :  { %v278_v42 = vpop.f32.mrf.mxu2 }
  0xc1   :  { %v279_v51 = vadd.f32 %v10786_v63, %v278_v42 }
  0xc2   :  { %v240_v45 = vpop.f32.mrf.mxu0 }
  0xc3   :  { %v241_v46 = vadd.f32 %v10786_v63, %v240_v45  ;;  %v328_v55 = vmax.f32 %v279_v51, 0.0  ;;  %v8815_v45 = vld [vmem:[#allocation4 + $0x3c] sm:$0xf0] }
  0xc5   :  { %v313_v52 = vmax.f32 %v241_v46, 0.0  ;;  %v7778_v46 = vor.u32 %v8815_v45, %v7777_v44 }
  0xc7   :  { %v342_v53 = vpack.c.bf16 %v313_v52, %v312_v50  ;;  %v7782_v50 = vor.u32 %v8807_v47, %v7779_v48  ;;  %1052 = vmatpush.bf16.msrb.mxu2 %v7778_v46 }
  0xc8   :  { %v280_v54 = vpop.f32.mrf.mxu2 }
  0xc9   :  { %v281_v56 = vadd.f32 %v10786_v63, %v280_v54  ;;  %7761 = vmatmul.msk.bf16.gmra.mxu1 %vm170_vm0, %v342_v53  ;;  %1141 = vmatpush.bf16.msrb.mxu3 %v7782_v50 }
  0xca   :  { %v243_v57 = vpop.f32.mrf.mxu0 }
  0xcb   :  { %v329_v58 = vmax.f32 %v281_v56, 0.0  ;;  %v244_v61 = vadd.f32 %v10786_v63, %v243_v57  ;;  %v7785_v57 = vld [vmem:[#allocation4 + $0x8] sm:$0xf] }
  0xcd   :  { %v350_v59 = vpack.c.bf16 %v329_v58, %v328_v55  ;;  %v314_v1 = vmax.f32 %v244_v61, 0.0  ;;  %v8816_v58 = vld [vmem:[#allocation4 + $0x44] sm:$0xf0] }
  0xce   :  { %v7786_v61 = vor.u32 %v8816_v58, %v7785_v57 }
  0xcf   :  { %7769 = vmatmul.msk.bf16.gmra.mxu3 %vm170_vm0, %v350_v59  ;;  %v8808_v59 = vld [vmem:[#allocation4 + $0xc] sm:$0xf] }
  0xd0   :  { %v283_v60 = vpop.f32.mrf.mxu2  ;;  %1230 = vmatpush.bf16.msrb.mxu0 %v7786_v61 }
  0xd1   :  { %v284_v2 = vadd.f32 %v10786_v63, %v283_v60 }
  0xd2   :  { %v245_v62 = vpop.f32.mrf.mxu0 }
  0xd3   :  { %v246_v0 = vadd.f32 %v10786_v63, %v245_v62  ;;  %v330_v12 = vmax.f32 %v284_v2, 0.0  ;;  %v7787_v62 = vld [vmem:[#allocation4 + $0x48] sm:$0xf0] }
  0xd5   :  { %v315_v3 = vmax.f32 %v246_v0, 0.0 }
  0xd7   :  { %v343_v9 = vpack.c.bf16 %v315_v3, %v314_v1  ;;  %v7790_v1 = vor.u32 %v8808_v59, %v7787_v62 }
  0xd8   :  { %v285_v11 = vpop.f32.mrf.mxu2 }
  0xd9   :  { %v286_v13 = vadd.f32 %v10786_v63, %v285_v11  ;;  %7762 = vmatmul.msk.bf16.gmra.mxu1 %vm170_vm0, %v343_v9 }
  0xda   :  { %v248_v14 = vpop.f32.mrf.mxu0  ;;  %1319 = vmatpush.bf16.msrb.mxu1 %v7790_v1 }
  0xdb   :  { %v331_v15 = vmax.f32 %v286_v13, 0.0  ;;  %v249_v21 = vadd.f32 %v10786_v63, %v248_v14 }
  0xdd   :  { %v351_v16 = vpack.c.bf16 %v331_v15, %v330_v12  ;;  %v316_v27 = vmax.f32 %v249_v21, 0.0  ;;  %v7985_v21 = vld [vmem:[#allocation4 + $0x190] sm:$0xf] }
  0xdf   :  { %7770 = vmatmul.msk.bf16.gmra.mxu3 %vm170_vm0, %v351_v16 }
  0xe0   :  { %v288_v19 = vpop.f32.mrf.mxu2 }
  0xe1   :  { %v289_v28 = vadd.f32 %v10786_v63, %v288_v19 }
  0xe2   :  { %v250_v22 = vpop.f32.mrf.mxu0 }
  0xe3   :  { %v251_v23 = vadd.f32 %v10786_v63, %v250_v22  ;;  %v332_v32 = vmax.f32 %v289_v28, 0.0  ;;  %v8865_v22 = vld [vmem:[#allocation4 + $0x1cc] sm:$0xf0]  ;;  %v8857_v28 = vld [vmem:[#allocation4 + $0x194] sm:$0xf] }
  0xe4   :  { %v7986_v24 = vor.u32 %v8865_v22, %v7985_v21 }
  0xe5   :  { %v317_v29 = vmax.f32 %v251_v23, 0.0 }
  0xe6   :  { %1405 = vmatpush.bf16.msra.mxu2 %v7986_v24 }
  0xe7   :  { %v344_v30 = vpack.c.bf16 %v317_v29, %v316_v27  ;;  %v7987_v29 = vld [vmem:[#allocation4 + $0x1d0] sm:$0xf0] }
  0xe8   :  { %v290_v31 = vpop.f32.mrf.mxu2 }
  0xe9   :  { %v291_v33 = vadd.f32 %v10786_v63, %v290_v31  ;;  %7763 = vmatmul.msk.bf16.gmra.mxu1 %vm170_vm0, %v344_v30  ;;  %v7990_v30 = vor.u32 %v8857_v28, %v7987_v29 }
  0xea   :  { %v253_v34 = vpop.f32.mrf.mxu0 }
  0xeb   :  { %v333_v35 = vmax.f32 %v291_v33, 0.0  ;;  %v254_v38 = vadd.f32 %v10786_v63, %v253_v34  ;;  %1494 = vmatpush.bf16.msra.mxu3 %v7990_v30  ;;  %v7993_v33 = vld [vmem:[#allocation4 + $0x198] sm:$0xf] }
  0xec   :  { %v8866_v34 = vld [vmem:[#allocation4 + $0x1d4] sm:$0xf0] }
  0xed   :  { %v352_v36 = vpack.c.bf16 %v333_v35, %v332_v32  ;;  %v318_v41 = vmax.f32 %v254_v38, 0.0  ;;  %v8858_v35 = vld [vmem:[#allocation4 + $0x19c] sm:$0xf] }
  0xef   :  { %7771 = vmatmul.msk.bf16.gmra.mxu3 %vm170_vm0, %v352_v36  ;;  %v7994_v36 = vor.u32 %v8866_v34, %v7993_v33  ;;  %v8850_v33 = vld [vmem:[#allocation4 + $0x154] sm:$0xf0]  ;;  %v8842_v34 = vld [vmem:[#allocation4 + $0x11c] sm:$0xf] }
  0xf0   :  { %v293_v37 = vpop.f32.mrf.mxu2 }
  0xf1   :  { %v294_v42 = vadd.f32 %v10786_v63, %v293_v37  ;;  %v7995_v37 = vld [vmem:[#allocation4 + $0x1d8] sm:$0xf0]  ;;  %1583 = vmatpush.bf16.msra.mxu0 %v7994_v36 }
  0xf2   :  { %v255_v39 = vpop.f32.mrf.mxu0  ;;  %v7998_v38 = vor.u32 %v8858_v35, %v7995_v37  ;;  %v7931_v36 = vld [vmem:[#allocation4 + $0x158] sm:$0xf0] }
  0xf3   :  { %v256_v40 = vadd.f32 %v10786_v63, %v255_v39  ;;  %v334_v52 = vmax.f32 %v294_v42, 0.0  ;;  %v7934_v37 = vor.u32 %v8842_v34, %v7931_v36 }
  0xf4   :  { %1672 = vmatpush.bf16.msra.mxu1 %v7998_v38 }
  0xf5   :  { %v319_v43 = vmax.f32 %v256_v40, 0.0 }
  0xf7   :  { %v345_v49 = vpack.c.bf16 %v319_v43, %v318_v41 }
  0xf8   :  { %v295_v51 = vpop.f32.mrf.mxu2  ;;  %1673 = vmatpush.bf16.msra.mxu1 %v7934_v37 }
  0xf9   :  { %v296_v53 = vadd.f32 %v10786_v63, %v295_v51  ;;  %7764 = vmatmul.msk.bf16.gmra.mxu1 %vm170_vm0, %v345_v49 }
  0xfa   :  { %v258_v54 = vpop.f32.mrf.mxu0 }
  0xfb   :  { %v335_v55 = vmax.f32 %v296_v53, 0.0  ;;  %v259_v0 = vadd.f32 %v10786_v63, %v258_v54 }
  0xfd   :  { %v353_v56 = vpack.c.bf16 %v335_v55, %v334_v52  ;;  %v320_v4 = vmax.f32 %v259_v0, 0.0 }
  0xff   :  { %7772 = vmatmul.msk.bf16.gmra.mxu3 %vm170_vm0, %v353_v56 }
 0x100   :  { %v298_v60 = vpop.f32.mrf.mxu2 }
 0x101   :  { %v299_v5 = vadd.f32 %v10786_v63, %v298_v60 }
 0x102   :  { %v260_v2 = vpop.f32.mrf.mxu0 }
 0x103   :  { %v261_v3 = vadd.f32 %v10786_v63, %v260_v2  ;;  %v336_v9 = vmax.f32 %v299_v5, 0.0 }
 0x105   :  { %v321_v6 = vmax.f32 %v261_v3, 0.0 }
 0x107   :  { %v346_v7 = vpack.c.bf16 %v321_v6, %v320_v4 }
 0x108   :  { %v300_v8 = vpop.f32.mrf.mxu2 }
 0x109   :  { %v301_v10 = vadd.f32 %v10786_v63, %v300_v8  ;;  %7765 = vmatmul.msk.bf16.gmra.mxu1 %vm170_vm0, %v346_v7 }
 0x10a   :  { %v263_v11 = vpop.f32.mrf.mxu0 }
 0x10b   :  { %v337_v12 = vmax.f32 %v301_v10, 0.0  ;;  %v264_v15 = vadd.f32 %v10786_v63, %v263_v11 }
 0x10d   :  { %v354_v13 = vpack.c.bf16 %v337_v12, %v336_v9  ;;  %v322_v18 = vmax.f32 %v264_v15, 0.0 }
 0x10f   :  { %7773 = vmatmul.msk.bf16.gmra.mxu3 %vm170_vm0, %v354_v13  ;;  %v7921_v13 = vld [vmem:[#allocation4 + $0x110] sm:$0xf] }
 0x110   :  { %v303_v14 = vpop.f32.mrf.mxu2 }
 0x111   :  { %v304_v19 = vadd.f32 %v10786_v63, %v303_v14  ;;  %v8849_v14 = vld [vmem:[#allocation4 + $0x14c] sm:$0xf0] }
 0x112   :  { %v265_v16 = vpop.f32.mrf.mxu0  ;;  %v7922_v15 = vor.u32 %v8849_v14, %v7921_v13 }
 0x113   :  { %v266_v17 = vadd.f32 %v10786_v63, %v265_v16  ;;  %v338_v26 = vmax.f32 %v304_v19, 0.0 }
 0x114   :  { %1406 = vmatpush.bf16.msra.mxu2 %v7922_v15 }
 0x115   :  { %v323_v20 = vmax.f32 %v266_v17, 0.0  ;;  %v8841_v17 = vld [vmem:[#allocation4 + $0x114] sm:$0xf] }
 0x117   :  { %v347_v23 = vpack.c.bf16 %v323_v20, %v322_v18  ;;  %v7923_v18 = vld [vmem:[#allocation4 + $0x150] sm:$0xf0] }
 0x118   :  { %v305_v25 = vpop.f32.mrf.mxu2  ;;  %v7926_v20 = vor.u32 %v8841_v17, %v7923_v18 }
 0x119   :  { %v306_v27 = vadd.f32 %v10786_v63, %v305_v25  ;;  %7766 = vmatmul.msk.bf16.gmra.mxu1 %vm170_vm0, %v347_v23  ;;  %v10839_v63 = vld [vmem:[%s16907_s5] ss:$0 sm:$0xff] }
 0x11a   :  { %1495 = vmatpush.bf16.msra.mxu3 %v7926_v20 }
 0x11b   :  { %v339_v31 = vmax.f32 %v306_v27, 0.0 }
 0x11d   :  { %v355_v32 = vpack.c.bf16 %v339_v31, %v338_v26 }
 0x11f   :  { %7774 = vmatmul.msk.bf16.gmra.mxu3 %vm170_vm0, %v355_v32  ;;  %v7929_v32 = vld [vmem:[#allocation4 + $0x118] sm:$0xf] }
 0x120   :  { %v7930_v35 = vor.u32 %v8850_v33, %v7929_v32 }
 0x122   :  { %1584 = vmatpush.bf16.msra.mxu0 %v7930_v35 }
 0x126   :  { %v449_v39 = vpop.f32.mrf.mxu1 }
 0x127   :  { %v450_v40 = vadd.f32 %v10839_v63, %v449_v39 }
 0x129   :  { %v529_v43 = vmax.f32 %v450_v40, 0.0 }
 0x12e   :  { %v451_v41 = vpop.f32.mrf.mxu1 }
 0x12f   :  { %v452_v42 = vadd.f32 %v10839_v63, %v451_v41 }
 0x131   :  { %v530_v44 = vmax.f32 %v452_v42, 0.0 }
 0x132   :  { %v489_v45 = vpop.f32.mrf.mxu3 }
 0x133   :  { %v10843_v46 = vpack.c.bf16 %v530_v44, %v529_v43  ;;  %v490_v48 = vadd.f32 %v10839_v63, %v489_v45 }
 0x135   :  { %8031 = vmatmul.msk.bf16.vlgmr.msrb.gmra.mxu2 %vm170_vm0, %v10843_v46  ;;  %8047 = vmatmul.msk.bf16.vlgmr.msrb.gmra.mxu3 %vm170_vm0, %v10843_v46  ;;  %v545_v51 = vmax.f32 %v490_v48, 0.0 }
 0x136   :  { %8063 = vmatmul.msk.bf16.vlgmr.msrb.gmra.mxu0 %vm170_vm0, %v10843_v46  ;;  %8079 = vmatmul.msk.bf16.vlgmr.msrb.gmra.mxu1 %vm170_vm0, %v10843_v46  ;;  %v454_v47 = vpop.f32.mrf.mxu1 }
 0x137   :  { %v455_v52 = vadd.f32 %v10839_v63, %v454_v47 }
 0x139   :  { %v531_v57 = vmax.f32 %v455_v52, 0.0 }
 0x13a   :  { %v491_v49 = vpop.f32.mrf.mxu3 }
 0x13b   :  { %v492_v50 = vadd.f32 %v10839_v63, %v491_v49 }
 0x13d   :  { %v546_v53 = vmax.f32 %v492_v50, 0.0 }
 0x13e   :  { %v456_v54 = vpop.f32.mrf.mxu1 }
 0x13f   :  { %v10856_v55 = vpack.c.bf16 %v546_v53, %v545_v51  ;;  %v457_v56 = vadd.f32 %v10839_v63, %v456_v54 }
 0x141   :  { %v532_v58 = vmax.f32 %v457_v56, 0.0 }
 0x142   :  { %v494_v59 = vpop.f32.mrf.mxu3 }
 0x143   :  { %v10859_v60 = vpack.c.bf16 %v532_v58, %v531_v57  ;;  %v495_v62 = vadd.f32 %v10839_v63, %v494_v59 }
 0x145   :  { %8032 = vmatmul.msk.bf16.gmra.mxu2 %vm170_vm0, %v10859_v60  ;;  %8048 = vmatmul.msk.bf16.gmra.mxu3 %vm170_vm0, %v10859_v60  ;;  %v547_v2 = vmax.f32 %v495_v62, 0.0 }
 0x146   :  { %8064 = vmatmul.msk.bf16.gmra.mxu0 %vm170_vm0, %v10859_v60  ;;  %8080 = vmatmul.msk.bf16.gmra.mxu1 %vm170_vm0, %v10859_v60  ;;  %v459_v61 = vpop.f32.mrf.mxu1 }
 0x147   :  { %v460_v3 = vadd.f32 %v10839_v63, %v459_v61 }
 0x149   :  { %v533_v8 = vmax.f32 %v460_v3, 0.0 }
 0x14a   :  { %v496_v0 = vpop.f32.mrf.mxu3 }
 0x14b   :  { %v497_v1 = vadd.f32 %v10839_v63, %v496_v0 }
 0x14d   :  { %v548_v4 = vmax.f32 %v497_v1, 0.0 }
 0x14e   :  { %v461_v5 = vpop.f32.mrf.mxu1 }
 0x14f   :  { %v10872_v6 = vpack.c.bf16 %v548_v4, %v547_v2  ;;  %v462_v7 = vadd.f32 %v10839_v63, %v461_v5 }
 0x151   :  { %v534_v9 = vmax.f32 %v462_v7, 0.0 }
 0x152   :  { %v499_v10 = vpop.f32.mrf.mxu3 }
 0x153   :  { %v10875_v11 = vpack.c.bf16 %v534_v9, %v533_v8  ;;  %v500_v16 = vadd.f32 %v10839_v63, %v499_v10 }
 0x155   :  { %8033 = vmatmul.msk.bf16.gmra.mxu2 %vm170_vm0, %v10875_v11  ;;  %8049 = vmatmul.msk.bf16.gmra.mxu3 %vm170_vm0, %v10875_v11  ;;  %v549_v22 = vmax.f32 %v500_v16, 0.0 }
 0x156   :  { %8065 = vmatmul.msk.bf16.gmra.mxu0 %vm170_vm0, %v10875_v11  ;;  %8081 = vmatmul.msk.bf16.gmra.mxu1 %vm170_vm0, %v10875_v11  ;;  %v464_v12 = vpop.f32.mrf.mxu1 }
 0x157   :  { %v465_v23 = vadd.f32 %v10839_v63, %v464_v12 }
 0x159   :  { %v535_v28 = vmax.f32 %v465_v23, 0.0  ;;  %v7857_v23 = vld [vmem:[#allocation4 + $0x90] sm:$0xf] }
 0x15a   :  { %v501_v19 = vpop.f32.mrf.mxu3 }
 0x15b   :  { %v502_v21 = vadd.f32 %v10839_v63, %v501_v19 }
 0x15d   :  { %v550_v24 = vmax.f32 %v502_v21, 0.0 }
 0x15e   :  { %v466_v25 = vpop.f32.mrf.mxu1 }
 0x15f   :  { %v10888_v26 = vpack.c.bf16 %v550_v24, %v549_v22  ;;  %v467_v27 = vadd.f32 %v10839_v63, %v466_v25  ;;  %v8833_v24 = vld [vmem:[#allocation4 + $0xcc] sm:$0xf0]  ;;  %v8825_v25 = vld [vmem:[#allocation4 + $0x94] sm:$0xf] }
 0x161   :  { %v536_v29 = vmax.f32 %v467_v27, 0.0  ;;  %v7858_v27 = vor.u32 %v8833_v24, %v7857_v23 }
 0x162   :  { %v504_v30 = vpop.f32.mrf.mxu3 }
 0x163   :  { %v10891_v31 = vpack.c.bf16 %v536_v29, %v535_v28  ;;  %v505_v39 = vadd.f32 %v10839_v63, %v504_v30  ;;  %v7859_v28 = vld [vmem:[#allocation4 + $0xd0] sm:$0xf0]  ;;  %1407 = vmatpush.bf16.msra.mxu2 %v7858_v27 }
 0x164   :  { %v7862_v30 = vor.u32 %v8825_v25, %v7859_v28 }
 0x165   :  { %8034 = vmatmul.msk.bf16.gmra.mxu2 %vm170_vm0, %v10891_v31  ;;  %8050 = vmatmul.msk.bf16.gmra.mxu3 %vm170_vm0, %v10891_v31  ;;  %v551_v42 = vmax.f32 %v505_v39, 0.0 }
 0x166   :  { %8066 = vmatmul.msk.bf16.gmra.mxu0 %vm170_vm0, %v10891_v31  ;;  %8082 = vmatmul.msk.bf16.gmra.mxu1 %vm170_vm0, %v10891_v31  ;;  %v469_v38 = vpop.f32.mrf.mxu1 }
 0x167   :  { %v470_v43 = vadd.f32 %v10839_v63, %v469_v38  ;;  %1496 = vmatpush.bf16.msra.mxu3 %v7862_v30 }
 0x169   :  { %v537_v49 = vmax.f32 %v470_v43, 0.0 }
 0x16a   :  { %v506_v40 = vpop.f32.mrf.mxu3 }
 0x16b   :  { %v507_v41 = vadd.f32 %v10839_v63, %v506_v40  ;;  %v7865_v40 = vld [vmem:[#allocation4 + $0x98] sm:$0xf] }
 0x16d   :  { %v552_v44 = vmax.f32 %v507_v41, 0.0  ;;  %v8834_v41 = vld [vmem:[#allocation4 + $0xd4] sm:$0xf0] }
 0x16e   :  { %v471_v45 = vpop.f32.mrf.mxu1 }
 0x16f   :  { %v10904_v47 = vpack.c.bf16 %v552_v44, %v551_v42  ;;  %v472_v48 = vadd.f32 %v10839_v63, %v471_v45  ;;  %v7866_v42 = vor.u32 %v8834_v41, %v7865_v40 }
 0x171   :  { %v538_v50 = vmax.f32 %v472_v48, 0.0  ;;  %1585 = vmatpush.bf16.msra.mxu0 %v7866_v42 }
 0x172   :  { %v509_v51 = vpop.f32.mrf.mxu3 }
 0x173   :  { %v10907_v52 = vpack.c.bf16 %v538_v50, %v537_v49  ;;  %v510_v54 = vadd.f32 %v10839_v63, %v509_v51  ;;  %v8826_v49 = vld [vmem:[#allocation4 + $0x9c] sm:$0xf] }
 0x174   :  { %v7867_v50 = vld [vmem:[#allocation4 + $0xd8] sm:$0xf0] }
 0x175   :  { %8035 = vmatmul.msk.bf16.gmra.mxu2 %vm170_vm0, %v10907_v52  ;;  %8051 = vmatmul.msk.bf16.gmra.mxu3 %vm170_vm0, %v10907_v52  ;;  %v553_v58 = vmax.f32 %v510_v54, 0.0  ;;  %v7870_v51 = vor.u32 %v8826_v49, %v7867_v50  ;;  %v7793_v50 = vld [vmem:[#allocation4 + $0x10] sm:$0xf] }
 0x176   :  { %8067 = vmatmul.msk.bf16.gmra.mxu0 %vm170_vm0, %v10907_v52  ;;  %8083 = vmatmul.msk.bf16.gmra.mxu1 %vm170_vm0, %v10907_v52  ;;  %v474_v53 = vpop.f32.mrf.mxu1 }
 0x177   :  { %v475_v59 = vadd.f32 %v10839_v63, %v474_v53  ;;  %1674 = vmatpush.bf16.msra.mxu1 %v7870_v51  ;;  %v8817_v51 = vld [vmem:[#allocation4 + $0x4c] sm:$0xf0] }
 0x179   :  { %v539_v2 = vmax.f32 %v475_v59, 0.0  ;;  %v641_v59 = vld [vmem:[%s16909_s7] sm:$0xff] }
 0x17a   :  { %v511_v56 = vpop.f32.mrf.mxu3 }
 0x17b   :  { %v512_v57 = vadd.f32 %v10839_v63, %v511_v56 }
 0x17d   :  { %v554_v61 = vmax.f32 %v512_v57, 0.0 }
 0x17e   :  { %v476_v62 = vpop.f32.mrf.mxu1 }
 0x17f   :  { %v10920_v0 = vpack.c.bf16 %v554_v61, %v553_v58  ;;  %v477_v1 = vadd.f32 %v10839_v63, %v476_v62  ;;  %v10972_v62 = vperm.slane %v641_v59, 2 }
 0x181   :  { %v540_v3 = vmax.f32 %v477_v1, 0.0  ;;  %v10974_v1 = vperm.slane %v641_v59, 3 }
 0x182   :  { %v514_v4 = vpop.f32.mrf.mxu3 }
 0x183   :  { %v10923_v5 = vpack.c.bf16 %v540_v3, %v539_v2  ;;  %v515_v8 = vadd.f32 %v10839_v63, %v514_v4 }
 0x185   :  { %8036 = vmatmul.msk.bf16.gmra.mxu2 %vm170_vm0, %v10923_v5  ;;  %8052 = vmatmul.msk.bf16.gmra.mxu3 %vm170_vm0, %v10923_v5  ;;  %v555_v12 = vmax.f32 %v515_v8, 0.0  ;;  %v10984_v8 = vperm.slane %v641_v59, 1 }
 0x186   :  { %8068 = vmatmul.msk.bf16.gmra.mxu0 %vm170_vm0, %v10923_v5  ;;  %8084 = vmatmul.msk.bf16.gmra.mxu1 %vm170_vm0, %v10923_v5  ;;  %v479_v7 = vpop.f32.mrf.mxu1 }
 0x187   :  { %v480_v13 = vadd.f32 %v10839_v63, %v479_v7 }
 0x189   :  { %v541_v18 = vmax.f32 %v480_v13, 0.0 }
 0x18a   :  { %v516_v9 = vpop.f32.mrf.mxu3 }
 0x18b   :  { %v517_v10 = vadd.f32 %v10839_v63, %v516_v9 }
 0x18d   :  { %v556_v14 = vmax.f32 %v517_v10, 0.0 }
 0x18e   :  { %v481_v15 = vpop.f32.mrf.mxu1 }
 0x18f   :  { %v10936_v16 = vpack.c.bf16 %v556_v14, %v555_v12  ;;  %v482_v17 = vadd.f32 %v10839_v63, %v481_v15 }
 0x191   :  { %v542_v19 = vmax.f32 %v482_v17, 0.0 }
 0x192   :  { %v519_v20 = vpop.f32.mrf.mxu3 }
 0x193   :  { %v10939_v21 = vpack.c.bf16 %v542_v19, %v541_v18  ;;  %v520_v29 = vadd.f32 %v10839_v63, %v519_v20 }
 0x195   :  { %8037 = vmatmul.msk.bf16.gmra.mxu2 %vm170_vm0, %v10939_v21  ;;  %8053 = vmatmul.msk.bf16.gmra.mxu3 %vm170_vm0, %v10939_v21  ;;  %v557_v34 = vmax.f32 %v520_v29, 0.0 }
 0x196   :  { %8069 = vmatmul.msk.bf16.gmra.mxu0 %vm170_vm0, %v10939_v21  ;;  %8085 = vmatmul.msk.bf16.gmra.mxu1 %vm170_vm0, %v10939_v21  ;;  %v484_v22 = vpop.f32.mrf.mxu1 }
 0x197   :  { %v485_v35 = vadd.f32 %v10839_v63, %v484_v22 }
 0x199   :  { %v543_v43 = vmax.f32 %v485_v35, 0.0 }
 0x19a   :  { %v521_v32 = vpop.f32.mrf.mxu3 }
 0x19b   :  { %v522_v33 = vadd.f32 %v10839_v63, %v521_v32 }
 0x19d   :  { %v558_v36 = vmax.f32 %v522_v33, 0.0 }
 0x19e   :  { %v486_v37 = vpop.f32.mrf.mxu1 }
 0x19f   :  { %v10952_v38 = vpack.c.bf16 %v558_v36, %v557_v34  ;;  %v487_v39 = vadd.f32 %v10839_v63, %v486_v37 }
 0x1a1   :  { %v544_v44 = vmax.f32 %v487_v39, 0.0 }
 0x1a2   :  { %v524_v45 = vpop.f32.mrf.mxu3 }
 0x1a3   :  { %v10955_v48 = vpack.c.bf16 %v544_v44, %v543_v43  ;;  %v525_v53 = vadd.f32 %v10839_v63, %v524_v45 }
 0x1a5   :  { %8038 = vmatmul.msk.bf16.gmra.mxu2 %vm170_vm0, %v10955_v48  ;;  %8054 = vmatmul.msk.bf16.gmra.mxu3 %vm170_vm0, %v10955_v48  ;;  %v559_v57 = vmax.f32 %v525_v53, 0.0 }
 0x1a6   :  { %8070 = vmatmul.msk.bf16.gmra.mxu0 %vm170_vm0, %v10955_v48  ;;  %8086 = vmatmul.msk.bf16.gmra.mxu1 %vm170_vm0, %v10955_v48 }
 0x1aa   :  { %v526_v54 = vpop.f32.mrf.mxu3 }
 0x1ab   :  { %v527_v56 = vadd.f32 %v10839_v63, %v526_v54  ;;  %v10982_v63 = vperm.slane %v641_v59, 0 }
 0x1ad   :  { %v560_v58 = vmax.f32 %v527_v56, 0.0  ;;  %v7794_v56 = vor.u32 %v8817_v51, %v7793_v50 }
 0x1af   :  { %v10970_v61 = vpack.c.bf16 %v560_v58, %v559_v57  ;;  %v8809_v57 = vld [vmem:[#allocation4 + $0x14] sm:$0xf]  ;;  %1408 = vmatpush.bf16.msra.mxu2 %v7794_v56 }
 0x1b0   :  { %v7795_v58 = vld [vmem:[#allocation4 + $0x50] sm:$0xf0] }
 0x1b3   :  { %v1232_v2 = vpop.f32.mrf.mxu0  ;;  %v1321_v3 = vpop.f32.mrf.mxu1 }
 0x1b4   :  { %v1233_v4 = vadd.f32 %v1232_v2, %v10972_v62  ;;  %v1322_v7 = vadd.f32 %v1321_v3, %v10974_v1  ;;  %v7798_v3 = vor.u32 %v8809_v57, %v7795_v58 }
 0x1b5   :  { %8039 = vmatmul.msk.bf16.gmra.mxu2 %vm170_vm0, %v10856_v55  ;;  %8055 = vmatmul.msk.bf16.gmra.mxu3 %vm170_vm0, %v10856_v55 }
 0x1b6   :  { %7187 = vst [vmem:[%s16913_s11 + $0x10] sm:$0xff] %v1233_v4  ;;  %8071 = vmatmul.msk.bf16.gmra.mxu0 %vm170_vm0, %v10856_v55  ;;  %8087 = vmatmul.msk.bf16.gmra.mxu1 %vm170_vm0, %v10856_v55 }
 0x1b7   :  { %7188 = vst [vmem:[%s16913_s11 + $0x18] sm:$0xff] %v1322_v7  ;;  %1497 = vmatpush.bf16.msra.mxu3 %v7798_v3 }
 0x1b8   :  { %v1054_v9 = vpop.f32.mrf.mxu2  ;;  %v1143_v10 = vpop.f32.mrf.mxu3 }
 0x1b9   :  { %v1055_v12 = vadd.f32 %v1054_v9, %v10982_v63  ;;  %v1144_v13 = vadd.f32 %v1143_v10, %v10984_v8 }
 0x1bb   :  { %7185 = vst [vmem:[%s16913_s11] sm:$0xff] %v1055_v12  ;;  %v1234_v14 = vpop.f32.mrf.mxu0  ;;  %v1323_v15 = vpop.f32.mrf.mxu1  ;;  %v7801_v12 = vld [vmem:[#allocation4 + $0x18] sm:$0xf] }
 0x1bc   :  { %7186 = vst [vmem:[%s16913_s11 + $0x8] sm:$0xff] %v1144_v13  ;;  %v1235_v17 = vadd.f32 %v1234_v14, %v10972_v62  ;;  %v1324_v18 = vadd.f32 %v1323_v15, %v10974_v1  ;;  %v8818_v13 = vld [vmem:[#allocation4 + $0x54] sm:$0xf0] }
 0x1be   :  { %7195 = vst [vmem:[%s16913_s11 + $0x50] sm:$0xff] %v1235_v17  ;;  %v7802_v17 = vor.u32 %v8818_v13, %v7801_v12 }
 0x1bf   :  { %7196 = vst [vmem:[%s16913_s11 + $0x58] sm:$0xff] %v1324_v18 }
 0x1c0   :  { %v1056_v19 = vpop.f32.mrf.mxu2  ;;  %v1145_v20 = vpop.f32.mrf.mxu3  ;;  %1586 = vmatpush.bf16.msra.mxu0 %v7802_v17 }
 0x1c1   :  { %v1057_v22 = vadd.f32 %v1056_v19, %v10982_v63  ;;  %v1146_v23 = vadd.f32 %v1145_v20, %v10984_v8 }
 0x1c3   :  { %7193 = vst [vmem:[%s16913_s11 + $0x40] sm:$0xff] %v1057_v22  ;;  %v1237_v24 = vpop.f32.mrf.mxu0  ;;  %v1326_v25 = vpop.f32.mrf.mxu1 }
 0x1c4   :  { %7194 = vst [vmem:[%s16913_s11 + $0x48] sm:$0xff] %v1146_v23  ;;  %v1238_v27 = vadd.f32 %v1237_v24, %v10972_v62  ;;  %v1327_v28 = vadd.f32 %v1326_v25, %v10974_v1  ;;  %v8810_v25 = vld [vmem:[#allocation4 + $0x1c] sm:$0xf] }
 0x1c5   :  { %8040 = vmatmul.msk.bf16.gmra.mxu2 %vm170_vm0, %v10872_v6  ;;  %8056 = vmatmul.msk.bf16.gmra.mxu3 %vm170_vm0, %v10872_v6 }
 0x1c6   :  { %7203 = vst [vmem:[%s16913_s11 + $0x90] sm:$0xff] %v1238_v27  ;;  %8072 = vmatmul.msk.bf16.gmra.mxu0 %vm170_vm0, %v10872_v6  ;;  %8088 = vmatmul.msk.bf16.gmra.mxu1 %vm170_vm0, %v10872_v6  ;;  %v7803_v27 = vld [vmem:[#allocation4 + $0x58] sm:$0xf0] }
 0x1c7   :  { %7204 = vst [vmem:[%s16913_s11 + $0x98] sm:$0xff] %v1327_v28  ;;  %v7806_v28 = vor.u32 %v8810_v25, %v7803_v27 }
 0x1c8   :  { %v1059_v29 = vpop.f32.mrf.mxu2  ;;  %v1148_v30 = vpop.f32.mrf.mxu3 }
 0x1c9   :  { %v1060_v32 = vadd.f32 %v1059_v29, %v10982_v63  ;;  %v1149_v33 = vadd.f32 %v1148_v30, %v10984_v8  ;;  %1675 = vmatpush.bf16.msra.mxu1 %v7806_v28 }
 0x1cb   :  { %7201 = vst [vmem:[%s16913_s11 + $0x80] sm:$0xff] %v1060_v32  ;;  %v1239_v34 = vpop.f32.mrf.mxu0  ;;  %v1328_v35 = vpop.f32.mrf.mxu1 }
 0x1cc   :  { %7202 = vst [vmem:[%s16913_s11 + $0x88] sm:$0xff] %v1149_v33  ;;  %v1240_v36 = vadd.f32 %v1239_v34, %v10972_v62  ;;  %v1329_v37 = vadd.f32 %v1328_v35, %v10974_v1 }
 0x1ce   :  { %7211 = vst [vmem:[%s16913_s11 + $0xd0] sm:$0xff] %v1240_v36 }
 0x1cf   :  { %7212 = vst [vmem:[%s16913_s11 + $0xd8] sm:$0xff] %v1329_v37 }
 0x1d0   :  { %v1061_v39 = vpop.f32.mrf.mxu2  ;;  %v1150_v40 = vpop.f32.mrf.mxu3 }
 0x1d1   :  { %v1062_v41 = vadd.f32 %v1061_v39, %v10982_v63  ;;  %v1151_v42 = vadd.f32 %v1150_v40, %v10984_v8 }
 0x1d3   :  { %7209 = vst [vmem:[%s16913_s11 + $0xc0] sm:$0xff] %v1062_v41  ;;  %v1242_v43 = vpop.f32.mrf.mxu0  ;;  %v1331_v44 = vpop.f32.mrf.mxu1 }
 0x1d4   :  { %7210 = vst [vmem:[%s16913_s11 + $0xc8] sm:$0xff] %v1151_v42  ;;  %v1243_v45 = vadd.f32 %v1242_v43, %v10972_v62  ;;  %v1332_v49 = vadd.f32 %v1331_v44, %v10974_v1 }
 0x1d5   :  { %8041 = vmatmul.msk.bf16.gmra.mxu2 %vm170_vm0, %v10888_v26  ;;  %8057 = vmatmul.msk.bf16.gmra.mxu3 %vm170_vm0, %v10888_v26 }
 0x1d6   :  { %7219 = vst [vmem:[%s16913_s11 + $0x110] sm:$0xff] %v1243_v45  ;;  %8073 = vmatmul.msk.bf16.gmra.mxu0 %vm170_vm0, %v10888_v26  ;;  %8089 = vmatmul.msk.bf16.gmra.mxu1 %vm170_vm0, %v10888_v26 }
 0x1d7   :  { %7220 = vst [vmem:[%s16913_s11 + $0x118] sm:$0xff] %v1332_v49 }
 0x1d8   :  { %v1064_v53 = vpop.f32.mrf.mxu2  ;;  %v1153_v54 = vpop.f32.mrf.mxu3 }
 0x1d9   :  { %v1065_v59 = vadd.f32 %v1064_v53, %v10982_v63  ;;  %v1154_v2 = vadd.f32 %v1153_v54, %v10984_v8 }
 0x1db   :  { %7217 = vst [vmem:[%s16913_s11 + $0x100] sm:$0xff] %v1065_v59  ;;  %v1244_v4 = vpop.f32.mrf.mxu0  ;;  %v1333_v7 = vpop.f32.mrf.mxu1 }
 0x1dc   :  { %7218 = vst [vmem:[%s16913_s11 + $0x108] sm:$0xff] %v1154_v2  ;;  %v1245_v9 = vadd.f32 %v1244_v4, %v10972_v62  ;;  %v1334_v10 = vadd.f32 %v1333_v7, %v10974_v1 }
 0x1de   :  { %7227 = vst [vmem:[%s16913_s11 + $0x150] sm:$0xff] %v1245_v9 }
 0x1df   :  { %7228 = vst [vmem:[%s16913_s11 + $0x158] sm:$0xff] %v1334_v10 }
 0x1e0   :  { %v1066_v14 = vpop.f32.mrf.mxu2  ;;  %v1155_v15 = vpop.f32.mrf.mxu3 }
 0x1e1   :  { %v1067_v18 = vadd.f32 %v1066_v14, %v10982_v63  ;;  %v1156_v19 = vadd.f32 %v1155_v15, %v10984_v8 }
 0x1e3   :  { %7225 = vst [vmem:[%s16913_s11 + $0x140] sm:$0xff] %v1067_v18  ;;  %v1247_v20 = vpop.f32.mrf.mxu0  ;;  %v1336_v22 = vpop.f32.mrf.mxu1 }
 0x1e4   :  { %7226 = vst [vmem:[%s16913_s11 + $0x148] sm:$0xff] %v1156_v19  ;;  %v1248_v23 = vadd.f32 %v1247_v20, %v10972_v62  ;;  %v1337_v24 = vadd.f32 %v1336_v22, %v10974_v1 }
 0x1e5   :  { %8042 = vmatmul.msk.bf16.gmra.mxu2 %vm170_vm0, %v10904_v47  ;;  %8058 = vmatmul.msk.bf16.gmra.mxu3 %vm170_vm0, %v10904_v47 }
 0x1e6   :  { %7235 = vst [vmem:[%s16913_s11 + $0x190] sm:$0xff] %v1248_v23  ;;  %8074 = vmatmul.msk.bf16.gmra.mxu0 %vm170_vm0, %v10904_v47  ;;  %8090 = vmatmul.msk.bf16.gmra.mxu1 %vm170_vm0, %v10904_v47 }
 0x1e7   :  { %7236 = vst [vmem:[%s16913_s11 + $0x198] sm:$0xff] %v1337_v24 }
 0x1e8   :  { %v1069_v29 = vpop.f32.mrf.mxu2  ;;  %v1158_v30 = vpop.f32.mrf.mxu3 }
 0x1e9   :  { %v1070_v32 = vadd.f32 %v1069_v29, %v10982_v63  ;;  %v1159_v33 = vadd.f32 %v1158_v30, %v10984_v8 }
 0x1eb   :  { %7233 = vst [vmem:[%s16913_s11 + $0x180] sm:$0xff] %v1070_v32  ;;  %v1249_v34 = vpop.f32.mrf.mxu0  ;;  %v1338_v35 = vpop.f32.mrf.mxu1 }
 0x1ec   :  { %7234 = vst [vmem:[%s16913_s11 + $0x188] sm:$0xff] %v1159_v33  ;;  %v1250_v36 = vadd.f32 %v1249_v34, %v10972_v62  ;;  %v1339_v37 = vadd.f32 %v1338_v35, %v10974_v1  ;;  %v8001_v34 = vld [vmem:[#allocation4 + $0x1a0] sm:$0xf] }
 0x1ed   :  { %v8867_v35 = vld [vmem:[#allocation4 + $0x1dc] sm:$0xf0] }
 0x1ee   :  { %7243 = vst [vmem:[%s16913_s11 + $0x1d0] sm:$0xff] %v1250_v36 }
 0x1ef   :  { %7244 = vst [vmem:[%s16913_s11 + $0x1d8] sm:$0xff] %v1339_v37 }
 0x1f0   :  { %v1071_v39 = vpop.f32.mrf.mxu2  ;;  %v1160_v40 = vpop.f32.mrf.mxu3 }
 0x1f1   :  { %v1072_v41 = vadd.f32 %v1071_v39, %v10982_v63  ;;  %v1161_v42 = vadd.f32 %v1160_v40, %v10984_v8  ;;  %v8002_v39 = vor.u32 %v8867_v35, %v8001_v34  ;;  %v8859_v40 = vld [vmem:[#allocation4 + $0x1a4] sm:$0xf] }
 0x1f3   :  { %7241 = vst [vmem:[%s16913_s11 + $0x1c0] sm:$0xff] %v1072_v41  ;;  %v1252_v43 = vpop.f32.mrf.mxu0  ;;  %v1341_v44 = vpop.f32.mrf.mxu1  ;;  %v8003_v41 = vld [vmem:[#allocation4 + $0x1e0] sm:$0xf0]  ;;  %1761 = vmatpush.bf16.msrb.mxu2 %v8002_v39 }
 0x1f4   :  { %7242 = vst [vmem:[%s16913_s11 + $0x1c8] sm:$0xff] %v1161_v42  ;;  %v1253_v45 = vadd.f32 %v1252_v43, %v10972_v62  ;;  %v1342_v49 = vadd.f32 %v1341_v44, %v10974_v1  ;;  %v8006_v44 = vor.u32 %v8859_v40, %v8003_v41 }
 0x1f5   :  { %8043 = vmatmul.msk.bf16.gmra.mxu2 %vm170_vm0, %v10920_v0  ;;  %8059 = vmatmul.msk.bf16.gmra.mxu3 %vm170_vm0, %v10920_v0 }
 0x1f6   :  { %7251 = vst [vmem:[%s16913_s11 + $0x210] sm:$0xff] %v1253_v45  ;;  %8075 = vmatmul.msk.bf16.gmra.mxu0 %vm170_vm0, %v10920_v0  ;;  %8091 = vmatmul.msk.bf16.gmra.mxu1 %vm170_vm0, %v10920_v0 }
 0x1f7   :  { %7252 = vst [vmem:[%s16913_s11 + $0x218] sm:$0xff] %v1342_v49  ;;  %1850 = vmatpush.bf16.msrb.mxu3 %v8006_v44 }
 0x1f8   :  { %v1074_v50 = vpop.f32.mrf.mxu2  ;;  %v1163_v51 = vpop.f32.mrf.mxu3 }
 0x1f9   :  { %v1075_v53 = vadd.f32 %v1074_v50, %v10982_v63  ;;  %v1164_v54 = vadd.f32 %v1163_v51, %v10984_v8 }
 0x1fb   :  { %7249 = vst [vmem:[%s16913_s11 + $0x200] sm:$0xff] %v1075_v53  ;;  %v1254_v56 = vpop.f32.mrf.mxu0  ;;  %v1343_v57 = vpop.f32.mrf.mxu1  ;;  %v8009_v53 = vld [vmem:[#allocation4 + $0x1a8] sm:$0xf] }
 0x1fc   :  { %7250 = vst [vmem:[%s16913_s11 + $0x208] sm:$0xff] %v1164_v54  ;;  %v1255_v58 = vadd.f32 %v1254_v56, %v10972_v62  ;;  %v1344_v59 = vadd.f32 %v1343_v57, %v10974_v1  ;;  %v8868_v54 = vld [vmem:[#allocation4 + $0x1e4] sm:$0xf0] }
 0x1fe   :  { %7259 = vst [vmem:[%s16913_s11 + $0x250] sm:$0xff] %v1255_v58  ;;  %v8010_v58 = vor.u32 %v8868_v54, %v8009_v53 }
 0x1ff   :  { %7260 = vst [vmem:[%s16913_s11 + $0x258] sm:$0xff] %v1344_v59 }
 0x200   :  { %v1076_v2 = vpop.f32.mrf.mxu2  ;;  %v1165_v3 = vpop.f32.mrf.mxu3  ;;  %1939 = vmatpush.bf16.msrb.mxu0 %v8010_v58 }
 0x201   :  { %v1077_v4 = vadd.f32 %v1076_v2, %v10982_v63  ;;  %v1166_v7 = vadd.f32 %v1165_v3, %v10984_v8 }
 0x203   :  { %7257 = vst [vmem:[%s16913_s11 + $0x240] sm:$0xff] %v1077_v4  ;;  %v1257_v9 = vpop.f32.mrf.mxu0  ;;  %v1346_v10 = vpop.f32.mrf.mxu1 }
 0x204   :  { %7258 = vst [vmem:[%s16913_s11 + $0x248] sm:$0xff] %v1166_v7  ;;  %v1258_v12 = vadd.f32 %v1257_v9, %v10972_v62  ;;  %v1347_v13 = vadd.f32 %v1346_v10, %v10974_v1  ;;  %v8860_v10 = vld [vmem:[#allocation4 + $0x1ac] sm:$0xf] }
 0x205   :  { %8044 = vmatmul.msk.bf16.gmra.mxu2 %vm170_vm0, %v10936_v16  ;;  %8060 = vmatmul.msk.bf16.gmra.mxu3 %vm170_vm0, %v10936_v16 }
 0x206   :  { %7267 = vst [vmem:[%s16913_s11 + $0x290] sm:$0xff] %v1258_v12  ;;  %8076 = vmatmul.msk.bf16.gmra.mxu0 %vm170_vm0, %v10936_v16  ;;  %8092 = vmatmul.msk.bf16.gmra.mxu1 %vm170_vm0, %v10936_v16  ;;  %v8011_v12 = vld [vmem:[#allocation4 + $0x1e8] sm:$0xf0] }
 0x207   :  { %7268 = vst [vmem:[%s16913_s11 + $0x298] sm:$0xff] %v1347_v13  ;;  %v8014_v13 = vor.u32 %v8860_v10, %v8011_v12 }
 0x208   :  { %v1079_v14 = vpop.f32.mrf.mxu2  ;;  %v1168_v15 = vpop.f32.mrf.mxu3 }
 0x209   :  { %v1080_v17 = vadd.f32 %v1079_v14, %v10982_v63  ;;  %v1169_v18 = vadd.f32 %v1168_v15, %v10984_v8  ;;  %2028 = vmatpush.bf16.msrb.mxu1 %v8014_v13 }
 0x20b   :  { %7265 = vst [vmem:[%s16913_s11 + $0x280] sm:$0xff] %v1080_v17  ;;  %v1259_v19 = vpop.f32.mrf.mxu0  ;;  %v1348_v20 = vpop.f32.mrf.mxu1 }
 0x20c   :  { %7266 = vst [vmem:[%s16913_s11 + $0x288] sm:$0xff] %v1169_v18  ;;  %v1260_v22 = vadd.f32 %v1259_v19, %v10972_v62  ;;  %v1349_v23 = vadd.f32 %v1348_v20, %v10974_v1 }
 0x20e   :  { %7275 = vst [vmem:[%s16913_s11 + $0x2d0] sm:$0xff] %v1260_v22 }
 0x20f   :  { %7276 = vst [vmem:[%s16913_s11 + $0x2d8] sm:$0xff] %v1349_v23 }
 0x210   :  { %v1081_v24 = vpop.f32.mrf.mxu2  ;;  %v1170_v25 = vpop.f32.mrf.mxu3 }
 0x211   :  { %v1082_v27 = vadd.f32 %v1081_v24, %v10982_v63  ;;  %v1171_v28 = vadd.f32 %v1170_v25, %v10984_v8 }
 0x213   :  { %7273 = vst [vmem:[%s16913_s11 + $0x2c0] sm:$0xff] %v1082_v27  ;;  %v1262_v29 = vpop.f32.mrf.mxu0  ;;  %v1351_v30 = vpop.f32.mrf.mxu1 }
 0x214   :  { %7274 = vst [vmem:[%s16913_s11 + $0x2c8] sm:$0xff] %v1171_v28  ;;  %v1263_v32 = vadd.f32 %v1262_v29, %v10972_v62  ;;  %v1352_v33 = vadd.f32 %v1351_v30, %v10974_v1 }
 0x215   :  { %8045 = vmatmul.msk.bf16.gmra.mxu2 %vm170_vm0, %v10952_v38  ;;  %8061 = vmatmul.msk.bf16.gmra.mxu3 %vm170_vm0, %v10952_v38 }
 0x216   :  { %7283 = vst [vmem:[%s16913_s11 + $0x310] sm:$0xff] %v1263_v32  ;;  %8077 = vmatmul.msk.bf16.gmra.mxu0 %vm170_vm0, %v10952_v38  ;;  %8093 = vmatmul.msk.bf16.gmra.mxu1 %vm170_vm0, %v10952_v38 }
 0x217   :  { %7284 = vst [vmem:[%s16913_s11 + $0x318] sm:$0xff] %v1352_v33 }
 0x218   :  { %v1084_v36 = vpop.f32.mrf.mxu2  ;;  %v1173_v37 = vpop.f32.mrf.mxu3 }
 0x219   :  { %v1085_v42 = vadd.f32 %v1084_v36, %v10982_v63  ;;  %v1174_v43 = vadd.f32 %v1173_v37, %v10984_v8 }
 0x21b   :  { %7281 = vst [vmem:[%s16913_s11 + $0x300] sm:$0xff] %v1085_v42  ;;  %v1264_v45 = vpop.f32.mrf.mxu0  ;;  %v1353_v49 = vpop.f32.mrf.mxu1 }
 0x21c   :  { %7282 = vst [vmem:[%s16913_s11 + $0x308] sm:$0xff] %v1174_v43  ;;  %v1265_v50 = vadd.f32 %v1264_v45, %v10972_v62  ;;  %v1354_v51 = vadd.f32 %v1353_v49, %v10974_v1 }
 0x21e   :  { %7291 = vst [vmem:[%s16913_s11 + $0x350] sm:$0xff] %v1265_v50 }
 0x21f   :  { %7292 = vst [vmem:[%s16913_s11 + $0x358] sm:$0xff] %v1354_v51 }
 0x220   :  { %v1086_v56 = vpop.f32.mrf.mxu2  ;;  %v1175_v57 = vpop.f32.mrf.mxu3 }
 0x221   :  { %v1087_v59 = vadd.f32 %v1086_v56, %v10982_v63  ;;  %v1176_v2 = vadd.f32 %v1175_v57, %v10984_v8 }
 0x223   :  { %7289 = vst [vmem:[%s16913_s11 + $0x340] sm:$0xff] %v1087_v59  ;;  %v1267_v3 = vpop.f32.mrf.mxu0  ;;  %v1356_v4 = vpop.f32.mrf.mxu1 }
 0x224   :  { %7290 = vst [vmem:[%s16913_s11 + $0x348] sm:$0xff] %v1176_v2  ;;  %v1268_v7 = vadd.f32 %v1267_v3, %v10972_v62  ;;  %v1357_v9 = vadd.f32 %v1356_v4, %v10974_v1 }
 0x225   :  { %8046 = vmatmul.msk.bf16.gmra.mxu2 %vm170_vm0, %v10970_v61  ;;  %8062 = vmatmul.msk.bf16.gmra.mxu3 %vm170_vm0, %v10970_v61 }
 0x226   :  { %7299 = vst [vmem:[%s16913_s11 + $0x390] sm:$0xff] %v1268_v7  ;;  %8078 = vmatmul.msk.bf16.gmra.mxu0 %vm170_vm0, %v10970_v61  ;;  %8094 = vmatmul.msk.bf16.gmra.mxu1 %vm170_vm0, %v10970_v61 }
 0x227   :  { %7300 = vst [vmem:[%s16913_s11 + $0x398] sm:$0xff] %v1357_v9 }
 0x228   :  { %v1089_v14 = vpop.f32.mrf.mxu2  ;;  %v1178_v15 = vpop.f32.mrf.mxu3 }
 0x229   :  { %v1090_v17 = vadd.f32 %v1089_v14, %v10982_v63  ;;  %v1179_v18 = vadd.f32 %v1178_v15, %v10984_v8 }
 0x22b   :  { %7297 = vst [vmem:[%s16913_s11 + $0x380] sm:$0xff] %v1090_v17  ;;  %v1269_v19 = vpop.f32.mrf.mxu0  ;;  %v1358_v20 = vpop.f32.mrf.mxu1 }
 0x22c   :  { %7298 = vst [vmem:[%s16913_s11 + $0x388] sm:$0xff] %v1179_v18  ;;  %v1270_v22 = vadd.f32 %v1269_v19, %v10972_v62  ;;  %v1359_v23 = vadd.f32 %v1358_v20, %v10974_v1  ;;  %v7937_v19 = vld [vmem:[#allocation4 + $0x120] sm:$0xf] }
 0x22d   :  { %v8851_v20 = vld [vmem:[#allocation4 + $0x15c] sm:$0xf0] }
 0x22e   :  { %7307 = vst [vmem:[%s16913_s11 + $0x3d0] sm:$0xff] %v1270_v22 }
 0x22f   :  { %7308 = vst [vmem:[%s16913_s11 + $0x3d8] sm:$0xff] %v1359_v23 }
 0x230   :  { %v1091_v24 = vpop.f32.mrf.mxu2  ;;  %v1180_v25 = vpop.f32.mrf.mxu3 }
 0x231   :  { %v1092_v27 = vadd.f32 %v1091_v24, %v10982_v63  ;;  %v1181_v28 = vadd.f32 %v1180_v25, %v10984_v8  ;;  %v7938_v24 = vor.u32 %v8851_v20, %v7937_v19  ;;  %v8843_v25 = vld [vmem:[#allocation4 + $0x124] sm:$0xf] }
 0x233   :  { %7305 = vst [vmem:[%s16913_s11 + $0x3c0] sm:$0xff] %v1092_v27  ;;  %v1272_v29 = vpop.f32.mrf.mxu0  ;;  %v1361_v30 = vpop.f32.mrf.mxu1  ;;  %v7939_v27 = vld [vmem:[#allocation4 + $0x160] sm:$0xf0]  ;;  %1762 = vmatpush.bf16.msrb.mxu2 %v7938_v24 }
 0x234   :  { %7306 = vst [vmem:[%s16913_s11 + $0x3c8] sm:$0xff] %v1181_v28  ;;  %v1273_v32 = vadd.f32 %v1272_v29, %v10972_v62  ;;  %v1362_v33 = vadd.f32 %v1361_v30, %v10974_v1  ;;  %v7942_v30 = vor.u32 %v8843_v25, %v7939_v27 }
 0x235   :  { %8095 = vmatmul.msk.bf16.vlgmr.msra.gmra.mxu2 %vm170_vm0, %v10843_v46  ;;  %8111 = vmatmul.msk.bf16.vlgmr.msra.gmra.mxu3 %vm170_vm0, %v10843_v46 }
 0x236   :  { %7315 = vst [vmem:[%s16913_s11 + $0x410] sm:$0xff] %v1273_v32  ;;  %8127 = vmatmul.msk.bf16.vlgmr.msra.gmra.mxu0 %vm170_vm0, %v10843_v46  ;;  %8143 = vmatmul.msk.bf16.vlgmr.msra.gmra.mxu1 %vm170_vm0, %v10843_v46 }
 0x237   :  { %7316 = vst [vmem:[%s16913_s11 + $0x418] sm:$0xff] %v1362_v33  ;;  %1851 = vmatpush.bf16.msrb.mxu3 %v7942_v30 }
 0x238   :  { %v1094_v34 = vpop.f32.mrf.mxu2  ;;  %v1183_v35 = vpop.f32.mrf.mxu3 }
 0x239   :  { %v1095_v36 = vadd.f32 %v1094_v34, %v10982_v63  ;;  %v1184_v37 = vadd.f32 %v1183_v35, %v10984_v8 }
 0x23b   :  { %7313 = vst [vmem:[%s16913_s11 + $0x400] sm:$0xff] %v1095_v36  ;;  %v1274_v39 = vpop.f32.mrf.mxu0  ;;  %v1363_v40 = vpop.f32.mrf.mxu1  ;;  %v7945_v36 = vld [vmem:[#allocation4 + $0x128] sm:$0xf] }
 0x23c   :  { %7314 = vst [vmem:[%s16913_s11 + $0x408] sm:$0xff] %v1184_v37  ;;  %v1275_v41 = vadd.f32 %v1274_v39, %v10972_v62  ;;  %v1364_v42 = vadd.f32 %v1363_v40, %v10974_v1  ;;  %v8852_v37 = vld [vmem:[#allocation4 + $0x164] sm:$0xf0] }
 0x23e   :  { %7323 = vst [vmem:[%s16913_s11 + $0x450] sm:$0xff] %v1275_v41  ;;  %v7946_v41 = vor.u32 %v8852_v37, %v7945_v36 }
 0x23f   :  { %7324 = vst [vmem:[%s16913_s11 + $0x458] sm:$0xff] %v1364_v42 }
 0x240   :  { %v1096_v43 = vpop.f32.mrf.mxu2  ;;  %v1185_v44 = vpop.f32.mrf.mxu3  ;;  %1940 = vmatpush.bf16.msrb.mxu0 %v7946_v41 }
 0x241   :  { %v1097_v45 = vadd.f32 %v1096_v43, %v10982_v63  ;;  %v1186_v49 = vadd.f32 %v1185_v44, %v10984_v8 }
 0x243   :  { %7321 = vst [vmem:[%s16913_s11 + $0x440] sm:$0xff] %v1097_v45  ;;  %v1277_v50 = vpop.f32.mrf.mxu0  ;;  %v1366_v51 = vpop.f32.mrf.mxu1 }
 0x244   :  { %7322 = vst [vmem:[%s16913_s11 + $0x448] sm:$0xff] %v1186_v49  ;;  %v1278_v53 = vadd.f32 %v1277_v50, %v10972_v62  ;;  %v1367_v54 = vadd.f32 %v1366_v51, %v10974_v1  ;;  %v8844_v51 = vld [vmem:[#allocation4 + $0x12c] sm:$0xf] }
 0x245   :  { %8096 = vmatmul.msk.bf16.gmra.mxu2 %vm170_vm0, %v10859_v60  ;;  %8112 = vmatmul.msk.bf16.gmra.mxu3 %vm170_vm0, %v10859_v60 }
 0x246   :  { %7331 = vst [vmem:[%s16913_s11 + $0x490] sm:$0xff] %v1278_v53  ;;  %8128 = vmatmul.msk.bf16.gmra.mxu0 %vm170_vm0, %v10859_v60  ;;  %8144 = vmatmul.msk.bf16.gmra.mxu1 %vm170_vm0, %v10859_v60  ;;  %v7947_v53 = vld [vmem:[#allocation4 + $0x168] sm:$0xf0] }
 0x247   :  { %7332 = vst [vmem:[%s16913_s11 + $0x498] sm:$0xff] %v1367_v54  ;;  %v7950_v54 = vor.u32 %v8844_v51, %v7947_v53 }
 0x248   :  { %v1099_v56 = vpop.f32.mrf.mxu2  ;;  %v1188_v57 = vpop.f32.mrf.mxu3 }
 0x249   :  { %v1100_v58 = vadd.f32 %v1099_v56, %v10982_v63  ;;  %v1189_v59 = vadd.f32 %v1188_v57, %v10984_v8  ;;  %2029 = vmatpush.bf16.msrb.mxu1 %v7950_v54 }
 0x24b   :  { %7329 = vst [vmem:[%s16913_s11 + $0x480] sm:$0xff] %v1100_v58  ;;  %v1279_v2 = vpop.f32.mrf.mxu0  ;;  %v1368_v3 = vpop.f32.mrf.mxu1 }
 0x24c   :  { %7330 = vst [vmem:[%s16913_s11 + $0x488] sm:$0xff] %v1189_v59  ;;  %v1280_v4 = vadd.f32 %v1279_v2, %v10972_v62  ;;  %v1369_v7 = vadd.f32 %v1368_v3, %v10974_v1 }
 0x24e   :  { %7339 = vst [vmem:[%s16913_s11 + $0x4d0] sm:$0xff] %v1280_v4 }
 0x24f   :  { %7340 = vst [vmem:[%s16913_s11 + $0x4d8] sm:$0xff] %v1369_v7 }
 0x250   :  { %v1101_v9 = vpop.f32.mrf.mxu2  ;;  %v1190_v10 = vpop.f32.mrf.mxu3 }
 0x251   :  { %v1102_v12 = vadd.f32 %v1101_v9, %v10982_v63  ;;  %v1191_v13 = vadd.f32 %v1190_v10, %v10984_v8 }
 0x253   :  { %7337 = vst [vmem:[%s16913_s11 + $0x4c0] sm:$0xff] %v1102_v12  ;;  %v1282_v14 = vpop.f32.mrf.mxu0  ;;  %v1371_v15 = vpop.f32.mrf.mxu1 }
 0x254   :  { %7338 = vst [vmem:[%s16913_s11 + $0x4c8] sm:$0xff] %v1191_v13  ;;  %v1283_v17 = vadd.f32 %v1282_v14, %v10972_v62  ;;  %v1372_v18 = vadd.f32 %v1371_v15, %v10974_v1 }
 0x255   :  { %8097 = vmatmul.msk.bf16.gmra.mxu2 %vm170_vm0, %v10875_v11  ;;  %8113 = vmatmul.msk.bf16.gmra.mxu3 %vm170_vm0, %v10875_v11 }
 0x256   :  { %7347 = vst [vmem:[%s16913_s11 + $0x510] sm:$0xff] %v1283_v17  ;;  %8129 = vmatmul.msk.bf16.gmra.mxu0 %vm170_vm0, %v10875_v11  ;;  %8145 = vmatmul.msk.bf16.gmra.mxu1 %vm170_vm0, %v10875_v11 }
 0x257   :  { %7348 = vst [vmem:[%s16913_s11 + $0x518] sm:$0xff] %v1372_v18 }
 0x258   :  { %v1104_v22 = vpop.f32.mrf.mxu2  ;;  %v1193_v23 = vpop.f32.mrf.mxu3 }
 0x259   :  { %v1105_v28 = vadd.f32 %v1104_v22, %v10982_v63  ;;  %v1194_v29 = vadd.f32 %v1193_v23, %v10984_v8 }
 0x25b   :  { %7345 = vst [vmem:[%s16913_s11 + $0x500] sm:$0xff] %v1105_v28  ;;  %v1284_v32 = vpop.f32.mrf.mxu0  ;;  %v1373_v33 = vpop.f32.mrf.mxu1 }
 0x25c   :  { %7346 = vst [vmem:[%s16913_s11 + $0x508] sm:$0xff] %v1194_v29  ;;  %v1285_v34 = vadd.f32 %v1284_v32, %v10972_v62  ;;  %v1374_v35 = vadd.f32 %v1373_v33, %v10974_v1 }
 0x25e   :  { %7355 = vst [vmem:[%s16913_s11 + $0x550] sm:$0xff] %v1285_v34 }
 0x25f   :  { %7356 = vst [vmem:[%s16913_s11 + $0x558] sm:$0xff] %v1374_v35 }
 0x260   :  { %v1106_v39 = vpop.f32.mrf.mxu2  ;;  %v1195_v40 = vpop.f32.mrf.mxu3 }
 0x261   :  { %v1107_v42 = vadd.f32 %v1106_v39, %v10982_v63  ;;  %v1196_v43 = vadd.f32 %v1195_v40, %v10984_v8 }
 0x263   :  { %7353 = vst [vmem:[%s16913_s11 + $0x540] sm:$0xff] %v1107_v42  ;;  %v1287_v44 = vpop.f32.mrf.mxu0  ;;  %v1376_v45 = vpop.f32.mrf.mxu1 }
 0x264   :  { %7354 = vst [vmem:[%s16913_s11 + $0x548] sm:$0xff] %v1196_v43  ;;  %v1288_v49 = vadd.f32 %v1287_v44, %v10972_v62  ;;  %v1377_v50 = vadd.f32 %v1376_v45, %v10974_v1 }
 0x265   :  { %8098 = vmatmul.msk.bf16.gmra.mxu2 %vm170_vm0, %v10891_v31  ;;  %8114 = vmatmul.msk.bf16.gmra.mxu3 %vm170_vm0, %v10891_v31 }
 0x266   :  { %7363 = vst [vmem:[%s16913_s11 + $0x590] sm:$0xff] %v1288_v49  ;;  %8130 = vmatmul.msk.bf16.gmra.mxu0 %vm170_vm0, %v10891_v31  ;;  %8146 = vmatmul.msk.bf16.gmra.mxu1 %vm170_vm0, %v10891_v31 }
 0x267   :  { %7364 = vst [vmem:[%s16913_s11 + $0x598] sm:$0xff] %v1377_v50 }
 0x268   :  { %v1109_v56 = vpop.f32.mrf.mxu2  ;;  %v1198_v57 = vpop.f32.mrf.mxu3 }
 0x269   :  { %v1110_v58 = vadd.f32 %v1109_v56, %v10982_v63  ;;  %v1199_v59 = vadd.f32 %v1198_v57, %v10984_v8 }
 0x26b   :  { %7361 = vst [vmem:[%s16913_s11 + $0x580] sm:$0xff] %v1110_v58  ;;  %v1289_v2 = vpop.f32.mrf.mxu0  ;;  %v1378_v3 = vpop.f32.mrf.mxu1 }
 0x26c   :  { %7362 = vst [vmem:[%s16913_s11 + $0x588] sm:$0xff] %v1199_v59  ;;  %v1290_v4 = vadd.f32 %v1289_v2, %v10972_v62  ;;  %v1379_v7 = vadd.f32 %v1378_v3, %v10974_v1  ;;  %v7873_v2 = vld [vmem:[#allocation4 + $0xa0] sm:$0xf] }
 0x26d   :  { %v8835_v3 = vld [vmem:[#allocation4 + $0xdc] sm:$0xf0] }
 0x26e   :  { %7371 = vst [vmem:[%s16913_s11 + $0x5d0] sm:$0xff] %v1290_v4 }
 0x26f   :  { %7372 = vst [vmem:[%s16913_s11 + $0x5d8] sm:$0xff] %v1379_v7 }
 0x270   :  { %v1111_v9 = vpop.f32.mrf.mxu2  ;;  %v1200_v10 = vpop.f32.mrf.mxu3 }
 0x271   :  { %v1112_v12 = vadd.f32 %v1111_v9, %v10982_v63  ;;  %v1201_v13 = vadd.f32 %v1200_v10, %v10984_v8  ;;  %v7874_v9 = vor.u32 %v8835_v3, %v7873_v2  ;;  %v8827_v10 = vld [vmem:[#allocation4 + $0xa4] sm:$0xf] }
 0x273   :  { %7369 = vst [vmem:[%s16913_s11 + $0x5c0] sm:$0xff] %v1112_v12  ;;  %v1292_v14 = vpop.f32.mrf.mxu0  ;;  %v1381_v15 = vpop.f32.mrf.mxu1  ;;  %v7875_v12 = vld [vmem:[#allocation4 + $0xe0] sm:$0xf0]  ;;  %1763 = vmatpush.bf16.msrb.mxu2 %v7874_v9 }
 0x274   :  { %7370 = vst [vmem:[%s16913_s11 + $0x5c8] sm:$0xff] %v1201_v13  ;;  %v1293_v17 = vadd.f32 %v1292_v14, %v10972_v62  ;;  %v1382_v18 = vadd.f32 %v1381_v15, %v10974_v1  ;;  %v7878_v15 = vor.u32 %v8827_v10, %v7875_v12 }
 0x275   :  { %8099 = vmatmul.msk.bf16.gmra.mxu2 %vm170_vm0, %v10907_v52  ;;  %8115 = vmatmul.msk.bf16.gmra.mxu3 %vm170_vm0, %v10907_v52 }
 0x276   :  { %7379 = vst [vmem:[%s16913_s11 + $0x610] sm:$0xff] %v1293_v17  ;;  %8131 = vmatmul.msk.bf16.gmra.mxu0 %vm170_vm0, %v10907_v52  ;;  %8147 = vmatmul.msk.bf16.gmra.mxu1 %vm170_vm0, %v10907_v52 }
 0x277   :  { %7380 = vst [vmem:[%s16913_s11 + $0x618] sm:$0xff] %v1382_v18  ;;  %1852 = vmatpush.bf16.msrb.mxu3 %v7878_v15 }
 0x278   :  { %v1114_v19 = vpop.f32.mrf.mxu2  ;;  %v1203_v20 = vpop.f32.mrf.mxu3 }
 0x279   :  { %v1115_v22 = vadd.f32 %v1114_v19, %v10982_v63  ;;  %v1204_v23 = vadd.f32 %v1203_v20, %v10984_v8 }
 0x27b   :  { %7377 = vst [vmem:[%s16913_s11 + $0x600] sm:$0xff] %v1115_v22  ;;  %v1294_v24 = vpop.f32.mrf.mxu0  ;;  %v1383_v25 = vpop.f32.mrf.mxu1  ;;  %v7881_v22 = vld [vmem:[#allocation4 + $0xa8] sm:$0xf] }
 0x27c   :  { %7378 = vst [vmem:[%s16913_s11 + $0x608] sm:$0xff] %v1204_v23  ;;  %v1295_v27 = vadd.f32 %v1294_v24, %v10972_v62  ;;  %v1384_v28 = vadd.f32 %v1383_v25, %v10974_v1  ;;  %v8836_v23 = vld [vmem:[#allocation4 + $0xe4] sm:$0xf0] }
 0x27e   :  { %7387 = vst [vmem:[%s16913_s11 + $0x650] sm:$0xff] %v1295_v27  ;;  %v7882_v27 = vor.u32 %v8836_v23, %v7881_v22 }
 0x27f   :  { %7388 = vst [vmem:[%s16913_s11 + $0x658] sm:$0xff] %v1384_v28 }
 0x280   :  { %v1116_v29 = vpop.f32.mrf.mxu2  ;;  %v1205_v30 = vpop.f32.mrf.mxu3  ;;  %1941 = vmatpush.bf16.msrb.mxu0 %v7882_v27 }
 0x281   :  { %v1117_v32 = vadd.f32 %v1116_v29, %v10982_v63  ;;  %v1206_v33 = vadd.f32 %v1205_v30, %v10984_v8 }
 0x283   :  { %7385 = vst [vmem:[%s16913_s11 + $0x640] sm:$0xff] %v1117_v32  ;;  %v1297_v34 = vpop.f32.mrf.mxu0  ;;  %v1386_v35 = vpop.f32.mrf.mxu1 }
 0x284   :  { %7386 = vst [vmem:[%s16913_s11 + $0x648] sm:$0xff] %v1206_v33  ;;  %v1298_v36 = vadd.f32 %v1297_v34, %v10972_v62  ;;  %v1387_v37 = vadd.f32 %v1386_v35, %v10974_v1  ;;  %v8828_v35 = vld [vmem:[#allocation4 + $0xac] sm:$0xf] }
 0x285   :  { %8100 = vmatmul.msk.bf16.gmra.mxu2 %vm170_vm0, %v10923_v5  ;;  %8116 = vmatmul.msk.bf16.gmra.mxu3 %vm170_vm0, %v10923_v5 }
 0x286   :  { %7395 = vst [vmem:[%s16913_s11 + $0x690] sm:$0xff] %v1298_v36  ;;  %8132 = vmatmul.msk.bf16.gmra.mxu0 %vm170_vm0, %v10923_v5  ;;  %8148 = vmatmul.msk.bf16.gmra.mxu1 %vm170_vm0, %v10923_v5  ;;  %v7883_v36 = vld [vmem:[#allocation4 + $0xe8] sm:$0xf0] }
 0x287   :  { %7396 = vst [vmem:[%s16913_s11 + $0x698] sm:$0xff] %v1387_v37  ;;  %v7886_v37 = vor.u32 %v8828_v35, %v7883_v36 }
 0x288   :  { %v1119_v39 = vpop.f32.mrf.mxu2  ;;  %v1208_v40 = vpop.f32.mrf.mxu3 }
 0x289   :  { %v1120_v41 = vadd.f32 %v1119_v39, %v10982_v63  ;;  %v1209_v42 = vadd.f32 %v1208_v40, %v10984_v8  ;;  %2030 = vmatpush.bf16.msrb.mxu1 %v7886_v37 }
 0x28b   :  { %7393 = vst [vmem:[%s16913_s11 + $0x680] sm:$0xff] %v1120_v41  ;;  %v1299_v43 = vpop.f32.mrf.mxu0  ;;  %v1388_v44 = vpop.f32.mrf.mxu1 }
 0x28c   :  { %7394 = vst [vmem:[%s16913_s11 + $0x688] sm:$0xff] %v1209_v42  ;;  %v1300_v45 = vadd.f32 %v1299_v43, %v10972_v62  ;;  %v1389_v49 = vadd.f32 %v1388_v44, %v10974_v1 }
 0x28e   :  { %7403 = vst [vmem:[%s16913_s11 + $0x6d0] sm:$0xff] %v1300_v45 }
 0x28f   :  { %7404 = vst [vmem:[%s16913_s11 + $0x6d8] sm:$0xff] %v1389_v49 }
 0x290   :  { %v1121_v50 = vpop.f32.mrf.mxu2  ;;  %v1210_v51 = vpop.f32.mrf.mxu3 }
 0x291   :  { %v1122_v53 = vadd.f32 %v1121_v50, %v10982_v63  ;;  %v1211_v54 = vadd.f32 %v1210_v51, %v10984_v8 }
 0x293   :  { %7401 = vst [vmem:[%s16913_s11 + $0x6c0] sm:$0xff] %v1122_v53  ;;  %v1302_v56 = vpop.f32.mrf.mxu0  ;;  %v1391_v57 = vpop.f32.mrf.mxu1  ;;  %v9976_v53 = vld [vmem:[%s16909_s7] sm:$0xff] }
 0x294   :  { %7402 = vst [vmem:[%s16913_s11 + $0x6c8] sm:$0xff] %v1211_v54  ;;  %v1303_v58 = vadd.f32 %v1302_v56, %v10972_v62  ;;  %v1392_v59 = vadd.f32 %v1391_v57, %v10974_v1  ;;  %v11615_v54 = vperm.slane %v9976_v53, 6  ;;  %v11617_v56 = vperm.slane %v9976_v53, 7 }
 0x295   :  { %8101 = vmatmul.msk.bf16.gmra.mxu2 %vm170_vm0, %v10939_v21  ;;  %8117 = vmatmul.msk.bf16.gmra.mxu3 %vm170_vm0, %v10939_v21 }
 0x296   :  { %7411 = vst [vmem:[%s16913_s11 + $0x710] sm:$0xff] %v1303_v58  ;;  %8133 = vmatmul.msk.bf16.gmra.mxu0 %vm170_vm0, %v10939_v21  ;;  %8149 = vmatmul.msk.bf16.gmra.mxu1 %vm170_vm0, %v10939_v21 }
 0x297   :  { %7412 = vst [vmem:[%s16913_s11 + $0x718] sm:$0xff] %v1392_v59 }
 0x298   :  { %v1124_v4 = vpop.f32.mrf.mxu2  ;;  %v1213_v7 = vpop.f32.mrf.mxu3 }
 0x299   :  { %v1125_v13 = vadd.f32 %v1124_v4, %v10982_v63  ;;  %v1214_v14 = vadd.f32 %v1213_v7, %v10984_v8 }
 0x29b   :  { %7409 = vst [vmem:[%s16913_s11 + $0x700] sm:$0xff] %v1125_v13  ;;  %v1304_v17 = vpop.f32.mrf.mxu0  ;;  %v1393_v18 = vpop.f32.mrf.mxu1 }
 0x29c   :  { %7410 = vst [vmem:[%s16913_s11 + $0x708] sm:$0xff] %v1214_v14  ;;  %v1305_v19 = vadd.f32 %v1304_v17, %v10972_v62  ;;  %v1394_v20 = vadd.f32 %v1393_v18, %v10974_v1 }
 0x29e   :  { %7419 = vst [vmem:[%s16913_s11 + $0x750] sm:$0xff] %v1305_v19 }
 0x29f   :  { %7420 = vst [vmem:[%s16913_s11 + $0x758] sm:$0xff] %v1394_v20 }
 0x2a0   :  { %v1126_v24 = vpop.f32.mrf.mxu2  ;;  %v1215_v25 = vpop.f32.mrf.mxu3 }
 0x2a1   :  { %v1127_v28 = vadd.f32 %v1126_v24, %v10982_v63  ;;  %v1216_v29 = vadd.f32 %v1215_v25, %v10984_v8 }
 0x2a3   :  { %7417 = vst [vmem:[%s16913_s11 + $0x740] sm:$0xff] %v1127_v28  ;;  %v1307_v30 = vpop.f32.mrf.mxu0  ;;  %v1396_v32 = vpop.f32.mrf.mxu1 }
 0x2a4   :  { %7418 = vst [vmem:[%s16913_s11 + $0x748] sm:$0xff] %v1216_v29  ;;  %v1308_v33 = vadd.f32 %v1307_v30, %v10972_v62  ;;  %v1397_v34 = vadd.f32 %v1396_v32, %v10974_v1 }
 0x2a5   :  { %8102 = vmatmul.msk.bf16.gmra.mxu2 %vm170_vm0, %v10955_v48  ;;  %8118 = vmatmul.msk.bf16.gmra.mxu3 %vm170_vm0, %v10955_v48 }
 0x2a6   :  { %7427 = vst [vmem:[%s16913_s11 + $0x790] sm:$0xff] %v1308_v33  ;;  %8134 = vmatmul.msk.bf16.gmra.mxu0 %vm170_vm0, %v10955_v48  ;;  %8150 = vmatmul.msk.bf16.gmra.mxu1 %vm170_vm0, %v10955_v48 }
 0x2a7   :  { %7428 = vst [vmem:[%s16913_s11 + $0x798] sm:$0xff] %v1397_v34 }
 0x2a8   :  { %v1129_v39 = vpop.f32.mrf.mxu2  ;;  %v1218_v40 = vpop.f32.mrf.mxu3 }
 0x2a9   :  { %v1130_v41 = vadd.f32 %v1129_v39, %v10982_v63  ;;  %v1219_v42 = vadd.f32 %v1218_v40, %v10984_v8 }
 0x2ab   :  { %7425 = vst [vmem:[%s16913_s11 + $0x780] sm:$0xff] %v1130_v41  ;;  %v1309_v43 = vpop.f32.mrf.mxu0  ;;  %v1398_v44 = vpop.f32.mrf.mxu1 }
 0x2ac   :  { %7426 = vst [vmem:[%s16913_s11 + $0x788] sm:$0xff] %v1219_v42  ;;  %v1310_v45 = vadd.f32 %v1309_v43, %v10972_v62  ;;  %v1399_v49 = vadd.f32 %v1398_v44, %v10974_v1  ;;  %v7809_v44 = vld [vmem:[#allocation4 + $0x20] sm:$0xf] }
 0x2ae   :  { %7435 = vst [vmem:[%s16913_s11 + $0x7d0] sm:$0xff] %v1310_v45  ;;  %v8819_v45 = vld [vmem:[#allocation4 + $0x5c] sm:$0xf0] }
 0x2af   :  { %7436 = vst [vmem:[%s16913_s11 + $0x7d8] sm:$0xff] %v1399_v49 }
 0x2b0   :  { %v1131_v50 = vpop.f32.mrf.mxu2  ;;  %v1220_v51 = vpop.f32.mrf.mxu3 }
 0x2b1   :  { %v1132_v62 = vadd.f32 %v1131_v50, %v10982_v63  ;;  %v1221_v1 = vadd.f32 %v1220_v51, %v10984_v8  ;;  %v11633_v63 = vperm.slane %v9976_v53, 4  ;;  %v11635_v8 = vperm.slane %v9976_v53, 5  ;;  %v8811_v53 = vld [vmem:[#allocation4 + $0x24] sm:$0xf] }
 0x2b2   :  { %v7810_v51 = vor.u32 %v8819_v45, %v7809_v44 }
 0x2b3   :  { %7433 = vst [vmem:[%s16913_s11 + $0x7c0] sm:$0xff] %v1132_v62  ;;  %v1588_v57 = vpop.f32.mrf.mxu0  ;;  %v1677_v58 = vpop.f32.mrf.mxu1  ;;  %v7811_v62 = vld [vmem:[#allocation4 + $0x60] sm:$0xf0] }
 0x2b4   :  { %7434 = vst [vmem:[%s16913_s11 + $0x7c8] sm:$0xff] %v1221_v1  ;;  %v1589_v59 = vadd.f32 %v1588_v57, %v11615_v54  ;;  %v1678_v2 = vadd.f32 %v1677_v58, %v11617_v56  ;;  %v7814_v58 = vor.u32 %v8811_v53, %v7811_v62  ;;  %1764 = vmatpush.bf16.msrb.mxu2 %v7810_v51 }
 0x2b5   :  { %8103 = vmatmul.msk.bf16.gmra.mxu2 %vm170_vm0, %v10856_v55  ;;  %8119 = vmatmul.msk.bf16.gmra.mxu3 %vm170_vm0, %v10856_v55 }
 0x2b6   :  { %7191 = vst [vmem:[%s16913_s11 + $0x30] sm:$0xff] %v1589_v59  ;;  %8135 = vmatmul.msk.bf16.gmra.mxu0 %vm170_vm0, %v10856_v55  ;;  %8151 = vmatmul.msk.bf16.gmra.mxu1 %vm170_vm0, %v10856_v55 }
 0x2b7   :  { %7192 = vst [vmem:[%s16913_s11 + $0x38] sm:$0xff] %v1678_v2  ;;  %1853 = vmatpush.bf16.msrb.mxu3 %v7814_v58 }
 0x2b8   :  { %v1410_v3 = vpop.f32.mrf.mxu2  ;;  %v1499_v4 = vpop.f32.mrf.mxu3 }
 0x2b9   :  { %v1411_v7 = vadd.f32 %v1410_v3, %v11633_v63  ;;  %v1500_v9 = vadd.f32 %v1499_v4, %v11635_v8 }
 0x2bb   :  { %7189 = vst [vmem:[%s16913_s11 + $0x20] sm:$0xff] %v1411_v7  ;;  %v1590_v10 = vpop.f32.mrf.mxu0  ;;  %v1679_v12 = vpop.f32.mrf.mxu1  ;;  %v7817_v7 = vld [vmem:[#allocation4 + $0x28] sm:$0xf] }
 0x2bc   :  { %7190 = vst [vmem:[%s16913_s11 + $0x28] sm:$0xff] %v1500_v9  ;;  %v1591_v13 = vadd.f32 %v1590_v10, %v11615_v54  ;;  %v1680_v14 = vadd.f32 %v1679_v12, %v11617_v56  ;;  %v8820_v9 = vld [vmem:[#allocation4 + $0x64] sm:$0xf0] }
 0x2be   :  { %7199 = vst [vmem:[%s16913_s11 + $0x70] sm:$0xff] %v1591_v13  ;;  %v7818_v13 = vor.u32 %v8820_v9, %v7817_v7 }
 0x2bf   :  { %7200 = vst [vmem:[%s16913_s11 + $0x78] sm:$0xff] %v1680_v14 }
 0x2c0   :  { %v1412_v15 = vpop.f32.mrf.mxu2  ;;  %v1501_v17 = vpop.f32.mrf.mxu3  ;;  %1942 = vmatpush.bf16.msrb.mxu0 %v7818_v13 }
 0x2c1   :  { %v1413_v18 = vadd.f32 %v1412_v15, %v11633_v63  ;;  %v1502_v19 = vadd.f32 %v1501_v17, %v11635_v8 }
 0x2c3   :  { %7197 = vst [vmem:[%s16913_s11 + $0x60] sm:$0xff] %v1413_v18  ;;  %v1593_v20 = vpop.f32.mrf.mxu0  ;;  %v1682_v22 = vpop.f32.mrf.mxu1 }
 0x2c4   :  { %7198 = vst [vmem:[%s16913_s11 + $0x68] sm:$0xff] %v1502_v19  ;;  %v1594_v23 = vadd.f32 %v1593_v20, %v11615_v54  ;;  %v1683_v24 = vadd.f32 %v1682_v22, %v11617_v56  ;;  %v8812_v22 = vld [vmem:[#allocation4 + $0x2c] sm:$0xf] }
 0x2c5   :  { %8104 = vmatmul.msk.bf16.gmra.mxu2 %vm170_vm0, %v10872_v6  ;;  %8120 = vmatmul.msk.bf16.gmra.mxu3 %vm170_vm0, %v10872_v6 }
 0x2c6   :  { %7207 = vst [vmem:[%s16913_s11 + $0xb0] sm:$0xff] %v1594_v23  ;;  %8136 = vmatmul.msk.bf16.gmra.mxu0 %vm170_vm0, %v10872_v6  ;;  %8152 = vmatmul.msk.bf16.gmra.mxu1 %vm170_vm0, %v10872_v6  ;;  %v7819_v23 = vld [vmem:[#allocation4 + $0x68] sm:$0xf0] }
 0x2c7   :  { %7208 = vst [vmem:[%s16913_s11 + $0xb8] sm:$0xff] %v1683_v24  ;;  %v7822_v24 = vor.u32 %v8812_v22, %v7819_v23 }
 0x2c8   :  { %v1415_v25 = vpop.f32.mrf.mxu2  ;;  %v1504_v27 = vpop.f32.mrf.mxu3 }
 0x2c9   :  { %v1416_v28 = vadd.f32 %v1415_v25, %v11633_v63  ;;  %v1505_v29 = vadd.f32 %v1504_v27, %v11635_v8  ;;  %2031 = vmatpush.bf16.msrb.mxu1 %v7822_v24 }
 0x2cb   :  { %7205 = vst [vmem:[%s16913_s11 + $0xa0] sm:$0xff] %v1416_v28  ;;  %v1595_v30 = vpop.f32.mrf.mxu0  ;;  %v1684_v32 = vpop.f32.mrf.mxu1 }
 0x2cc   :  { %7206 = vst [vmem:[%s16913_s11 + $0xa8] sm:$0xff] %v1505_v29  ;;  %v1596_v33 = vadd.f32 %v1595_v30, %v11615_v54  ;;  %v1685_v34 = vadd.f32 %v1684_v32, %v11617_v56 }
 0x2ce   :  { %7215 = vst [vmem:[%s16913_s11 + $0xf0] sm:$0xff] %v1596_v33 }
 0x2cf   :  { %7216 = vst [vmem:[%s16913_s11 + $0xf8] sm:$0xff] %v1685_v34 }
 0x2d0   :  { %v1417_v35 = vpop.f32.mrf.mxu2  ;;  %v1506_v36 = vpop.f32.mrf.mxu3 }
 0x2d1   :  { %v1418_v37 = vadd.f32 %v1417_v35, %v11633_v63  ;;  %v1507_v39 = vadd.f32 %v1506_v36, %v11635_v8 }
 0x2d3   :  { %7213 = vst [vmem:[%s16913_s11 + $0xe0] sm:$0xff] %v1418_v37  ;;  %v1598_v40 = vpop.f32.mrf.mxu0  ;;  %v1687_v41 = vpop.f32.mrf.mxu1 }
 0x2d4   :  { %7214 = vst [vmem:[%s16913_s11 + $0xe8] sm:$0xff] %v1507_v39  ;;  %v1599_v42 = vadd.f32 %v1598_v40, %v11615_v54  ;;  %v1688_v43 = vadd.f32 %v1687_v41, %v11617_v56 }
 0x2d5   :  { %8105 = vmatmul.msk.bf16.gmra.mxu2 %vm170_vm0, %v10888_v26  ;;  %8121 = vmatmul.msk.bf16.gmra.mxu3 %vm170_vm0, %v10888_v26 }
 0x2d6   :  { %7223 = vst [vmem:[%s16913_s11 + $0x130] sm:$0xff] %v1599_v42  ;;  %8137 = vmatmul.msk.bf16.gmra.mxu0 %vm170_vm0, %v10888_v26  ;;  %8153 = vmatmul.msk.bf16.gmra.mxu1 %vm170_vm0, %v10888_v26 }
 0x2d7   :  { %7224 = vst [vmem:[%s16913_s11 + $0x138] sm:$0xff] %v1688_v43 }
 0x2d8   :  { %v1420_v49 = vpop.f32.mrf.mxu2  ;;  %v1509_v50 = vpop.f32.mrf.mxu3 }
 0x2d9   :  { %v1421_v1 = vadd.f32 %v1420_v49, %v11633_v63  ;;  %v1510_v57 = vadd.f32 %v1509_v50, %v11635_v8 }
 0x2db   :  { %7221 = vst [vmem:[%s16913_s11 + $0x120] sm:$0xff] %v1421_v1  ;;  %v1600_v59 = vpop.f32.mrf.mxu0  ;;  %v1689_v2 = vpop.f32.mrf.mxu1 }
 0x2dc   :  { %7222 = vst [vmem:[%s16913_s11 + $0x128] sm:$0xff] %v1510_v57  ;;  %v1601_v3 = vadd.f32 %v1600_v59, %v11615_v54  ;;  %v1690_v4 = vadd.f32 %v1689_v2, %v11617_v56 }
 0x2de   :  { %7231 = vst [vmem:[%s16913_s11 + $0x170] sm:$0xff] %v1601_v3 }
 0x2df   :  { %7232 = vst [vmem:[%s16913_s11 + $0x178] sm:$0xff] %v1690_v4 }
 0x2e0   :  { %v1422_v10 = vpop.f32.mrf.mxu2  ;;  %v1511_v12 = vpop.f32.mrf.mxu3 }
 0x2e1   :  { %v1423_v14 = vadd.f32 %v1422_v10, %v11633_v63  ;;  %v1512_v15 = vadd.f32 %v1511_v12, %v11635_v8 }
 0x2e3   :  { %7229 = vst [vmem:[%s16913_s11 + $0x160] sm:$0xff] %v1423_v14  ;;  %v1603_v17 = vpop.f32.mrf.mxu0  ;;  %v1692_v18 = vpop.f32.mrf.mxu1 }
 0x2e4   :  { %7230 = vst [vmem:[%s16913_s11 + $0x168] sm:$0xff] %v1512_v15  ;;  %v1604_v19 = vadd.f32 %v1603_v17, %v11615_v54  ;;  %v1693_v20 = vadd.f32 %v1692_v18, %v11617_v56 }
 0x2e5   :  { %8106 = vmatmul.msk.bf16.gmra.mxu2 %vm170_vm0, %v10904_v47  ;;  %8122 = vmatmul.msk.bf16.gmra.mxu3 %vm170_vm0, %v10904_v47 }
 0x2e6   :  { %7239 = vst [vmem:[%s16913_s11 + $0x1b0] sm:$0xff] %v1604_v19  ;;  %8138 = vmatmul.msk.bf16.gmra.mxu0 %vm170_vm0, %v10904_v47  ;;  %8154 = vmatmul.msk.bf16.gmra.mxu1 %vm170_vm0, %v10904_v47 }
 0x2e7   :  { %7240 = vst [vmem:[%s16913_s11 + $0x1b8] sm:$0xff] %v1693_v20 }
 0x2e8   :  { %v1425_v25 = vpop.f32.mrf.mxu2  ;;  %v1514_v27 = vpop.f32.mrf.mxu3 }
 0x2e9   :  { %v1426_v28 = vadd.f32 %v1425_v25, %v11633_v63  ;;  %v1515_v29 = vadd.f32 %v1514_v27, %v11635_v8 }
 0x2eb   :  { %7237 = vst [vmem:[%s16913_s11 + $0x1a0] sm:$0xff] %v1426_v28  ;;  %v1605_v30 = vpop.f32.mrf.mxu0  ;;  %v1694_v32 = vpop.f32.mrf.mxu1 }
 0x2ec   :  { %7238 = vst [vmem:[%s16913_s11 + $0x1a8] sm:$0xff] %v1515_v29  ;;  %v1606_v33 = vadd.f32 %v1605_v30, %v11615_v54  ;;  %v1695_v34 = vadd.f32 %v1694_v32, %v11617_v56  ;;  %v8017_v30 = vld [vmem:[#allocation4 + $0x1b0] sm:$0xf] }
 0x2ed   :  { %v8869_v32 = vld [vmem:[#allocation4 + $0x1ec] sm:$0xf0] }
 0x2ee   :  { %7247 = vst [vmem:[%s16913_s11 + $0x1f0] sm:$0xff] %v1606_v33 }
 0x2ef   :  { %7248 = vst [vmem:[%s16913_s11 + $0x1f8] sm:$0xff] %v1695_v34 }
 0x2f0   :  { %v1427_v35 = vpop.f32.mrf.mxu2  ;;  %v1516_v36 = vpop.f32.mrf.mxu3 }
 0x2f1   :  { %v1428_v37 = vadd.f32 %v1427_v35, %v11633_v63  ;;  %v1517_v39 = vadd.f32 %v1516_v36, %v11635_v8  ;;  %v8018_v35 = vor.u32 %v8869_v32, %v8017_v30  ;;  %v8861_v36 = vld [vmem:[#allocation4 + $0x1b4] sm:$0xf] }
 0x2f3   :  { %7245 = vst [vmem:[%s16913_s11 + $0x1e0] sm:$0xff] %v1428_v37  ;;  %v1608_v40 = vpop.f32.mrf.mxu0  ;;  %v1697_v41 = vpop.f32.mrf.mxu1  ;;  %v8019_v37 = vld [vmem:[#allocation4 + $0x1f0] sm:$0xf0]  ;;  %2117 = vmatpush.bf16.msra.mxu2 %v8018_v35 }
 0x2f4   :  { %7246 = vst [vmem:[%s16913_s11 + $0x1e8] sm:$0xff] %v1517_v39  ;;  %v1609_v42 = vadd.f32 %v1608_v40, %v11615_v54  ;;  %v1698_v43 = vadd.f32 %v1697_v41, %v11617_v56  ;;  %v8022_v41 = vor.u32 %v8861_v36, %v8019_v37 }
 0x2f5   :  { %8107 = vmatmul.msk.bf16.gmra.mxu2 %vm170_vm0, %v10920_v0  ;;  %8123 = vmatmul.msk.bf16.gmra.mxu3 %vm170_vm0, %v10920_v0 }
 0x2f6   :  { %7255 = vst [vmem:[%s16913_s11 + $0x230] sm:$0xff] %v1609_v42  ;;  %8139 = vmatmul.msk.bf16.gmra.mxu0 %vm170_vm0, %v10920_v0  ;;  %8155 = vmatmul.msk.bf16.gmra.mxu1 %vm170_vm0, %v10920_v0 }
 0x2f7   :  { %7256 = vst [vmem:[%s16913_s11 + $0x238] sm:$0xff] %v1698_v43  ;;  %2206 = vmatpush.bf16.msra.mxu3 %v8022_v41 }
 0x2f8   :  { %v1430_v44 = vpop.f32.mrf.mxu2  ;;  %v1519_v45 = vpop.f32.mrf.mxu3 }
 0x2f9   :  { %v1431_v49 = vadd.f32 %v1430_v44, %v11633_v63  ;;  %v1520_v50 = vadd.f32 %v1519_v45, %v11635_v8 }
 0x2fb   :  { %7253 = vst [vmem:[%s16913_s11 + $0x220] sm:$0xff] %v1431_v49  ;;  %v1610_v51 = vpop.f32.mrf.mxu0  ;;  %v1699_v53 = vpop.f32.mrf.mxu1  ;;  %v8025_v49 = vld [vmem:[#allocation4 + $0x1b8] sm:$0xf] }
 0x2fc   :  { %7254 = vst [vmem:[%s16913_s11 + $0x228] sm:$0xff] %v1520_v50  ;;  %v1611_v62 = vadd.f32 %v1610_v51, %v11615_v54  ;;  %v1700_v1 = vadd.f32 %v1699_v53, %v11617_v56  ;;  %v8870_v50 = vld [vmem:[#allocation4 + $0x1f4] sm:$0xf0] }
 0x2fe   :  { %7263 = vst [vmem:[%s16913_s11 + $0x270] sm:$0xff] %v1611_v62  ;;  %v8026_v62 = vor.u32 %v8870_v50, %v8025_v49 }
 0x2ff   :  { %7264 = vst [vmem:[%s16913_s11 + $0x278] sm:$0xff] %v1700_v1 }
 0x300   :  { %v1432_v57 = vpop.f32.mrf.mxu2  ;;  %v1521_v58 = vpop.f32.mrf.mxu3  ;;  %2295 = vmatpush.bf16.msra.mxu0 %v8026_v62 }
 0x301   :  { %v1433_v59 = vadd.f32 %v1432_v57, %v11633_v63  ;;  %v1522_v2 = vadd.f32 %v1521_v58, %v11635_v8 }
 0x303   :  { %7261 = vst [vmem:[%s16913_s11 + $0x260] sm:$0xff] %v1433_v59  ;;  %v1613_v3 = vpop.f32.mrf.mxu0  ;;  %v1702_v4 = vpop.f32.mrf.mxu1 }
 0x304   :  { %7262 = vst [vmem:[%s16913_s11 + $0x268] sm:$0xff] %v1522_v2  ;;  %v1614_v7 = vadd.f32 %v1613_v3, %v11615_v54  ;;  %v1703_v9 = vadd.f32 %v1702_v4, %v11617_v56  ;;  %v8862_v4 = vld [vmem:[#allocation4 + $0x1bc] sm:$0xf] }
 0x305   :  { %8108 = vmatmul.msk.bf16.gmra.mxu2 %vm170_vm0, %v10936_v16  ;;  %8124 = vmatmul.msk.bf16.gmra.mxu3 %vm170_vm0, %v10936_v16 }
 0x306   :  { %7271 = vst [vmem:[%s16913_s11 + $0x2b0] sm:$0xff] %v1614_v7  ;;  %8140 = vmatmul.msk.bf16.gmra.mxu0 %vm170_vm0, %v10936_v16  ;;  %8156 = vmatmul.msk.bf16.gmra.mxu1 %vm170_vm0, %v10936_v16  ;;  %v8027_v7 = vld [vmem:[#allocation4 + $0x1f8] sm:$0xf0] }
 0x307   :  { %7272 = vst [vmem:[%s16913_s11 + $0x2b8] sm:$0xff] %v1703_v9  ;;  %v8030_v9 = vor.u32 %v8862_v4, %v8027_v7 }
 0x308   :  { %v1435_v10 = vpop.f32.mrf.mxu2  ;;  %v1524_v12 = vpop.f32.mrf.mxu3 }
 0x309   :  { %v1436_v13 = vadd.f32 %v1435_v10, %v11633_v63  ;;  %v1525_v14 = vadd.f32 %v1524_v12, %v11635_v8  ;;  %2384 = vmatpush.bf16.msra.mxu1 %v8030_v9 }
 0x30b   :  { %7269 = vst [vmem:[%s16913_s11 + $0x2a0] sm:$0xff] %v1436_v13  ;;  %v1615_v15 = vpop.f32.mrf.mxu0  ;;  %v1704_v17 = vpop.f32.mrf.mxu1 }
 0x30c   :  { %7270 = vst [vmem:[%s16913_s11 + $0x2a8] sm:$0xff] %v1525_v14  ;;  %v1616_v18 = vadd.f32 %v1615_v15, %v11615_v54  ;;  %v1705_v19 = vadd.f32 %v1704_v17, %v11617_v56 }
 0x30e   :  { %7279 = vst [vmem:[%s16913_s11 + $0x2f0] sm:$0xff] %v1616_v18 }
 0x30f   :  { %7280 = vst [vmem:[%s16913_s11 + $0x2f8] sm:$0xff] %v1705_v19 }
 0x310   :  { %v1437_v20 = vpop.f32.mrf.mxu2  ;;  %v1526_v22 = vpop.f32.mrf.mxu3 }
 0x311   :  { %v1438_v23 = vadd.f32 %v1437_v20, %v11633_v63  ;;  %v1527_v24 = vadd.f32 %v1526_v22, %v11635_v8 }
 0x313   :  { %7277 = vst [vmem:[%s16913_s11 + $0x2e0] sm:$0xff] %v1438_v23  ;;  %v1618_v25 = vpop.f32.mrf.mxu0  ;;  %v1707_v27 = vpop.f32.mrf.mxu1 }
 0x314   :  { %7278 = vst [vmem:[%s16913_s11 + $0x2e8] sm:$0xff] %v1527_v24  ;;  %v1619_v28 = vadd.f32 %v1618_v25, %v11615_v54  ;;  %v1708_v29 = vadd.f32 %v1707_v27, %v11617_v56 }
 0x315   :  { %8109 = vmatmul.msk.bf16.gmra.mxu2 %vm170_vm0, %v10952_v38  ;;  %8125 = vmatmul.msk.bf16.gmra.mxu3 %vm170_vm0, %v10952_v38 }
 0x316   :  { %7287 = vst [vmem:[%s16913_s11 + $0x330] sm:$0xff] %v1619_v28  ;;  %8141 = vmatmul.msk.bf16.gmra.mxu0 %vm170_vm0, %v10952_v38  ;;  %8157 = vmatmul.msk.bf16.gmra.mxu1 %vm170_vm0, %v10952_v38 }
 0x317   :  { %7288 = vst [vmem:[%s16913_s11 + $0x338] sm:$0xff] %v1708_v29 }
 0x318   :  { %v1440_v33 = vpop.f32.mrf.mxu2  ;;  %v1529_v34 = vpop.f32.mrf.mxu3 }
 0x319   :  { %v1441_v39 = vadd.f32 %v1440_v33, %v11633_v63  ;;  %v1530_v40 = vadd.f32 %v1529_v34, %v11635_v8 }
 0x31b   :  { %7285 = vst [vmem:[%s16913_s11 + $0x320] sm:$0xff] %v1441_v39  ;;  %v1620_v42 = vpop.f32.mrf.mxu0  ;;  %v1709_v43 = vpop.f32.mrf.mxu1 }
 0x31c   :  { %7286 = vst [vmem:[%s16913_s11 + $0x328] sm:$0xff] %v1530_v40  ;;  %v1621_v44 = vadd.f32 %v1620_v42, %v11615_v54  ;;  %v1710_v45 = vadd.f32 %v1709_v43, %v11617_v56 }
 0x31e   :  { %7295 = vst [vmem:[%s16913_s11 + $0x370] sm:$0xff] %v1621_v44 }
 0x31f   :  { %7296 = vst [vmem:[%s16913_s11 + $0x378] sm:$0xff] %v1710_v45 }
 0x320   :  { %v1442_v51 = vpop.f32.mrf.mxu2  ;;  %v1531_v53 = vpop.f32.mrf.mxu3 }
 0x321   :  { %v1443_v1 = vadd.f32 %v1442_v51, %v11633_v63  ;;  %v1532_v57 = vadd.f32 %v1531_v53, %v11635_v8 }
 0x323   :  { %7293 = vst [vmem:[%s16913_s11 + $0x360] sm:$0xff] %v1443_v1  ;;  %v1623_v58 = vpop.f32.mrf.mxu0  ;;  %v1712_v59 = vpop.f32.mrf.mxu1 }
 0x324   :  { %7294 = vst [vmem:[%s16913_s11 + $0x368] sm:$0xff] %v1532_v57  ;;  %v1624_v2 = vadd.f32 %v1623_v58, %v11615_v54  ;;  %v1713_v3 = vadd.f32 %v1712_v59, %v11617_v56 }
 0x325   :  { %8110 = vmatmul.msk.bf16.gmra.mxu2 %vm170_vm0, %v10970_v61  ;;  %8126 = vmatmul.msk.bf16.gmra.mxu3 %vm170_vm0, %v10970_v61 }
 0x326   :  { %7303 = vst [vmem:[%s16913_s11 + $0x3b0] sm:$0xff] %v1624_v2  ;;  %8142 = vmatmul.msk.bf16.gmra.mxu0 %vm170_vm0, %v10970_v61  ;;  %8158 = vmatmul.msk.bf16.gmra.mxu1 %vm170_vm0, %v10970_v61 }
 0x327   :  { %7304 = vst [vmem:[%s16913_s11 + $0x3b8] sm:$0xff] %v1713_v3 }
 0x328   :  { %v1445_v10 = vpop.f32.mrf.mxu2  ;;  %v1534_v12 = vpop.f32.mrf.mxu3 }
 0x329   :  { %v1446_v13 = vadd.f32 %v1445_v10, %v11633_v63  ;;  %v1535_v14 = vadd.f32 %v1534_v12, %v11635_v8 }
 0x32b   :  { %7301 = vst [vmem:[%s16913_s11 + $0x3a0] sm:$0xff] %v1446_v13  ;;  %v1625_v15 = vpop.f32.mrf.mxu0  ;;  %v1714_v17 = vpop.f32.mrf.mxu1 }
 0x32c   :  { %7302 = vst [vmem:[%s16913_s11 + $0x3a8] sm:$0xff] %v1535_v14  ;;  %v1626_v18 = vadd.f32 %v1625_v15, %v11615_v54  ;;  %v1715_v19 = vadd.f32 %v1714_v17, %v11617_v56  ;;  %v7953_v15 = vld [vmem:[#allocation4 + $0x130] sm:$0xf] }
 0x32d   :  { %v8853_v17 = vld [vmem:[#allocation4 + $0x16c] sm:$0xf0] }
 0x32e   :  { %7311 = vst [vmem:[%s16913_s11 + $0x3f0] sm:$0xff] %v1626_v18 }
 0x32f   :  { %7312 = vst [vmem:[%s16913_s11 + $0x3f8] sm:$0xff] %v1715_v19 }
 0x330   :  { %v1447_v20 = vpop.f32.mrf.mxu2  ;;  %v1536_v22 = vpop.f32.mrf.mxu3 }
 0x331   :  { %v1448_v23 = vadd.f32 %v1447_v20, %v11633_v63  ;;  %v1537_v24 = vadd.f32 %v1536_v22, %v11635_v8  ;;  %v7954_v20 = vor.u32 %v8853_v17, %v7953_v15  ;;  %v8845_v22 = vld [vmem:[#allocation4 + $0x134] sm:$0xf] }
 0x333   :  { %7309 = vst [vmem:[%s16913_s11 + $0x3e0] sm:$0xff] %v1448_v23  ;;  %v1628_v25 = vpop.f32.mrf.mxu0  ;;  %v1717_v27 = vpop.f32.mrf.mxu1  ;;  %v7955_v23 = vld [vmem:[#allocation4 + $0x170] sm:$0xf0]  ;;  %2118 = vmatpush.bf16.msra.mxu2 %v7954_v20 }
 0x334   :  { %7310 = vst [vmem:[%s16913_s11 + $0x3e8] sm:$0xff] %v1537_v24  ;;  %v1629_v28 = vadd.f32 %v1628_v25, %v11615_v54  ;;  %v1718_v29 = vadd.f32 %v1717_v27, %v11617_v56  ;;  %v7958_v27 = vor.u32 %v8845_v22, %v7955_v23 }
 0x335   :  { %8159 = vmatmul.msk.bf16.vlgmr.msrb.gmra.mxu2 %vm170_vm0, %v10843_v46  ;;  %8175 = vmatmul.msk.bf16.vlgmr.msrb.gmra.mxu3 %vm170_vm0, %v10843_v46 }
 0x336   :  { %7319 = vst [vmem:[%s16913_s11 + $0x430] sm:$0xff] %v1629_v28  ;;  %8191 = vmatmul.msk.bf16.vlgmr.msrb.gmra.mxu0 %vm170_vm0, %v10843_v46  ;;  %8207 = vmatmul.msk.bf16.vlgmr.msrb.gmra.mxu1 %vm170_vm0, %v10843_v46 }
 0x337   :  { %7320 = vst [vmem:[%s16913_s11 + $0x438] sm:$0xff] %v1718_v29  ;;  %2207 = vmatpush.bf16.msra.mxu3 %v7958_v27 }
 0x338   :  { %v1450_v30 = vpop.f32.mrf.mxu2  ;;  %v1539_v32 = vpop.f32.mrf.mxu3 }
 0x339   :  { %v1451_v33 = vadd.f32 %v1450_v30, %v11633_v63  ;;  %v1540_v34 = vadd.f32 %v1539_v32, %v11635_v8 }
 0x33b   :  { %7317 = vst [vmem:[%s16913_s11 + $0x420] sm:$0xff] %v1451_v33  ;;  %v1630_v35 = vpop.f32.mrf.mxu0  ;;  %v1719_v36 = vpop.f32.mrf.mxu1  ;;  %v7961_v33 = vld [vmem:[#allocation4 + $0x138] sm:$0xf] }
 0x33c   :  { %7318 = vst [vmem:[%s16913_s11 + $0x428] sm:$0xff] %v1540_v34  ;;  %v1631_v37 = vadd.f32 %v1630_v35, %v11615_v54  ;;  %v1720_v39 = vadd.f32 %v1719_v36, %v11617_v56  ;;  %v8854_v34 = vld [vmem:[#allocation4 + $0x174] sm:$0xf0] }
 0x33e   :  { %7327 = vst [vmem:[%s16913_s11 + $0x470] sm:$0xff] %v1631_v37  ;;  %v7962_v37 = vor.u32 %v8854_v34, %v7961_v33 }
 0x33f   :  { %7328 = vst [vmem:[%s16913_s11 + $0x478] sm:$0xff] %v1720_v39 }
 0x340   :  { %v1452_v40 = vpop.f32.mrf.mxu2  ;;  %v1541_v41 = vpop.f32.mrf.mxu3  ;;  %2296 = vmatpush.bf16.msra.mxu0 %v7962_v37 }
 0x341   :  { %v1453_v42 = vadd.f32 %v1452_v40, %v11633_v63  ;;  %v1542_v43 = vadd.f32 %v1541_v41, %v11635_v8 }
 0x343   :  { %7325 = vst [vmem:[%s16913_s11 + $0x460] sm:$0xff] %v1453_v42  ;;  %v1633_v44 = vpop.f32.mrf.mxu0  ;;  %v1722_v45 = vpop.f32.mrf.mxu1 }
 0x344   :  { %7326 = vst [vmem:[%s16913_s11 + $0x468] sm:$0xff] %v1542_v43  ;;  %v1634_v49 = vadd.f32 %v1633_v44, %v11615_v54  ;;  %v1723_v50 = vadd.f32 %v1722_v45, %v11617_v56  ;;  %v8846_v45 = vld [vmem:[#allocation4 + $0x13c] sm:$0xf] }
 0x345   :  { %8160 = vmatmul.msk.bf16.gmra.mxu2 %vm170_vm0, %v10859_v60  ;;  %8176 = vmatmul.msk.bf16.gmra.mxu3 %vm170_vm0, %v10859_v60 }
 0x346   :  { %7335 = vst [vmem:[%s16913_s11 + $0x4b0] sm:$0xff] %v1634_v49  ;;  %8192 = vmatmul.msk.bf16.gmra.mxu0 %vm170_vm0, %v10859_v60  ;;  %8208 = vmatmul.msk.bf16.gmra.mxu1 %vm170_vm0, %v10859_v60  ;;  %v7963_v49 = vld [vmem:[#allocation4 + $0x178] sm:$0xf0] }
 0x347   :  { %7336 = vst [vmem:[%s16913_s11 + $0x4b8] sm:$0xff] %v1723_v50  ;;  %v7966_v50 = vor.u32 %v8846_v45, %v7963_v49 }
 0x348   :  { %v1455_v51 = vpop.f32.mrf.mxu2  ;;  %v1544_v53 = vpop.f32.mrf.mxu3 }
 0x349   :  { %v1456_v62 = vadd.f32 %v1455_v51, %v11633_v63  ;;  %v1545_v1 = vadd.f32 %v1544_v53, %v11635_v8  ;;  %2385 = vmatpush.bf16.msra.mxu1 %v7966_v50 }
 0x34b   :  { %7333 = vst [vmem:[%s16913_s11 + $0x4a0] sm:$0xff] %v1456_v62  ;;  %v1635_v57 = vpop.f32.mrf.mxu0  ;;  %v1724_v58 = vpop.f32.mrf.mxu1 }
 0x34c   :  { %7334 = vst [vmem:[%s16913_s11 + $0x4a8] sm:$0xff] %v1545_v1  ;;  %v1636_v59 = vadd.f32 %v1635_v57, %v11615_v54  ;;  %v1725_v2 = vadd.f32 %v1724_v58, %v11617_v56 }
 0x34e   :  { %7343 = vst [vmem:[%s16913_s11 + $0x4f0] sm:$0xff] %v1636_v59 }
 0x34f   :  { %7344 = vst [vmem:[%s16913_s11 + $0x4f8] sm:$0xff] %v1725_v2 }
 0x350   :  { %v1457_v3 = vpop.f32.mrf.mxu2  ;;  %v1546_v4 = vpop.f32.mrf.mxu3 }
 0x351   :  { %v1458_v7 = vadd.f32 %v1457_v3, %v11633_v63  ;;  %v1547_v9 = vadd.f32 %v1546_v4, %v11635_v8 }
 0x353   :  { %7341 = vst [vmem:[%s16913_s11 + $0x4e0] sm:$0xff] %v1458_v7  ;;  %v1638_v10 = vpop.f32.mrf.mxu0  ;;  %v1727_v12 = vpop.f32.mrf.mxu1 }
 0x354   :  { %7342 = vst [vmem:[%s16913_s11 + $0x4e8] sm:$0xff] %v1547_v9  ;;  %v1639_v13 = vadd.f32 %v1638_v10, %v11615_v54  ;;  %v1728_v14 = vadd.f32 %v1727_v12, %v11617_v56 }
 0x355   :  { %8161 = vmatmul.msk.bf16.gmra.mxu2 %vm170_vm0, %v10875_v11  ;;  %8177 = vmatmul.msk.bf16.gmra.mxu3 %vm170_vm0, %v10875_v11 }
 0x356   :  { %7351 = vst [vmem:[%s16913_s11 + $0x530] sm:$0xff] %v1639_v13  ;;  %8193 = vmatmul.msk.bf16.gmra.mxu0 %vm170_vm0, %v10875_v11  ;;  %8209 = vmatmul.msk.bf16.gmra.mxu1 %vm170_vm0, %v10875_v11 }
 0x357   :  { %7352 = vst [vmem:[%s16913_s11 + $0x538] sm:$0xff] %v1728_v14 }
 0x358   :  { %v1460_v18 = vpop.f32.mrf.mxu2  ;;  %v1549_v19 = vpop.f32.mrf.mxu3 }
 0x359   :  { %v1461_v24 = vadd.f32 %v1460_v18, %v11633_v63  ;;  %v1550_v25 = vadd.f32 %v1549_v19, %v11635_v8 }
 0x35b   :  { %7349 = vst [vmem:[%s16913_s11 + $0x520] sm:$0xff] %v1461_v24  ;;  %v1640_v28 = vpop.f32.mrf.mxu0  ;;  %v1729_v29 = vpop.f32.mrf.mxu1 }
 0x35c   :  { %7350 = vst [vmem:[%s16913_s11 + $0x528] sm:$0xff] %v1550_v25  ;;  %v1641_v30 = vadd.f32 %v1640_v28, %v11615_v54  ;;  %v1730_v32 = vadd.f32 %v1729_v29, %v11617_v56 }
 0x35e   :  { %7359 = vst [vmem:[%s16913_s11 + $0x570] sm:$0xff] %v1641_v30 }
 0x35f   :  { %7360 = vst [vmem:[%s16913_s11 + $0x578] sm:$0xff] %v1730_v32 }
 0x360   :  { %v1462_v35 = vpop.f32.mrf.mxu2  ;;  %v1551_v36 = vpop.f32.mrf.mxu3 }
 0x361   :  { %v1463_v39 = vadd.f32 %v1462_v35, %v11633_v63  ;;  %v1552_v40 = vadd.f32 %v1551_v36, %v11635_v8 }
 0x363   :  { %7357 = vst [vmem:[%s16913_s11 + $0x560] sm:$0xff] %v1463_v39  ;;  %v1643_v41 = vpop.f32.mrf.mxu0  ;;  %v1732_v42 = vpop.f32.mrf.mxu1 }
 0x364   :  { %7358 = vst [vmem:[%s16913_s11 + $0x568] sm:$0xff] %v1552_v40  ;;  %v1644_v43 = vadd.f32 %v1643_v41, %v11615_v54  ;;  %v1733_v44 = vadd.f32 %v1732_v42, %v11617_v56 }
 0x365   :  { %8162 = vmatmul.msk.bf16.gmra.mxu2 %vm170_vm0, %v10891_v31  ;;  %8178 = vmatmul.msk.bf16.gmra.mxu3 %vm170_vm0, %v10891_v31 }
 0x366   :  { %7367 = vst [vmem:[%s16913_s11 + $0x5b0] sm:$0xff] %v1644_v43  ;;  %8194 = vmatmul.msk.bf16.gmra.mxu0 %vm170_vm0, %v10891_v31  ;;  %8210 = vmatmul.msk.bf16.gmra.mxu1 %vm170_vm0, %v10891_v31 }
 0x367   :  { %7368 = vst [vmem:[%s16913_s11 + $0x5b8] sm:$0xff] %v1733_v44 }
 0x368   :  { %v1465_v51 = vpop.f32.mrf.mxu2  ;;  %v1554_v53 = vpop.f32.mrf.mxu3 }
 0x369   :  { %v1466_v62 = vadd.f32 %v1465_v51, %v11633_v63  ;;  %v1555_v1 = vadd.f32 %v1554_v53, %v11635_v8 }
 0x36b   :  { %7365 = vst [vmem:[%s16913_s11 + $0x5a0] sm:$0xff] %v1466_v62  ;;  %v1645_v57 = vpop.f32.mrf.mxu0  ;;  %v1734_v58 = vpop.f32.mrf.mxu1 }
 0x36c   :  { %7366 = vst [vmem:[%s16913_s11 + $0x5a8] sm:$0xff] %v1555_v1  ;;  %v1646_v59 = vadd.f32 %v1645_v57, %v11615_v54  ;;  %v1735_v2 = vadd.f32 %v1734_v58, %v11617_v56 }
 0x36e   :  { %7375 = vst [vmem:[%s16913_s11 + $0x5f0] sm:$0xff] %v1646_v59 }
 0x36f   :  { %7376 = vst [vmem:[%s16913_s11 + $0x5f8] sm:$0xff] %v1735_v2 }
 0x370   :  { %v1467_v3 = vpop.f32.mrf.mxu2  ;;  %v1556_v4 = vpop.f32.mrf.mxu3 }
 0x371   :  { %v1468_v7 = vadd.f32 %v1467_v3, %v11633_v63  ;;  %v1557_v9 = vadd.f32 %v1556_v4, %v11635_v8 }
 0x373   :  { %7373 = vst [vmem:[%s16913_s11 + $0x5e0] sm:$0xff] %v1468_v7  ;;  %v1648_v10 = vpop.f32.mrf.mxu0  ;;  %v1737_v12 = vpop.f32.mrf.mxu1 }
 0x374   :  { %7374 = vst [vmem:[%s16913_s11 + $0x5e8] sm:$0xff] %v1557_v9  ;;  %v1649_v13 = vadd.f32 %v1648_v10, %v11615_v54  ;;  %v1738_v14 = vadd.f32 %v1737_v12, %v11617_v56 }
 0x375   :  { %8163 = vmatmul.msk.bf16.gmra.mxu2 %vm170_vm0, %v10907_v52  ;;  %8179 = vmatmul.msk.bf16.gmra.mxu3 %vm170_vm0, %v10907_v52 }
 0x376   :  { %7383 = vst [vmem:[%s16913_s11 + $0x630] sm:$0xff] %v1649_v13  ;;  %8195 = vmatmul.msk.bf16.gmra.mxu0 %vm170_vm0, %v10907_v52  ;;  %8211 = vmatmul.msk.bf16.gmra.mxu1 %vm170_vm0, %v10907_v52 }
 0x377   :  { %7384 = vst [vmem:[%s16913_s11 + $0x638] sm:$0xff] %v1738_v14 }
 0x378   :  { %v1470_v15 = vpop.f32.mrf.mxu2  ;;  %v1559_v17 = vpop.f32.mrf.mxu3 }
 0x379   :  { %v1471_v18 = vadd.f32 %v1470_v15, %v11633_v63  ;;  %v1560_v19 = vadd.f32 %v1559_v17, %v11635_v8 }
 0x37b   :  { %7381 = vst [vmem:[%s16913_s11 + $0x620] sm:$0xff] %v1471_v18  ;;  %v1650_v20 = vpop.f32.mrf.mxu0  ;;  %v1739_v22 = vpop.f32.mrf.mxu1 }
 0x37c   :  { %7382 = vst [vmem:[%s16913_s11 + $0x628] sm:$0xff] %v1560_v19  ;;  %v1651_v23 = vadd.f32 %v1650_v20, %v11615_v54  ;;  %v1740_v24 = vadd.f32 %v1739_v22, %v11617_v56 }
 0x37e   :  { %7391 = vst [vmem:[%s16913_s11 + $0x670] sm:$0xff] %v1651_v23 }
 0x37f   :  { %7392 = vst [vmem:[%s16913_s11 + $0x678] sm:$0xff] %v1740_v24 }
 0x380   :  { %v1472_v25 = vpop.f32.mrf.mxu2  ;;  %v1561_v27 = vpop.f32.mrf.mxu3 }
 0x381   :  { %v1473_v28 = vadd.f32 %v1472_v25, %v11633_v63  ;;  %v1562_v29 = vadd.f32 %v1561_v27, %v11635_v8 }
 0x383   :  { %7389 = vst [vmem:[%s16913_s11 + $0x660] sm:$0xff] %v1473_v28  ;;  %v1653_v30 = vpop.f32.mrf.mxu0  ;;  %v1742_v32 = vpop.f32.mrf.mxu1 }
 0x384   :  { %7390 = vst [vmem:[%s16913_s11 + $0x668] sm:$0xff] %v1562_v29  ;;  %v1654_v33 = vadd.f32 %v1653_v30, %v11615_v54  ;;  %v1743_v34 = vadd.f32 %v1742_v32, %v11617_v56  ;;  %v642_v30 = vld [vmem:[%s16909_s7 + $0x8] sm:$0xff] }
 0x385   :  { %8164 = vmatmul.msk.bf16.gmra.mxu2 %vm170_vm0, %v10923_v5  ;;  %8180 = vmatmul.msk.bf16.gmra.mxu3 %vm170_vm0, %v10923_v5 }
 0x386   :  { %7399 = vst [vmem:[%s16913_s11 + $0x6b0] sm:$0xff] %v1654_v33  ;;  %8196 = vmatmul.msk.bf16.gmra.mxu0 %vm170_vm0, %v10923_v5  ;;  %8212 = vmatmul.msk.bf16.gmra.mxu1 %vm170_vm0, %v10923_v5 }
 0x387   :  { %7400 = vst [vmem:[%s16913_s11 + $0x6b8] sm:$0xff] %v1743_v34  ;;  %v12266_v34 = vperm.slane %v642_v30, 2 }
 0x388   :  { %v1475_v35 = vpop.f32.mrf.mxu2  ;;  %v1564_v36 = vpop.f32.mrf.mxu3 }
 0x389   :  { %v1476_v37 = vadd.f32 %v1475_v35, %v11633_v63  ;;  %v1565_v39 = vadd.f32 %v1564_v36, %v11635_v8  ;;  %v12268_v35 = vperm.slane %v642_v30, 3 }
 0x38b   :  { %7397 = vst [vmem:[%s16913_s11 + $0x6a0] sm:$0xff] %v1476_v37  ;;  %v1655_v40 = vpop.f32.mrf.mxu0  ;;  %v1744_v41 = vpop.f32.mrf.mxu1 }
 0x38c   :  { %7398 = vst [vmem:[%s16913_s11 + $0x6a8] sm:$0xff] %v1565_v39  ;;  %v1656_v42 = vadd.f32 %v1655_v40, %v11615_v54  ;;  %v1745_v43 = vadd.f32 %v1744_v41, %v11617_v56  ;;  %v12280_v41 = vperm.slane %v642_v30, 0 }
 0x38e   :  { %7407 = vst [vmem:[%s16913_s11 + $0x6f0] sm:$0xff] %v1656_v42  ;;  %v12282_v42 = vperm.slane %v642_v30, 1 }
 0x38f   :  { %7408 = vst [vmem:[%s16913_s11 + $0x6f8] sm:$0xff] %v1745_v43  ;;  %v8829_v43 = vld [vmem:[#allocation4 + $0xb4] sm:$0xf] }
 0x390   :  { %v1477_v44 = vpop.f32.mrf.mxu2  ;;  %v1566_v45 = vpop.f32.mrf.mxu3 }
 0x391   :  { %v1478_v49 = vadd.f32 %v1477_v44, %v11633_v63  ;;  %v1567_v50 = vadd.f32 %v1566_v45, %v11635_v8 }
 0x393   :  { %7405 = vst [vmem:[%s16913_s11 + $0x6e0] sm:$0xff] %v1478_v49  ;;  %v1658_v51 = vpop.f32.mrf.mxu0  ;;  %v1747_v53 = vpop.f32.mrf.mxu1 }
 0x394   :  { %7406 = vst [vmem:[%s16913_s11 + $0x6e8] sm:$0xff] %v1567_v50  ;;  %v1659_v62 = vadd.f32 %v1658_v51, %v11615_v54  ;;  %v1748_v1 = vadd.f32 %v1747_v53, %v11617_v56  ;;  %v7891_v50 = vld [vmem:[#allocation4 + $0xf0] sm:$0xf0] }
 0x395   :  { %8165 = vmatmul.msk.bf16.gmra.mxu2 %vm170_vm0, %v10939_v21  ;;  %8181 = vmatmul.msk.bf16.gmra.mxu3 %vm170_vm0, %v10939_v21  ;;  %v7894_v51 = vor.u32 %v8829_v43, %v7891_v50 }
 0x396   :  { %7415 = vst [vmem:[%s16913_s11 + $0x730] sm:$0xff] %v1659_v62  ;;  %8197 = vmatmul.msk.bf16.gmra.mxu0 %vm170_vm0, %v10939_v21  ;;  %8213 = vmatmul.msk.bf16.gmra.mxu1 %vm170_vm0, %v10939_v21 }
 0x397   :  { %7416 = vst [vmem:[%s16913_s11 + $0x738] sm:$0xff] %v1748_v1  ;;  %2208 = vmatpush.bf16.msra.mxu3 %v7894_v51 }
 0x398   :  { %v1480_v57 = vpop.f32.mrf.mxu2  ;;  %v1569_v58 = vpop.f32.mrf.mxu3 }
 0x399   :  { %v1481_v59 = vadd.f32 %v1480_v57, %v11633_v63  ;;  %v1570_v2 = vadd.f32 %v1569_v58, %v11635_v8 }
 0x39b   :  { %7413 = vst [vmem:[%s16913_s11 + $0x720] sm:$0xff] %v1481_v59  ;;  %v1660_v3 = vpop.f32.mrf.mxu0  ;;  %v1749_v4 = vpop.f32.mrf.mxu1 }
 0x39c   :  { %7414 = vst [vmem:[%s16913_s11 + $0x728] sm:$0xff] %v1570_v2  ;;  %v1661_v7 = vadd.f32 %v1660_v3, %v11615_v54  ;;  %v1750_v9 = vadd.f32 %v1749_v4, %v11617_v56 }
 0x39e   :  { %7423 = vst [vmem:[%s16913_s11 + $0x770] sm:$0xff] %v1661_v7 }
 0x39f   :  { %7424 = vst [vmem:[%s16913_s11 + $0x778] sm:$0xff] %v1750_v9 }
 0x3a0   :  { %v1482_v10 = vpop.f32.mrf.mxu2  ;;  %v1571_v12 = vpop.f32.mrf.mxu3 }
 0x3a1   :  { %v1483_v13 = vadd.f32 %v1482_v10, %v11633_v63  ;;  %v1572_v14 = vadd.f32 %v1571_v12, %v11635_v8 }
 0x3a3   :  { %7421 = vst [vmem:[%s16913_s11 + $0x760] sm:$0xff] %v1483_v13  ;;  %v1663_v15 = vpop.f32.mrf.mxu0  ;;  %v1752_v17 = vpop.f32.mrf.mxu1 }
 0x3a4   :  { %7422 = vst [vmem:[%s16913_s11 + $0x768] sm:$0xff] %v1572_v14  ;;  %v1664_v18 = vadd.f32 %v1663_v15, %v11615_v54  ;;  %v1753_v19 = vadd.f32 %v1752_v17, %v11617_v56 }
 0x3a5   :  { %8166 = vmatmul.msk.bf16.gmra.mxu2 %vm170_vm0, %v10955_v48  ;;  %8182 = vmatmul.msk.bf16.gmra.mxu3 %vm170_vm0, %v10955_v48 }
 0x3a6   :  { %7431 = vst [vmem:[%s16913_s11 + $0x7b0] sm:$0xff] %v1664_v18  ;;  %8198 = vmatmul.msk.bf16.gmra.mxu0 %vm170_vm0, %v10955_v48  ;;  %8214 = vmatmul.msk.bf16.gmra.mxu1 %vm170_vm0, %v10955_v48 }
 0x3a7   :  { %7432 = vst [vmem:[%s16913_s11 + $0x7b8] sm:$0xff] %v1753_v19 }
 0x3a8   :  { %v1485_v20 = vpop.f32.mrf.mxu2  ;;  %v1574_v22 = vpop.f32.mrf.mxu3 }
 0x3a9   :  { %v1486_v23 = vadd.f32 %v1485_v20, %v11633_v63  ;;  %v1575_v24 = vadd.f32 %v1574_v22, %v11635_v8 }
 0x3ab   :  { %7429 = vst [vmem:[%s16913_s11 + $0x7a0] sm:$0xff] %v1486_v23  ;;  %v1665_v25 = vpop.f32.mrf.mxu0  ;;  %v1754_v27 = vpop.f32.mrf.mxu1 }
 0x3ac   :  { %7430 = vst [vmem:[%s16913_s11 + $0x7a8] sm:$0xff] %v1575_v24  ;;  %v1666_v28 = vadd.f32 %v1665_v25, %v11615_v54  ;;  %v1755_v29 = vadd.f32 %v1754_v27, %v11617_v56  ;;  %v7897_v24 = vld [vmem:[#allocation4 + $0xb8] sm:$0xf] }
 0x3ad   :  { %v8838_v25 = vld [vmem:[#allocation4 + $0xf4] sm:$0xf0] }
 0x3ae   :  { %7439 = vst [vmem:[%s16913_s11 + $0x7f0] sm:$0xff] %v1666_v28 }
 0x3af   :  { %7440 = vst [vmem:[%s16913_s11 + $0x7f8] sm:$0xff] %v1755_v29 }
 0x3b0   :  { %v1487_v32 = vpop.f32.mrf.mxu2  ;;  %v1576_v33 = vpop.f32.mrf.mxu3 }
 0x3b1   :  { %v1488_v54 = vadd.f32 %v1487_v32, %v11633_v63  ;;  %v1577_v56 = vadd.f32 %v1576_v33, %v11635_v8  ;;  %v7889_v63 = vld [vmem:[#allocation4 + $0xb0] sm:$0xf] }
 0x3b2   :  { %v8837_v8 = vld [vmem:[#allocation4 + $0xec] sm:$0xf0] }
 0x3b3   :  { %7437 = vst [vmem:[%s16913_s11 + $0x7e0] sm:$0xff] %v1488_v54  ;;  %v1944_v36 = vpop.f32.mrf.mxu0  ;;  %v2033_v37 = vpop.f32.mrf.mxu1  ;;  %v7890_v49 = vor.u32 %v8837_v8, %v7889_v63  ;;  %v7898_v54 = vor.u32 %v8838_v25, %v7897_v24 }
 0x3b4   :  { %7438 = vst [vmem:[%s16913_s11 + $0x7e8] sm:$0xff] %v1577_v56  ;;  %v1945_v39 = vadd.f32 %v1944_v36, %v12266_v34  ;;  %v2034_v40 = vadd.f32 %v2033_v37, %v12268_v35 }
 0x3b5   :  { %8167 = vmatmul.msk.bf16.gmra.mxu2 %vm170_vm0, %v10856_v55  ;;  %8183 = vmatmul.msk.bf16.gmra.mxu3 %vm170_vm0, %v10856_v55 }
 0x3b6   :  { %v12288_v44 = vadd.f32 -5.0, %v1945_v39  ;;  %v12290_v45 = vadd.f32 -5.0, %v2034_v40  ;;  %8199 = vmatmul.msk.bf16.gmra.mxu0 %vm170_vm0, %v10856_v55  ;;  %8215 = vmatmul.msk.bf16.gmra.mxu1 %vm170_vm0, %v10856_v55 }
 0x3b7   :  { %2119 = vmatpush.bf16.msra.mxu2 %v7890_v49  ;;  %2297 = vmatpush.bf16.msra.mxu0 %v7898_v54 }
 0x3b8   :  { %v2983_v53 = vand.u32 2147483647, %v12288_v44  ;;  %v2984_v62 = vand.u32 2147483647, %v12290_v45  ;;  %v1766_v1 = vpop.f32.mrf.mxu2  ;;  %v1855_v57 = vpop.f32.mrf.mxu3 }
 0x3b9   :  { %v1767_v58 = vadd.f32 %v1766_v1, %v12280_v41  ;;  %v1856_v59 = vadd.f32 %v1855_v57, %v12282_v42  ;;  %v8830_v1 = vld [vmem:[#allocation4 + $0xbc] sm:$0xf] }
 0x3ba   :  { %v3239_v2 = vsub.f32 0.0, %v2983_v53  ;;  %v3240_v3 = vsub.f32 0.0, %v2984_v62 }
 0x3bb   :  { %v12300_v4 = vadd.f32 -5.0, %v1767_v58  ;;  %v12302_v7 = vadd.f32 -5.0, %v1856_v59  ;;  %v1946_v9 = vpop.f32.mrf.mxu0  ;;  %v2035_v10 = vpop.f32.mrf.mxu1 }
 0x3bc   :  { %v3497_v12 = vmul.f32 1.442695, %v3239_v2  ;;  %v3499_v13 = vmul.f32 1.442695, %v3240_v3  ;;  %v1947_v14 = vadd.f32 %v1946_v9, %v12266_v34  ;;  %v2036_v15 = vadd.f32 %v2035_v10, %v12268_v35  ;;  %v7899_v3 = vld [vmem:[#allocation4 + $0xf8] sm:$0xf0] }
 0x3bd   :  { %v2981_v17 = vand.u32 2147483647, %v12300_v4  ;;  %v2982_v18 = vand.u32 2147483647, %v12302_v7  ;;  %v7902_v10 = vor.u32 %v8830_v1, %v7899_v3  ;;  %v2728_v1 = vmax.f32 %v12290_v45, 0.0 }
 0x3be   :  { %8952 = vpow2.f32 %v3497_v12  ;;  %v12308_v19 = vadd.f32 -5.0, %v1947_v14  ;;  %v12310_v20 = vadd.f32 -5.0, %v2036_v15  ;;  %v2725_v45 = vmax.f32 %v12300_v4, 0.0 }
 0x3bf   :  { %8954 = vpow2.f32 %v3499_v13  ;;  %v3237_v22 = vsub.f32 0.0, %v2981_v17  ;;  %v3238_v23 = vsub.f32 0.0, %v2982_v18  ;;  %2386 = vmatpush.bf16.msra.mxu1 %v7902_v10 }
 0x3c0   :  { %v2991_v27 = vand.u32 2147483647, %v12308_v19  ;;  %v2992_v28 = vand.u32 2147483647, %v12310_v20  ;;  %v1768_v29 = vpop.f32.mrf.mxu2  ;;  %v1857_v30 = vpop.f32.mrf.mxu3 }
 0x3c1   :  { %v3493_v32 = vmul.f32 1.442695, %v3237_v22  ;;  %v3495_v33 = vmul.f32 1.442695, %v3238_v23  ;;  %v1769_v56 = vadd.f32 %v1768_v29, %v12280_v41  ;;  %v1858_v39 = vadd.f32 %v1857_v30, %v12282_v42 }
 0x3c2   :  { %v3247_v36 = vsub.f32 0.0, %v2991_v27  ;;  %v3248_v37 = vsub.f32 0.0, %v2992_v28 }
 0x3c3   :  { %8956 = vpow2.f32 %v3493_v32  ;;  %v12316_v40 = vadd.f32 -5.0, %v1769_v56  ;;  %v1949_v63 = vpop.f32.mrf.mxu0  ;;  %v12318_v50 = vadd.f32 -5.0, %v1858_v39  ;;  %v2038_v58 = vpop.f32.mrf.mxu1 }
 0x3c4   :  { %v8953_v8 = vpop.eup %8952  ;;  %8958 = vpow2.f32 %v3495_v33  ;;  %v3513_v43 = vmul.f32 1.442695, %v3247_v36  ;;  %v3515_v49 = vmul.f32 1.442695, %v3248_v37  ;;  %v1950_v57 = vadd.f32 %v1949_v63, %v12266_v34 }
 0x3c5   :  { %v8955_v51 = vpop.eup %8954  ;;  %v4007_v53 = vadd.f32 1.0, %v8953_v8  ;;  %v2989_v62 = vand.u32 2147483647, %v12316_v40  ;;  %8168 = vmatmul.msk.bf16.gmra.mxu2 %vm170_vm0, %v10872_v6  ;;  %8184 = vmatmul.msk.bf16.gmra.mxu3 %vm170_vm0, %v10872_v6  ;;  %v2990_v2 = vand.u32 2147483647, %v12318_v50  ;;  %v2039_v14 = vadd.f32 %v2038_v58, %v12268_v35 }
 0x3c6   :  { %v4008_v59 = vadd.f32 1.0, %v8955_v51  ;;  %8960 = vpow2.f32 %v3513_v43  ;;  %8200 = vmatmul.msk.bf16.gmra.mxu0 %vm170_vm0, %v10872_v6  ;;  %8216 = vmatmul.msk.bf16.gmra.mxu1 %vm170_vm0, %v10872_v6  ;;  %v12331_v12 = vadd.f32 -5.0, %v1950_v57 }
 0x3c7   :  { %8962 = vlog2.f32 %v4007_v53  ;;  %v3245_v9 = vsub.f32 0.0, %v2989_v62  ;;  %v3246_v13 = vsub.f32 0.0, %v2990_v2  ;;  %v12335_v28 = vadd.f32 -5.0, %v2039_v14 }
 0x3c8   :  { %8964 = vlog2.f32 %v4008_v59  ;;  %v1771_v15 = vpop.f32.mrf.mxu2  ;;  %v1860_v17 = vpop.f32.mrf.mxu3  ;;  %v2999_v23 = vand.u32 2147483647, %v12331_v12 }
 0x3c9   :  { %v8957_v18 = vpop.eup %8956  ;;  %8966 = vpow2.f32 %v3515_v49  ;;  %v3509_v22 = vmul.f32 1.442695, %v3245_v9  ;;  %v3511_v27 = vmul.f32 1.442695, %v3246_v13  ;;  %v1772_v29 = vadd.f32 %v1771_v15, %v12280_v41 }
 0x3ca   :  { %v8959_v24 = vpop.eup %8958  ;;  %v4005_v25 = vadd.f32 1.0, %v8957_v18  ;;  %v3255_v32 = vsub.f32 0.0, %v2999_v23  ;;  %v1861_v33 = vadd.f32 %v1860_v17, %v12282_v42  ;;  %v3000_v56 = vand.u32 2147483647, %v12335_v28 }
 0x3cb   :  { %v4006_v30 = vadd.f32 1.0, %v8959_v24  ;;  %8968 = vpow2.f32 %v3509_v22  ;;  %v12340_v36 = vadd.f32 -5.0, %v1772_v29  ;;  %v2727_v49 = vmax.f32 %v12288_v44, 0.0  ;;  %v1951_v59 = vpop.f32.mrf.mxu0  ;;  %v2040_v10 = vpop.f32.mrf.mxu1 }
 0x3cc   :  { %v8961_v54 = vpop.eup %8960  ;;  %8970 = vlog2.f32 %v4005_v25  ;;  %v3529_v63 = vmul.f32 1.442695, %v3255_v32  ;;  %v12342_v8 = vadd.f32 -5.0, %v1861_v33  ;;  %v3256_v53 = vsub.f32 0.0, %v3000_v56 }
 0x3cd   :  { %v8963_v37 = vpop.eup %8962  ;;  %8972 = vlog2.f32 %v4006_v30  ;;  %v4015_v39 = vadd.f32 1.0, %v8961_v54  ;;  %v2997_v58 = vand.u32 2147483647, %v12340_v36  ;;  %v1952_v22 = vadd.f32 %v1951_v59, %v12266_v34 }
 0x3ce   :  { %v8965_v43 = vpop.eup %8964  ;;  %v4266_v51 = vmul.f32 0.6931472, %v8963_v37  ;;  %8974 = vpow2.f32 %v3511_v27  ;;  %v3531_v9 = vmul.f32 1.442695, %v3256_v53  ;;  %v2998_v44 = vand.u32 2147483647, %v12342_v8 }
 0x3cf   :  { %v8967_v62 = vpop.eup %8966  ;;  %v4268_v57 = vmul.f32 0.6931472, %v8965_v43  ;;  %8976 = vlog2.f32 %v4015_v39  ;;  %v3253_v15 = vsub.f32 0.0, %v2997_v58  ;;  %v2041_v27 = vadd.f32 %v2040_v10, %v12268_v35 }
 0x3d0   :  { %v4775_v2 = vadd.f32 %v4266_v51, %v2727_v49  ;;  %v4016_v3 = vadd.f32 1.0, %v8967_v62  ;;  %8978 = vpow2.f32 %v3529_v63  ;;  %v2726_v30 = vmax.f32 %v12302_v7, 0.0 }
 0x3d1   :  { %v8969_v13 = vpop.eup %8968  ;;  %v4776_v14 = vadd.f32 %v4268_v57, %v2728_v1  ;;  %v3525_v25 = vmul.f32 1.442695, %v3253_v15  ;;  %v3254_v4 = vsub.f32 0.0, %v2998_v44  ;;  %v2735_v56 = vmax.f32 %v12308_v19, 0.0  ;;  %v1773_v1 = vpop.f32.mrf.mxu2 }
 0x3d2   :  { %v8971_v17 = vpop.eup %8970  ;;  %7443 = vst [vmem:[%s16914_s12 + $0x10] sm:$0xff] %v4775_v2  ;;  %8980 = vlog2.f32 %v4016_v3  ;;  %v4013_v18 = vadd.f32 1.0, %v8969_v13  ;;  %v12363_v7 = vadd.f32 -5.0, %v1952_v22  ;;  %v12372_v51 = vadd.f32 -5.0, %v2041_v27 }
 0x3d3   :  { %v8973_v23 = vpop.eup %8972  ;;  %7444 = vst [vmem:[%s16914_s12 + $0x18] sm:$0xff] %v4776_v14  ;;  %v4262_v24 = vmul.f32 0.6931472, %v8971_v17  ;;  %8982 = vpow2.f32 %v3531_v9  ;;  %v3527_v49 = vmul.f32 1.442695, %v3254_v4  ;;  %v2736_v58 = vmax.f32 %v12310_v20, 0.0  ;;  %v1954_v4 = vpop.f32.mrf.mxu0 }
 0x3d4   :  { %v8975_v29 = vpop.eup %8974  ;;  %v4264_v32 = vmul.f32 0.6931472, %v8973_v23  ;;  %8984 = vlog2.f32 %v4013_v18  ;;  %v3007_v2 = vand.u32 2147483647, %v12363_v7  ;;  %v2733_v9 = vmax.f32 %v12316_v40, 0.0 }
 0x3d5   :  { %v8977_v33 = vpop.eup %8976  ;;  %v4773_v54 = vadd.f32 %v4262_v24, %v2725_v45  ;;  %v4014_v37 = vadd.f32 1.0, %v8975_v29  ;;  %8986 = vpow2.f32 %v3525_v25  ;;  %8169 = vmatmul.msk.bf16.gmra.mxu2 %vm170_vm0, %v10888_v26  ;;  %8185 = vmatmul.msk.bf16.gmra.mxu3 %vm170_vm0, %v10888_v26  ;;  %v3008_v17 = vand.u32 2147483647, %v12372_v51  ;;  %v1862_v45 = vpop.f32.mrf.mxu3 }
 0x3d6   :  { %v8979_v39 = vpop.eup %8978  ;;  %v4774_v63 = vadd.f32 %v4264_v32, %v2726_v30  ;;  %v4282_v43 = vmul.f32 0.6931472, %v8977_v33  ;;  %8201 = vmatmul.msk.bf16.gmra.mxu0 %vm170_vm0, %v10888_v26  ;;  %8217 = vmatmul.msk.bf16.gmra.mxu1 %vm170_vm0, %v10888_v26  ;;  %v3263_v44 = vsub.f32 0.0, %v3007_v2  ;;  %v1774_v18 = vadd.f32 %v1773_v1, %v12280_v41  ;;  %v2043_v33 = vpop.f32.mrf.mxu1 }
 0x3d7   :  { %7441 = vst [vmem:[%s16914_s12] sm:$0xff] %v4773_v54  ;;  %8988 = vlog2.f32 %v4014_v37  ;;  %v4023_v19 = vadd.f32 1.0, %v8979_v39  ;;  %v2734_v40 = vmax.f32 %v12318_v50, 0.0  ;;  %v3264_v25 = vsub.f32 0.0, %v3008_v17 }
 0x3d8   :  { %v8981_v53 = vpop.eup %8980  ;;  %7442 = vst [vmem:[%s16914_s12 + $0x8] sm:$0xff] %v4774_v63  ;;  %v4783_v62 = vadd.f32 %v4282_v43, %v2735_v56  ;;  %8990 = vpow2.f32 %v3527_v49  ;;  %v3545_v24 = vmul.f32 1.442695, %v3263_v44  ;;  %v12389_v30 = vadd.f32 -5.0, %v1774_v18 }
 0x3d9   :  { %v8983_v57 = vpop.eup %8982  ;;  %v4284_v59 = vmul.f32 0.6931472, %v8981_v53  ;;  %8992 = vlog2.f32 %v4023_v19  ;;  %v1863_v32 = vadd.f32 %v1862_v45, %v12282_v42  ;;  %v2743_v50 = vmax.f32 %v12331_v12, 0.0  ;;  %v1776_v1 = vpop.f32.mrf.mxu2 }
 0x3da   :  { %v8985_v3 = vpop.eup %8984  ;;  %7451 = vst [vmem:[%s16914_s12 + $0x50] sm:$0xff] %v4783_v62  ;;  %v4024_v10 = vadd.f32 1.0, %v8983_v57  ;;  %v3547_v63 = vmul.f32 1.442695, %v3264_v25  ;;  %v3005_v43 = vand.u32 2147483647, %v12389_v30  ;;  %v1955_v62 = vadd.f32 %v1954_v4, %v12266_v34 }
 0x3db   :  { %v8987_v13 = vpop.eup %8986  ;;  %v4784_v14 = vadd.f32 %v4284_v59, %v2736_v58  ;;  %v4278_v15 = vmul.f32 0.6931472, %v8985_v3  ;;  %v12397_v49 = vadd.f32 -5.0, %v1863_v32  ;;  %v2744_v57 = vmax.f32 %v12335_v28, 0.0 }
 0x3dc   :  { %8994 = vlog2.f32 %v4024_v10  ;;  %v4021_v20 = vadd.f32 1.0, %v8987_v13  ;;  %v3261_v58 = vsub.f32 0.0, %v3005_v43  ;;  %v2741_v3 = vmax.f32 %v12340_v36, 0.0 }
 0x3dd   :  { %v8989_v22 = vpop.eup %8988  ;;  %7452 = vst [vmem:[%s16914_s12 + $0x58] sm:$0xff] %v4784_v14  ;;  %v4781_v23 = vadd.f32 %v4278_v15, %v2733_v9  ;;  %v3006_v59 = vand.u32 2147483647, %v12397_v49  ;;  %v12409_v9 = vadd.f32 -5.0, %v1955_v62  ;;  %v2044_v10 = vadd.f32 %v2043_v33, %v12268_v35 }
 0x3de   :  { %v8991_v27 = vpop.eup %8990  ;;  %v4280_v29 = vmul.f32 0.6931472, %v8989_v22  ;;  %8996 = vlog2.f32 %v4021_v20  ;;  %v3541_v44 = vmul.f32 1.442695, %v3261_v58  ;;  %v2045_v32 = vpop.f32.mrf.mxu1 }
 0x3df   :  { %v8993_v54 = vpop.eup %8992  ;;  %7449 = vst [vmem:[%s16914_s12 + $0x40] sm:$0xff] %v4781_v23  ;;  %v4022_v56 = vadd.f32 1.0, %v8991_v27  ;;  %8998 = vpow2.f32 %v3545_v24  ;;  %v3262_v28 = vsub.f32 0.0, %v3006_v59  ;;  %v3015_v45 = vand.u32 2147483647, %v12409_v9  ;;  %v1865_v23 = vpop.f32.mrf.mxu3 }
 0x3e0   :  { %v4782_v37 = vadd.f32 %v4280_v29, %v2734_v40  ;;  %v4298_v39 = vmul.f32 0.6931472, %v8993_v54  ;;  %v12417_v20 = vadd.f32 -5.0, %v2044_v10  ;;  %v2742_v24 = vmax.f32 %v12342_v8, 0.0  ;;  %v1956_v29 = vpop.f32.mrf.mxu0 }
 0x3e1   :  { %9000 = vlog2.f32 %v4022_v56  ;;  %v3543_v22 = vmul.f32 1.442695, %v3262_v28  ;;  %v3271_v27 = vsub.f32 0.0, %v3015_v45  ;;  %v2751_v59 = vmax.f32 %v12363_v7, 0.0 }
 0x3e2   :  { %v8995_v19 = vpop.eup %8994  ;;  %7450 = vst [vmem:[%s16914_s12 + $0x48] sm:$0xff] %v4782_v37  ;;  %v4791_v53 = vadd.f32 %v4298_v39, %v2743_v50  ;;  %9002 = vpow2.f32 %v3547_v63  ;;  %v3016_v33 = vand.u32 2147483647, %v12417_v20  ;;  %v1777_v37 = vadd.f32 %v1776_v1, %v12280_v41 }
 0x3e3   :  { %v4300_v12 = vmul.f32 0.6931472, %v8995_v19  ;;  %9004 = vpow2.f32 %v3541_v44  ;;  %v3561_v56 = vmul.f32 1.442695, %v3271_v27  ;;  %v1866_v50 = vadd.f32 %v1865_v23, %v12282_v42 }
 0x3e4   :  { %v8997_v2 = vpop.eup %8996  ;;  %7459 = vst [vmem:[%s16914_s12 + $0x90] sm:$0xff] %v4791_v53  ;;  %v3272_v8 = vsub.f32 0.0, %v3016_v33  ;;  %v1957_v39 = vadd.f32 %v1956_v29, %v12266_v34  ;;  %v2046_v63 = vadd.f32 %v2045_v32, %v12268_v35  ;;  %v12438_v43 = vadd.f32 -5.0, %v1777_v37  ;;  %v1778_v53 = vpop.f32.mrf.mxu2 }
 0x3e5   :  { %v8999_v13 = vpop.eup %8998  ;;  %v4792_v14 = vadd.f32 %v4300_v12, %v2744_v57  ;;  %v4294_v15 = vmul.f32 0.6931472, %v8997_v2  ;;  %8170 = vmatmul.msk.bf16.gmra.mxu2 %vm170_vm0, %v10904_v47  ;;  %8186 = vmatmul.msk.bf16.gmra.mxu3 %vm170_vm0, %v10904_v47  ;;  %v12440_v19 = vadd.f32 -5.0, %v1866_v50 }
 0x3e6   :  { %v4031_v17 = vadd.f32 1.0, %v8999_v13  ;;  %8202 = vmatmul.msk.bf16.gmra.mxu0 %vm170_vm0, %v10904_v47  ;;  %8218 = vmatmul.msk.bf16.gmra.mxu1 %vm170_vm0, %v10904_v47  ;;  %v3563_v1 = vmul.f32 1.442695, %v3272_v8  ;;  %v12442_v57 = vadd.f32 -5.0, %v1957_v39  ;;  %v12444_v12 = vadd.f32 -5.0, %v2046_v63  ;;  %v2048_v50 = vpop.f32.mrf.mxu1 }
 0x3e7   :  { %v9001_v36 = vpop.eup %9000  ;;  %7460 = vst [vmem:[%s16914_s12 + $0x98] sm:$0xff] %v4792_v14  ;;  %v4789_v18 = vadd.f32 %v4294_v15, %v2741_v3  ;;  %v3013_v3 = vand.u32 2147483647, %v12438_v43  ;;  %v3014_v14 = vand.u32 2147483647, %v12440_v19  ;;  %v1779_v15 = vadd.f32 %v1778_v53, %v12280_v41  ;;  %v1867_v23 = vpop.f32.mrf.mxu3 }
 0x3e8   :  { %v9003_v40 = vpop.eup %9002  ;;  %v4296_v25 = vmul.f32 0.6931472, %v9001_v36  ;;  %9006 = vlog2.f32 %v4031_v17  ;;  %v3023_v17 = vand.u32 2147483647, %v12442_v57  ;;  %v1868_v37 = vadd.f32 %v1867_v23, %v12282_v42 }
 0x3e9   :  { %7457 = vst [vmem:[%s16914_s12 + $0x80] sm:$0xff] %v4789_v18  ;;  %v4032_v4 = vadd.f32 1.0, %v9003_v40  ;;  %9008 = vpow2.f32 %v3543_v22  ;;  %v9005_v62 = vpop.eup %9004  ;;  %v3269_v28 = vsub.f32 0.0, %v3013_v3  ;;  %v2752_v18 = vmax.f32 %v12372_v51, 0.0 }
 0x3ea   :  { %v4790_v54 = vadd.f32 %v4296_v25, %v2742_v24  ;;  %v4029_v2 = vadd.f32 1.0, %v9005_v62  ;;  %v3270_v7 = vsub.f32 0.0, %v3014_v14  ;;  %v3024_v22 = vand.u32 2147483647, %v12444_v12 }
 0x3eb   :  { %9010 = vlog2.f32 %v4032_v4  ;;  %v3557_v25 = vmul.f32 1.442695, %v3269_v28  ;;  %v3279_v27 = vsub.f32 0.0, %v3023_v17  ;;  %v12456_v33 = vadd.f32 -5.0, %v1779_v15 }
 0x3ec   :  { %7458 = vst [vmem:[%s16914_s12 + $0x88] sm:$0xff] %v4790_v54  ;;  %9012 = vpow2.f32 %v3561_v56  ;;  %v3559_v32 = vmul.f32 1.442695, %v3270_v7  ;;  %v3280_v4 = vsub.f32 0.0, %v3024_v22  ;;  %v1959_v54 = vpop.f32.mrf.mxu0  ;;  %v2749_v39 = vmax.f32 %v12389_v30, 0.0 }
 0x3ed   :  { %9014 = vpow2.f32 %v3563_v1  ;;  %v3577_v56 = vmul.f32 1.442695, %v3279_v27  ;;  %v3021_v53 = vand.u32 2147483647, %v12456_v33  ;;  %v1960_v30 = vadd.f32 %v1959_v54, %v12266_v34 }
 0x3ee   :  { %v9007_v58 = vpop.eup %9006  ;;  %9016 = vlog2.f32 %v4029_v2  ;;  %v3579_v63 = vmul.f32 1.442695, %v3280_v4  ;;  %v2049_v3 = vadd.f32 %v2048_v50, %v12268_v35  ;;  %v2759_v27 = vmax.f32 %v12409_v9, 0.0 }
 0x3ef   :  { %v9009_v10 = vpop.eup %9008  ;;  %v4314_v13 = vmul.f32 0.6931472, %v9007_v58  ;;  %v12468_v58 = vadd.f32 -5.0, %v1868_v37  ;;  %v3277_v2 = vsub.f32 0.0, %v3021_v53  ;;  %v12478_v15 = vadd.f32 -5.0, %v1960_v30  ;;  %v1870_v54 = vpop.f32.mrf.mxu3 }
 0x3f0   :  { %v4030_v44 = vadd.f32 1.0, %v9009_v10  ;;  %v12481_v22 = vadd.f32 -5.0, %v2049_v3 }
 0x3f1   :  { %v9011_v45 = vpop.eup %9010  ;;  %v4799_v36 = vadd.f32 %v4314_v13, %v2751_v59  ;;  %v2750_v13 = vmax.f32 %v12397_v49, 0.0  ;;  %v3022_v14 = vand.u32 2147483647, %v12468_v58  ;;  %v3031_v7 = vand.u32 2147483647, %v12478_v15 }
 0x3f2   :  { %v9013_v40 = vpop.eup %9012  ;;  %v4316_v24 = vmul.f32 0.6931472, %v9011_v45  ;;  %9018 = vlog2.f32 %v4030_v44  ;;  %v1781_v44 = vpop.f32.mrf.mxu2  ;;  %v3573_v45 = vmul.f32 1.442695, %v3277_v2  ;;  %v3032_v37 = vand.u32 2147483647, %v12481_v22 }
 0x3f3   :  { %7467 = vst [vmem:[%s16914_s12 + $0xd0] sm:$0xff] %v4799_v36  ;;  %v4039_v29 = vadd.f32 1.0, %v9013_v40  ;;  %9020 = vpow2.f32 %v3557_v25  ;;  %v9015_v8 = vpop.eup %9014  ;;  %v3287_v4 = vsub.f32 0.0, %v3031_v7 }
 0x3f4   :  { %v4800_v51 = vadd.f32 %v4316_v24, %v2752_v18  ;;  %v9017_v62 = vpop.eup %9016  ;;  %v4040_v1 = vadd.f32 1.0, %v9015_v8  ;;  %v3278_v18 = vsub.f32 0.0, %v3022_v14  ;;  %v1782_v24 = vadd.f32 %v1781_v44, %v12280_v41 }
 0x3f5   :  { %9022 = vlog2.f32 %v4039_v29  ;;  %8171 = vmatmul.msk.bf16.gmra.mxu2 %vm170_vm0, %v10920_v0  ;;  %8187 = vmatmul.msk.bf16.gmra.mxu3 %vm170_vm0, %v10920_v0  ;;  %v4310_v59 = vmul.f32 0.6931472, %v9017_v62  ;;  %v3593_v9 = vmul.f32 1.442695, %v3287_v4  ;;  %v2760_v62 = vmax.f32 %v12417_v20, 0.0 }
 0x3f6   :  { %7468 = vst [vmem:[%s16914_s12 + $0xd8] sm:$0xff] %v4800_v51  ;;  %9024 = vpow2.f32 %v3559_v32  ;;  %8203 = vmatmul.msk.bf16.gmra.mxu0 %vm170_vm0, %v10920_v0  ;;  %8219 = vmatmul.msk.bf16.gmra.mxu1 %vm170_vm0, %v10920_v0  ;;  %v3575_v32 = vmul.f32 1.442695, %v3278_v18  ;;  %v12492_v50 = vadd.f32 -5.0, %v1782_v24  ;;  %v3288_v30 = vsub.f32 0.0, %v3032_v37 }
 0x3f7   :  { %9026 = vpow2.f32 %v3577_v56  ;;  %v4797_v28 = vadd.f32 %v4310_v59, %v2749_v39  ;;  %v1961_v59 = vpop.f32.mrf.mxu0  ;;  %v2757_v18 = vmax.f32 %v12438_v43, 0.0  ;;  %v2767_v4 = vmax.f32 %v12442_v57, 0.0 }
 0x3f8   :  { %v9019_v10 = vpop.eup %9018  ;;  %9028 = vlog2.f32 %v4040_v1  ;;  %v3029_v3 = vand.u32 2147483647, %v12492_v50  ;;  %v3595_v44 = vmul.f32 1.442695, %v3288_v30  ;;  %v2765_v30 = vmax.f32 %v12456_v33, 0.0 }
 0x3f9   :  { %v4312_v17 = vmul.f32 0.6931472, %v9019_v10  ;;  %9030 = vpow2.f32 %v3579_v63  ;;  %v9021_v36 = vpop.eup %9020  ;;  %7465 = vst [vmem:[%s16914_s12 + $0xc0] sm:$0xff] %v4797_v28  ;;  %v2050_v10 = vpop.f32.mrf.mxu1  ;;  %v1871_v28 = vadd.f32 %v1870_v54, %v12282_v42 }
 0x3fa   :  { %v4037_v40 = vadd.f32 1.0, %v9021_v36  ;;  %9032 = vpow2.f32 %v3573_v45  ;;  %v1962_v45 = vadd.f32 %v1961_v59, %v12266_v34 }
 0x3fb   :  { %v9023_v23 = vpop.eup %9022  ;;  %v4798_v49 = vadd.f32 %v4312_v17, %v2750_v13  ;;  %v3285_v17 = vsub.f32 0.0, %v3029_v3  ;;  %v12505_v7 = vadd.f32 -5.0, %v1871_v28  ;;  %v2766_v28 = vmax.f32 %v12468_v58, 0.0 }
 0x3fc   :  { %v9025_v25 = vpop.eup %9024  ;;  %v4330_v29 = vmul.f32 0.6931472, %v9023_v23  ;;  %9034 = vlog2.f32 %v4037_v40  ;;  %v2051_v23 = vadd.f32 %v2050_v10, %v12268_v35 }
 0x3fd   :  { %v9027_v51 = vpop.eup %9026  ;;  %7466 = vst [vmem:[%s16914_s12 + $0xc8] sm:$0xff] %v4798_v49  ;;  %v4038_v56 = vadd.f32 1.0, %v9025_v25  ;;  %9036 = vpow2.f32 %v3575_v32  ;;  %v3589_v24 = vmul.f32 1.442695, %v3285_v17  ;;  %v12508_v25 = vadd.f32 -5.0, %v1962_v45 }
 0x3fe   :  { %v9029_v8 = vpop.eup %9028  ;;  %v4807_v39 = vadd.f32 %v4330_v29, %v2759_v27  ;;  %v4047_v63 = vadd.f32 1.0, %v9027_v51  ;;  %v1783_v27 = vpop.f32.mrf.mxu2  ;;  %v2758_v32 = vmax.f32 %v12440_v19, 0.0  ;;  %v3030_v43 = vand.u32 2147483647, %v12505_v7 }
 0x3ff   :  { %v9031_v53 = vpop.eup %9030  ;;  %v4332_v1 = vmul.f32 0.6931472, %v9029_v8  ;;  %9038 = vlog2.f32 %v4038_v56  ;;  %v12517_v8 = vadd.f32 -5.0, %v2051_v23 }
 0x400   :  { %7475 = vst [vmem:[%s16914_s12 + $0x110] sm:$0xff] %v4807_v39  ;;  %9040 = vlog2.f32 %v4047_v63  ;;  %v4048_v2 = vadd.f32 1.0, %v9031_v53  ;;  %v9033_v13 = vpop.eup %9032  ;;  %v1872_v39 = vpop.f32.mrf.mxu3  ;;  %v3286_v63 = vsub.f32 0.0, %v3030_v43 }
 0x401   :  { %v4808_v14 = vadd.f32 %v4332_v1, %v2760_v62  ;;  %9042 = vpow2.f32 %v3593_v9  ;;  %v4045_v20 = vadd.f32 1.0, %v9033_v13  ;;  %v3039_v9 = vand.u32 2147483647, %v12508_v25 }
 0x402   :  { %9044 = vlog2.f32 %v4048_v2  ;;  %v9035_v36 = vpop.eup %9034  ;;  %v2768_v1 = vmax.f32 %v12444_v12, 0.0  ;;  %v3591_v13 = vmul.f32 1.442695, %v3286_v63  ;;  %v3040_v17 = vand.u32 2147483647, %v12517_v8  ;;  %v1964_v12 = vpop.f32.mrf.mxu0 }
 0x403   :  { %7476 = vst [vmem:[%s16914_s12 + $0x118] sm:$0xff] %v4808_v14  ;;  %9046 = vpow2.f32 %v3595_v44  ;;  %v9037_v49 = vpop.eup %9036  ;;  %v4326_v40 = vmul.f32 0.6931472, %v9035_v36  ;;  %v3295_v14 = vsub.f32 0.0, %v3039_v9  ;;  %v1873_v58 = vadd.f32 %v1872_v39, %v12282_v42 }
 0x404   :  { %9048 = vlog2.f32 %v4045_v20  ;;  %v4046_v54 = vadd.f32 1.0, %v9037_v49  ;;  %v3296_v23 = vsub.f32 0.0, %v3040_v17  ;;  %v1784_v49 = vadd.f32 %v1783_v27, %v12280_v41 }
 0x405   :  { %v9039_v29 = vpop.eup %9038  ;;  %8172 = vmatmul.msk.bf16.gmra.mxu2 %vm170_vm0, %v10936_v16  ;;  %8188 = vmatmul.msk.bf16.gmra.mxu3 %vm170_vm0, %v10936_v16  ;;  %v4805_v56 = vadd.f32 %v4326_v40, %v2757_v18  ;;  %9050 = vpow2.f32 %v3589_v24  ;;  %v3609_v36 = vmul.f32 1.442695, %v3295_v14  ;;  %v2053_v40 = vpop.f32.mrf.mxu1  ;;  %v2775_v63 = vmax.f32 %v12478_v15, 0.0 }
 0x406   :  { %v9041_v51 = vpop.eup %9040  ;;  %v4328_v37 = vmul.f32 0.6931472, %v9039_v29  ;;  %8204 = vmatmul.msk.bf16.gmra.mxu0 %vm170_vm0, %v10936_v16  ;;  %8220 = vmatmul.msk.bf16.gmra.mxu1 %vm170_vm0, %v10936_v16  ;;  %9052 = vlog2.f32 %v4046_v54  ;;  %v3611_v43 = vmul.f32 1.442695, %v3296_v23  ;;  %v1786_v27 = vpop.f32.mrf.mxu2  ;;  %v2054_v39 = vadd.f32 %v2053_v40, %v12268_v35  ;;  %v8813_v23 = vld [vmem:[#allocation4 + $0x34] sm:$0xf] }
 0x407   :  { %v9043_v19 = vpop.eup %9042  ;;  %v4346_v57 = vmul.f32 0.6931472, %v9041_v51  ;;  %7473 = vst [vmem:[%s16914_s12 + $0x100] sm:$0xff] %v4805_v56  ;;  %v12543_v51 = vadd.f32 -5.0, %v1784_v49  ;;  %v12545_v56 = vadd.f32 -5.0, %v1873_v58 }
 0x408   :  { %v9045_v53 = vpop.eup %9044  ;;  %v4806_v62 = vadd.f32 %v4328_v37, %v2758_v32  ;;  %v4055_v59 = vadd.f32 1.0, %v9043_v19  ;;  %v12562_v14 = vadd.f32 -5.0, %v2054_v39 }
 0x409   :  { %v9047_v2 = vpop.eup %9046  ;;  %v4815_v3 = vadd.f32 %v4346_v57, %v2767_v4  ;;  %v4348_v10 = vmul.f32 0.6931472, %v9045_v53  ;;  %v1965_v4 = vadd.f32 %v1964_v12, %v12266_v34  ;;  %v3037_v9 = vand.u32 2147483647, %v12543_v51  ;;  %v1875_v53 = vpop.f32.mrf.mxu3 }
 0x40a   :  { %v9049_v44 = vpop.eup %9048  ;;  %7474 = vst [vmem:[%s16914_s12 + $0x108] sm:$0xff] %v4806_v62  ;;  %9054 = vlog2.f32 %v4055_v59  ;;  %v4056_v20 = vadd.f32 1.0, %v9047_v2  ;;  %v3038_v59 = vand.u32 2147483647, %v12545_v56  ;;  %v1787_v2 = vadd.f32 %v1786_v27, %v12280_v41 }
 0x40b   :  { %7483 = vst [vmem:[%s16914_s12 + $0x150] sm:$0xff] %v4815_v3  ;;  %v4816_v33 = vadd.f32 %v4348_v10, %v2768_v1  ;;  %v4342_v45 = vmul.f32 0.6931472, %v9049_v44  ;;  %9056 = vpow2.f32 %v3591_v13  ;;  %v9051_v18 = vpop.eup %9050  ;;  %v12550_v37 = vadd.f32 -5.0, %v1965_v4  ;;  %v7825_v44 = vld [vmem:[#allocation4 + $0x30] sm:$0xf] }
 0x40c   :  { %9058 = vlog2.f32 %v4056_v20  ;;  %v9053_v24 = vpop.eup %9052  ;;  %v4053_v32 = vadd.f32 1.0, %v9051_v18  ;;  %v3293_v13 = vsub.f32 0.0, %v3037_v9  ;;  %v3294_v12 = vsub.f32 0.0, %v3038_v59 }
 0x40d   :  { %7484 = vst [vmem:[%s16914_s12 + $0x158] sm:$0xff] %v4816_v33  ;;  %v4813_v29 = vadd.f32 %v4342_v45, %v2765_v30  ;;  %9060 = vpow2.f32 %v3609_v36  ;;  %v4344_v54 = vmul.f32 0.6931472, %v9053_v24  ;;  %v2776_v30 = vmax.f32 %v12481_v22, 0.0  ;;  %v8821_v33 = vld [vmem:[#allocation4 + $0x6c] sm:$0xf0]  ;;  %v2055_v27 = vpop.f32.mrf.mxu1 }
 0x40e   :  { %9062 = vlog2.f32 %v4053_v32  ;;  %v3047_v15 = vand.u32 2147483647, %v12550_v37  ;;  %v2773_v22 = vmax.f32 %v12492_v50, 0.0  ;;  %v3605_v36 = vmul.f32 1.442695, %v3293_v13 }
 0x40f   :  { %7481 = vst [vmem:[%s16914_s12 + $0x140] sm:$0xff] %v4813_v29  ;;  %v4814_v57 = vadd.f32 %v4344_v54, %v2766_v28  ;;  %9064 = vpow2.f32 %v3611_v43  ;;  %v3607_v40 = vmul.f32 1.442695, %v3294_v12  ;;  %v7827_v24 = vld [vmem:[#allocation4 + $0x70] sm:$0xf0]  ;;  %v12568_v29 = vadd.f32 -5.0, %v1787_v2  ;;  %v1966_v43 = vpop.f32.mrf.mxu0 }
 0x410   :  { %v9055_v19 = vpop.eup %9054  ;;  %v3303_v18 = vsub.f32 0.0, %v3047_v15  ;;  %v3048_v54 = vand.u32 2147483647, %v12562_v14  ;;  %v7830_v9 = vor.u32 %v8813_v23, %v7827_v24  ;;  %v1967_v2 = vadd.f32 %v1966_v43, %v12266_v34 }
 0x411   :  { %v9057_v62 = vpop.eup %9056  ;;  %v4362_v1 = vmul.f32 0.6931472, %v9055_v19  ;;  %7482 = vst [vmem:[%s16914_s12 + $0x148] sm:$0xff] %v4814_v57  ;;  %v7826_v19 = vor.u32 %v8821_v33, %v7825_v44  ;;  %v2774_v13 = vmax.f32 %v12505_v7, 0.0 }
 0x412   :  { %v9059_v3 = vpop.eup %9058  ;;  %v4054_v10 = vadd.f32 1.0, %v9057_v62  ;;  %v3625_v4 = vmul.f32 1.442695, %v3303_v18  ;;  %v3045_v62 = vand.u32 2147483647, %v12568_v29  ;;  %2209 = vmatpush.bf16.msra.mxu3 %v7830_v9  ;;  %v2056_v18 = vadd.f32 %v2055_v27, %v12268_v35 }
 0x413   :  { %v9061_v28 = vpop.eup %9060  ;;  %v4823_v20 = vadd.f32 %v4362_v1, %v2775_v63  ;;  %v4364_v17 = vmul.f32 0.6931472, %v9059_v3  ;;  %v3304_v63 = vsub.f32 0.0, %v3048_v54  ;;  %2120 = vmatpush.bf16.msra.mxu2 %v7826_v19  ;;  %v1876_v1 = vadd.f32 %v1875_v53, %v12282_v42  ;;  %v1788_v3 = vpop.f32.mrf.mxu2 }
 0x414   :  { %9066 = vlog2.f32 %v4054_v10  ;;  %v4063_v45 = vadd.f32 1.0, %v9061_v28  ;;  %v9063_v49 = vpop.eup %9062  ;;  %v1877_v10 = vpop.f32.mrf.mxu3  ;;  %v3301_v44 = vsub.f32 0.0, %v3045_v62  ;;  %v2783_v53 = vmax.f32 %v12508_v25, 0.0 }
 0x415   :  { %7491 = vst [vmem:[%s16914_s12 + $0x190] sm:$0xff] %v4823_v20  ;;  %v4824_v58 = vadd.f32 %v4364_v17, %v2776_v30  ;;  %8173 = vmatmul.msk.bf16.gmra.mxu2 %vm170_vm0, %v10952_v38  ;;  %8189 = vmatmul.msk.bf16.gmra.mxu3 %vm170_vm0, %v10952_v38  ;;  %v9065_v50 = vpop.eup %9064  ;;  %v4358_v32 = vmul.f32 0.6931472, %v9063_v49  ;;  %v3627_v59 = vmul.f32 1.442695, %v3304_v63  ;;  %v12589_v28 = vadd.f32 -5.0, %v1876_v1 }
 0x416   :  { %9068 = vlog2.f32 %v4063_v45  ;;  %8205 = vmatmul.msk.bf16.gmra.mxu0 %vm170_vm0, %v10952_v38  ;;  %8221 = vmatmul.msk.bf16.gmra.mxu1 %vm170_vm0, %v10952_v38  ;;  %v4064_v39 = vadd.f32 1.0, %v9065_v50  ;;  %v2784_v17 = vmax.f32 %v12517_v8, 0.0  ;;  %v7833_v50 = vld [vmem:[#allocation4 + $0x38] sm:$0xf]  ;;  %v12606_v9 = vadd.f32 -5.0, %v2056_v18 }
 0x417   :  { %7492 = vst [vmem:[%s16914_s12 + $0x198] sm:$0xff] %v4824_v58  ;;  %9070 = vpow2.f32 %v3605_v36  ;;  %v4821_v57 = vadd.f32 %v4358_v32, %v2773_v22  ;;  %v12593_v22 = vadd.f32 -5.0, %v1967_v2  ;;  %v3621_v36 = vmul.f32 1.442695, %v3301_v44  ;;  %v8822_v32 = vld [vmem:[#allocation4 + $0x74] sm:$0xf0]  ;;  %v1969_v19 = vpop.f32.mrf.mxu0 }
 0x418   :  { %9072 = vpow2.f32 %v3607_v40  ;;  %v3046_v49 = vand.u32 2147483647, %v12589_v28  ;;  %v1789_v40 = vadd.f32 %v1788_v3, %v12280_v41  ;;  %v7834_v62 = vor.u32 %v8822_v32, %v7833_v50 }
 0x419   :  { %9074 = vlog2.f32 %v4064_v39  ;;  %7489 = vst [vmem:[%s16914_s12 + $0x180] sm:$0xff] %v4821_v57  ;;  %v3055_v58 = vand.u32 2147483647, %v12593_v22  ;;  %v2058_v57 = vpop.f32.mrf.mxu1 }
 0x41a   :  { %v9067_v30 = vpop.eup %9066  ;;  %9076 = vpow2.f32 %v3625_v4  ;;  %v1878_v4 = vadd.f32 %v1877_v10, %v12282_v42  ;;  %v3302_v27 = vsub.f32 0.0, %v3046_v49  ;;  %v12608_v3 = vadd.f32 -5.0, %v1789_v40  ;;  %2298 = vmatpush.bf16.msra.mxu0 %v7834_v62 }
 0x41b   :  { %v4360_v15 = vmul.f32 0.6931472, %v9067_v30  ;;  %9078 = vpow2.f32 %v3627_v59  ;;  %v3311_v39 = vsub.f32 0.0, %v3055_v58  ;;  %v2781_v10 = vmax.f32 %v12543_v51, 0.0 }
 0x41c   :  { %v9069_v20 = vpop.eup %9068  ;;  %9080 = vpow2.f32 %v3621_v36  ;;  %v3623_v59 = vmul.f32 1.442695, %v3302_v27  ;;  %v3053_v44 = vand.u32 2147483647, %v12608_v3  ;;  %v1970_v36 = vadd.f32 %v1969_v19, %v12266_v34 }
 0x41d   :  { %v9071_v12 = vpop.eup %9070  ;;  %v4822_v33 = vadd.f32 %v4360_v15, %v2774_v13  ;;  %v4378_v45 = vmul.f32 0.6931472, %v9069_v20  ;;  %v3641_v2 = vmul.f32 1.442695, %v3311_v39  ;;  %v3056_v15 = vand.u32 2147483647, %v12606_v9 }
 0x41e   :  { %v9073_v23 = vpop.eup %9072  ;;  %v4061_v7 = vadd.f32 1.0, %v9071_v12  ;;  %v12616_v20 = vadd.f32 -5.0, %v1878_v4  ;;  %v12618_v12 = vpop.f32.mrf.mxu3  ;;  %v2059_v18 = vadd.f32 %v2058_v57, %v12268_v35  ;;  %v3309_v58 = vsub.f32 0.0, %v3053_v44 }
 0x41f   :  { %v9075_v25 = vpop.eup %9074  ;;  %7490 = vst [vmem:[%s16914_s12 + $0x188] sm:$0xff] %v4822_v33  ;;  %v4831_v8 = vadd.f32 %v4378_v45, %v2783_v53  ;;  %v4062_v24 = vadd.f32 1.0, %v9073_v23  ;;  %v8814_v53 = vld [vmem:[#allocation4 + $0x3c] sm:$0xf]  ;;  %v3312_v51 = vsub.f32 0.0, %v3056_v15 }
 0x420   :  { %v9077_v54 = vpop.eup %9076  ;;  %v4380_v43 = vmul.f32 0.6931472, %v9075_v25  ;;  %9082 = vlog2.f32 %v4061_v7  ;;  %v7835_v45 = vld [vmem:[#allocation4 + $0x78] sm:$0xf0]  ;;  %v2782_v7 = vmax.f32 %v12545_v56, 0.0  ;;  %v12634_v39 = vadd.f32 -5.0, %v2059_v18 }
 0x421   :  { %7499 = vst [vmem:[%s16914_s12 + $0x1d0] sm:$0xff] %v4831_v8  ;;  %9084 = vlog2.f32 %v4062_v24  ;;  %v4071_v63 = vadd.f32 1.0, %v9077_v54  ;;  %v9079_v1 = vpop.eup %9078  ;;  %v3643_v8 = vmul.f32 1.442695, %v3312_v51  ;;  %v3054_v24 = vand.u32 2147483647, %v12616_v20 }
 0x422   :  { %v4832_v30 = vadd.f32 %v4380_v43, %v2784_v17  ;;  %v4072_v13 = vadd.f32 1.0, %v9079_v1  ;;  %v1791_v17 = vpop.f32.mrf.mxu2  ;;  %v9081_v33 = vpop.eup %9080  ;;  %v7838_v50 = vor.u32 %v8814_v53, %v7835_v45  ;;  %v3637_v4 = vmul.f32 1.442695, %v3309_v58 }
 0x423   :  { %9086 = vlog2.f32 %v4071_v63  ;;  %v4069_v49 = vadd.f32 1.0, %v9081_v33  ;;  %v12632_v54 = vadd.f32 -5.0, %v1970_v36  ;;  %v3310_v27 = vsub.f32 0.0, %v3054_v24  ;;  %v1971_v1 = vpop.f32.mrf.mxu0 }
 0x424   :  { %7500 = vst [vmem:[%s16914_s12 + $0x1d8] sm:$0xff] %v4832_v30  ;;  %9088 = vpow2.f32 %v3623_v59  ;;  %2387 = vmatpush.bf16.msra.mxu1 %v7838_v50  ;;  %v2791_v63 = vmax.f32 %v12550_v37, 0.0  ;;  %v2060_v30 = vpop.f32.mrf.mxu1  ;;  %v1792_v15 = vadd.f32 %v1791_v17, %v12280_v41  ;;  %v2792_v53 = vmax.f32 %v12562_v14, 0.0 }
 0x425   :  { %9090 = vlog2.f32 %v4072_v13  ;;  %8174 = vmatmul.msk.bf16.gmra.mxu2 %vm170_vm0, %v10970_v61  ;;  %8190 = vmatmul.msk.bf16.gmra.mxu3 %vm170_vm0, %v10970_v61  ;;  %v3063_v13 = vand.u32 2147483647, %v12632_v54  ;;  %v3064_v51 = vand.u32 2147483647, %v12634_v39 }
 0x426   :  { %v9083_v23 = vpop.eup %9082  ;;  %9092 = vpow2.f32 %v3641_v2  ;;  %8206 = vmatmul.msk.bf16.gmra.mxu0 %vm170_vm0, %v10970_v61  ;;  %8222 = vmatmul.msk.bf16.gmra.mxu1 %vm170_vm0, %v10970_v61  ;;  %v12647_v18 = vadd.f32 -5.0, %v1792_v15  ;;  %v12652_v58 = vpop.f32.mrf.mxu3 }
 0x427   :  { %v9085_v40 = vpop.eup %9084  ;;  %v4374_v25 = vmul.f32 0.6931472, %v9083_v23  ;;  %9094 = vlog2.f32 %v4069_v49  ;;  %v3319_v36 = vsub.f32 0.0, %v3063_v13 }
 0x428   :  { %v4376_v32 = vmul.f32 0.6931472, %v9085_v40  ;;  %9096 = vpow2.f32 %v3643_v8  ;;  %v2789_v40 = vmax.f32 %v12568_v29, 0.0 }
 0x429   :  { %v9087_v56 = vpop.eup %9086  ;;  %v4829_v43 = vadd.f32 %v4374_v25, %v2781_v10  ;;  %9098 = vpow2.f32 %v3637_v4  ;;  %v3639_v10 = vmul.f32 1.442695, %v3310_v27  ;;  %v3657_v8 = vmul.f32 1.442695, %v3319_v36 }
 0x42a   :  { %v9089_v19 = vpop.eup %9088  ;;  %v4830_v57 = vadd.f32 %v4376_v32, %v2782_v7  ;;  %v4394_v62 = vmul.f32 0.6931472, %v9087_v56  ;;  %v3320_v7 = vsub.f32 0.0, %v3064_v51  ;;  %v1793_v49 = vpop.f32.mrf.mxu2  ;;  %v3061_v4 = vand.u32 2147483647, %v12647_v18 }
 0x42b   :  { %v9091_v59 = vpop.eup %9090  ;;  %7497 = vst [vmem:[%s16914_s12 + $0x1c0] sm:$0xff] %v4829_v43  ;;  %v4070_v2 = vadd.f32 1.0, %v9089_v19  ;;  %v1881_v27 = vadd.f32 %v12618_v12, %v12282_v42  ;;  %v1972_v19 = vadd.f32 %v1971_v1, %v12266_v34  ;;  %v1974_v15 = vpop.f32.mrf.mxu0  ;;  %v2799_v51 = vmax.f32 %v12593_v22, 0.0 }
 0x42c   :  { %v9093_v44 = vpop.eup %9092  ;;  %7498 = vst [vmem:[%s16914_s12 + $0x1c8] sm:$0xff] %v4830_v57  ;;  %v4839_v37 = vadd.f32 %v4394_v62, %v2791_v63  ;;  %v4396_v33 = vmul.f32 0.6931472, %v9091_v59  ;;  %v3659_v32 = vmul.f32 1.442695, %v3320_v7  ;;  %v3317_v29 = vsub.f32 0.0, %v3061_v4  ;;  %v2063_v1 = vpop.f32.mrf.mxu1 }
 0x42d   :  { %9100 = vlog2.f32 %v4070_v2  ;;  %v4079_v45 = vadd.f32 1.0, %v9093_v44  ;;  %v9095_v23 = vpop.eup %9094  ;;  %v2061_v57 = vadd.f32 %v2060_v30, %v12268_v35  ;;  %v2790_v62 = vmax.f32 %v12589_v28, 0.0 }
 0x42e   :  { %7507 = vst [vmem:[%s16914_s12 + $0x210] sm:$0xff] %v4839_v37  ;;  %v4840_v17 = vadd.f32 %v4396_v33, %v2792_v53  ;;  %9102 = vpow2.f32 %v3639_v10  ;;  %v9097_v14 = vpop.eup %9096  ;;  %v4390_v25 = vmul.f32 0.6931472, %v9095_v23  ;;  %v12667_v59 = vadd.f32 -5.0, %v1881_v27 }
 0x42f   :  { %9104 = vlog2.f32 %v4079_v45  ;;  %v9099_v24 = vpop.eup %9098  ;;  %v4080_v50 = vadd.f32 1.0, %v9097_v14  ;;  %v3653_v12 = vmul.f32 1.442695, %v3317_v29  ;;  %v12669_v13 = vadd.f32 -5.0, %v1972_v19 }
 0x430   :  { %7508 = vst [vmem:[%s16914_s12 + $0x218] sm:$0xff] %v4840_v17  ;;  %v4837_v56 = vadd.f32 %v4390_v25, %v2789_v40  ;;  %v4077_v43 = vadd.f32 1.0, %v9099_v24  ;;  %9106 = vpow2.f32 %v3657_v8  ;;  %v3062_v37 = vand.u32 2147483647, %v12667_v59 }
 0x431   :  { %9108 = vlog2.f32 %v4080_v50  ;;  %v12672_v53 = vadd.f32 -5.0, %v2061_v57  ;;  %v1794_v33 = vadd.f32 %v1793_v49, %v12280_v41  ;;  %v2800_v23 = vmax.f32 %v12606_v9, 0.0 }
 0x432   :  { %7505 = vst [vmem:[%s16914_s12 + $0x200] sm:$0xff] %v4837_v56  ;;  %9110 = vlog2.f32 %v4077_v43  ;;  %v3318_v17 = vsub.f32 0.0, %v3062_v37  ;;  %v3071_v7 = vand.u32 2147483647, %v12669_v13  ;;  %v2797_v14 = vmax.f32 %v12608_v3, 0.0  ;;  %v1796_v8 = vpop.f32.mrf.mxu2 }
 0x433   :  { %v9101_v63 = vpop.eup %9100  ;;  %9112 = vpow2.f32 %v3659_v32  ;;  %v3072_v25 = vand.u32 2147483647, %v12672_v53  ;;  %v12693_v4 = vadd.f32 -5.0, %v1794_v33  ;;  %v1883_v27 = vadd.f32 %v12652_v58, %v12282_v42 }
 0x434   :  { %v9103_v2 = vpop.eup %9102  ;;  %v4392_v10 = vmul.f32 0.6931472, %v9101_v63  ;;  %9114 = vpow2.f32 %v3653_v12  ;;  %v3655_v50 = vmul.f32 1.442695, %v3318_v17  ;;  %v3327_v32 = vsub.f32 0.0, %v3071_v7 }
 0x435   :  { %v9105_v44 = vpop.eup %9104  ;;  %v4078_v30 = vadd.f32 1.0, %v9103_v2  ;;  %8223 = vmatmul.msk.bf16.vlgmr.msra.gmra.mxu2 %vm170_vm0, %v10843_v46  ;;  %8239 = vmatmul.msk.bf16.vlgmr.msra.gmra.mxu3 %vm170_vm0, %v10843_v46  ;;  %v3328_v3 = vsub.f32 0.0, %v3072_v25  ;;  %v2798_v2 = vmax.f32 %v12616_v20, 0.0  ;;  %v3069_v12 = vand.u32 2147483647, %v12693_v4 }
 0x436   :  { %v4838_v28 = vadd.f32 %v4392_v10, %v2790_v62  ;;  %v4410_v45 = vmul.f32 0.6931472, %v9105_v44  ;;  %8255 = vmatmul.msk.bf16.vlgmr.msra.gmra.mxu0 %vm170_vm0, %v10843_v46  ;;  %8271 = vmatmul.msk.bf16.vlgmr.msra.gmra.mxu1 %vm170_vm0, %v10843_v46  ;;  %v9107_v36 = vpop.eup %9106  ;;  %v12691_v46 = vpop.f32.mrf.mxu3  ;;  %v3673_v57 = vmul.f32 1.442695, %v3327_v32  ;;  %v12705_v37 = vadd.f32 -5.0, %v1883_v27 }
 0x437   :  { %9116 = vlog2.f32 %v4078_v30  ;;  %v9109_v49 = vpop.eup %9108  ;;  %v4087_v40 = vadd.f32 1.0, %v9107_v36  ;;  %v3675_v10 = vmul.f32 1.442695, %v3328_v3  ;;  %v1975_v58 = vadd.f32 %v1974_v15, %v12266_v34 }
 0x438   :  { %7506 = vst [vmem:[%s16914_s12 + $0x208] sm:$0xff] %v4838_v28  ;;  %v4847_v22 = vadd.f32 %v4410_v45, %v2799_v51  ;;  %v9111_v24 = vpop.eup %9110  ;;  %v4412_v9 = vmul.f32 0.6931472, %v9109_v49  ;;  %v3325_v20 = vsub.f32 0.0, %v3069_v12  ;;  %v2064_v28 = vadd.f32 %v2063_v1, %v12268_v35  ;;  %v1976_v51 = vpop.f32.mrf.mxu0 }
 0x439   :  { %v9113_v56 = vpop.eup %9112  ;;  %v4406_v43 = vmul.f32 0.6931472, %v9111_v24  ;;  %9118 = vlog2.f32 %v4087_v40  ;;  %v12712_v45 = vpop.f32.mrf.mxu1  ;;  %v3070_v36 = vand.u32 2147483647, %v12705_v37  ;;  %v2808_v24 = vmax.f32 %v12634_v39, 0.0 }
 0x43a   :  { %7515 = vst [vmem:[%s16914_s12 + $0x250] sm:$0xff] %v4847_v22  ;;  %v4848_v29 = vadd.f32 %v4412_v9, %v2800_v23  ;;  %v4088_v19 = vadd.f32 1.0, %v9113_v56  ;;  %9120 = vpow2.f32 %v3655_v50  ;;  %v9115_v63 = vpop.eup %9114  ;;  %v12715_v23 = vadd.f32 -5.0, %v1975_v58  ;;  %v1798_v32 = vpop.f32.mrf.mxu2 }
 0x43b   :  { %v4845_v62 = vadd.f32 %v4406_v43, %v2797_v14  ;;  %v4085_v30 = vadd.f32 1.0, %v9115_v63  ;;  %v3669_v15 = vmul.f32 1.442695, %v3325_v20  ;;  %v12717_v49 = vadd.f32 -5.0, %v2064_v28 }
 0x43c   :  { %7516 = vst [vmem:[%s16914_s12 + $0x258] sm:$0xff] %v4848_v29  ;;  %9122 = vlog2.f32 %v4088_v19  ;;  %v2807_v14 = vmax.f32 %v12632_v54, 0.0  ;;  %v3326_v25 = vsub.f32 0.0, %v3070_v36  ;;  %v3079_v1 = vand.u32 2147483647, %v12715_v23 }
 0x43d   :  { %v9117_v44 = vpop.eup %9116  ;;  %7513 = vst [vmem:[%s16914_s12 + $0x240] sm:$0xff] %v4845_v62  ;;  %9124 = vpow2.f32 %v3673_v57  ;;  %v3080_v50 = vand.u32 2147483647, %v12717_v49  ;;  %v1797_v29 = vadd.f32 %v1796_v8, %v12280_v41  ;;  %v1886_v39 = vadd.f32 %v12691_v46, %v12282_v42 }
 0x43e   :  { %v4408_v33 = vmul.f32 0.6931472, %v9117_v44  ;;  %9126 = vlog2.f32 %v4085_v30  ;;  %v12726_v56 = vpop.f32.mrf.mxu3  ;;  %v3671_v54 = vmul.f32 1.442695, %v3326_v25  ;;  %v3335_v27 = vsub.f32 0.0, %v3079_v1 }
 0x43f   :  { %v9119_v17 = vpop.eup %9118  ;;  %9128 = vpow2.f32 %v3675_v10  ;;  %v3336_v63 = vsub.f32 0.0, %v3080_v50  ;;  %v12739_v58 = vadd.f32 -5.0, %v1797_v29  ;;  %v1977_v20 = vadd.f32 %v1976_v51, %v12266_v34 }
 0x440   :  { %v4846_v7 = vadd.f32 %v4408_v33, %v2798_v2  ;;  %v9121_v22 = vpop.eup %9120  ;;  %v4426_v40 = vmul.f32 0.6931472, %v9119_v17  ;;  %9130 = vpow2.f32 %v3669_v15  ;;  %v2805_v2 = vmax.f32 %v12647_v18, 0.0  ;;  %v12751_v17 = vpop.f32.mrf.mxu0 }
 0x441   :  { %v4086_v9 = vadd.f32 1.0, %v9121_v22  ;;  %v3689_v12 = vmul.f32 1.442695, %v3335_v27  ;;  %v3691_v46 = vmul.f32 1.442695, %v3336_v63  ;;  %v12745_v33 = vadd.f32 -5.0, %v1886_v39 }
 0x442   :  { %7514 = vst [vmem:[%s16914_s12 + $0x248] sm:$0xff] %v4846_v7  ;;  %v9123_v43 = vpop.eup %9122  ;;  %v4855_v3 = vadd.f32 %v4426_v40, %v2807_v14  ;;  %v12753_v7 = vpop.f32.mrf.mxu1  ;;  %v2806_v51 = vmax.f32 %v12667_v59, 0.0  ;;  %v12761_v40 = vadd.f32 -5.0, %v1977_v20  ;;  %v2815_v50 = vmax.f32 %v12669_v13, 0.0 }
 0x443   :  { %v9125_v19 = vpop.eup %9124  ;;  %v4428_v57 = vmul.f32 0.6931472, %v9123_v43  ;;  %9132 = vlog2.f32 %v4086_v9  ;;  %v3078_v14 = vand.u32 2147483647, %v12745_v33  ;;  %v2066_v9 = vadd.f32 %v12712_v45, %v12268_v35  ;;  %v12767_v27 = vpop.f32.mrf.mxu2 }
 0x444   :  { %v9127_v62 = vpop.eup %9126  ;;  %7523 = vst [vmem:[%s16914_s12 + $0x290] sm:$0xff] %v4855_v3  ;;  %v4095_v10 = vadd.f32 1.0, %v9125_v19  ;;  %9134 = vpow2.f32 %v3671_v54  ;;  %v3087_v54 = vand.u32 2147483647, %v12761_v40  ;;  %v1799_v39 = vadd.f32 %v1798_v32, %v12280_v41 }
 0x445   :  { %8224 = vmatmul.msk.bf16.gmra.mxu2 %vm170_vm0, %v10859_v60  ;;  %8240 = vmatmul.msk.bf16.gmra.mxu3 %vm170_vm0, %v10859_v60  ;;  %v9129_v8 = vpop.eup %9128  ;;  %v4856_v44 = vadd.f32 %v4428_v57, %v2808_v24  ;;  %v4422_v30 = vmul.f32 0.6931472, %v9127_v62  ;;  %v3334_v3 = vsub.f32 0.0, %v3078_v14  ;;  %v12771_v63 = vadd.f32 -5.0, %v2066_v9 }
 0x446   :  { %8256 = vmatmul.msk.bf16.gmra.mxu0 %vm170_vm0, %v10859_v60  ;;  %8272 = vmatmul.msk.bf16.gmra.mxu1 %vm170_vm0, %v10859_v60  ;;  %9136 = vlog2.f32 %v4095_v10  ;;  %v4096_v18 = vadd.f32 1.0, %v9129_v8  ;;  %v9131_v28 = vpop.eup %9130  ;;  %v3077_v60 = vand.u32 2147483647, %v12739_v58  ;;  %v12769_v59 = vpop.f32.mrf.mxu3  ;;  %v3343_v13 = vsub.f32 0.0, %v3087_v54 }
 0x447   :  { %7524 = vst [vmem:[%s16914_s12 + $0x298] sm:$0xff] %v4856_v44  ;;  %v4853_v36 = vadd.f32 %v4422_v30, %v2805_v2  ;;  %9138 = vpow2.f32 %v3689_v12  ;;  %v4093_v15 = vadd.f32 1.0, %v9131_v28  ;;  %v3687_v45 = vmul.f32 1.442695, %v3334_v3 }
 0x448   :  { %9140 = vlog2.f32 %v4096_v18  ;;  %v3333_v24 = vsub.f32 0.0, %v3077_v60  ;;  %v2816_v12 = vmax.f32 %v12672_v53, 0.0  ;;  %v2813_v8 = vmax.f32 %v12693_v4, 0.0 }
 0x449   :  { %v9133_v22 = vpop.eup %9132  ;;  %7521 = vst [vmem:[%s16914_s12 + $0x280] sm:$0xff] %v4853_v36  ;;  %9142 = vpow2.f32 %v3691_v46  ;;  %v3705_v32 = vmul.f32 1.442695, %v3343_v13  ;;  %v3088_v36 = vand.u32 2147483647, %v12771_v63  ;;  %v1888_v60 = vadd.f32 %v12726_v56, %v12282_v42 }
 0x44a   :  { %v9135_v25 = vpop.eup %9134  ;;  %v4424_v1 = vmul.f32 0.6931472, %v9133_v22  ;;  %9144 = vlog2.f32 %v4093_v15  ;;  %v3685_v57 = vmul.f32 1.442695, %v3333_v24  ;;  %v12780_v15 = vadd.f32 -5.0, %v1799_v39  ;;  %v1981_v22 = vpop.f32.mrf.mxu0 }
 0x44b   :  { %v4094_v43 = vadd.f32 1.0, %v9135_v25  ;;  %v2814_v14 = vmax.f32 %v12705_v37, 0.0  ;;  %v3344_v25 = vsub.f32 0.0, %v3088_v36  ;;  %v1980_v56 = vadd.f32 %v12751_v17, %v12266_v34 }
 0x44c   :  { %v9137_v29 = vpop.eup %9136  ;;  %v4854_v19 = vadd.f32 %v4424_v1, %v2806_v51  ;;  %v12787_v51 = vpop.f32.mrf.mxu1  ;;  %v3085_v1 = vand.u32 2147483647, %v12780_v15 }
 0x44d   :  { %v9139_v62 = vpop.eup %9138  ;;  %v4442_v2 = vmul.f32 0.6931472, %v9137_v29  ;;  %9146 = vlog2.f32 %v4094_v43  ;;  %v12795_v43 = vadd.f32 -5.0, %v1888_v60  ;;  %v3707_v37 = vmul.f32 1.442695, %v3344_v25 }
 0x44e   :  { %v9141_v10 = vpop.eup %9140  ;;  %7522 = vst [vmem:[%s16914_s12 + $0x288] sm:$0xff] %v4854_v19  ;;  %v4103_v44 = vadd.f32 1.0, %v9139_v62  ;;  %9148 = vpow2.f32 %v3685_v57  ;;  %v3341_v29 = vsub.f32 0.0, %v3085_v1  ;;  %v2069_v19 = vadd.f32 %v12753_v7, %v12268_v35  ;;  %v12814_v7 = vpop.f32.mrf.mxu3 }
 0x44f   :  { %v9143_v30 = vpop.eup %9142  ;;  %v4863_v46 = vadd.f32 %v4442_v2, %v2815_v50  ;;  %v4444_v18 = vmul.f32 0.6931472, %v9141_v10  ;;  %9150 = vpow2.f32 %v3687_v45  ;;  %v2823_v50 = vmax.f32 %v12715_v23, 0.0  ;;  %v12812_v2 = vpop.f32.mrf.mxu2 }
 0x450   :  { %v9145_v20 = vpop.eup %9144  ;;  %9152 = vlog2.f32 %v4103_v44  ;;  %v4104_v28 = vadd.f32 1.0, %v9143_v30  ;;  %v2824_v23 = vmax.f32 %v12717_v49, 0.0  ;;  %v3086_v39 = vand.u32 2147483647, %v12795_v43 }
 0x451   :  { %7531 = vst [vmem:[%s16914_s12 + $0x2d0] sm:$0xff] %v4863_v46  ;;  %v4864_v53 = vadd.f32 %v4444_v18, %v2816_v12  ;;  %v4438_v4 = vmul.f32 0.6931472, %v9145_v20  ;;  %9154 = vpow2.f32 %v3705_v32  ;;  %v12810_v62 = vadd.f32 -5.0, %v1980_v56 }
 0x452   :  { %9156 = vlog2.f32 %v4104_v28  ;;  %v3701_v49 = vmul.f32 1.442695, %v3341_v29  ;;  %v3342_v44 = vsub.f32 0.0, %v3086_v39  ;;  %v1802_v30 = vadd.f32 %v12767_v27, %v12280_v41 }
 0x453   :  { %v9147_v24 = vpop.eup %9146  ;;  %7532 = vst [vmem:[%s16914_s12 + $0x2d8] sm:$0xff] %v4864_v53  ;;  %v4861_v9 = vadd.f32 %v4438_v4, %v2813_v8  ;;  %9158 = vpow2.f32 %v3707_v37  ;;  %v12826_v32 = vadd.f32 -5.0, %v2069_v19  ;;  %v1982_v56 = vadd.f32 %v1981_v22, %v12266_v34 }
 0x454   :  { %v9149_v3 = vpop.eup %9148  ;;  %v4440_v54 = vmul.f32 0.6931472, %v9147_v24  ;;  %v3703_v36 = vmul.f32 1.442695, %v3342_v44  ;;  %v12832_v60 = vadd.f32 -5.0, %v1802_v30  ;;  %v12834_v25 = vpop.f32.mrf.mxu1  ;;  %v2822_v37 = vmax.f32 %v12745_v33, 0.0 }
 0x455   :  { %8225 = vmatmul.msk.bf16.gmra.mxu2 %vm170_vm0, %v10875_v11  ;;  %8241 = vmatmul.msk.bf16.gmra.mxu3 %vm170_vm0, %v10875_v11  ;;  %v9151_v57 = vpop.eup %9150  ;;  %7529 = vst [vmem:[%s16914_s12 + $0x2c0] sm:$0xff] %v4861_v9  ;;  %v4101_v17 = vadd.f32 1.0, %v9149_v3  ;;  %v3096_v4 = vand.u32 2147483647, %v12826_v32 }
 0x456   :  { %8257 = vmatmul.msk.bf16.gmra.mxu0 %vm170_vm0, %v10875_v11  ;;  %8273 = vmatmul.msk.bf16.gmra.mxu1 %vm170_vm0, %v10875_v11  ;;  %v9153_v45 = vpop.eup %9152  ;;  %v4862_v13 = vadd.f32 %v4440_v54, %v2814_v14  ;;  %v4102_v10 = vadd.f32 1.0, %v9151_v57  ;;  %v3095_v11 = vand.u32 2147483647, %v12810_v62  ;;  %v1984_v14 = vpop.f32.mrf.mxu0  ;;  %v2821_v54 = vmax.f32 %v12739_v58, 0.0 }
 0x457   :  { %v9155_v12 = vpop.eup %9154  ;;  %v4458_v8 = vmul.f32 0.6931472, %v9153_v45  ;;  %9160 = vlog2.f32 %v4101_v17  ;;  %v3352_v9 = vsub.f32 0.0, %v3096_v4  ;;  %v3093_v19 = vand.u32 2147483647, %v12832_v60  ;;  %v12850_v58 = vpop.f32.mrf.mxu3 }
 0x458   :  { %v9157_v46 = vpop.eup %9156  ;;  %7530 = vst [vmem:[%s16914_s12 + $0x2c8] sm:$0xff] %v4862_v13  ;;  %9162 = vlog2.f32 %v4102_v10  ;;  %v4111_v18 = vadd.f32 1.0, %v9155_v12  ;;  %v3351_v53 = vsub.f32 0.0, %v3095_v11  ;;  %v2831_v45 = vmax.f32 %v12761_v40, 0.0  ;;  %v12848_v10 = vpop.f32.mrf.mxu2 }
 0x459   :  { %v4871_v20 = vadd.f32 %v4458_v8, %v2823_v50  ;;  %v4460_v28 = vmul.f32 0.6931472, %v9157_v46  ;;  %9164 = vpow2.f32 %v3701_v49  ;;  %v9159_v1 = vpop.eup %9158  ;;  %v1891_v50 = vadd.f32 %v12769_v59, %v12282_v42 }
 0x45a   :  { %9166 = vlog2.f32 %v4111_v18  ;;  %v3721_v24 = vmul.f32 1.442695, %v3351_v53  ;;  %v4112_v29 = vadd.f32 1.0, %v9159_v1  ;;  %v3723_v17 = vmul.f32 1.442695, %v3352_v9 }
 0x45b   :  { %7539 = vst [vmem:[%s16914_s12 + $0x310] sm:$0xff] %v4871_v20  ;;  %v4872_v27 = vadd.f32 %v4460_v28, %v2824_v23  ;;  %9168 = vpow2.f32 %v3703_v36  ;;  %v12845_v39 = vadd.f32 -5.0, %v1891_v50  ;;  %v3349_v13 = vsub.f32 0.0, %v3093_v19 }
 0x45c   :  { %9170 = vpow2.f32 %v3721_v24  ;;  %v12852_v8 = vadd.f32 -5.0, %v1982_v56  ;;  %v2832_v28 = vmax.f32 %v12771_v63, 0.0  ;;  %v1804_v1 = vadd.f32 %v12812_v2, %v12280_v41  ;;  %v12879_v2 = vpop.f32.mrf.mxu1 }
 0x45d   :  { %v9161_v3 = vpop.eup %9160  ;;  %7540 = vst [vmem:[%s16914_s12 + $0x318] sm:$0xff] %v4872_v27  ;;  %9172 = vlog2.f32 %v4112_v29  ;;  %v3717_v18 = vmul.f32 1.442695, %v3349_v13  ;;  %v3094_v11 = vand.u32 2147483647, %v12845_v39  ;;  %v2071_v27 = vadd.f32 %v12787_v51, %v12268_v35 }
 0x45e   :  { %v9163_v57 = vpop.eup %9162  ;;  %v4454_v23 = vmul.f32 0.6931472, %v9161_v3  ;;  %9174 = vpow2.f32 %v3723_v17  ;;  %v3103_v4 = vand.u32 2147483647, %v12852_v8  ;;  %v1893_v50 = vadd.f32 %v12814_v7, %v12282_v42  ;;  %v12877_v56 = vpop.f32.mrf.mxu0 }
 0x45f   :  { %v9165_v59 = vpop.eup %9164  ;;  %v4456_v22 = vmul.f32 0.6931472, %v9163_v57  ;;  %v3350_v36 = vsub.f32 0.0, %v3094_v11  ;;  %v1985_v51 = vadd.f32 %v1984_v14, %v12266_v34  ;;  %v12885_v29 = vadd.f32 -5.0, %v2071_v27 }
 0x460   :  { %v9167_v33 = vpop.eup %9166  ;;  %v4869_v49 = vadd.f32 %v4454_v23, %v2821_v54  ;;  %v4109_v12 = vadd.f32 1.0, %v9165_v59  ;;  %v12887_v19 = vadd.f32 -5.0, %v1804_v1  ;;  %v2829_v7 = vmax.f32 %v12780_v15, 0.0  ;;  %v12898_v15 = vpop.f32.mrf.mxu3 }
 0x461   :  { %v9169_v44 = vpop.eup %9168  ;;  %v4870_v30 = vadd.f32 %v4456_v22, %v2822_v37  ;;  %v4474_v46 = vmul.f32 0.6931472, %v9167_v33  ;;  %v3719_v9 = vmul.f32 1.442695, %v3350_v36  ;;  %v3359_v37 = vsub.f32 0.0, %v3103_v4  ;;  %v8886_v4 = vld [vmem:[#allocation6 + $0x78] sm:$0xff] }
 0x462   :  { %7537 = vst [vmem:[%s16914_s12 + $0x300] sm:$0xff] %v4869_v49  ;;  %9176 = vlog2.f32 %v4109_v12  ;;  %v4110_v40 = vadd.f32 1.0, %v9169_v44  ;;  %v9171_v53 = vpop.eup %9170  ;;  %v12890_v57 = vadd.f32 -5.0, %v1893_v50  ;;  %v12892_v22 = vadd.f32 -5.0, %v1985_v51  ;;  %v12896_v49 = vpop.f32.mrf.mxu2  ;;  %6530 = vmatpush.bf16.msrb.mxu3 %v8886_v4 }
 0x463   :  { %7538 = vst [vmem:[%s16914_s12 + $0x308] sm:$0xff] %v4870_v30  ;;  %v4879_v20 = vadd.f32 %v4474_v46, %v2831_v45  ;;  %9178 = vpow2.f32 %v3717_v18  ;;  %v9173_v24 = vpop.eup %9172  ;;  %v4119_v63 = vadd.f32 1.0, %v9171_v53  ;;  %v3737_v59 = vmul.f32 1.442695, %v3359_v37 }
 0x464   :  { %9180 = vlog2.f32 %v4110_v40  ;;  %v9175_v3 = vpop.eup %9174  ;;  %v4476_v54 = vmul.f32 0.6931472, %v9173_v24  ;;  %v2830_v13 = vmax.f32 %v12795_v43, 0.0  ;;  %v3104_v33 = vand.u32 2147483647, %v12885_v29 }
 0x465   :  { %8226 = vmatmul.msk.bf16.gmra.mxu2 %vm170_vm0, %v10891_v31  ;;  %8242 = vmatmul.msk.bf16.gmra.mxu3 %vm170_vm0, %v10891_v31  ;;  %7547 = vst [vmem:[%s16914_s12 + $0x350] sm:$0xff] %v4879_v20  ;;  %9182 = vlog2.f32 %v4119_v63  ;;  %v4120_v14 = vadd.f32 1.0, %v9175_v3  ;;  %v2839_v44 = vmax.f32 %v12810_v62, 0.0  ;;  %v3101_v46 = vand.u32 2147483647, %v12887_v19  ;;  %v8878_v20 = vld [vmem:[#allocation6 + $0x38] sm:$0xff] }
 0x466   :  { %8258 = vmatmul.msk.bf16.gmra.mxu0 %vm170_vm0, %v10891_v31  ;;  %8274 = vmatmul.msk.bf16.gmra.mxu1 %vm170_vm0, %v10891_v31  ;;  %v4880_v17 = vadd.f32 %v4476_v54, %v2832_v28  ;;  %9184 = vpow2.f32 %v3719_v9  ;;  %v3360_v11 = vsub.f32 0.0, %v3104_v33  ;;  %v3102_v40 = vand.u32 2147483647, %v12890_v57 }
 0x467   :  { %9186 = vlog2.f32 %v4120_v14  ;;  %v2840_v28 = vmax.f32 %v12826_v32, 0.0  ;;  %v3357_v36 = vsub.f32 0.0, %v3101_v46  ;;  %v3111_v53 = vand.u32 2147483647, %v12892_v22  ;;  %6441 = vmatpush.bf16.msrb.mxu2 %v8878_v20 }
 0x468   :  { %v9177_v23 = vpop.eup %9176  ;;  %7548 = vst [vmem:[%s16914_s12 + $0x358] sm:$0xff] %v4880_v17  ;;  %9188 = vpow2.f32 %v3737_v59  ;;  %v3739_v1 = vmul.f32 1.442695, %v3360_v11  ;;  %v3358_v24 = vsub.f32 0.0, %v3102_v40  ;;  %v2074_v63 = vadd.f32 %v12834_v25, %v12268_v35  ;;  %v12920_v25 = vpop.f32.mrf.mxu0 }
 0x469   :  { %v9179_v31 = vpop.eup %9178  ;;  %v4470_v45 = vmul.f32 0.6931472, %v9177_v23  ;;  %v3733_v32 = vmul.f32 1.442695, %v3357_v36  ;;  %v3367_v51 = vsub.f32 0.0, %v3111_v53  ;;  %v1807_v3 = vadd.f32 %v12848_v10, %v12280_v41  ;;  %v12922_v23 = vpop.f32.mrf.mxu1 }
 0x46a   :  { %v9181_v12 = vpop.eup %9180  ;;  %v4117_v30 = vadd.f32 1.0, %v9179_v31  ;;  %v12918_v14 = vadd.f32 -5.0, %v2074_v63  ;;  %v12933_v11 = vpop.f32.mrf.mxu2  ;;  %v1987_v53 = vadd.f32 %v12877_v56, %v12266_v34  ;;  %v2847_v56 = vmax.f32 %v12852_v8, 0.0 }
 0x46b   :  { %v4877_v18 = vadd.f32 %v4470_v45, %v2829_v7  ;;  %v4472_v43 = vmul.f32 0.6931472, %v9181_v12  ;;  %v9183_v27 = vpop.eup %9182  ;;  %v3735_v7 = vmul.f32 1.442695, %v3358_v24  ;;  %v3753_v45 = vmul.f32 1.442695, %v3367_v51  ;;  %v12935_v40 = vpop.f32.mrf.mxu3 }
 0x46c   :  { %9190 = vlog2.f32 %v4117_v30  ;;  %v9185_v9 = vpop.eup %9184  ;;  %v4490_v50 = vmul.f32 0.6931472, %v9183_v27  ;;  %v2837_v30 = vmax.f32 %v12832_v60, 0.0  ;;  %v12929_v46 = vadd.f32 -5.0, %v1807_v3 }
 0x46d   :  { %7545 = vst [vmem:[%s16914_s12 + $0x340] sm:$0xff] %v4877_v18  ;;  %v4878_v62 = vadd.f32 %v4472_v43, %v2830_v13  ;;  %v9187_v54 = vpop.eup %9186  ;;  %v4118_v37 = vadd.f32 1.0, %v9185_v9  ;;  %9192 = vpow2.f32 %v3739_v1  ;;  %v3112_v13 = vand.u32 2147483647, %v12918_v14 }
 0x46e   :  { %v9189_v17 = vpop.eup %9188  ;;  %v4887_v59 = vadd.f32 %v4490_v50, %v2839_v44  ;;  %v4492_v31 = vmul.f32 0.6931472, %v9187_v54  ;;  %9194 = vpow2.f32 %v3733_v32  ;;  %v1896_v43 = vadd.f32 %v12850_v58, %v12282_v42 }
 0x46f   :  { %7546 = vst [vmem:[%s16914_s12 + $0x348] sm:$0xff] %v4878_v62  ;;  %9196 = vlog2.f32 %v4118_v37  ;;  %v4127_v10 = vadd.f32 1.0, %v9189_v17  ;;  %v3368_v44 = vsub.f32 0.0, %v3112_v13  ;;  %v3109_v60 = vand.u32 2147483647, %v12929_v46 }
 0x470   :  { %7555 = vst [vmem:[%s16914_s12 + $0x390] sm:$0xff] %v4887_v59  ;;  %v4888_v12 = vadd.f32 %v4492_v31, %v2840_v28  ;;  %9198 = vpow2.f32 %v3735_v7  ;;  %v12945_v36 = vadd.f32 -5.0, %v1896_v43  ;;  %v2838_v27 = vmax.f32 %v12845_v39, 0.0  ;;  %v8894_v7 = vld [vmem:[#allocation6 + $0xb8] sm:$0xff]  ;;  %v12967_v8 = vpop.f32.mrf.mxu0 }
 0x471   :  { %9200 = vlog2.f32 %v4127_v10  ;;  %v3755_v58 = vmul.f32 1.442695, %v3368_v44  ;;  %v3365_v1 = vsub.f32 0.0, %v3109_v60  ;;  %v2076_v24 = vadd.f32 %v12879_v2, %v12268_v35  ;;  %v12969_v17 = vpop.f32.mrf.mxu1  ;;  %6619 = vmatpush.bf16.msrb.mxu0 %v8894_v7 }
 0x472   :  { %v9191_v33 = vpop.eup %9190  ;;  %7556 = vst [vmem:[%s16914_s12 + $0x398] sm:$0xff] %v4888_v12  ;;  %9202 = vpow2.f32 %v3753_v45  ;;  %v3110_v51 = vand.u32 2147483647, %v12945_v36  ;;  %v12963_v54 = vadd.f32 -5.0, %v1987_v53  ;;  %v2848_v12 = vmax.f32 %v12885_v29, 0.0 }
 0x473   :  { %v4486_v18 = vmul.f32 0.6931472, %v9191_v33  ;;  %v9193_v20 = vpop.eup %9192  ;;  %9204 = vpow2.f32 %v3755_v58  ;;  %v3749_v39 = vmul.f32 1.442695, %v3365_v1  ;;  %v12965_v37 = vadd.f32 -5.0, %v2076_v24  ;;  %v12980_v58 = vpop.f32.mrf.mxu2 }
 0x474   :  { %v9195_v4 = vpop.eup %9194  ;;  %v4128_v62 = vadd.f32 1.0, %v9193_v20  ;;  %v3366_v45 = vsub.f32 0.0, %v3110_v51  ;;  %v3119_v13 = vand.u32 2147483647, %v12963_v54  ;;  %v12982_v53 = vpop.f32.mrf.mxu3  ;;  %v2846_v29 = vmax.f32 %v12890_v57, 0.0 }
 0x475   :  { %8227 = vmatmul.msk.bf16.gmra.mxu2 %vm170_vm0, %v10907_v52  ;;  %8243 = vmatmul.msk.bf16.gmra.mxu3 %vm170_vm0, %v10907_v52  ;;  %v4885_v28 = vadd.f32 %v4486_v18, %v2837_v30  ;;  %v9197_v63 = vpop.eup %9196  ;;  %v4125_v9 = vadd.f32 1.0, %v9195_v4  ;;  %v2845_v30 = vmax.f32 %v12887_v19, 0.0  ;;  %v3120_v60 = vand.u32 2147483647, %v12965_v37 }
 0x476   :  { %8259 = vmatmul.msk.bf16.gmra.mxu0 %vm170_vm0, %v10907_v52  ;;  %8275 = vmatmul.msk.bf16.gmra.mxu1 %vm170_vm0, %v10907_v52  ;;  %v1809_v52 = vadd.f32 %v12896_v49, %v12280_v41  ;;  %v9199_v50 = vpop.eup %9198  ;;  %v4488_v32 = vmul.f32 0.6931472, %v9197_v63  ;;  %9206 = vlog2.f32 %v4128_v62  ;;  %v3751_v18 = vmul.f32 1.442695, %v3366_v45 }
 0x477   :  { %7553 = vst [vmem:[%s16914_s12 + $0x380] sm:$0xff] %v4885_v28  ;;  %v9201_v3 = vpop.eup %9200  ;;  %9208 = vlog2.f32 %v4125_v9  ;;  %v4126_v2 = vadd.f32 1.0, %v9199_v50  ;;  %v3375_v43 = vsub.f32 0.0, %v3119_v13  ;;  %v8902_v28 = vld [vmem:[#allocation6 + $0xf8] sm:$0xff]  ;;  %v3376_v63 = vsub.f32 0.0, %v3120_v60 }
 0x478   :  { %v9203_v59 = vpop.eup %9202  ;;  %v4886_v49 = vadd.f32 %v4488_v32, %v2838_v27  ;;  %v4506_v31 = vmul.f32 0.6931472, %v9201_v3  ;;  %9210 = vpow2.f32 %v3749_v39  ;;  %v12978_v20 = vadd.f32 -5.0, %v1809_v52  ;;  %6708 = vmatpush.bf16.msrb.mxu1 %v8902_v28 }
 0x479   :  { %9212 = vlog2.f32 %v4126_v2  ;;  %v4135_v10 = vadd.f32 1.0, %v9203_v59  ;;  %v9205_v44 = vpop.eup %9204  ;;  %v1898_v27 = vadd.f32 %v12898_v15, %v12282_v42  ;;  %v3769_v24 = vmul.f32 1.442695, %v3375_v43  ;;  %v13006_v13 = vpop.f32.mrf.mxu1 }
 0x47a   :  { %7554 = vst [vmem:[%s16914_s12 + $0x388] sm:$0xff] %v4886_v49  ;;  %v4895_v33 = vadd.f32 %v4506_v31, %v2847_v56  ;;  %v4136_v19 = vadd.f32 1.0, %v9205_v44  ;;  %v1990_v56 = vadd.f32 %v12920_v25, %v12266_v34  ;;  %v3117_v50 = vand.u32 2147483647, %v12978_v20 }
 0x47b   :  { %9214 = vlog2.f32 %v4135_v10  ;;  %v12993_v32 = vadd.f32 -5.0, %v1898_v27  ;;  %v3771_v15 = vmul.f32 1.442695, %v3376_v63  ;;  %v2855_v7 = vmax.f32 %v12892_v22, 0.0  ;;  %v13004_v10 = vpop.f32.mrf.mxu0 }
 0x47c   :  { %v9207_v4 = vpop.eup %9206  ;;  %7563 = vst [vmem:[%s16914_s12 + $0x3d0] sm:$0xff] %v4895_v33  ;;  %9216 = vpow2.f32 %v3751_v18  ;;  %v3373_v59 = vsub.f32 0.0, %v3117_v50  ;;  %v13000_v31 = vadd.f32 -5.0, %v1990_v56  ;;  %v2079_v45 = vadd.f32 %v12922_v23, %v12268_v35 }
 0x47d   :  { %v9209_v62 = vpop.eup %9208  ;;  %v4508_v1 = vmul.f32 0.6931472, %v9207_v4  ;;  %9218 = vlog2.f32 %v4136_v19  ;;  %v3118_v25 = vand.u32 2147483647, %v12993_v32  ;;  %v2856_v23 = vmax.f32 %v12918_v14, 0.0 }
 0x47e   :  { %v9211_v9 = vpop.eup %9210  ;;  %v4502_v52 = vmul.f32 0.6931472, %v9209_v62  ;;  %9220 = vpow2.f32 %v3769_v24  ;;  %v3127_v43 = vand.u32 2147483647, %v13000_v31  ;;  %v13024_v4 = vadd.f32 -5.0, %v2079_v45 }
 0x47f   :  { %v9213_v57 = vpop.eup %9212  ;;  %v4896_v39 = vadd.f32 %v4508_v1, %v2848_v12  ;;  %v4133_v51 = vadd.f32 1.0, %v9211_v9  ;;  %v3374_v44 = vsub.f32 0.0, %v3118_v25  ;;  %v1812_v14 = vadd.f32 %v12933_v11, %v12280_v41  ;;  %v13028_v1 = vpop.f32.mrf.mxu2 }
 0x480   :  { %v4893_v3 = vadd.f32 %v4502_v52, %v2845_v30  ;;  %v4504_v2 = vmul.f32 0.6931472, %v9213_v57  ;;  %v3765_v30 = vmul.f32 1.442695, %v3373_v59  ;;  %v3383_v62 = vsub.f32 0.0, %v3127_v43 }
 0x481   :  { %v9215_v49 = vpop.eup %9214  ;;  %7564 = vst [vmem:[%s16914_s12 + $0x3d8] sm:$0xff] %v4896_v39  ;;  %9222 = vlog2.f32 %v4133_v51  ;;  %v3767_v27 = vmul.f32 1.442695, %v3374_v44  ;;  %v2853_v24 = vmax.f32 %v12929_v46, 0.0  ;;  %v3128_v56 = vand.u32 2147483647, %v13024_v4 }
 0x482   :  { %v9217_v33 = vpop.eup %9216  ;;  %7561 = vst [vmem:[%s16914_s12 + $0x3c0] sm:$0xff] %v4893_v3  ;;  %v4894_v22 = vadd.f32 %v4504_v2, %v2846_v29  ;;  %v4522_v12 = vmul.f32 0.6931472, %v9215_v49  ;;  %9224 = vpow2.f32 %v3771_v15  ;;  %v3785_v52 = vmul.f32 1.442695, %v3383_v62 }
 0x483   :  { %v4134_v18 = vadd.f32 1.0, %v9217_v33  ;;  %v9219_v60 = vpop.eup %9218  ;;  %9226 = vpow2.f32 %v3765_v30  ;;  %v13037_v50 = vadd.f32 -5.0, %v1812_v14  ;;  %v3384_v51 = vsub.f32 0.0, %v3128_v56 }
 0x484   :  { %7562 = vst [vmem:[%s16914_s12 + $0x3c8] sm:$0xff] %v4894_v22  ;;  %v4903_v28 = vadd.f32 %v4522_v12, %v2855_v7  ;;  %v9221_v29 = vpop.eup %9220  ;;  %v4524_v19 = vmul.f32 0.6931472, %v9219_v60  ;;  %v1901_v15 = vadd.f32 %v12935_v40, %v12282_v42  ;;  %v1992_v33 = vadd.f32 %v12967_v8, %v12266_v34  ;;  %v13051_v22 = vpop.f32.mrf.mxu0 }
 0x485   :  { %8228 = vmatmul.msk.bf16.gmra.mxu2 %vm170_vm0, %v10923_v5  ;;  %8244 = vmatmul.msk.bf16.gmra.mxu3 %vm170_vm0, %v10923_v5  ;;  %9228 = vlog2.f32 %v4134_v18  ;;  %v4143_v63 = vadd.f32 1.0, %v9221_v29  ;;  %v3787_v7 = vmul.f32 1.442695, %v3384_v51  ;;  %v3125_v59 = vand.u32 2147483647, %v13037_v50  ;;  %v13053_v12 = vpop.f32.mrf.mxu1 }
 0x486   :  { %8260 = vmatmul.msk.bf16.gmra.mxu0 %vm170_vm0, %v10923_v5  ;;  %8276 = vmatmul.msk.bf16.gmra.mxu1 %vm170_vm0, %v10923_v5  ;;  %v13030_v5 = vpop.f32.mrf.mxu3  ;;  %7571 = vst [vmem:[%s16914_s12 + $0x410] sm:$0xff] %v4903_v28  ;;  %v4904_v11 = vadd.f32 %v4524_v19, %v2856_v23  ;;  %9230 = vpow2.f32 %v3767_v27  ;;  %v13045_v49 = vadd.f32 -5.0, %v1901_v15  ;;  %v2081_v40 = vadd.f32 %v12969_v17, %v12268_v35 }
 0x487   :  { %v9223_v9 = vpop.eup %9222  ;;  %9232 = vlog2.f32 %v4143_v63  ;;  %v2854_v30 = vmax.f32 %v12945_v36, 0.0  ;;  %v3381_v18 = vsub.f32 0.0, %v3125_v59  ;;  %v13060_v43 = vadd.f32 -5.0, %v1992_v33  ;;  %v13066_v63 = vpop.f32.mrf.mxu2 }
 0x488   :  { %v9225_v57 = vpop.eup %9224  ;;  %v4518_v39 = vmul.f32 0.6931472, %v9223_v9  ;;  %7572 = vst [vmem:[%s16914_s12 + $0x418] sm:$0xff] %v4904_v11  ;;  %9234 = vpow2.f32 %v3785_v52  ;;  %v3126_v8 = vand.u32 2147483647, %v13045_v49  ;;  %v13062_v29 = vadd.f32 -5.0, %v2081_v40 }
 0x489   :  { %v4144_v46 = vadd.f32 1.0, %v9225_v57  ;;  %v9227_v3 = vpop.eup %9226  ;;  %v3781_v14 = vmul.f32 1.442695, %v3381_v18  ;;  %v2863_v27 = vmax.f32 %v12963_v54, 0.0  ;;  %v2864_v9 = vmax.f32 %v12965_v37, 0.0 }
 0x48a   :  { %v4901_v2 = vadd.f32 %v4518_v39, %v2853_v24  ;;  %v4141_v45 = vadd.f32 1.0, %v9227_v3  ;;  %v3382_v36 = vsub.f32 0.0, %v3126_v8  ;;  %v3135_v24 = vand.u32 2147483647, %v13060_v43 }
 0x48b   :  { %v9229_v25 = vpop.eup %9228  ;;  %9236 = vlog2.f32 %v4144_v46  ;;  %v2861_v11 = vmax.f32 %v12978_v20, 0.0  ;;  %v3136_v3 = vand.u32 2147483647, %v13062_v29  ;;  %v1903_v59 = vadd.f32 %v12982_v53, %v12282_v42 }
 0x48c   :  { %7569 = vst [vmem:[%s16914_s12 + $0x400] sm:$0xff] %v4901_v2  ;;  %v4520_v23 = vmul.f32 0.6931472, %v9229_v25  ;;  %9238 = vpow2.f32 %v3787_v7  ;;  %v9231_v44 = vpop.eup %9230  ;;  %v3783_v39 = vmul.f32 1.442695, %v3382_v36  ;;  %v3391_v51 = vsub.f32 0.0, %v3135_v24 }
 0x48d   :  { %9240 = vlog2.f32 %v4141_v45  ;;  %v9233_v17 = vpop.eup %9232  ;;  %v4142_v28 = vadd.f32 1.0, %v9231_v44  ;;  %v1814_v2 = vadd.f32 %v12980_v58, %v12280_v41  ;;  %v3392_v45 = vsub.f32 0.0, %v3136_v3  ;;  %v13101_v18 = vpop.f32.mrf.mxu1 }
 0x48e   :  { %v4902_v60 = vadd.f32 %v4520_v23, %v2854_v30  ;;  %v9235_v19 = vpop.eup %9234  ;;  %v4538_v62 = vmul.f32 0.6931472, %v9233_v17  ;;  %v13068_v56 = vpop.f32.mrf.mxu3  ;;  %v3801_v7 = vmul.f32 1.442695, %v3391_v51  ;;  %v13093_v40 = vadd.f32 -5.0, %v1903_v59  ;;  %v8877_v17 = vld [vmem:[#allocation6 + $0x30] sm:$0xff] }
 0x48f   :  { %9242 = vlog2.f32 %v4142_v28  ;;  %v4151_v52 = vadd.f32 1.0, %v9235_v19  ;;  %v13091_v33 = vadd.f32 -5.0, %v1814_v2  ;;  %v1995_v30 = vadd.f32 %v13004_v10, %v12266_v34  ;;  %v13099_v23 = vpop.f32.mrf.mxu0  ;;  %6442 = vmatpush.bf16.msrb.mxu2 %v8877_v17 }
 0x490   :  { %7570 = vst [vmem:[%s16914_s12 + $0x408] sm:$0xff] %v4902_v60  ;;  %v4911_v54 = vadd.f32 %v4538_v62, %v2863_v27  ;;  %9244 = vpow2.f32 %v3781_v14  ;;  %v2084_v53 = vadd.f32 %v13006_v13, %v12268_v35  ;;  %v3803_v8 = vmul.f32 1.442695, %v3392_v45  ;;  %v8885_v60 = vld [vmem:[#allocation6 + $0x70] sm:$0xff] }
 0x491   :  { %v9237_v57 = vpop.eup %9236  ;;  %9246 = vlog2.f32 %v4151_v52  ;;  %v2862_v10 = vmax.f32 %v12993_v32, 0.0  ;;  %v3133_v13 = vand.u32 2147483647, %v13091_v33  ;;  %v13108_v19 = vadd.f32 -5.0, %v1995_v30  ;;  %6531 = vmatpush.bf16.msrb.mxu3 %v8885_v60 }
 0x492   :  { %v9239_v15 = vpop.eup %9238  ;;  %v4540_v46 = vmul.f32 0.6931472, %v9237_v57  ;;  %7579 = vst [vmem:[%s16914_s12 + $0x450] sm:$0xff] %v4911_v54  ;;  %9248 = vpow2.f32 %v3783_v39  ;;  %v3134_v36 = vand.u32 2147483647, %v13093_v40  ;;  %v13114_v24 = vadd.f32 -5.0, %v2084_v53  ;;  %v13117_v54 = vpop.f32.mrf.mxu2 }
 0x493   :  { %v9241_v37 = vpop.eup %9240  ;;  %v4152_v20 = vadd.f32 1.0, %v9239_v15  ;;  %v3389_v57 = vsub.f32 0.0, %v3133_v13  ;;  %v1906_v60 = vadd.f32 %v13030_v5, %v12282_v42 }
 0x494   :  { %v4912_v58 = vadd.f32 %v4540_v46, %v2864_v9  ;;  %v4534_v25 = vmul.f32 0.6931472, %v9241_v37  ;;  %v3390_v15 = vsub.f32 0.0, %v3134_v36  ;;  %v3143_v46 = vand.u32 2147483647, %v13108_v19 }
 0x495   :  { %8229 = vmatmul.msk.bf16.gmra.mxu2 %vm170_vm0, %v10939_v21  ;;  %8245 = vmatmul.msk.bf16.gmra.mxu3 %vm170_vm0, %v10939_v21  ;;  %9250 = vlog2.f32 %v4152_v20  ;;  %v9243_v44 = vpop.eup %9242  ;;  %v2872_v37 = vmax.f32 %v13024_v4, 0.0  ;;  %v3144_v20 = vand.u32 2147483647, %v13114_v24  ;;  %v1817_v4 = vadd.f32 %v13028_v1, %v12280_v41 }
 0x496   :  { %8261 = vmatmul.msk.bf16.gmra.mxu0 %vm170_vm0, %v10939_v21  ;;  %8277 = vmatmul.msk.bf16.gmra.mxu1 %vm170_vm0, %v10939_v21  ;;  %7580 = vst [vmem:[%s16914_s12 + $0x458] sm:$0xff] %v4912_v58  ;;  %v4909_v21 = vadd.f32 %v4534_v25, %v2861_v11  ;;  %9252 = vpow2.f32 %v3801_v7  ;;  %v9245_v28 = vpop.eup %9244  ;;  %v4536_v14 = vmul.f32 0.6931472, %v9243_v44  ;;  %v2871_v11 = vmax.f32 %v13000_v31, 0.0  ;;  %v13119_v39 = vpop.f32.mrf.mxu3 }
 0x497   :  { %v9247_v27 = vpop.eup %9246  ;;  %v4149_v62 = vadd.f32 1.0, %v9245_v28  ;;  %9254 = vpow2.f32 %v3803_v8  ;;  %v3797_v31 = vmul.f32 1.442695, %v3389_v57  ;;  %v3799_v58 = vmul.f32 1.442695, %v3390_v15  ;;  %v13134_v28 = vpop.f32.mrf.mxu0 }
 0x498   :  { %7577 = vst [vmem:[%s16914_s12 + $0x440] sm:$0xff] %v4909_v21  ;;  %v9249_v9 = vpop.eup %9248  ;;  %v4910_v32 = vadd.f32 %v4536_v14, %v2862_v10  ;;  %v4554_v52 = vmul.f32 0.6931472, %v9247_v27  ;;  %v3399_v25 = vsub.f32 0.0, %v3143_v46  ;;  %v3400_v30 = vsub.f32 0.0, %v3144_v20  ;;  %v13136_v10 = vpop.f32.mrf.mxu1 }
 0x499   :  { %9256 = vlog2.f32 %v4149_v62  ;;  %v4150_v51 = vadd.f32 1.0, %v9249_v9  ;;  %v13141_v13 = vadd.f32 -5.0, %v1817_v4  ;;  %v1997_v1 = vadd.f32 %v13051_v22, %v12266_v34 }
 0x49a   :  { %7578 = vst [vmem:[%s16914_s12 + $0x448] sm:$0xff] %v4910_v32  ;;  %v4919_v2 = vadd.f32 %v4554_v52, %v2871_v11  ;;  %v3817_v21 = vmul.f32 1.442695, %v3399_v25  ;;  %v3819_v17 = vmul.f32 1.442695, %v3400_v30  ;;  %v2869_v27 = vmax.f32 %v13037_v50, 0.0  ;;  %v13153_v22 = vpop.f32.mrf.mxu2 }
 0x49b   :  { %v9251_v3 = vpop.eup %9250  ;;  %9258 = vlog2.f32 %v4150_v51  ;;  %v13146_v5 = vadd.f32 -5.0, %v1906_v60  ;;  %v3141_v9 = vand.u32 2147483647, %v13141_v13  ;;  %v13149_v32 = vadd.f32 -5.0, %v1997_v1 }
 0x49c   :  { %v9253_v7 = vpop.eup %9252  ;;  %v4556_v59 = vmul.f32 0.6931472, %v9251_v3  ;;  %7587 = vst [vmem:[%s16914_s12 + $0x490] sm:$0xff] %v4919_v2  ;;  %9260 = vpow2.f32 %v3797_v31  ;;  %v2870_v57 = vmax.f32 %v13045_v49, 0.0  ;;  %v2879_v3 = vmax.f32 %v13060_v43, 0.0 }
 0x49d   :  { %v4159_v45 = vadd.f32 1.0, %v9253_v7  ;;  %v9255_v53 = vpop.eup %9254  ;;  %9262 = vpow2.f32 %v3799_v58  ;;  %v3142_v15 = vand.u32 2147483647, %v13146_v5  ;;  %v3151_v49 = vand.u32 2147483647, %v13149_v32 }
 0x49e   :  { %v4920_v44 = vadd.f32 %v4556_v59, %v2872_v37  ;;  %v4160_v8 = vadd.f32 1.0, %v9255_v53  ;;  %v13155_v50 = vpop.f32.mrf.mxu3  ;;  %v3397_v37 = vsub.f32 0.0, %v3141_v9  ;;  %v2086_v43 = vadd.f32 %v13053_v12, %v12268_v35  ;;  %v8893_v53 = vld [vmem:[#allocation6 + $0xb0] sm:$0xff] }
 0x49f   :  { %9264 = vlog2.f32 %v4159_v45  ;;  %v9257_v14 = vpop.eup %9256  ;;  %v3398_v59 = vsub.f32 0.0, %v3142_v15  ;;  %v3407_v30 = vsub.f32 0.0, %v3151_v49  ;;  %6620 = vmatpush.bf16.msrb.mxu0 %v8893_v53  ;;  %v1908_v9 = vadd.f32 %v13068_v56, %v12282_v42 }
 0x4a0   :  { %7588 = vst [vmem:[%s16914_s12 + $0x498] sm:$0xff] %v4920_v44  ;;  %9266 = vpow2.f32 %v3817_v21  ;;  %v4550_v62 = vmul.f32 0.6931472, %v9257_v14  ;;  %v3813_v45 = vmul.f32 1.442695, %v3397_v37  ;;  %v13176_v1 = vadd.f32 -5.0, %v2086_v43 }
 0x4a1   :  { %9268 = vlog2.f32 %v4160_v8  ;;  %v9259_v36 = vpop.eup %9258  ;;  %v3815_v4 = vmul.f32 1.442695, %v3398_v59  ;;  %v3833_v12 = vmul.f32 1.442695, %v3407_v30  ;;  %v13199_v56 = vadd.f32 -5.0, %v1908_v9 }
 0x4a2   :  { %9270 = vpow2.f32 %v3819_v17  ;;  %v9261_v11 = vpop.eup %9260  ;;  %v4917_v52 = vadd.f32 %v4550_v62, %v2869_v27  ;;  %v4552_v51 = vmul.f32 0.6931472, %v9259_v36  ;;  %v1819_v27 = vadd.f32 %v13066_v63, %v12280_v41  ;;  %v13180_v62 = vpop.f32.mrf.mxu0 }
 0x4a3   :  { %v9263_v46 = vpop.eup %9262  ;;  %v4157_v2 = vadd.f32 1.0, %v9261_v11  ;;  %v13182_v36 = vpop.f32.mrf.mxu1  ;;  %v8901_v11 = vld [vmem:[#allocation6 + $0xf0] sm:$0xff]  ;;  %v3152_v63 = vand.u32 2147483647, %v13176_v1  ;;  %v2089_v49 = vadd.f32 %v13101_v18, %v12268_v35  ;;  %v3150_v59 = vand.u32 2147483647, %v13199_v56 }
 0x4a4   :  { %7585 = vst [vmem:[%s16914_s12 + $0x480] sm:$0xff] %v4917_v52  ;;  %v4918_v20 = vadd.f32 %v4552_v51, %v2870_v57  ;;  %v4158_v7 = vadd.f32 1.0, %v9263_v46  ;;  %v2000_v52 = vadd.f32 %v13099_v23, %v12266_v34  ;;  %v2877_v57 = vmax.f32 %v13091_v33, 0.0  ;;  %6709 = vmatpush.bf16.msrb.mxu1 %v8901_v11  ;;  %v13210_v18 = vpop.f32.mrf.mxu2 }
 0x4a5   :  { %8230 = vmatmul.msk.bf16.gmra.mxu2 %vm170_vm0, %v10955_v48  ;;  %8246 = vmatmul.msk.bf16.gmra.mxu3 %vm170_vm0, %v10955_v48  ;;  %v9265_v31 = vpop.eup %9264  ;;  %9272 = vlog2.f32 %v4157_v2  ;;  %v13193_v51 = vadd.f32 -5.0, %v1819_v27  ;;  %v2878_v46 = vmax.f32 %v13093_v40, 0.0  ;;  %v3408_v2 = vsub.f32 0.0, %v3152_v63 }
 0x4a6   :  { %8262 = vmatmul.msk.bf16.gmra.mxu0 %vm170_vm0, %v10955_v48  ;;  %8278 = vmatmul.msk.bf16.gmra.mxu1 %vm170_vm0, %v10955_v48  ;;  %v9267_v58 = vpop.eup %9266  ;;  %v4570_v25 = vmul.f32 0.6931472, %v9265_v31  ;;  %7586 = vst [vmem:[%s16914_s12 + $0x488] sm:$0xff] %v4918_v20  ;;  %v2880_v48 = vmax.f32 %v13062_v29, 0.0  ;;  %9274 = vlog2.f32 %v4158_v7  ;;  %v2887_v7 = vmax.f32 %v13108_v19, 0.0 }
 0x4a7   :  { %v9269_v44 = vpop.eup %9268  ;;  %v4167_v21 = vadd.f32 1.0, %v9267_v58  ;;  %9276 = vpow2.f32 %v3813_v45  ;;  %v3149_v37 = vand.u32 2147483647, %v13193_v51  ;;  %v2888_v40 = vmax.f32 %v13114_v24, 0.0 }
 0x4a8   :  { %v9271_v8 = vpop.eup %9270  ;;  %v4927_v17 = vadd.f32 %v4570_v25, %v2879_v3  ;;  %v4572_v60 = vmul.f32 0.6931472, %v9269_v44  ;;  %v13201_v3 = vadd.f32 -5.0, %v2000_v52  ;;  %v3835_v45 = vmul.f32 1.442695, %v3408_v2 }
 0x4a9   :  { %9278 = vlog2.f32 %v4167_v21  ;;  %v4168_v14 = vadd.f32 1.0, %v9271_v8  ;;  %v3405_v30 = vsub.f32 0.0, %v3149_v37  ;;  %v3406_v21 = vsub.f32 0.0, %v3150_v59  ;;  %v13212_v8 = vpop.f32.mrf.mxu3 }
 0x4aa   :  { %7595 = vst [vmem:[%s16914_s12 + $0x4d0] sm:$0xff] %v4927_v17  ;;  %v4928_v29 = vadd.f32 %v4572_v60, %v2880_v48  ;;  %9280 = vpow2.f32 %v3815_v4  ;;  %v3159_v4 = vand.u32 2147483647, %v13201_v3  ;;  %v13217_v60 = vadd.f32 -5.0, %v2089_v49  ;;  %v13222_v52 = vpop.f32.mrf.mxu0 }
 0x4ab   :  { %9282 = vlog2.f32 %v4168_v14  ;;  %v9273_v15 = vpop.eup %9272  ;;  %v3829_v17 = vmul.f32 1.442695, %v3405_v30  ;;  %v2002_v37 = vadd.f32 %v13134_v28, %v12266_v34  ;;  %v2091_v28 = vadd.f32 %v13136_v10, %v12268_v35 }
 0x4ac   :  { %7596 = vst [vmem:[%s16914_s12 + $0x4d8] sm:$0xff] %v4928_v29  ;;  %9284 = vpow2.f32 %v3833_v12  ;;  %v9275_v23 = vpop.eup %9274  ;;  %v4566_v33 = vmul.f32 0.6931472, %v9273_v15  ;;  %v3831_v29 = vmul.f32 1.442695, %v3406_v21  ;;  %v3415_v11 = vsub.f32 0.0, %v3159_v4 }
 0x4ad   :  { %v9277_v31 = vpop.eup %9276  ;;  %v4568_v20 = vmul.f32 0.6931472, %v9275_v23  ;;  %v3160_v15 = vand.u32 2147483647, %v13217_v60  ;;  %v1822_v23 = vadd.f32 %v13117_v54, %v12280_v41  ;;  %v2885_v54 = vmax.f32 %v13141_v13, 0.0  ;;  %v13255_v13 = vpop.f32.mrf.mxu2 }
 0x4ae   :  { %v4925_v58 = vadd.f32 %v4566_v33, %v2877_v57  ;;  %v4165_v25 = vadd.f32 1.0, %v9277_v31  ;;  %v13224_v57 = vpop.f32.mrf.mxu1  ;;  %v1911_v33 = vadd.f32 %v13119_v39, %v12282_v42  ;;  %v2886_v39 = vmax.f32 %v13146_v5, 0.0 }
 0x4af   :  { %v9279_v43 = vpop.eup %9278  ;;  %v4926_v44 = vadd.f32 %v4568_v20, %v2878_v46  ;;  %v3849_v46 = vmul.f32 1.442695, %v3415_v11  ;;  %v3416_v2 = vsub.f32 0.0, %v3160_v15  ;;  %v13243_v31 = vadd.f32 -5.0, %v1822_v23 }
 0x4b0   :  { %v9281_v53 = vpop.eup %9280  ;;  %v4586_v48 = vmul.f32 0.6931472, %v9279_v43  ;;  %7593 = vst [vmem:[%s16914_s12 + $0x4c0] sm:$0xff] %v4925_v58  ;;  %9286 = vlog2.f32 %v4165_v25  ;;  %v13245_v20 = vadd.f32 -5.0, %v1911_v33  ;;  %v13277_v33 = vadd.f32 -5.0, %v2091_v28 }
 0x4b1   :  { %v9283_v19 = vpop.eup %9282  ;;  %v4166_v24 = vadd.f32 1.0, %v9281_v53  ;;  %7594 = vst [vmem:[%s16914_s12 + $0x4c8] sm:$0xff] %v4926_v44  ;;  %9288 = vpow2.f32 %v3835_v45  ;;  %v3851_v59 = vmul.f32 1.442695, %v3416_v2  ;;  %v3157_v25 = vand.u32 2147483647, %v13243_v31  ;;  %v13257_v21 = vpop.f32.mrf.mxu3 }
 0x4b2   :  { %v9285_v12 = vpop.eup %9284  ;;  %v4935_v14 = vadd.f32 %v4586_v48, %v2887_v7  ;;  %v4588_v27 = vmul.f32 0.6931472, %v9283_v19  ;;  %v13250_v45 = vadd.f32 -5.0, %v2002_v37  ;;  %v3158_v48 = vand.u32 2147483647, %v13245_v20 }
 0x4b3   :  { %9290 = vlog2.f32 %v4166_v24  ;;  %v4175_v9 = vadd.f32 1.0, %v9285_v12  ;;  %v3413_v10 = vsub.f32 0.0, %v3157_v25  ;;  %v1824_v19 = vadd.f32 %v13153_v22, %v12280_v41 }
 0x4b4   :  { %7603 = vst [vmem:[%s16914_s12 + $0x510] sm:$0xff] %v4935_v14  ;;  %v4936_v63 = vadd.f32 %v4588_v27, %v2888_v40  ;;  %9292 = vpow2.f32 %v3829_v17  ;;  %v2895_v12 = vmax.f32 %v13149_v32, 0.0  ;;  %v3414_v27 = vsub.f32 0.0, %v3158_v48 }
 0x4b5   :  { %9294 = vlog2.f32 %v4175_v9  ;;  %8231 = vmatmul.msk.bf16.gmra.mxu2 %vm170_vm0, %v10856_v55  ;;  %8247 = vmatmul.msk.bf16.gmra.mxu3 %vm170_vm0, %v10856_v55  ;;  %v3845_v9 = vmul.f32 1.442695, %v3413_v10  ;;  %v3167_v11 = vand.u32 2147483647, %v13250_v45  ;;  %v13279_v2 = vadd.f32 -5.0, %v1824_v19 }
 0x4b6   :  { %8263 = vmatmul.msk.bf16.gmra.mxu0 %vm170_vm0, %v10856_v55  ;;  %8279 = vmatmul.msk.bf16.gmra.mxu1 %vm170_vm0, %v10856_v55  ;;  %7604 = vst [vmem:[%s16914_s12 + $0x518] sm:$0xff] %v4936_v63  ;;  %9296 = vpow2.f32 %v3831_v29  ;;  %v9287_v49 = vpop.eup %9286  ;;  %v13270_v63 = vpop.f32.mrf.mxu0  ;;  %v3847_v23 = vmul.f32 1.442695, %v3414_v27  ;;  %v3168_v25 = vand.u32 2147483647, %v13277_v33 }
 0x4b7   :  { %9298 = vpow2.f32 %v3849_v46  ;;  %v9289_v7 = vpop.eup %9288  ;;  %v4582_v40 = vmul.f32 0.6931472, %v9287_v49  ;;  %v13272_v15 = vpop.f32.mrf.mxu1  ;;  %v3423_v32 = vsub.f32 0.0, %v3167_v11  ;;  %v2896_v49 = vmax.f32 %v13176_v1, 0.0  ;;  %v8876_v11 = vld [vmem:[#allocation6 + $0x28] sm:$0xff] }
 0x4b8   :  { %v4176_v58 = vadd.f32 1.0, %v9289_v7  ;;  %9300 = vpow2.f32 %v3851_v59  ;;  %v1913_v7 = vadd.f32 %v13155_v50, %v12282_v42  ;;  %v2094_v1 = vadd.f32 %v13182_v36, %v12268_v35  ;;  %v13306_v27 = vpop.f32.mrf.mxu2  ;;  %6443 = vmatpush.bf16.msrb.mxu2 %v8876_v11 }
 0x4b9   :  { %v9291_v43 = vpop.eup %9290  ;;  %v4933_v53 = vadd.f32 %v4582_v40, %v2885_v54  ;;  %v2005_v54 = vadd.f32 %v13180_v62, %v12266_v34  ;;  %v3165_v50 = vand.u32 2147483647, %v13279_v2 }
 0x4ba   :  { %v9293_v30 = vpop.eup %9292  ;;  %v4584_v44 = vmul.f32 0.6931472, %v9291_v43  ;;  %9302 = vlog2.f32 %v4176_v58  ;;  %v3865_v43 = vmul.f32 1.442695, %v3423_v32 }
 0x4bb   :  { %v9295_v5 = vpop.eup %9294  ;;  %v4173_v4 = vadd.f32 1.0, %v9293_v30  ;;  %7601 = vst [vmem:[%s16914_s12 + $0x500] sm:$0xff] %v4933_v53  ;;  %v13294_v30 = vadd.f32 -5.0, %v1913_v7  ;;  %v13296_v62 = vadd.f32 -5.0, %v2005_v54  ;;  %v3421_v10 = vsub.f32 0.0, %v3165_v50  ;;  %v8884_v7 = vld [vmem:[#allocation6 + $0x68] sm:$0xff] }
 0x4bc   :  { %v9297_v24 = vpop.eup %9296  ;;  %v4934_v17 = vadd.f32 %v4584_v44, %v2886_v39  ;;  %v4602_v14 = vmul.f32 0.6931472, %v9295_v5  ;;  %v2893_v39 = vmax.f32 %v13193_v51, 0.0  ;;  %v3424_v44 = vsub.f32 0.0, %v3168_v25  ;;  %6532 = vmatpush.bf16.msrb.mxu3 %v8884_v7 }
 0x4bd   :  { %v9299_v29 = vpop.eup %9298  ;;  %9304 = vlog2.f32 %v4173_v4  ;;  %v4174_v55 = vadd.f32 1.0, %v9297_v24  ;;  %v2894_v5 = vmax.f32 %v13199_v56, 0.0  ;;  %v2903_v4 = vmax.f32 %v13201_v3, 0.0 }
 0x4be   :  { %7602 = vst [vmem:[%s16914_s12 + $0x508] sm:$0xff] %v4934_v17  ;;  %v4943_v22 = vadd.f32 %v4602_v14, %v2895_v12  ;;  %v4183_v46 = vadd.f32 1.0, %v9299_v29  ;;  %v9301_v37 = vpop.eup %9300  ;;  %v3166_v36 = vand.u32 2147483647, %v13294_v30  ;;  %v3867_v12 = vmul.f32 1.442695, %v3424_v44  ;;  %v13308_v29 = vpop.f32.mrf.mxu3 }
 0x4bf   :  { %9306 = vlog2.f32 %v4174_v55  ;;  %v4184_v59 = vadd.f32 1.0, %v9301_v37  ;;  %v13304_v14 = vadd.f32 -5.0, %v2094_v1  ;;  %v3861_v3 = vmul.f32 1.442695, %v3421_v10 }
 0x4c0   :  { %7611 = vst [vmem:[%s16914_s12 + $0x550] sm:$0xff] %v4943_v22  ;;  %9308 = vlog2.f32 %v4183_v46  ;;  %v9303_v40 = vpop.eup %9302  ;;  %v1827_v22 = vadd.f32 %v13210_v18, %v12280_v41  ;;  %v13312_v46 = vpop.f32.mrf.mxu0  ;;  %v3175_v18 = vand.u32 2147483647, %v13296_v62  ;;  %v2901_v10 = vmax.f32 %v13243_v31, 0.0 }
 0x4c1   :  { %9310 = vpow2.f32 %v3845_v9  ;;  %v4604_v58 = vmul.f32 0.6931472, %v9303_v40  ;;  %v3422_v9 = vsub.f32 0.0, %v3166_v36  ;;  %v3176_v50 = vand.u32 2147483647, %v13304_v14 }
 0x4c2   :  { %9312 = vpow2.f32 %v3847_v23  ;;  %v13314_v23 = vpop.f32.mrf.mxu1  ;;  %v3431_v1 = vsub.f32 0.0, %v3175_v18  ;;  %v13332_v44 = vadd.f32 -5.0, %v1827_v22  ;;  %v1829_v7 = vadd.f32 %v13255_v13, %v12280_v41 }
 0x4c3   :  { %v9305_v28 = vpop.eup %9304  ;;  %9314 = vlog2.f32 %v4184_v59  ;;  %v4944_v53 = vadd.f32 %v4604_v58, %v2896_v49  ;;  %v3863_v59 = vmul.f32 1.442695, %v3422_v9  ;;  %v2904_v58 = vmax.f32 %v13217_v60, 0.0 }
 0x4c4   :  { %v4598_v51 = vmul.f32 0.6931472, %v9305_v28  ;;  %9316 = vpow2.f32 %v3865_v43  ;;  %v1916_v60 = vadd.f32 %v13212_v8, %v12282_v42  ;;  %v3173_v36 = vand.u32 2147483647, %v13332_v44 }
 0x4c5   :  { %v9307_v48 = vpop.eup %9306  ;;  %7612 = vst [vmem:[%s16914_s12 + $0x558] sm:$0xff] %v4944_v53  ;;  %9318 = vpow2.f32 %v3867_v12 }
 0x4c6   :  { %v9309_v19 = vpop.eup %9308  ;;  %v4941_v24 = vadd.f32 %v4598_v51, %v2893_v39  ;;  %v4600_v17 = vmul.f32 0.6931472, %v9307_v48  ;;  %8264 = vmatmul.msk.bf16.gmra.mxu0 %vm170_vm0, %v10872_v6  ;;  %8280 = vmatmul.msk.bf16.gmra.mxu1 %vm170_vm0, %v10872_v6  ;;  %9320 = vpow2.f32 %v3861_v3  ;;  %v3881_v51 = vmul.f32 1.442695, %v3431_v1 }
 0x4c7   :  { %v9311_v56 = vpop.eup %9310  ;;  %v4618_v55 = vmul.f32 0.6931472, %v9309_v19  ;;  %v3432_v48 = vsub.f32 0.0, %v3176_v50  ;;  %v3429_v3 = vsub.f32 0.0, %v3173_v36  ;;  %v13377_v36 = vadd.f32 -5.0, %v1829_v7 }
 0x4c8   :  { %v9313_v32 = vpop.eup %9312  ;;  %7609 = vst [vmem:[%s16914_s12 + $0x540] sm:$0xff] %v4941_v24  ;;  %v4942_v37 = vadd.f32 %v4600_v17, %v2894_v5  ;;  %v4181_v49 = vadd.f32 1.0, %v9311_v56  ;;  %v2007_v5 = vadd.f32 %v13222_v52, %v12266_v34  ;;  %v2902_v24 = vmax.f32 %v13245_v20, 0.0  ;;  %v13352_v20 = vpop.f32.mrf.mxu2  ;;  %8232 = vmatmul.msk.bf16.gmra.mxu2 %vm170_vm0, %v10872_v6 }
 0x4c9   :  { %v9315_v54 = vpop.eup %9314  ;;  %v4951_v40 = vadd.f32 %v4618_v55, %v2903_v4  ;;  %v4182_v39 = vadd.f32 1.0, %v9313_v32  ;;  %v3883_v12 = vmul.f32 1.442695, %v3432_v48  ;;  %v13344_v56 = vadd.f32 -5.0, %v1916_v60 }
 0x4ca   :  { %v9317_v43 = vpop.eup %9316  ;;  %7610 = vst [vmem:[%s16914_s12 + $0x548] sm:$0xff] %v4942_v37  ;;  %v4620_v25 = vmul.f32 0.6931472, %v9315_v54  ;;  %9322 = vlog2.f32 %v4181_v49  ;;  %v2911_v52 = vmax.f32 %v13250_v45, 0.0  ;;  %v13347_v9 = vadd.f32 -5.0, %v2007_v5  ;;  %v13354_v37 = vpop.f32.mrf.mxu3  ;;  %8248 = vmatmul.msk.bf16.gmra.mxu3 %vm170_vm0, %v10872_v6  ;;  %v8900_v5 = vld [vmem:[#allocation6 + $0xe8] sm:$0xff] }
 0x4cb   :  { %7619 = vst [vmem:[%s16914_s12 + $0x590] sm:$0xff] %v4951_v40  ;;  %9324 = vlog2.f32 %v4182_v39  ;;  %v4191_v28 = vadd.f32 1.0, %v9317_v43  ;;  %v9319_v4 = vpop.eup %9318  ;;  %v3174_v31 = vand.u32 2147483647, %v13344_v56  ;;  %v2096_v32 = vadd.f32 %v13224_v57, %v12268_v35  ;;  %v13362_v43 = vpop.f32.mrf.mxu0  ;;  %6710 = vmatpush.bf16.msrb.mxu1 %v8900_v5 }
 0x4cc   :  { %v4952_v53 = vadd.f32 %v4620_v25, %v2904_v58  ;;  %9326 = vpow2.f32 %v3863_v59  ;;  %v9321_v19 = vpop.eup %9320  ;;  %v4192_v17 = vadd.f32 1.0, %v9319_v4  ;;  %v3877_v18 = vmul.f32 1.442695, %v3429_v3  ;;  %v8892_v59 = vld [vmem:[#allocation6 + $0xa8] sm:$0xff]  ;;  %v13364_v58 = vpop.f32.mrf.mxu1 }
 0x4cd   :  { %9328 = vlog2.f32 %v4191_v28  ;;  %v4189_v55 = vadd.f32 1.0, %v9321_v19  ;;  %v3430_v39 = vsub.f32 0.0, %v3174_v31  ;;  %v3183_v28 = vand.u32 2147483647, %v13347_v9  ;;  %6621 = vmatpush.bf16.msrb.mxu0 %v8892_v59 }
 0x4ce   :  { %7620 = vst [vmem:[%s16914_s12 + $0x598] sm:$0xff] %v4952_v53  ;;  %9330 = vpow2.f32 %v3881_v51  ;;  %v2912_v51 = vmax.f32 %v13277_v33, 0.0  ;;  %v13374_v60 = vadd.f32 -5.0, %v2096_v32  ;;  %v1918_v19 = vadd.f32 %v13257_v21, %v12282_v42 }
 0x4cf   :  { %9332 = vlog2.f32 %v4192_v17  ;;  %v3879_v50 = vmul.f32 1.442695, %v3430_v39  ;;  %v3439_v48 = vsub.f32 0.0, %v3183_v28  ;;  %v2910_v33 = vmax.f32 %v13294_v30, 0.0 }
 0x4d0   :  { %v9323_v8 = vpop.eup %9322  ;;  %9334 = vlog2.f32 %v4189_v55  ;;  %v13386_v55 = vadd.f32 -5.0, %v1918_v19  ;;  %v2010_v21 = vadd.f32 %v13270_v63, %v12266_v34  ;;  %v3181_v31 = vand.u32 2147483647, %v13377_v36 }
 0x4d1   :  { %v9325_v11 = vpop.eup %9324  ;;  %v4614_v22 = vmul.f32 0.6931472, %v9323_v8  ;;  %9336 = vpow2.f32 %v3883_v12  ;;  %v3897_v12 = vmul.f32 1.442695, %v3439_v48 }
 0x4d2   :  { %v9327_v45 = vpop.eup %9326  ;;  %v4616_v49 = vmul.f32 0.6931472, %v9325_v11  ;;  %9338 = vpow2.f32 %v3877_v18  ;;  %v3182_v63 = vand.u32 2147483647, %v13386_v55  ;;  %v13403_v59 = vadd.f32 -5.0, %v2010_v21 }
 0x4d3   :  { %v9329_v54 = vpop.eup %9328  ;;  %v4949_v40 = vadd.f32 %v4614_v22, %v2901_v10  ;;  %v4190_v57 = vadd.f32 1.0, %v9327_v45  ;;  %v2909_v10 = vmax.f32 %v13279_v2, 0.0  ;;  %v3184_v2 = vand.u32 2147483647, %v13374_v60 }
 0x4d4   :  { %v9331_v25 = vpop.eup %9330  ;;  %v4950_v1 = vadd.f32 %v4616_v49, %v2902_v24  ;;  %v4634_v6 = vmul.f32 0.6931472, %v9329_v54  ;;  %v2919_v45 = vmax.f32 %v13296_v62, 0.0  ;;  %v3437_v54 = vsub.f32 0.0, %v3181_v31 }
 0x4d5   :  { %7617 = vst [vmem:[%s16914_s12 + $0x580] sm:$0xff] %v4949_v40  ;;  %9340 = vlog2.f32 %v4190_v57  ;;  %v4199_v13 = vadd.f32 1.0, %v9331_v25  ;;  %v9333_v4 = vpop.eup %9332  ;;  %v3440_v18 = vsub.f32 0.0, %v3184_v2  ;;  %v13396_v40 = vpop.f32.mrf.mxu2  ;;  %v2099_v25 = vadd.f32 %v13272_v15, %v12268_v35 }
 0x4d6   :  { %7618 = vst [vmem:[%s16914_s12 + $0x588] sm:$0xff] %v4950_v1  ;;  %v4959_v53 = vadd.f32 %v4634_v6, %v2911_v52  ;;  %v9335_v24 = vpop.eup %9334  ;;  %v4636_v17 = vmul.f32 0.6931472, %v9333_v4  ;;  %v13398_v57 = vpop.f32.mrf.mxu3  ;;  %v3191_v5 = vand.u32 2147483647, %v13403_v59 }
 0x4d7   :  { %9342 = vlog2.f32 %v4199_v13  ;;  %v9337_v8 = vpop.eup %9336  ;;  %v4630_v52 = vmul.f32 0.6931472, %v9335_v24  ;;  %v3899_v62 = vmul.f32 1.442695, %v3440_v18  ;;  %v13407_v1 = vpop.f32.mrf.mxu0  ;;  %8265 = vmatmul.msk.bf16.gmra.mxu0 %vm170_vm0, %v10888_v26  ;;  %v13419_v19 = vadd.f32 -5.0, %v2099_v25 }
 0x4d8   :  { %7627 = vst [vmem:[%s16914_s12 + $0x5d0] sm:$0xff] %v4959_v53  ;;  %9344 = vpow2.f32 %v3879_v50  ;;  %v9339_v3 = vpop.eup %9338  ;;  %v4960_v11 = vadd.f32 %v4636_v17, %v2912_v51  ;;  %v4200_v22 = vadd.f32 1.0, %v9337_v8  ;;  %v13409_v6 = vpop.f32.mrf.mxu1  ;;  %8281 = vmatmul.msk.bf16.gmra.mxu1 %vm170_vm0, %v10888_v26  ;;  %v3893_v53 = vmul.f32 1.442695, %v3437_v54 }
 0x4d9   :  { %9346 = vpow2.f32 %v3897_v12  ;;  %v4957_v30 = vadd.f32 %v4630_v52, %v2909_v10  ;;  %v4197_v49 = vadd.f32 1.0, %v9339_v3  ;;  %v3438_v51 = vsub.f32 0.0, %v3182_v63 }
 0x4da   :  { %7628 = vst [vmem:[%s16914_s12 + $0x5d8] sm:$0xff] %v4960_v11  ;;  %9348 = vlog2.f32 %v4200_v22  ;;  %v3447_v17 = vsub.f32 0.0, %v3191_v5  ;;  %v2920_v8 = vmax.f32 %v13304_v14, 0.0  ;;  %v2917_v52 = vmax.f32 %v13332_v44, 0.0 }
 0x4db   :  { %v9341_v32 = vpop.eup %9340  ;;  %7625 = vst [vmem:[%s16914_s12 + $0x5c0] sm:$0xff] %v4957_v30  ;;  %9350 = vlog2.f32 %v4197_v49  ;;  %v3895_v10 = vmul.f32 1.442695, %v3438_v51  ;;  %v3192_v2 = vand.u32 2147483647, %v13419_v19  ;;  %v2012_v30 = vadd.f32 %v13312_v46, %v12266_v34 }
 0x4dc   :  { %v4632_v7 = vmul.f32 0.6931472, %v9341_v32  ;;  %9352 = vpow2.f32 %v3899_v62  ;;  %v3913_v11 = vmul.f32 1.442695, %v3447_v17  ;;  %v1921_v32 = vadd.f32 %v13308_v29, %v12282_v42 }
 0x4dd   :  { %v9343_v39 = vpop.eup %9342  ;;  %9354 = vpow2.f32 %v3893_v53 }
 0x4de   :  { %v9345_v28 = vpop.eup %9344  ;;  %v4958_v13 = vadd.f32 %v4632_v7, %v2910_v33  ;;  %v4650_v50 = vmul.f32 0.6931472, %v9343_v39  ;;  %v1832_v33 = vadd.f32 %v13306_v27, %v12280_v41  ;;  %v3448_v27 = vsub.f32 0.0, %v3192_v2  ;;  %v13438_v39 = vpop.f32.mrf.mxu2  ;;  %8233 = vmatmul.msk.bf16.gmra.mxu2 %vm170_vm0, %v10888_v26 }
 0x4df   :  { %v4198_v48 = vadd.f32 1.0, %v9345_v28  ;;  %v9347_v15 = vpop.eup %9346  ;;  %v13436_v63 = vadd.f32 -5.0, %v1921_v32  ;;  %v13440_v62 = vpop.f32.mrf.mxu3  ;;  %8249 = vmatmul.msk.bf16.gmra.mxu3 %vm170_vm0, %v10888_v26  ;;  %v13449_v28 = vadd.f32 -5.0, %v2012_v30  ;;  %v2015_v32 = vadd.f32 %v13362_v43, %v12266_v34 }
 0x4e0   :  { %7626 = vst [vmem:[%s16914_s12 + $0x5c8] sm:$0xff] %v4958_v13  ;;  %v4967_v4 = vadd.f32 %v4650_v50, %v2919_v45  ;;  %v4207_v24 = vadd.f32 1.0, %v9347_v15  ;;  %v9349_v12 = vpop.eup %9348  ;;  %v13429_v22 = vadd.f32 -5.0, %v1832_v33  ;;  %v3915_v54 = vmul.f32 1.442695, %v3448_v27  ;;  %v13459_v17 = vpop.f32.mrf.mxu1 }
 0x4e1   :  { %9356 = vlog2.f32 %v4198_v48  ;;  %v9351_v21 = vpop.eup %9350  ;;  %v4652_v3 = vmul.f32 0.6931472, %v9349_v12  ;;  %v2918_v50 = vmax.f32 %v13344_v56, 0.0  ;;  %v3190_v5 = vand.u32 2147483647, %v13436_v63 }
 0x4e2   :  { %7635 = vst [vmem:[%s16914_s12 + $0x610] sm:$0xff] %v4967_v4  ;;  %9358 = vpow2.f32 %v3895_v10  ;;  %v4646_v31 = vmul.f32 0.6931472, %v9351_v21  ;;  %v9353_v14 = vpop.eup %9352  ;;  %v3189_v44 = vand.u32 2147483647, %v13429_v22  ;;  %v2927_v4 = vmax.f32 %v13347_v9, 0.0 }
 0x4e3   :  { %9360 = vlog2.f32 %v4207_v24  ;;  %v4968_v45 = vadd.f32 %v4652_v3, %v2920_v8  ;;  %v9355_v49 = vpop.eup %9354  ;;  %v4208_v7 = vadd.f32 1.0, %v9353_v14  ;;  %v13457_v24 = vpop.f32.mrf.mxu0  ;;  %v3446_v56 = vsub.f32 0.0, %v3190_v5 }
 0x4e4   :  { %9362 = vpow2.f32 %v3913_v11  ;;  %v4965_v18 = vadd.f32 %v4646_v31, %v2917_v52  ;;  %v4205_v46 = vadd.f32 1.0, %v9355_v49  ;;  %v3445_v25 = vsub.f32 0.0, %v3189_v44 }
 0x4e5   :  { %7636 = vst [vmem:[%s16914_s12 + $0x618] sm:$0xff] %v4968_v45  ;;  %9364 = vlog2.f32 %v4208_v7  ;;  %v3199_v12 = vand.u32 2147483647, %v13449_v28  ;;  %v2101_v8 = vadd.f32 %v13314_v23, %v12268_v35  ;;  %v2928_v9 = vmax.f32 %v13374_v60, 0.0 }
 0x4e6   :  { %7633 = vst [vmem:[%s16914_s12 + $0x600] sm:$0xff] %v4965_v18  ;;  %9366 = vlog2.f32 %v4205_v46  ;;  %v3909_v48 = vmul.f32 1.442695, %v3445_v25  ;;  %v3911_v21 = vmul.f32 1.442695, %v3446_v56  ;;  %v1834_v31 = vadd.f32 %v13352_v20, %v12280_v41 }
 0x4e7   :  { %v9357_v29 = vpop.eup %9356  ;;  %9368 = vpow2.f32 %v3915_v54  ;;  %v3455_v3 = vsub.f32 0.0, %v3199_v12  ;;  %v13468_v11 = vadd.f32 -5.0, %v2101_v8  ;;  %v2925_v23 = vmax.f32 %v13377_v36, 0.0 }
 0x4e8   :  { %v9359_v13 = vpop.eup %9358  ;;  %v4648_v53 = vmul.f32 0.6931472, %v9357_v29  ;;  %v1923_v60 = vadd.f32 %v13354_v37, %v12282_v42  ;;  %v2926_v45 = vmax.f32 %v13386_v55, 0.0  ;;  %v13482_v7 = vadd.f32 -5.0, %v1834_v31  ;;  %v13505_v56 = vpop.f32.mrf.mxu1  ;;  %8282 = vmatmul.msk.bf16.gmra.mxu1 %vm170_vm0, %v10904_v47  ;;  %v8883_v31 = vld [vmem:[#allocation6 + $0x60] sm:$0xff] }
 0x4e9   :  { %v9361_v51 = vpop.eup %9360  ;;  %v4206_v26 = vadd.f32 1.0, %v9359_v13  ;;  %v3929_v20 = vmul.f32 1.442695, %v3455_v3  ;;  %v3200_v18 = vand.u32 2147483647, %v13468_v11  ;;  %v13486_v46 = vadd.f32 -5.0, %v2015_v32  ;;  %6533 = vmatpush.bf16.msrb.mxu3 %v8883_v31 }
 0x4ea   :  { %v4966_v15 = vadd.f32 %v4648_v53, %v2918_v50  ;;  %v4666_v10 = vmul.f32 0.6931472, %v9361_v51  ;;  %v9363_v33 = vpop.eup %9362  ;;  %v13484_v36 = vadd.f32 -5.0, %v1923_v60  ;;  %v2104_v50 = vadd.f32 %v13364_v58, %v12268_v35 }
 0x4eb   :  { %9370 = vlog2.f32 %v4206_v26  ;;  %v4215_v2 = vadd.f32 1.0, %v9363_v33  ;;  %v9365_v27 = vpop.eup %9364  ;;  %v3456_v55 = vsub.f32 0.0, %v3200_v18  ;;  %v3197_v51 = vand.u32 2147483647, %v13482_v7  ;;  %v13494_v26 = vpop.f32.mrf.mxu2 }
 0x4ec   :  { %7634 = vst [vmem:[%s16914_s12 + $0x608] sm:$0xff] %v4966_v15  ;;  %v4975_v52 = vadd.f32 %v4666_v10, %v2927_v4  ;;  %9372 = vpow2.f32 %v3909_v48  ;;  %v9367_v30 = vpop.eup %9366  ;;  %v4668_v14 = vmul.f32 0.6931472, %v9365_v27  ;;  %v13496_v48 = vpop.f32.mrf.mxu3  ;;  %v2935_v58 = vmax.f32 %v13403_v59, 0.0  ;;  %v8875_v59 = vld [vmem:[#allocation6 + $0x20] sm:$0xff] }
 0x4ed   :  { %9374 = vlog2.f32 %v4215_v2  ;;  %v9369_v44 = vpop.eup %9368  ;;  %v4662_v49 = vmul.f32 0.6931472, %v9367_v30  ;;  %v3931_v4 = vmul.f32 1.442695, %v3456_v55  ;;  %v3198_v10 = vand.u32 2147483647, %v13484_v36  ;;  %v13503_v33 = vpop.f32.mrf.mxu0  ;;  %8266 = vmatmul.msk.bf16.gmra.mxu0 %vm170_vm0, %v10904_v47  ;;  %6444 = vmatpush.bf16.msrb.mxu2 %v8875_v59 }
 0x4ee   :  { %7643 = vst [vmem:[%s16914_s12 + $0x650] sm:$0xff] %v4975_v52  ;;  %9376 = vpow2.f32 %v3911_v21  ;;  %v4976_v29 = vadd.f32 %v4668_v14, %v2928_v9  ;;  %v4216_v37 = vadd.f32 1.0, %v9369_v44  ;;  %v3453_v52 = vsub.f32 0.0, %v3197_v51 }
 0x4ef   :  { %9378 = vpow2.f32 %v3929_v20  ;;  %v4973_v25 = vadd.f32 %v4662_v49, %v2925_v23  ;;  %v3207_v9 = vand.u32 2147483647, %v13486_v46  ;;  %v3454_v21 = vsub.f32 0.0, %v3198_v10 }
 0x4f0   :  { %7644 = vst [vmem:[%s16914_s12 + $0x658] sm:$0xff] %v4976_v29  ;;  %9380 = vlog2.f32 %v4216_v37  ;;  %v13515_v3 = vadd.f32 -5.0, %v2104_v50  ;;  %v3925_v60 = vmul.f32 1.442695, %v3453_v52  ;;  %v1837_v30 = vadd.f32 %v13396_v40, %v12280_v41 }
 0x4f1   :  { %v9371_v54 = vpop.eup %9370  ;;  %7641 = vst [vmem:[%s16914_s12 + $0x640] sm:$0xff] %v4973_v25  ;;  %v3463_v32 = vsub.f32 0.0, %v3207_v9  ;;  %v2936_v44 = vmax.f32 %v13419_v19, 0.0  ;;  %v1926_v40 = vadd.f32 %v13398_v57, %v12282_v42  ;;  %v8891_v9 = vld [vmem:[#allocation6 + $0xa0] sm:$0xff] }
 0x4f2   :  { %v9373_v43 = vpop.eup %9372  ;;  %v4664_v13 = vmul.f32 0.6931472, %v9371_v54  ;;  %v3208_v18 = vand.u32 2147483647, %v13515_v3  ;;  %v13524_v29 = vadd.f32 -5.0, %v1837_v30  ;;  %6622 = vmatpush.bf16.msrb.mxu0 %v8891_v9 }
 0x4f3   :  { %v4213_v53 = vadd.f32 1.0, %v9373_v43  ;;  %v9375_v5 = vpop.eup %9374  ;;  %v3945_v49 = vmul.f32 1.442695, %v3463_v32  ;;  %v2933_v43 = vmax.f32 %v13429_v22, 0.0  ;;  %v13534_v57 = vadd.f32 -5.0, %v1926_v40  ;;  %v13564_v40 = vpop.f32.mrf.mxu1 }
 0x4f4   :  { %v4974_v15 = vadd.f32 %v4664_v13, %v2926_v45  ;;  %v9377_v12 = vpop.eup %9376  ;;  %v4682_v8 = vmul.f32 0.6931472, %v9375_v5  ;;  %v3927_v45 = vmul.f32 1.442695, %v3454_v21  ;;  %v3464_v25 = vsub.f32 0.0, %v3208_v18  ;;  %v13538_v22 = vpop.f32.mrf.mxu3  ;;  %8250 = vmatmul.msk.bf16.gmra.mxu3 %vm170_vm0, %v10904_v47 }
 0x4f5   :  { %9382 = vlog2.f32 %v4213_v53  ;;  %v4214_v2 = vadd.f32 1.0, %v9377_v12  ;;  %v9379_v27 = vpop.eup %9378  ;;  %v2017_v13 = vadd.f32 %v13407_v1, %v12266_v34  ;;  %v2106_v53 = vadd.f32 %v13409_v6, %v12268_v35 }
 0x4f6   :  { %7642 = vst [vmem:[%s16914_s12 + $0x648] sm:$0xff] %v4974_v15  ;;  %9384 = vpow2.f32 %v3931_v4  ;;  %v4983_v23 = vadd.f32 %v4682_v8, %v2935_v58  ;;  %v4223_v14 = vadd.f32 1.0, %v9379_v27  ;;  %v9381_v20 = vpop.eup %9380  ;;  %v3947_v5 = vmul.f32 1.442695, %v3464_v25  ;;  %v13536_v58 = vpop.f32.mrf.mxu2  ;;  %8234 = vmatmul.msk.bf16.gmra.mxu2 %vm170_vm0, %v10904_v47 }
 0x4f7   :  { %9386 = vlog2.f32 %v4214_v2  ;;  %v4684_v54 = vmul.f32 0.6931472, %v9381_v20  ;;  %v3205_v15 = vand.u32 2147483647, %v13524_v29  ;;  %v13547_v4 = vadd.f32 -5.0, %v2017_v13 }
 0x4f8   :  { %7651 = vst [vmem:[%s16914_s12 + $0x690] sm:$0xff] %v4983_v23  ;;  %9388 = vpow2.f32 %v3925_v60  ;;  %v2934_v12 = vmax.f32 %v13436_v63, 0.0  ;;  %v2943_v47 = vmax.f32 %v13449_v28, 0.0  ;;  %v3206_v21 = vand.u32 2147483647, %v13534_v57 }
 0x4f9   :  { %9390 = vlog2.f32 %v4223_v14  ;;  %v4984_v55 = vadd.f32 %v4684_v54, %v2936_v44  ;;  %v3461_v52 = vsub.f32 0.0, %v3205_v15  ;;  %v13555_v63 = vadd.f32 -5.0, %v2106_v53  ;;  %v13562_v54 = vpop.f32.mrf.mxu0 }
 0x4fa   :  { %9392 = vpow2.f32 %v3927_v45  ;;  %v3462_v14 = vsub.f32 0.0, %v3206_v21  ;;  %v3215_v45 = vand.u32 2147483647, %v13547_v4  ;;  %v2944_v44 = vmax.f32 %v13468_v11, 0.0 }
 0x4fb   :  { %v9383_v37 = vpop.eup %9382  ;;  %9394 = vpow2.f32 %v3945_v49  ;;  %7652 = vst [vmem:[%s16914_s12 + $0x698] sm:$0xff] %v4984_v55  ;;  %v3941_v60 = vmul.f32 1.442695, %v3461_v52  ;;  %v1839_v25 = vadd.f32 %v13438_v39, %v12280_v41  ;;  %v1928_v11 = vadd.f32 %v13440_v62, %v12282_v42 }
 0x4fc   :  { %v9385_v19 = vpop.eup %9384  ;;  %v4678_v50 = vmul.f32 0.6931472, %v9383_v37  ;;  %v3943_v49 = vmul.f32 1.442695, %v3462_v14  ;;  %v3471_v18 = vsub.f32 0.0, %v3215_v45  ;;  %v2020_v53 = vadd.f32 %v13457_v24, %v12266_v34 }
 0x4fd   :  { %v4224_v51 = vadd.f32 1.0, %v9385_v19  ;;  %v9387_v1 = vpop.eup %9386  ;;  %v13576_v15 = vadd.f32 -5.0, %v1839_v25  ;;  %v2941_v39 = vmax.f32 %v13482_v7, 0.0  ;;  %v2109_v24 = vadd.f32 %v13459_v17, %v12268_v35 }
 0x4fe   :  { %v4981_v6 = vadd.f32 %v4678_v50, %v2933_v43  ;;  %v9389_v10 = vpop.eup %9388  ;;  %v4680_v8 = vmul.f32 0.6931472, %v9387_v1  ;;  %v3216_v43 = vand.u32 2147483647, %v13555_v63  ;;  %v3961_v55 = vmul.f32 1.442695, %v3471_v18  ;;  %v13593_v14 = vpop.f32.mrf.mxu2 }
 0x4ff   :  { %9396 = vlog2.f32 %v4224_v51  ;;  %v9391_v59 = vpop.eup %9390  ;;  %v4221_v2 = vadd.f32 1.0, %v9389_v10  ;;  %v8899_v50 = vld [vmem:[#allocation6 + $0xe0] sm:$0xff]  ;;  %v13578_v1 = vadd.f32 -5.0, %v1928_v11  ;;  %v13581_v62 = vadd.f32 -5.0, %v2020_v53  ;;  %v13606_v11 = vpop.f32.mrf.mxu1  ;;  %8283 = vmatmul.msk.bf16.gmra.mxu1 %vm170_vm0, %v10920_v0 }
 0x500   :  { %7649 = vst [vmem:[%s16914_s12 + $0x680] sm:$0xff] %v4981_v6  ;;  %9398 = vpow2.f32 %v3947_v5  ;;  %v9393_v31 = vpop.eup %9392  ;;  %v4982_v27 = vadd.f32 %v4680_v8, %v2934_v12  ;;  %v4698_v23 = vmul.f32 0.6931472, %v9391_v59  ;;  %v3472_v5 = vsub.f32 0.0, %v3216_v43  ;;  %6711 = vmatpush.bf16.msrb.mxu1 %v8899_v50 }
 0x501   :  { %v9395_v32 = vpop.eup %9394  ;;  %9400 = vlog2.f32 %v4221_v2  ;;  %v4222_v30 = vadd.f32 1.0, %v9393_v31  ;;  %v2942_v59 = vmax.f32 %v13484_v36, 0.0  ;;  %v2951_v7 = vmax.f32 %v13486_v46, 0.0  ;;  %v13595_v36 = vpop.f32.mrf.mxu3 }
 0x502   :  { %7650 = vst [vmem:[%s16914_s12 + $0x688] sm:$0xff] %v4982_v27  ;;  %v4991_v28 = vadd.f32 %v4698_v23, %v2943_v47  ;;  %v4231_v20 = vadd.f32 1.0, %v9395_v32  ;;  %9402 = vpow2.f32 %v3941_v60  ;;  %v3963_v52 = vmul.f32 1.442695, %v3472_v5  ;;  %v13604_v25 = vpop.f32.mrf.mxu0  ;;  %8267 = vmatmul.msk.bf16.gmra.mxu0 %vm170_vm0, %v10920_v0 }
 0x503   :  { %9404 = vlog2.f32 %v4222_v30  ;;  %v3213_v2 = vand.u32 2147483647, %v13576_v15  ;;  %v3214_v23 = vand.u32 2147483647, %v13578_v1  ;;  %v3223_v30 = vand.u32 2147483647, %v13581_v62 }
 0x504   :  { %7659 = vst [vmem:[%s16914_s12 + $0x6d0] sm:$0xff] %v4991_v28  ;;  %9406 = vlog2.f32 %v4231_v20  ;;  %v13600_v20 = vadd.f32 -5.0, %v2109_v24  ;;  %v1842_v43 = vadd.f32 %v13494_v26, %v12280_v41  ;;  %v2952_v26 = vmax.f32 %v13515_v3, 0.0 }
 0x505   :  { %v9397_v37 = vpop.eup %9396  ;;  %9408 = vpow2.f32 %v3943_v49  ;;  %v3469_v32 = vsub.f32 0.0, %v3213_v2  ;;  %v3470_v28 = vsub.f32 0.0, %v3214_v23  ;;  %v2949_v3 = vmax.f32 %v13524_v29, 0.0 }
 0x506   :  { %v9399_v13 = vpop.eup %9398  ;;  %v4700_v19 = vmul.f32 0.6931472, %v9397_v37  ;;  %9410 = vpow2.f32 %v3961_v55  ;;  %v3479_v37 = vsub.f32 0.0, %v3223_v30  ;;  %v3224_v5 = vand.u32 2147483647, %v13600_v20 }
 0x507   :  { %v4232_v51 = vadd.f32 1.0, %v9399_v13  ;;  %v9401_v6 = vpop.eup %9400  ;;  %v3957_v18 = vmul.f32 1.442695, %v3469_v32  ;;  %v3959_v55 = vmul.f32 1.442695, %v3470_v28  ;;  %v2950_v29 = vmax.f32 %v13534_v57, 0.0 }
 0x508   :  { %v4992_v10 = vadd.f32 %v4700_v19, %v2944_v44  ;;  %v9403_v12 = vpop.eup %9402  ;;  %v4694_v8 = vmul.f32 0.6931472, %v9401_v6  ;;  %v3977_v53 = vmul.f32 1.442695, %v3479_v37  ;;  %v13620_v6 = vadd.f32 -5.0, %v1842_v43 }
 0x509   :  { %9412 = vlog2.f32 %v4232_v51  ;;  %v9405_v9 = vpop.eup %9404  ;;  %v4229_v47 = vadd.f32 1.0, %v9403_v12 }
 0x50a   :  { %7660 = vst [vmem:[%s16914_s12 + $0x6d8] sm:$0xff] %v4992_v10  ;;  %v9407_v21 = vpop.eup %9406  ;;  %v4989_v31 = vadd.f32 %v4694_v8, %v2941_v39  ;;  %v4696_v27 = vmul.f32 0.6931472, %v9405_v9  ;;  %9414 = vpow2.f32 %v3963_v52  ;;  %v1931_v10 = vadd.f32 %v13496_v48, %v12282_v42  ;;  %v13654_v37 = vpop.f32.mrf.mxu0 }
 0x50b   :  { %v9409_v60 = vpop.eup %9408  ;;  %v4714_v17 = vmul.f32 0.6931472, %v9407_v21  ;;  %9416 = vlog2.f32 %v4229_v47  ;;  %v2022_v52 = vadd.f32 %v13503_v33, %v12266_v34  ;;  %v3480_v9 = vsub.f32 0.0, %v3224_v5 }
 0x50c   :  { %7657 = vst [vmem:[%s16914_s12 + $0x6c0] sm:$0xff] %v4989_v31  ;;  %v4990_v46 = vadd.f32 %v4696_v27, %v2942_v59  ;;  %v4230_v45 = vadd.f32 1.0, %v9409_v60  ;;  %v9411_v44 = vpop.eup %9410  ;;  %v3221_v59 = vand.u32 2147483647, %v13620_v6  ;;  %v13631_v48 = vadd.f32 -5.0, %v1931_v10  ;;  %v13639_v60 = vpop.f32.mrf.mxu2  ;;  %8235 = vmatmul.msk.bf16.gmra.mxu2 %vm170_vm0, %v10920_v0 }
 0x50d   :  { %v4999_v49 = vadd.f32 %v4714_v17, %v2951_v7  ;;  %v4239_v19 = vadd.f32 1.0, %v9411_v44  ;;  %v3979_v2 = vmul.f32 1.442695, %v3480_v9  ;;  %v13633_v21 = vadd.f32 -5.0, %v2022_v52  ;;  %v13641_v17 = vpop.f32.mrf.mxu3  ;;  %8251 = vmatmul.msk.bf16.gmra.mxu3 %vm170_vm0, %v10920_v0 }
 0x50e   :  { %7658 = vst [vmem:[%s16914_s12 + $0x6c8] sm:$0xff] %v4990_v46  ;;  %9418 = vlog2.f32 %v4230_v45  ;;  %v2111_v34 = vadd.f32 %v13505_v56, %v12268_v35  ;;  %v3477_v27 = vsub.f32 0.0, %v3221_v59  ;;  %v3222_v23 = vand.u32 2147483647, %v13631_v48 }
 0x50f   :  { %v9413_v13 = vpop.eup %9412  ;;  %7667 = vst [vmem:[%s16914_s12 + $0x710] sm:$0xff] %v4999_v49  ;;  %9420 = vpow2.f32 %v3957_v18  ;;  %v2959_v35 = vmax.f32 %v13547_v4, 0.0  ;;  %v3231_v18 = vand.u32 2147483647, %v13633_v21 }
 0x510   :  { %v4716_v50 = vmul.f32 0.6931472, %v9413_v13  ;;  %v9415_v51 = vpop.eup %9414  ;;  %9422 = vlog2.f32 %v4239_v19  ;;  %v3973_v45 = vmul.f32 1.442695, %v3477_v27  ;;  %v3478_v28 = vsub.f32 0.0, %v3222_v23 }
 0x511   :  { %v9417_v39 = vpop.eup %9416  ;;  %v4240_v8 = vadd.f32 1.0, %v9415_v51  ;;  %9424 = vpow2.f32 %v3959_v55  ;;  %v13652_v0 = vadd.f32 -5.0, %v2111_v34  ;;  %v2960_v13 = vmax.f32 %v13555_v63, 0.0  ;;  %v13660_v55 = vpop.f32.mrf.mxu1 }
 0x512   :  { %v5000_v12 = vadd.f32 %v4716_v50, %v2952_v26  ;;  %v4710_v24 = vmul.f32 0.6931472, %v9417_v39  ;;  %9426 = vpow2.f32 %v3977_v53  ;;  %v3975_v50 = vmul.f32 1.442695, %v3478_v28 }
 0x513   :  { %9428 = vlog2.f32 %v4240_v8  ;;  %v3487_v53 = vsub.f32 0.0, %v3231_v18  ;;  %v2957_v51 = vmax.f32 %v13576_v15, 0.0  ;;  %v3232_v5 = vand.u32 2147483647, %v13652_v0  ;;  %v9977_v15 = vld [vmem:[%s16909_s7 + $0x8] sm:$0xff] }
 0x514   :  { %7668 = vst [vmem:[%s16914_s12 + $0x718] sm:$0xff] %v5000_v12  ;;  %v9419_v7 = vpop.eup %9418  ;;  %v4997_v47 = vadd.f32 %v4710_v24, %v2949_v3  ;;  %9430 = vpow2.f32 %v3979_v2  ;;  %v1844_v63 = vadd.f32 %v13536_v58, %v12280_v41  ;;  %v1933_v8 = vadd.f32 %v13538_v22, %v12282_v42 }
 0x515   :  { %v9421_v33 = vpop.eup %9420  ;;  %v4712_v31 = vmul.f32 0.6931472, %v9419_v7  ;;  %v3993_v12 = vmul.f32 1.442695, %v3487_v53  ;;  %v3488_v3 = vsub.f32 0.0, %v3232_v5  ;;  %v13676_v9 = vperm.slane %v9977_v15, 6 }
 0x516   :  { %v9423_v32 = vpop.eup %9422  ;;  %7665 = vst [vmem:[%s16914_s12 + $0x700] sm:$0xff] %v4997_v47  ;;  %v4237_v56 = vadd.f32 1.0, %v9421_v33  ;;  %v13671_v24 = vadd.f32 -5.0, %v1844_v63  ;;  %v2958_v41 = vmax.f32 %v13578_v1, 0.0  ;;  %v2967_v58 = vmax.f32 %v13581_v62, 0.0 }
 0x517   :  { %v9425_v57 = vpop.eup %9424  ;;  %v4998_v30 = vadd.f32 %v4712_v31, %v2950_v29  ;;  %v4730_v46 = vmul.f32 0.6931472, %v9423_v32  ;;  %v13683_v42 = vadd.f32 -5.0, %v1933_v8  ;;  %v3995_v47 = vmul.f32 1.442695, %v3488_v3 }
 0x518   :  { %v9427_v44 = vpop.eup %9426  ;;  %9432 = vlog2.f32 %v4237_v56  ;;  %v4238_v49 = vadd.f32 1.0, %v9425_v57  ;;  %v13685_v2 = vperm.slane %v9977_v15, 7  ;;  %v3229_v29 = vand.u32 2147483647, %v13671_v24 }
 0x519   :  { %v9429_v43 = vpop.eup %9428  ;;  %7666 = vst [vmem:[%s16914_s12 + $0x708] sm:$0xff] %v4998_v30  ;;  %v5007_v4 = vadd.f32 %v4730_v46, %v2959_v35  ;;  %v4247_v19 = vadd.f32 1.0, %v9427_v44  ;;  %9434 = vpow2.f32 %v3973_v45  ;;  %v3230_v31 = vand.u32 2147483647, %v13683_v42  ;;  %v13693_v35 = vpop.f32.mrf.mxu0  ;;  %8268 = vmatmul.msk.bf16.gmra.mxu0 %vm170_vm0, %v10936_v16 }
 0x51a   :  { %v4732_v26 = vmul.f32 0.6931472, %v9429_v43  ;;  %9436 = vlog2.f32 %v4238_v49  ;;  %v9431_v10 = vpop.eup %9430  ;;  %v13689_v27 = vperm.slane %v9977_v15, 4  ;;  %v2301_v32 = vadd.f32 %v13562_v54, %v13676_v9  ;;  %v13704_v49 = vpop.f32.mrf.mxu1  ;;  %8284 = vmatmul.msk.bf16.gmra.mxu1 %vm170_vm0, %v10936_v16 }
 0x51b   :  { %7675 = vst [vmem:[%s16914_s12 + $0x750] sm:$0xff] %v5007_v4  ;;  %9438 = vlog2.f32 %v4247_v19  ;;  %v4248_v52 = vadd.f32 1.0, %v9431_v10  ;;  %v3485_v30 = vsub.f32 0.0, %v3229_v29  ;;  %v3486_v46 = vsub.f32 0.0, %v3230_v31  ;;  %v8874_v10 = vld [vmem:[#allocation6 + $0x18] sm:$0xff] }
 0x51c   :  { %v5008_v39 = vadd.f32 %v4732_v26, %v2960_v13  ;;  %9440 = vpow2.f32 %v3975_v50  ;;  %v13700_v44 = vadd.f32 -5.0, %v2301_v32  ;;  %v2390_v54 = vadd.f32 %v13564_v40, %v13685_v2  ;;  %v13710_v26 = vpop.f32.mrf.mxu2  ;;  %v13712_v50 = vpop.f32.mrf.mxu3  ;;  %6445 = vmatpush.bf16.msrb.mxu2 %v8874_v10 }
 0x51d   :  { %9442 = vpow2.f32 %v3993_v12  ;;  %v3989_v4 = vmul.f32 1.442695, %v3485_v30  ;;  %v3991_v13 = vmul.f32 1.442695, %v3486_v46  ;;  %v2123_v19 = vadd.f32 %v13593_v14, %v13689_v27 }
 0x51e   :  { %v9433_v59 = vpop.eup %9432  ;;  %7676 = vst [vmem:[%s16914_s12 + $0x758] sm:$0xff] %v5008_v39  ;;  %9444 = vlog2.f32 %v4248_v52  ;;  %v2968_v40 = vmax.f32 %v13600_v20, 0.0  ;;  %v2987_v5 = vand.u32 2147483647, %v13700_v44  ;;  %v13722_v63 = vadd.f32 -5.0, %v2390_v54  ;;  %v8882_v39 = vld [vmem:[#allocation6 + $0x58] sm:$0xff] }
 0x51f   :  { %v9435_v22 = vpop.eup %9434  ;;  %v4726_v7 = vmul.f32 0.6931472, %v9433_v59  ;;  %9446 = vpow2.f32 %v3995_v47  ;;  %v13724_v52 = vadd.f32 -5.0, %v2123_v19  ;;  %v13726_v20 = vperm.slane %v9977_v15, 5  ;;  %6534 = vmatpush.bf16.msrb.mxu3 %v8882_v39 }
 0x520   :  { %v9437_v34 = vpop.eup %9436  ;;  %v4245_v33 = vadd.f32 1.0, %v9435_v22  ;;  %v3243_v8 = vsub.f32 0.0, %v2987_v5  ;;  %v2988_v47 = vand.u32 2147483647, %v13722_v63  ;;  %v2966_v15 = vmax.f32 %v13631_v48, 0.0 }
 0x521   :  { %v9439_v1 = vpop.eup %9438  ;;  %v5005_v23 = vadd.f32 %v4726_v7, %v2957_v51  ;;  %v4728_v62 = vmul.f32 0.6931472, %v9437_v34  ;;  %v2212_v34 = vadd.f32 %v13595_v36, %v13726_v20  ;;  %v2303_v36 = vadd.f32 %v13604_v25, %v13676_v9 }
 0x522   :  { %v9441_v56 = vpop.eup %9440  ;;  %v4746_v57 = vmul.f32 0.6931472, %v9439_v1  ;;  %9448 = vlog2.f32 %v4245_v33  ;;  %v3505_v7 = vmul.f32 1.442695, %v3243_v8  ;;  %v3244_v31 = vsub.f32 0.0, %v2988_v47 }
 0x523   :  { %7673 = vst [vmem:[%s16914_s12 + $0x740] sm:$0xff] %v5005_v23  ;;  %v5006_v45 = vadd.f32 %v4728_v62, %v2958_v41  ;;  %v4246_v28 = vadd.f32 1.0, %v9441_v56  ;;  %v9443_v18 = vpop.eup %9442  ;;  %v2965_v41 = vmax.f32 %v13620_v6, 0.0  ;;  %v2985_v6 = vand.u32 2147483647, %v13724_v52 }
 0x524   :  { %v5015_v43 = vadd.f32 %v4746_v57, %v2967_v58  ;;  %v9445_v53 = vpop.eup %9444  ;;  %v4255_v51 = vadd.f32 1.0, %v9443_v18  ;;  %v13737_v1 = vadd.f32 -5.0, %v2212_v34  ;;  %v2392_v56 = vadd.f32 %v13606_v11, %v13685_v2  ;;  %v13750_v25 = vpop.f32.mrf.mxu3  ;;  %8252 = vmatmul.msk.bf16.gmra.mxu3 %vm170_vm0, %v10936_v16 }
 0x525   :  { %7674 = vst [vmem:[%s16914_s12 + $0x748] sm:$0xff] %v5006_v45  ;;  %9450 = vlog2.f32 %v4246_v28  ;;  %v4748_v14 = vmul.f32 0.6931472, %v9445_v53  ;;  %v9447_v12 = vpop.eup %9446  ;;  %v3241_v32 = vsub.f32 0.0, %v2985_v6  ;;  %v2975_v48 = vmax.f32 %v13633_v21, 0.0 }
 0x526   :  { %7683 = vst [vmem:[%s16914_s12 + $0x790] sm:$0xff] %v5015_v43  ;;  %9452 = vpow2.f32 %v3989_v4  ;;  %v4256_v58 = vadd.f32 1.0, %v9447_v12  ;;  %v3507_v46 = vmul.f32 1.442695, %v3244_v31  ;;  %v2986_v43 = vand.u32 2147483647, %v13737_v1  ;;  %v13748_v4 = vpop.f32.mrf.mxu2  ;;  %8236 = vmatmul.msk.bf16.gmra.mxu2 %vm170_vm0, %v10936_v16 }
 0x527   :  { %9454 = vlog2.f32 %v4255_v51  ;;  %v5016_v59 = vadd.f32 %v4748_v14, %v2968_v40  ;;  %v3501_v18 = vmul.f32 1.442695, %v3241_v32  ;;  %v13756_v21 = vadd.f32 -5.0, %v2303_v36  ;;  %v8890_v51 = vld [vmem:[#allocation6 + $0x98] sm:$0xff] }
 0x528   :  { %v9449_v3 = vpop.eup %9448  ;;  %9456 = vpow2.f32 %v3991_v13  ;;  %v13758_v13 = vadd.f32 -5.0, %v2392_v56  ;;  %v3242_v40 = vsub.f32 0.0, %v2986_v43  ;;  %v2976_v14 = vmax.f32 %v13652_v0, 0.0  ;;  %6623 = vmatpush.bf16.msrb.mxu0 %v8890_v51  ;;  %v8898_v32 = vld [vmem:[#allocation6 + $0xd8] sm:$0xff] }
 0x529   :  { %v4742_v22 = vmul.f32 0.6931472, %v9449_v3  ;;  %7684 = vst [vmem:[%s16914_s12 + $0x798] sm:$0xff] %v5016_v59  ;;  %9458 = vlog2.f32 %v4256_v58  ;;  %v2995_v16 = vand.u32 2147483647, %v13756_v21  ;;  %v2214_v0 = vadd.f32 %v13641_v17, %v13726_v20  ;;  %6712 = vmatpush.bf16.msrb.mxu1 %v8898_v32 }
 0x52a   :  { %9460 = vpow2.f32 %v3505_v7  ;;  %v3503_v12 = vmul.f32 1.442695, %v3242_v40  ;;  %v2996_v59 = vand.u32 2147483647, %v13758_v13  ;;  %v2306_v58 = vadd.f32 %v13654_v37, %v13676_v9 }
 0x52b   :  { %v9451_v33 = vpop.eup %9450  ;;  %v5013_v29 = vadd.f32 %v4742_v22, %v2965_v41  ;;  %v3251_v3 = vsub.f32 0.0, %v2995_v16  ;;  %v2125_v41 = vadd.f32 %v13639_v60, %v13689_v27  ;;  %v2395_v22 = vadd.f32 %v13660_v55, %v13685_v2  ;;  %v13789_v55 = vpop.f32.mrf.mxu1 }
 0x52c   :  { %v9453_v23 = vpop.eup %9452  ;;  %v4744_v62 = vmul.f32 0.6931472, %v9451_v33  ;;  %v3252_v34 = vsub.f32 0.0, %v2996_v59  ;;  %v2973_v6 = vmax.f32 %v13671_v24, 0.0  ;;  %v13783_v33 = vadd.f32 -5.0, %v2214_v0  ;;  %v13813_v0 = vpop.f32.mrf.mxu3 }
 0x52d   :  { %v9455_v57 = vpop.eup %9454  ;;  %7681 = vst [vmem:[%s16914_s12 + $0x780] sm:$0xff] %v5013_v29  ;;  %v4253_v30 = vadd.f32 1.0, %v9453_v23  ;;  %v3521_v47 = vmul.f32 1.442695, %v3251_v3  ;;  %v13785_v37 = vadd.f32 -5.0, %v2306_v58  ;;  %v13787_v29 = vpop.f32.mrf.mxu0 }
 0x52e   :  { %v9457_v45 = vpop.eup %9456  ;;  %v5014_v28 = vadd.f32 %v4744_v62, %v2966_v15  ;;  %v4762_v54 = vmul.f32 0.6931472, %v9455_v57  ;;  %v13780_v15 = vadd.f32 -5.0, %v2125_v41  ;;  %v3523_v62 = vmul.f32 1.442695, %v3252_v34  ;;  %v13811_v41 = vpop.f32.mrf.mxu2 }
 0x52f   :  { %9462 = vlog2.f32 %v4253_v30  ;;  %v4254_v11 = vadd.f32 1.0, %v9457_v45  ;;  %v9459_v19 = vpop.eup %9458  ;;  %v2974_v57 = vmax.f32 %v13683_v42, 0.0  ;;  %v13794_v45 = vadd.f32 -5.0, %v2395_v22 }
 0x530   :  { %7682 = vst [vmem:[%s16914_s12 + $0x788] sm:$0xff] %v5014_v28  ;;  %v5023_v53 = vadd.f32 %v4762_v54, %v2975_v48  ;;  %9464 = vpow2.f32 %v3507_v46  ;;  %v9461_v5 = vpop.eup %9460  ;;  %v4764_v10 = vmul.f32 0.6931472, %v9459_v19  ;;  %v2993_v24 = vand.u32 2147483647, %v13780_v15 }
 0x531   :  { %9466 = vlog2.f32 %v4254_v11  ;;  %v4011_v39 = vadd.f32 1.0, %v9461_v5  ;;  %v2994_v46 = vand.u32 2147483647, %v13783_v33  ;;  %v3003_v42 = vand.u32 2147483647, %v13785_v37 }
 0x532   :  { %7691 = vst [vmem:[%s16914_s12 + $0x7d0] sm:$0xff] %v5023_v53  ;;  %9468 = vpow2.f32 %v3501_v18  ;;  %v5024_v8 = vadd.f32 %v4764_v10, %v2976_v14  ;;  %v3249_v18 = vsub.f32 0.0, %v2993_v24  ;;  %v2731_v11 = vmax.f32 %v13700_v44, 0.0 }
 0x533   :  { %9470 = vlog2.f32 %v4011_v39  ;;  %v3250_v53 = vsub.f32 0.0, %v2994_v46  ;;  %v3259_v5 = vsub.f32 0.0, %v3003_v42  ;;  %v2128_v14 = vadd.f32 %v13710_v26, %v13689_v27 }
 0x534   :  { %7692 = vst [vmem:[%s16914_s12 + $0x7d8] sm:$0xff] %v5024_v8  ;;  %9472 = vpow2.f32 %v3503_v12  ;;  %v3517_v51 = vmul.f32 1.442695, %v3249_v18  ;;  %v3004_v12 = vand.u32 2147483647, %v13794_v45  ;;  %v2217_v44 = vadd.f32 %v13712_v50, %v13726_v20 }
 0x535   :  { %v9463_v7 = vpop.eup %9462  ;;  %9474 = vpow2.f32 %v3521_v47  ;;  %v3519_v39 = vmul.f32 1.442695, %v3250_v53  ;;  %v3537_v3 = vmul.f32 1.442695, %v3259_v5  ;;  %v13809_v59 = vadd.f32 -5.0, %v2128_v14 }
 0x536   :  { %v9465_v60 = vpop.eup %9464  ;;  %v4758_v17 = vmul.f32 0.6931472, %v9463_v7  ;;  %v3260_v26 = vsub.f32 0.0, %v3004_v12  ;;  %v13818_v22 = vadd.f32 -5.0, %v2217_v44  ;;  %v2732_v50 = vmax.f32 %v13722_v63, 0.0 }
 0x537   :  { %v9467_v31 = vpop.eup %9466  ;;  %v4012_v23 = vadd.f32 1.0, %v9465_v60  ;;  %v3001_v34 = vand.u32 2147483647, %v13809_v59  ;;  %v13822_v60 = vpop.f32.mrf.mxu0  ;;  %8269 = vmatmul.msk.bf16.gmra.mxu0 %vm170_vm0, %v10952_v38  ;;  %v2730_v46 = vmax.f32 %v13737_v1, 0.0  ;;  %v2740_v12 = vmax.f32 %v13758_v13, 0.0 }
 0x538   :  { %v9469_v36 = vpop.eup %9468  ;;  %v5021_v56 = vadd.f32 %v4758_v17, %v2973_v6  ;;  %v4760_v48 = vmul.f32 0.6931472, %v9467_v31  ;;  %v13824_v6 = vpop.f32.mrf.mxu1  ;;  %8285 = vmatmul.msk.bf16.gmra.mxu1 %vm170_vm0, %v10952_v38  ;;  %v2729_v31 = vmax.f32 %v13724_v52, 0.0  ;;  %v3539_v63 = vmul.f32 1.442695, %v3260_v26 }
 0x539   :  { %9476 = vlog2.f32 %v4012_v23  ;;  %v4009_v30 = vadd.f32 1.0, %v9469_v36  ;;  %v9471_v28 = vpop.eup %9470  ;;  %v3257_v36 = vsub.f32 0.0, %v3001_v34 }
 0x53a   :  { %7689 = vst [vmem:[%s16914_s12 + $0x7c0] sm:$0xff] %v5021_v56  ;;  %v5022_v54 = vadd.f32 %v4760_v48, %v2974_v57  ;;  %9478 = vpow2.f32 %v3523_v62  ;;  %v9473_v43 = vpop.eup %9472  ;;  %v4274_v19 = vmul.f32 0.6931472, %v9471_v28  ;;  %v3002_v56 = vand.u32 2147483647, %v13818_v22 }
 0x53b   :  { %9480 = vlog2.f32 %v4009_v30  ;;  %v4010_v40 = vadd.f32 1.0, %v9473_v43  ;;  %v9475_v10 = vpop.eup %9474  ;;  %v2308_v57 = vadd.f32 %v13693_v35, %v13676_v9  ;;  %v3533_v52 = vmul.f32 1.442695, %v3257_v36 }
 0x53c   :  { %7690 = vst [vmem:[%s16914_s12 + $0x7c8] sm:$0xff] %v5022_v54  ;;  %v4779_v16 = vadd.f32 %v4274_v19, %v2731_v11  ;;  %v4019_v8 = vadd.f32 1.0, %v9475_v10  ;;  %v3258_v54 = vsub.f32 0.0, %v3002_v56  ;;  %v2397_v43 = vadd.f32 %v13704_v49, %v13685_v2  ;;  %v13845_v11 = vpop.f32.mrf.mxu2  ;;  %v13847_v19 = vpop.f32.mrf.mxu3  ;;  %8237 = vmatmul.msk.bf16.gmra.mxu2 %vm170_vm0, %v10952_v38  ;;  %8253 = vmatmul.msk.bf16.gmra.mxu3 %vm170_vm0, %v10952_v38 }
 0x53d   :  { %9482 = vlog2.f32 %v4010_v40  ;;  %v13838_v18 = vadd.f32 -5.0, %v2308_v57  ;;  %v2739_v40 = vmax.f32 %v13756_v21, 0.0  ;;  %v2737_v36 = vmax.f32 %v13780_v15, 0.0 }
 0x53e   :  { %7447 = vst [vmem:[%s16914_s12 + $0x30] sm:$0xff] %v4779_v16  ;;  %9484 = vpow2.f32 %v3517_v51  ;;  %v3535_v5 = vmul.f32 1.442695, %v3258_v54  ;;  %v13863_v26 = vadd.f32 -5.0, %v2397_v43  ;;  %v2738_v54 = vmax.f32 %v13783_v33, 0.0 }
 0x53f   :  { %v9477_v58 = vpop.eup %9476  ;;  %9486 = vlog2.f32 %v4019_v8  ;;  %v3011_v49 = vand.u32 2147483647, %v13838_v18  ;;  %v13859_v44 = vpop.f32.mrf.mxu0  ;;  %v2747_v15 = vmax.f32 %v13785_v37, 0.0 }
 0x540   :  { %v9479_v7 = vpop.eup %9478  ;;  %v4276_v47 = vmul.f32 0.6931472, %v9477_v58  ;;  %9488 = vpow2.f32 %v3519_v39  ;;  %v13861_v21 = vpop.f32.mrf.mxu1  ;;  %v3012_v34 = vand.u32 2147483647, %v13863_v26 }
 0x541   :  { %v9481_v17 = vpop.eup %9480  ;;  %v4020_v23 = vadd.f32 1.0, %v9479_v7  ;;  %9490 = vpow2.f32 %v3537_v3  ;;  %v3267_v58 = vsub.f32 0.0, %v3011_v49 }
 0x542   :  { %v4780_v62 = vadd.f32 %v4276_v47, %v2732_v50  ;;  %v4270_v32 = vmul.f32 0.6931472, %v9481_v17 }
 0x543   :  { %9492 = vlog2.f32 %v4020_v23  ;;  %v9483_v48 = vpop.eup %9482  ;;  %v3553_v47 = vmul.f32 1.442695, %v3267_v58 }
 0x544   :  { %7448 = vst [vmem:[%s16914_s12 + $0x38] sm:$0xff] %v4780_v62  ;;  %v4777_v24 = vadd.f32 %v4270_v32, %v2729_v31  ;;  %9494 = vpow2.f32 %v3539_v63  ;;  %v9485_v30 = vpop.eup %9484  ;;  %v4272_v28 = vmul.f32 0.6931472, %v9483_v48  ;;  %v2130_v31 = vadd.f32 %v13748_v4, %v13689_v27 }
 0x545   :  { %v9487_v42 = vpop.eup %9486  ;;  %v4017_v35 = vadd.f32 1.0, %v9485_v30  ;;  %9496 = vpow2.f32 %v3533_v52  ;;  %v3268_v63 = vsub.f32 0.0, %v3012_v34  ;;  %v2219_v62 = vadd.f32 %v13750_v25, %v13726_v20 }
 0x546   :  { %7445 = vst [vmem:[%s16914_s12 + $0x20] sm:$0xff] %v4777_v24  ;;  %v9489_v1 = vpop.eup %9488  ;;  %v4778_v53 = vadd.f32 %v4272_v28, %v2730_v46  ;;  %v4290_v51 = vmul.f32 0.6931472, %v9487_v42  ;;  %v13877_v57 = vadd.f32 -5.0, %v2130_v31  ;;  %v2311_v30 = vadd.f32 %v13787_v29, %v13676_v9 }
 0x547   :  { %v9491_v14 = vpop.eup %9490  ;;  %9498 = vlog2.f32 %v4017_v35  ;;  %v4018_v10 = vadd.f32 1.0, %v9489_v1  ;;  %v3555_v4 = vmul.f32 1.442695, %v3268_v63  ;;  %v13879_v52 = vadd.f32 -5.0, %v2219_v62  ;;  %v13891_v33 = vpop.f32.mrf.mxu0  ;;  %8270 = vmatmul.msk.bf16.gmra.mxu0 %vm170_vm0, %v10970_v61 }
 0x548   :  { %7446 = vst [vmem:[%s16914_s12 + $0x28] sm:$0xff] %v4778_v53  ;;  %v4787_v39 = vadd.f32 %v4290_v51, %v2739_v40  ;;  %v4027_v38 = vadd.f32 1.0, %v9491_v14  ;;  %9500 = vpow2.f32 %v3535_v5  ;;  %v3009_v42 = vand.u32 2147483647, %v13877_v57  ;;  %v13893_v51 = vpop.f32.mrf.mxu1  ;;  %8286 = vmatmul.msk.bf16.gmra.mxu1 %vm170_vm0, %v10970_v61 }
 0x549   :  { %v9493_v16 = vpop.eup %9492  ;;  %9502 = vlog2.f32 %v4018_v10  ;;  %v3010_v43 = vand.u32 2147483647, %v13879_v52  ;;  %v2748_v29 = vmax.f32 %v13794_v45, 0.0  ;;  %v13899_v49 = vadd.f32 -5.0, %v2311_v30  ;;  %v13903_v45 = vpop.f32.mrf.mxu3 }
 0x54a   :  { %v9495_v8 = vpop.eup %9494  ;;  %v4292_v3 = vmul.f32 0.6931472, %v9493_v16  ;;  %7455 = vst [vmem:[%s16914_s12 + $0x70] sm:$0xff] %v4787_v39  ;;  %9504 = vlog2.f32 %v4027_v38  ;;  %v3265_v40 = vsub.f32 0.0, %v3009_v42  ;;  %v13901_v16 = vpop.f32.mrf.mxu2  ;;  %v2746_v31 = vmax.f32 %v13818_v22, 0.0 }
 0x54b   :  { %v4028_v7 = vadd.f32 1.0, %v9495_v8  ;;  %v9497_v50 = vpop.eup %9496  ;;  %v3266_v10 = vsub.f32 0.0, %v3010_v43  ;;  %v2222_v22 = vadd.f32 %v13813_v0, %v13726_v20 }
 0x54c   :  { %v4788_v13 = vadd.f32 %v4292_v3, %v2740_v12  ;;  %v4025_v17 = vadd.f32 1.0, %v9497_v50  ;;  %v3549_v38 = vmul.f32 1.442695, %v3265_v40  ;;  %v2745_v3 = vmax.f32 %v13809_v59, 0.0  ;;  %v8889_v40 = vld [vmem:[#allocation6 + $0x90] sm:$0xff] }
 0x54d   :  { %9506 = vlog2.f32 %v4028_v7  ;;  %v9499_v23 = vpop.eup %9498  ;;  %v3551_v7 = vmul.f32 1.442695, %v3266_v10  ;;  %v3019_v50 = vand.u32 2147483647, %v13899_v49  ;;  %v13933_v30 = vadd.f32 -5.0, %v2222_v22  ;;  %6624 = vmatpush.bf16.msrb.mxu0 %v8889_v40 }
 0x54e   :  { %7456 = vst [vmem:[%s16914_s12 + $0x78] sm:$0xff] %v4788_v13  ;;  %9508 = vpow2.f32 %v3553_v47  ;;  %v9501_v32 = vpop.eup %9500  ;;  %v4286_v56 = vmul.f32 0.6931472, %v9499_v23  ;;  %v8873_v13 = vld [vmem:[#allocation6 + $0x10] sm:$0xff]  ;;  %v2400_v23 = vadd.f32 %v13789_v55, %v13685_v2  ;;  %v2753_v22 = vmax.f32 %v13877_v57, 0.0 }
 0x54f   :  { %9510 = vlog2.f32 %v4025_v17  ;;  %v9503_v48 = vpop.eup %9502  ;;  %v4026_v24 = vadd.f32 1.0, %v9501_v32  ;;  %v8881_v47 = vld [vmem:[#allocation6 + $0x50] sm:$0xff]  ;;  %v3275_v62 = vsub.f32 0.0, %v3019_v50  ;;  %6446 = vmatpush.bf16.msrb.mxu2 %v8873_v13  ;;  %v2133_v32 = vadd.f32 %v13811_v41, %v13689_v27 }
 0x550   :  { %v9505_v46 = vpop.eup %9504  ;;  %v4785_v28 = vadd.f32 %v4286_v56, %v2737_v36  ;;  %v4288_v25 = vmul.f32 0.6931472, %v9503_v48  ;;  %6535 = vmatpush.bf16.msrb.mxu3 %v8881_v47  ;;  %v13924_v56 = vadd.f32 -5.0, %v2400_v23  ;;  %v2224_v50 = vadd.f32 %v13847_v19, %v13726_v20  ;;  %v8897_v23 = vld [vmem:[#allocation6 + $0xd0] sm:$0xff] }
 0x551   :  { %v4306_v35 = vmul.f32 0.6931472, %v9505_v46  ;;  %9512 = vlog2.f32 %v4026_v24  ;;  %v3569_v48 = vmul.f32 1.442695, %v3275_v62  ;;  %v13928_v24 = vadd.f32 -5.0, %v2133_v32  ;;  %6713 = vmatpush.bf16.msrb.mxu1 %v8897_v23 }
 0x552   :  { %7453 = vst [vmem:[%s16914_s12 + $0x60] sm:$0xff] %v4785_v28  ;;  %v4786_v53 = vadd.f32 %v4288_v25, %v2738_v54  ;;  %9514 = vpow2.f32 %v3555_v4  ;;  %v2313_v4 = vadd.f32 %v13822_v60, %v13676_v9  ;;  %v3020_v41 = vand.u32 2147483647, %v13924_v56 }
 0x553   :  { %v9507_v1 = vpop.eup %9506  ;;  %v4795_v5 = vadd.f32 %v4306_v35, %v2747_v15  ;;  %v3017_v0 = vand.u32 2147483647, %v13928_v24  ;;  %v2755_v54 = vmax.f32 %v13838_v18, 0.0  ;;  %v3018_v60 = vand.u32 2147483647, %v13933_v30  ;;  %v13941_v15 = vpop.f32.mrf.mxu2  ;;  %8238 = vmatmul.msk.bf16.gmra.mxu2 %vm170_vm0, %v10970_v61 }
 0x554   :  { %v9509_v37 = vpop.eup %9508  ;;  %v4308_v14 = vmul.f32 0.6931472, %v9507_v1  ;;  %7454 = vst [vmem:[%s16914_s12 + $0x68] sm:$0xff] %v4786_v53  ;;  %v3276_v42 = vsub.f32 0.0, %v3020_v41  ;;  %v13943_v35 = vpop.f32.mrf.mxu3  ;;  %8254 = vmatmul.msk.bf16.gmra.mxu3 %vm170_vm0, %v10970_v61  ;;  %v2402_v18 = vadd.f32 %v13824_v6, %v13685_v2  ;;  %v2405_v32 = vadd.f32 %v13861_v21, %v13685_v2 }
 0x555   :  { %v9511_v39 = vpop.eup %9510  ;;  %v4035_v12 = vadd.f32 1.0, %v9509_v37  ;;  %7463 = vst [vmem:[%s16914_s12 + $0xb0] sm:$0xff] %v4795_v5  ;;  %v3273_v53 = vsub.f32 0.0, %v3017_v0  ;;  %v3274_v10 = vsub.f32 0.0, %v3018_v60  ;;  %v2754_v41 = vmax.f32 %v13879_v52, 0.0 }
 0x556   :  { %v4796_v8 = vadd.f32 %v4308_v14, %v2748_v29  ;;  %v4302_v58 = vmul.f32 0.6931472, %v9511_v39  ;;  %v13949_v29 = vadd.f32 -5.0, %v2313_v4  ;;  %v3571_v14 = vmul.f32 1.442695, %v3276_v42 }
 0x557   :  { %9516 = vlog2.f32 %v4035_v12  ;;  %v9513_v34 = vpop.eup %9512  ;;  %v2756_v39 = vmax.f32 %v13863_v26, 0.0  ;;  %v3565_v12 = vmul.f32 1.442695, %v3273_v53  ;;  %v13958_v6 = vadd.f32 -5.0, %v2402_v18 }
 0x558   :  { %7464 = vst [vmem:[%s16914_s12 + $0xb8] sm:$0xff] %v4796_v8  ;;  %v4793_v17 = vadd.f32 %v4302_v58, %v2745_v3  ;;  %9518 = vpow2.f32 %v3549_v38  ;;  %v9515_v59 = vpop.eup %9514  ;;  %v4304_v63 = vmul.f32 0.6931472, %v9513_v34  ;;  %v3027_v38 = vand.u32 2147483647, %v13949_v29 }
 0x559   :  { %9520 = vpow2.f32 %v3551_v7  ;;  %v4036_v36 = vadd.f32 1.0, %v9515_v59  ;;  %v3567_v8 = vmul.f32 1.442695, %v3274_v10  ;;  %v2135_v3 = vadd.f32 %v13845_v11, %v13689_v27 }
 0x55a   :  { %7461 = vst [vmem:[%s16914_s12 + $0xa0] sm:$0xff] %v4793_v17  ;;  %v4794_v55 = vadd.f32 %v4304_v63, %v2746_v31  ;;  %v3283_v26 = vsub.f32 0.0, %v3027_v38  ;;  %v3028_v47 = vand.u32 2147483647, %v13958_v6  ;;  %v13967_v11 = vadd.f32 -5.0, %v2224_v50 }
 0x55b   :  { %9522 = vlog2.f32 %v4036_v36  ;;  %v13965_v31 = vadd.f32 -5.0, %v2135_v3  ;;  %v2316_v63 = vadd.f32 %v13859_v44, %v13676_v9  ;;  %v13982_v60 = vadd.f32 -5.0, %v2405_v32 }
 0x55c   :  { %7462 = vst [vmem:[%s16914_s12 + $0xa8] sm:$0xff] %v4794_v55  ;;  %9524 = vpow2.f32 %v3569_v48  ;;  %v3585_v17 = vmul.f32 1.442695, %v3283_v26  ;;  %v3284_v59 = vsub.f32 0.0, %v3028_v47  ;;  %v2763_v52 = vmax.f32 %v13899_v49, 0.0 }
 0x55d   :  { %v9517_v46 = vpop.eup %9516  ;;  %v3025_v19 = vand.u32 2147483647, %v13965_v31  ;;  %v13978_v4 = vadd.f32 -5.0, %v2316_v63  ;;  %v3036_v49 = vand.u32 2147483647, %v13982_v60 }
 0x55e   :  { %v9519_v28 = vpop.eup %9518  ;;  %v4322_v25 = vmul.f32 0.6931472, %v9517_v46  ;;  %v3587_v48 = vmul.f32 1.442695, %v3284_v59 }
 0x55f   :  { %v9521_v43 = vpop.eup %9520  ;;  %v4033_v1 = vadd.f32 1.0, %v9519_v28  ;;  %v3281_v0 = vsub.f32 0.0, %v3025_v19  ;;  %v3026_v28 = vand.u32 2147483647, %v13967_v11  ;;  %v3292_v50 = vsub.f32 0.0, %v3036_v49 }
 0x560   :  { %v4803_v37 = vadd.f32 %v4322_v25, %v2755_v54  ;;  %v4034_v5 = vadd.f32 1.0, %v9521_v43  ;;  %v2761_v19 = vmax.f32 %v13928_v24, 0.0 }
 0x561   :  { %9526 = vlog2.f32 %v4033_v1  ;;  %v9523_v61 = vpop.eup %9522  ;;  %v3581_v1 = vmul.f32 1.442695, %v3281_v0  ;;  %v3282_v53 = vsub.f32 0.0, %v3026_v28  ;;  %v3603_v23 = vmul.f32 1.442695, %v3292_v50 }
 0x562   :  { %7471 = vst [vmem:[%s16914_s12 + $0xf0] sm:$0xff] %v4803_v37  ;;  %9528 = vlog2.f32 %v4034_v5  ;;  %v9525_v58 = vpop.eup %9524  ;;  %v4324_v7 = vmul.f32 0.6931472, %v9523_v61  ;;  %v3035_v37 = vand.u32 2147483647, %v13978_v4  ;;  %v2771_v0 = vmax.f32 %v13949_v29, 0.0 }
 0x563   :  { %9530 = vpow2.f32 %v3571_v14  ;;  %v4043_v13 = vadd.f32 1.0, %v9525_v58  ;;  %v3583_v10 = vmul.f32 1.442695, %v3282_v53  ;;  %v2227_v58 = vadd.f32 %v13903_v45, %v13726_v20 }
 0x564   :  { %9532 = vpow2.f32 %v3565_v12  ;;  %v4804_v34 = vadd.f32 %v4324_v7, %v2756_v39  ;;  %v2138_v39 = vadd.f32 %v13901_v16, %v13689_v27  ;;  %v5031_v12 = vld [vmem:[#allocation2 + $0x10] sm:$0xff]  ;;  %v3291_v61 = vsub.f32 0.0, %v3035_v37 }
 0x565   :  { %9534 = vpow2.f32 %v3567_v8  ;;  %v2318_v16 = vadd.f32 %v13891_v33, %v13676_v9  ;;  %v14011_v33 = vadd.f32 -5.0, %v2227_v58  ;;  %v2407_v53 = vadd.f32 %v13893_v51, %v13685_v2 }
 0x566   :  { %9536 = vlog2.f32 %v4043_v13  ;;  %7472 = vst [vmem:[%s16914_s12 + $0xf8] sm:$0xff] %v4804_v34  ;;  %v13995_v3 = vadd.f32 -5.0, %v2138_v39  ;;  %v3601_v26 = vmul.f32 1.442695, %v3291_v61  ;;  %v9978_v13 = vld [vmem:[%s16914_s12 + $0x10] sm:$0xff]  ;;  %v2764_v34 = vmax.f32 %v13924_v56, 0.0  ;;  %v2320_v39 = vpop.f32.mrf.mxu0 }
 0x567   :  { %v9527_v62 = vpop.eup %9526  ;;  %9538 = vpow2.f32 %v3585_v17  ;;  %v14004_v47 = vmul.f32 %v9978_v13, %v5031_v12  ;;  %v14014_v32 = vadd.f32 -5.0, %v2318_v16  ;;  %v2762_v56 = vmax.f32 %v13933_v30, 0.0 }
 0x568   :  { %v9529_v36 = vpop.eup %9528  ;;  %v4318_v55 = vmul.f32 0.6931472, %v9527_v62  ;;  %9540 = vpow2.f32 %v3587_v48  ;;  %v3033_v59 = vand.u32 2147483647, %v13995_v3  ;;  %v3034_v28 = vand.u32 2147483647, %v14011_v33 }
 0x569   :  { %v9531_v44 = vpop.eup %9530  ;;  %v4320_v46 = vmul.f32 0.6931472, %v9529_v36  ;;  %v14040_v58 = vadd.f32 -5.0, %v2407_v53  ;;  %v2321_v50 = vadd.f32 %v2320_v39, %v13676_v9  ;;  %v2769_v16 = vmax.f32 %v13965_v31, 0.0 }
 0x56a   :  { %v9533_v54 = vpop.eup %9532  ;;  %v4801_v25 = vadd.f32 %v4318_v55, %v2753_v22  ;;  %v4044_v42 = vadd.f32 1.0, %v9531_v44  ;;  %v3289_v55 = vsub.f32 0.0, %v3033_v59  ;;  %v5032_v44 = vld [vmem:[#allocation2 + $0x18] sm:$0xff] }
 0x56b   :  { %v9535_v21 = vpop.eup %9534  ;;  %v4802_v43 = vadd.f32 %v4320_v46, %v2754_v41  ;;  %v4041_v57 = vadd.f32 1.0, %v9533_v54  ;;  %v3044_v13 = vand.u32 2147483647, %v14040_v58 }
 0x56c   :  { %v9537_v18 = vpop.eup %9536  ;;  %7469 = vst [vmem:[%s16914_s12 + $0xe0] sm:$0xff] %v4801_v25  ;;  %9542 = vlog2.f32 %v4044_v42  ;;  %v4042_v40 = vadd.f32 1.0, %v9535_v21  ;;  %v3597_v42 = vmul.f32 1.442695, %v3289_v55  ;;  %v3043_v21 = vand.u32 2147483647, %v14014_v32 }
 0x56d   :  { %v9539_v5 = vpop.eup %9538  ;;  %7470 = vst [vmem:[%s16914_s12 + $0xe8] sm:$0xff] %v4802_v43  ;;  %v4338_v14 = vmul.f32 0.6931472, %v9537_v18  ;;  %9544 = vlog2.f32 %v4041_v57  ;;  %v9979_v18 = vld [vmem:[%s16914_s12 + $0x18] sm:$0xff] }
 0x56e   :  { %9546 = vlog2.f32 %v4042_v40  ;;  %v4051_v38 = vadd.f32 1.0, %v9539_v5  ;;  %v9541_v7 = vpop.eup %9540  ;;  %v3299_v37 = vsub.f32 0.0, %v3043_v21  ;;  %v8880_v21 = vld [vmem:[#allocation6 + $0x48] sm:$0xff] }
 0x56f   :  { %v4811_v8 = vadd.f32 %v4338_v14, %v2763_v52  ;;  %9548 = vpow2.f32 %v3581_v1  ;;  %v4052_v45 = vadd.f32 1.0, %v9541_v7  ;;  %v3290_v1 = vsub.f32 0.0, %v3034_v28  ;;  %v8872_v28 = vld [vmem:[#allocation6 + $0x8] sm:$0xff]  ;;  %6536 = vmatpush.bf16.msrb.mxu3 %v8880_v21 }
 0x570   :  { %9550 = vlog2.f32 %v4051_v38  ;;  %v14028_v52 = vmul.f32 %v9979_v18, %v5032_v44  ;;  %v2772_v14 = vmax.f32 %v13958_v6, 0.0  ;;  %v3617_v49 = vmul.f32 1.442695, %v3299_v37  ;;  %6447 = vmatpush.bf16.msrb.mxu2 %v8872_v28  ;;  %v5030_v28 = vld [vmem:[#allocation2 + $0x8] sm:$0xff] }
 0x571   :  { %7479 = vst [vmem:[%s16914_s12 + $0x130] sm:$0xff] %v4811_v8  ;;  %9552 = vpow2.f32 %v3583_v10  ;;  %v3599_v61 = vmul.f32 1.442695, %v3290_v1  ;;  %v2140_v7 = vadd.f32 %v13941_v15, %v13689_v27  ;;  %v2770_v15 = vmax.f32 %v13967_v11, 0.0 }
 0x572   :  { %v9543_v17 = vpop.eup %9542  ;;  %9554 = vpow2.f32 %v3601_v26  ;;  %v2229_v26 = vadd.f32 %v13943_v35, %v13726_v20  ;;  %v14057_v35 = vadd.f32 -5.0, %v2321_v50 }
 0x573   :  { %v9545_v63 = vpop.eup %9544  ;;  %v4340_v62 = vmul.f32 0.6931472, %v9543_v17  ;;  %9556 = vlog2.f32 %v4052_v45  ;;  %v2409_v45 = vpop.f32.mrf.mxu1 }
 0x574   :  { %v9547_v36 = vpop.eup %9546  ;;  %v4334_v22 = vmul.f32 0.6931472, %v9545_v63  ;;  %9558 = vpow2.f32 %v3603_v23  ;;  %v14055_v23 = vadd.f32 -5.0, %v2229_v26  ;;  %v2779_v63 = vmax.f32 %v13978_v4, 0.0  ;;  %v9981_v26 = vld [vmem:[%s16913_s11 + $0x18] sm:$0xff] }
 0x575   :  { %v9549_v48 = vpop.eup %9548  ;;  %v4812_v41 = vadd.f32 %v4340_v62, %v2764_v34  ;;  %v4336_v46 = vmul.f32 0.6931472, %v9547_v36  ;;  %v14049_v34 = vadd.f32 -5.0, %v2140_v7  ;;  %v3300_v62 = vsub.f32 0.0, %v3044_v13 }
 0x576   :  { %v9551_v54 = vpop.eup %9550  ;;  %v4809_v25 = vadd.f32 %v4334_v22, %v2761_v19  ;;  %v4049_v24 = vadd.f32 1.0, %v9549_v48  ;;  %v2780_v22 = vmax.f32 %v13982_v60, 0.0  ;;  %v3042_v55 = vand.u32 2147483647, %v14055_v23 }
 0x577   :  { %v9553_v43 = vpop.eup %9552  ;;  %7480 = vst [vmem:[%s16914_s12 + $0x138] sm:$0xff] %v4812_v41  ;;  %v4810_v30 = vadd.f32 %v4336_v46, %v2762_v56  ;;  %v4354_v57 = vmul.f32 0.6931472, %v9551_v54  ;;  %v3041_v19 = vand.u32 2147483647, %v14049_v34  ;;  %v2410_v11 = vadd.f32 %v2409_v45, %v13685_v2  ;;  %v2142_v54 = vpop.f32.mrf.mxu2 }
 0x578   :  { %v9555_v29 = vpop.eup %9554  ;;  %7477 = vst [vmem:[%s16914_s12 + $0x120] sm:$0xff] %v4809_v25  ;;  %9560 = vlog2.f32 %v4049_v24  ;;  %v4050_v40 = vadd.f32 1.0, %v9553_v43  ;;  %v3619_v46 = vmul.f32 1.442695, %v3300_v62  ;;  %v3298_v24 = vsub.f32 0.0, %v3042_v55 }
 0x579   :  { %v9557_v5 = vpop.eup %9556  ;;  %7478 = vst [vmem:[%s16914_s12 + $0x128] sm:$0xff] %v4810_v30  ;;  %v4819_v51 = vadd.f32 %v4354_v57, %v2771_v0  ;;  %v4059_v10 = vadd.f32 1.0, %v9555_v29  ;;  %9562 = vpow2.f32 %v3597_v42  ;;  %v3297_v0 = vsub.f32 0.0, %v3041_v19 }
 0x57a   :  { %v9559_v12 = vpop.eup %9558  ;;  %v4356_v38 = vmul.f32 0.6931472, %v9557_v5  ;;  %9564 = vlog2.f32 %v4050_v40  ;;  %v3051_v42 = vand.u32 2147483647, %v14057_v35  ;;  %v3615_v18 = vmul.f32 1.442695, %v3298_v24 }
 0x57b   :  { %7487 = vst [vmem:[%s16914_s12 + $0x170] sm:$0xff] %v4819_v51  ;;  %9566 = vlog2.f32 %v4059_v10  ;;  %v4060_v8 = vadd.f32 1.0, %v9559_v12  ;;  %v3613_v57 = vmul.f32 1.442695, %v3297_v0  ;;  %v14071_v5 = vadd.f32 -5.0, %v2410_v11  ;;  %v2322_v10 = vpop.f32.mrf.mxu0  ;;  %v2411_v13 = vpop.f32.mrf.mxu1 }
 0x57c   :  { %v4820_v6 = vadd.f32 %v4356_v38, %v2772_v14  ;;  %9568 = vpow2.f32 %v3599_v61  ;;  %v3307_v40 = vsub.f32 0.0, %v3051_v42  ;;  %v2143_v51 = vadd.f32 %v2142_v54, %v13689_v27  ;;  %v2231_v14 = vpop.f32.mrf.mxu3  ;;  %v9980_v38 = vld [vmem:[%s16913_s11 + $0x10] sm:$0xff] }
 0x57d   :  { %9570 = vlog2.f32 %v4060_v8  ;;  %v14081_v61 = vadd.f32 %v9980_v38, %v14004_v47  ;;  %v3052_v8 = vand.u32 2147483647, %v14071_v5  ;;  %v14090_v50 = vadd.f32 %v9981_v26, %v14028_v52  ;;  %v9982_v52 = vld [vmem:[%s16914_s12] sm:$0xff] }
 0x57e   :  { %v9561_v17 = vpop.eup %9560  ;;  %7488 = vst [vmem:[%s16914_s12 + $0x178] sm:$0xff] %v4820_v6  ;;  %9572 = vpow2.f32 %v3617_v49  ;;  %v3633_v12 = vmul.f32 1.442695, %v3307_v40  ;;  %v5029_v49 = vld [vmem:[#allocation2] sm:$0xff]  ;;  %v14084_v7 = vadd.f32 -5.0, %v2143_v51  ;;  %v2232_v47 = vadd.f32 %v2231_v14, %v13726_v20 }
 0x57f   :  { %v9563_v59 = vpop.eup %9562  ;;  %v4350_v31 = vmul.f32 0.6931472, %v9561_v17  ;;  %v2777_v17 = vmax.f32 %v13995_v3, 0.0  ;;  %v2144_v11 = vpop.f32.mrf.mxu2 }
 0x580   :  { %v9565_v36 = vpop.eup %9564  ;;  %v4057_v56 = vadd.f32 1.0, %v9563_v59  ;;  %v3308_v59 = vsub.f32 0.0, %v3052_v8  ;;  %v3049_v62 = vand.u32 2147483647, %v14084_v7  ;;  %v14104_v19 = vadd.f32 -5.0, %v2232_v47 }
 0x581   :  { %v9567_v48 = vpop.eup %9566  ;;  %v4817_v44 = vadd.f32 %v4350_v31, %v2769_v16  ;;  %v4352_v41 = vmul.f32 0.6931472, %v9565_v36  ;;  %v2323_v16 = vadd.f32 %v2322_v10, %v13676_v9  ;;  %v14101_v31 = vmul.f32 %v9982_v52, %v5029_v49 }
 0x582   :  { %v9569_v25 = vpop.eup %9568  ;;  %v4370_v4 = vmul.f32 0.6931472, %v9567_v48  ;;  %9574 = vlog2.f32 %v4057_v56  ;;  %v2778_v56 = vmax.f32 %v14011_v33, 0.0  ;;  %v3635_v55 = vmul.f32 1.442695, %v3308_v59 }
 0x583   :  { %v9571_v60 = vpop.eup %9570  ;;  %7485 = vst [vmem:[%s16914_s12 + $0x160] sm:$0xff] %v4817_v44  ;;  %v4818_v43 = vadd.f32 %v4352_v41, %v2770_v15  ;;  %v4058_v30 = vadd.f32 1.0, %v9569_v25  ;;  %9576 = vpow2.f32 %v3619_v46  ;;  %v14107_v3 = vadd.f32 -5.0, %v2323_v16  ;;  %v2414_v26 = vpop.f32.mrf.mxu1 }
 0x584   :  { %v9573_v1 = vpop.eup %9572  ;;  %v4827_v53 = vadd.f32 %v4370_v4, %v2779_v63  ;;  %v4372_v29 = vmul.f32 0.6931472, %v9571_v60  ;;  %v2787_v41 = vmax.f32 %v14014_v32, 0.0  ;;  %v3305_v46 = vsub.f32 0.0, %v3049_v62  ;;  %v8888_v60 = vld [vmem:[#allocation6 + $0x88] sm:$0xff] }
 0x585   :  { %7486 = vst [vmem:[%s16914_s12 + $0x168] sm:$0xff] %v4818_v43  ;;  %9578 = vlog2.f32 %v4058_v30  ;;  %v4067_v37 = vadd.f32 1.0, %v9573_v1  ;;  %v3050_v33 = vand.u32 2147483647, %v14104_v19  ;;  %v2412_v25 = vadd.f32 %v2411_v13, %v13685_v2  ;;  %6625 = vmatpush.bf16.msrb.mxu0 %v8888_v60 }
 0x586   :  { %7495 = vst [vmem:[%s16914_s12 + $0x1b0] sm:$0xff] %v4827_v53  ;;  %v4828_v39 = vadd.f32 %v4372_v29, %v2780_v22  ;;  %9580 = vpow2.f32 %v3613_v57  ;;  %v3629_v21 = vmul.f32 1.442695, %v3305_v46  ;;  %v2145_v32 = vadd.f32 %v2144_v11, %v13689_v27  ;;  %v2233_v53 = vpop.f32.mrf.mxu3  ;;  %v2325_v29 = vpop.f32.mrf.mxu0 }
 0x587   :  { %9582 = vlog2.f32 %v4067_v37  ;;  %v3306_v57 = vsub.f32 0.0, %v3050_v33  ;;  %v3059_v1 = vand.u32 2147483647, %v14107_v3  ;;  %v2234_v8 = vadd.f32 %v2233_v53, %v13726_v20  ;;  %v2147_v60 = vpop.f32.mrf.mxu2 }
 0x588   :  { %v9575_v6 = vpop.eup %9574  ;;  %7496 = vst [vmem:[%s16914_s12 + $0x1b8] sm:$0xff] %v4828_v39  ;;  %9584 = vpow2.f32 %v3615_v18  ;;  %v9983_v18 = vld [vmem:[%s16914_s12 + $0x8] sm:$0xff]  ;;  %v14125_v39 = vadd.f32 -5.0, %v2412_v25  ;;  %v14130_v49 = vadd.f32 -5.0, %v2145_v32  ;;  %v2788_v16 = vmax.f32 %v14040_v58, 0.0 }
 0x589   :  { %v9577_v45 = vpop.eup %9576  ;;  %v4366_v15 = vmul.f32 0.6931472, %v9575_v6  ;;  %9586 = vpow2.f32 %v3633_v12  ;;  %v14120_v40 = vmul.f32 %v9983_v18, %v5030_v28  ;;  %v3631_v14 = vmul.f32 1.442695, %v3306_v57  ;;  %v8896_v12 = vld [vmem:[#allocation6 + $0xc8] sm:$0xff] }
 0x58a   :  { %v4068_v63 = vadd.f32 1.0, %v9577_v45  ;;  %v3315_v10 = vsub.f32 0.0, %v3059_v1  ;;  %v2326_v6 = vadd.f32 %v2325_v29, %v13676_v9  ;;  %6714 = vmatpush.bf16.msrb.mxu1 %v8896_v12  ;;  %v3060_v59 = vand.u32 2147483647, %v14125_v39 }
 0x58b   :  { %v9579_v36 = vpop.eup %9578  ;;  %v4825_v22 = vadd.f32 %v4366_v15, %v2777_v17  ;;  %v2785_v17 = vmax.f32 %v14049_v34, 0.0  ;;  %v3057_v52 = vand.u32 2147483647, %v14130_v49  ;;  %v2786_v34 = vmax.f32 %v14055_v23, 0.0 }
 0x58c   :  { %v9581_v48 = vpop.eup %9580  ;;  %v4368_v44 = vmul.f32 0.6931472, %v9579_v36  ;;  %9588 = vlog2.f32 %v4068_v63  ;;  %v3649_v45 = vmul.f32 1.442695, %v3315_v10  ;;  %v14138_v36 = vadd.f32 -5.0, %v2234_v8  ;;  %v14159_v10 = vpop.f32.mrf.mxu1 }
 0x58d   :  { %v9583_v0 = vpop.eup %9582  ;;  %7493 = vst [vmem:[%s16914_s12 + $0x1a0] sm:$0xff] %v4825_v22  ;;  %v4065_v54 = vadd.f32 1.0, %v9581_v48  ;;  %9590 = vpow2.f32 %v3635_v55  ;;  %v14140_v22 = vadd.f32 -5.0, %v2326_v6  ;;  %v3316_v55 = vsub.f32 0.0, %v3060_v59  ;;  %v9984_v6 = vld [vmem:[%s16913_s11] sm:$0xff] }
 0x58e   :  { %v9585_v4 = vpop.eup %9584  ;;  %v4826_v24 = vadd.f32 %v4368_v44, %v2778_v56  ;;  %v4386_v42 = vmul.f32 0.6931472, %v9583_v0  ;;  %v3313_v11 = vsub.f32 0.0, %v3057_v52  ;;  %v2795_v44 = vmax.f32 %v14057_v35, 0.0  ;;  %v2236_v53 = vpop.f32.mrf.mxu3 }
 0x58f   :  { %v9587_v43 = vpop.eup %9586  ;;  %9592 = vlog2.f32 %v4065_v54  ;;  %v4066_v30 = vadd.f32 1.0, %v9585_v4  ;;  %v3058_v46 = vand.u32 2147483647, %v14138_v36  ;;  %v3651_v33 = vmul.f32 1.442695, %v3316_v55 }
 0x590   :  { %7494 = vst [vmem:[%s16914_s12 + $0x1a8] sm:$0xff] %v4826_v24  ;;  %v4835_v37 = vadd.f32 %v4386_v42, %v2787_v41  ;;  %v4075_v51 = vadd.f32 1.0, %v9587_v43  ;;  %9594 = vpow2.f32 %v3629_v21  ;;  %v3645_v25 = vmul.f32 1.442695, %v3313_v11 }
 0x591   :  { %9596 = vlog2.f32 %v4066_v30  ;;  %v3314_v42 = vsub.f32 0.0, %v3058_v46  ;;  %v3067_v21 = vand.u32 2147483647, %v14140_v22  ;;  %v2415_v32 = vadd.f32 %v2414_v26, %v13685_v2 }
 0x592   :  { %v9589_v38 = vpop.eup %9588  ;;  %7503 = vst [vmem:[%s16914_s12 + $0x1f0] sm:$0xff] %v4835_v37  ;;  %9598 = vlog2.f32 %v4075_v51  ;;  %v2148_v51 = vadd.f32 %v2147_v60, %v13689_v27  ;;  %v2796_v12 = vmax.f32 %v14071_v5, 0.0  ;;  %v14169_v26 = vadd.f32 %v9984_v6, %v14101_v31 }
 0x593   :  { %v9591_v47 = vpop.eup %9590  ;;  %v4388_v13 = vmul.f32 0.6931472, %v9589_v38  ;;  %9600 = vpow2.f32 %v3631_v14  ;;  %v3647_v57 = vmul.f32 1.442695, %v3314_v42  ;;  %v3323_v1 = vsub.f32 0.0, %v3067_v21  ;;  %v2327_v14 = vpop.f32.mrf.mxu0 }
 0x594   :  { %v4076_v15 = vadd.f32 1.0, %v9591_v47  ;;  %9602 = vpow2.f32 %v3649_v45  ;;  %v14156_v37 = vadd.f32 -5.0, %v2415_v32  ;;  %v2237_v5 = vadd.f32 %v2236_v53, %v13726_v20  ;;  %v2419_v53 = vpop.f32.mrf.mxu1 }
 0x595   :  { %v9593_v63 = vpop.eup %9592  ;;  %v4836_v62 = vadd.f32 %v4388_v13, %v2788_v16  ;;  %v3665_v8 = vmul.f32 1.442695, %v3323_v1  ;;  %v14172_v16 = vadd.f32 -5.0, %v2148_v51  ;;  %v2793_v59 = vmax.f32 %v14084_v7, 0.0 }
 0x596   :  { %v9595_v56 = vpop.eup %9594  ;;  %v4382_v58 = vmul.f32 0.6931472, %v9593_v63  ;;  %9604 = vlog2.f32 %v4076_v15  ;;  %v3068_v47 = vand.u32 2147483647, %v14156_v37  ;;  %v14187_v11 = vadd.f32 -5.0, %v2237_v5  ;;  %v2238_v32 = vpop.f32.mrf.mxu3 }
 0x597   :  { %v9597_v48 = vpop.eup %9596  ;;  %7504 = vst [vmem:[%s16914_s12 + $0x1f8] sm:$0xff] %v4836_v62  ;;  %v4073_v41 = vadd.f32 1.0, %v9595_v56  ;;  %v3065_v31 = vand.u32 2147483647, %v14172_v16  ;;  %v9985_v56 = vld [vmem:[%s16913_s11 + $0x8] sm:$0xff]  ;;  %v2239_v6 = vadd.f32 %v2238_v32, %v13726_v20 }
 0x598   :  { %v9599_v0 = vpop.eup %9598  ;;  %v4833_v28 = vadd.f32 %v4382_v58, %v2785_v17  ;;  %v4384_v54 = vmul.f32 0.6931472, %v9597_v48  ;;  %v2328_v17 = vadd.f32 %v2327_v14, %v13676_v9  ;;  %v3324_v63 = vsub.f32 0.0, %v3068_v47 }
 0x599   :  { %v9601_v4 = vpop.eup %9600  ;;  %v4402_v24 = vmul.f32 0.6931472, %v9599_v0  ;;  %9606 = vlog2.f32 %v4073_v41  ;;  %v14182_v58 = vadd.f32 %v9985_v56, %v14120_v40  ;;  %v3321_v46 = vsub.f32 0.0, %v3065_v31 }
 0x59a   :  { %7501 = vst [vmem:[%s16914_s12 + $0x1e0] sm:$0xff] %v4833_v28  ;;  %v4834_v23 = vadd.f32 %v4384_v54, %v2786_v34  ;;  %v4074_v35 = vadd.f32 1.0, %v9601_v4  ;;  %9608 = vpow2.f32 %v3651_v33  ;;  %v9603_v43 = vpop.eup %9602  ;;  %v14189_v7 = vadd.f32 -5.0, %v2328_v17  ;;  %v5039_v28 = vld [vmem:[#allocation2 + $0x50] sm:$0xff] }
 0x59b   :  { %v4843_v30 = vadd.f32 %v4402_v24, %v2795_v44  ;;  %9610 = vpow2.f32 %v3645_v25  ;;  %v4083_v18 = vadd.f32 1.0, %v9603_v43  ;;  %v3667_v41 = vmul.f32 1.442695, %v3324_v63  ;;  %v9986_v43 = vld [vmem:[%s16914_s12 + $0x50] sm:$0xff] }
 0x59c   :  { %v9605_v29 = vpop.eup %9604  ;;  %7502 = vst [vmem:[%s16914_s12 + $0x1e8] sm:$0xff] %v4834_v23  ;;  %9612 = vlog2.f32 %v4074_v35  ;;  %v2794_v54 = vmax.f32 %v14104_v19, 0.0  ;;  %v3066_v33 = vand.u32 2147483647, %v14187_v11  ;;  %v2803_v4 = vmax.f32 %v14107_v3, 0.0  ;;  %v2149_v19 = vpop.f32.mrf.mxu2 }
 0x59d   :  { %7511 = vst [vmem:[%s16914_s12 + $0x230] sm:$0xff] %v4843_v30  ;;  %v4404_v38 = vmul.f32 0.6931472, %v9605_v29  ;;  %9614 = vpow2.f32 %v3647_v57  ;;  %v3661_v42 = vmul.f32 1.442695, %v3321_v46  ;;  %v5295_v30 = vmul.f32 %v9986_v43, %v5039_v28  ;;  %v2330_v3 = vpop.f32.mrf.mxu0  ;;  %v8871_v28 = vld [vmem:[#allocation6] sm:$0xff] }
 0x59e   :  { %9616 = vlog2.f32 %v4083_v18  ;;  %v3322_v35 = vsub.f32 0.0, %v3066_v33  ;;  %v3075_v1 = vand.u32 2147483647, %v14189_v7  ;;  %v2804_v18 = vmax.f32 %v14125_v39, 0.0  ;;  %6448 = vmatpush.bf16.msrb.mxu2 %v8871_v28 }
 0x59f   :  { %v9607_v13 = vpop.eup %9606  ;;  %v4844_v45 = vadd.f32 %v4404_v38, %v2796_v12  ;;  %9618 = vpow2.f32 %v3665_v8  ;;  %v2417_v12 = vadd.f32 %v14159_v10, %v13685_v2  ;;  %v2150_v38 = vadd.f32 %v2149_v19, %v13689_v27 }
 0x5a0   :  { %v9609_v15 = vpop.eup %9608  ;;  %v4398_v52 = vmul.f32 0.6931472, %v9607_v13  ;;  %v3663_v51 = vmul.f32 1.442695, %v3322_v35  ;;  %v3331_v14 = vsub.f32 0.0, %v3075_v1  ;;  %v2331_v47 = vadd.f32 %v2330_v3, %v13676_v9 }
 0x5a1   :  { %v9611_v62 = vpop.eup %9610  ;;  %7512 = vst [vmem:[%s16914_s12 + $0x238] sm:$0xff] %v4844_v45  ;;  %v4084_v55 = vadd.f32 1.0, %v9609_v15  ;;  %v2420_v39 = vadd.f32 %v2419_v53, %v13685_v2  ;;  %v14214_v17 = vadd.f32 -5.0, %v2417_v12  ;;  %v14216_v10 = vadd.f32 -5.0, %v2150_v38  ;;  %v9988_v12 = vld [vmem:[%s16914_s12 + $0x58] sm:$0xff] }
 0x5a2   :  { %v9613_v48 = vpop.eup %9612  ;;  %v4841_v34 = vadd.f32 %v4398_v52, %v2793_v59  ;;  %v4081_v44 = vadd.f32 1.0, %v9611_v62  ;;  %v3681_v5 = vmul.f32 1.442695, %v3331_v14  ;;  %v2801_v59 = vmax.f32 %v14130_v49, 0.0 }
 0x5a3   :  { %v9615_v0 = vpop.eup %9614  ;;  %v4400_v40 = vmul.f32 0.6931472, %v9613_v48  ;;  %9620 = vlog2.f32 %v4084_v55  ;;  %v2802_v63 = vmax.f32 %v14138_v36, 0.0  ;;  %v14220_v31 = vadd.f32 -5.0, %v2239_v6 }
 0x5a4   :  { %v9617_v25 = vpop.eup %9616  ;;  %7509 = vst [vmem:[%s16914_s12 + $0x220] sm:$0xff] %v4841_v34  ;;  %9622 = vlog2.f32 %v4081_v44  ;;  %v4082_v24 = vadd.f32 1.0, %v9615_v0  ;;  %v2811_v55 = vmax.f32 %v14140_v22, 0.0  ;;  %v3076_v46 = vand.u32 2147483647, %v14214_v17  ;;  %v2152_v3 = vpop.f32.mrf.mxu2 }
 0x5a5   :  { %v9619_v21 = vpop.eup %9618  ;;  %v4842_v60 = vadd.f32 %v4400_v40, %v2794_v54  ;;  %v4418_v23 = vmul.f32 0.6931472, %v9617_v25  ;;  %9624 = vpow2.f32 %v3667_v41  ;;  %v14224_v0 = vadd.f32 -5.0, %v2331_v47  ;;  %v8879_v40 = vld [vmem:[#allocation6 + $0x40] sm:$0xff]  ;;  %v2332_v14 = vpop.f32.mrf.mxu0 }
 0x5a6   :  { %9626 = vlog2.f32 %v4082_v24  ;;  %v4091_v57 = vadd.f32 1.0, %v9619_v21  ;;  %v3073_v54 = vand.u32 2147483647, %v14216_v10  ;;  %v14230_v22 = vadd.f32 -5.0, %v2420_v39  ;;  %v9987_v21 = vld [vmem:[%s16913_s11 + $0x50] sm:$0xff]  ;;  %6537 = vmatpush.bf16.msrb.mxu3 %v8879_v40  ;;  %v8887_v47 = vld [vmem:[#allocation6 + $0x80] sm:$0xff] }
 0x5a7   :  { %7510 = vst [vmem:[%s16914_s12 + $0x228] sm:$0xff] %v4842_v60  ;;  %v4851_v29 = vadd.f32 %v4418_v23, %v2803_v4  ;;  %9628 = vpow2.f32 %v3661_v42  ;;  %v3332_v24 = vsub.f32 0.0, %v3076_v46  ;;  %v3074_v42 = vand.u32 2147483647, %v14220_v31  ;;  %v5040_v23 = vld [vmem:[#allocation2 + $0x58] sm:$0xff]  ;;  %6626 = vmatpush.bf16.msrb.mxu0 %v8887_v47 }
 0x5a8   :  { %9630 = vlog2.f32 %v4091_v57  ;;  %v14239_v60 = vadd.f32 %v9987_v21, %v5295_v30  ;;  %v3329_v19 = vsub.f32 0.0, %v3073_v54  ;;  %v3083_v1 = vand.u32 2147483647, %v14224_v0 }
 0x5a9   :  { %v9621_v8 = vpop.eup %9620  ;;  %7519 = vst [vmem:[%s16914_s12 + $0x270] sm:$0xff] %v4851_v29  ;;  %9632 = vpow2.f32 %v3663_v51  ;;  %v3683_v43 = vmul.f32 1.442695, %v3332_v24  ;;  %v3330_v57 = vsub.f32 0.0, %v3074_v42  ;;  %v2812_v29 = vmax.f32 %v14156_v37, 0.0  ;;  %v2241_v51 = vpop.f32.mrf.mxu3  ;;  %v8895_v37 = vld [vmem:[#allocation6 + $0xc0] sm:$0xff] }
 0x5aa   :  { %v9623_v13 = vpop.eup %9622  ;;  %v4420_v45 = vmul.f32 0.6931472, %v9621_v8  ;;  %9634 = vpow2.f32 %v3681_v5  ;;  %v3677_v30 = vmul.f32 1.442695, %v3329_v19  ;;  %v5296_v38 = vmul.f32 %v9988_v12, %v5040_v23  ;;  %6715 = vmatpush.bf16.msrb.mxu1 %v8895_v37 }
 0x5ab   :  { %v9625_v15 = vpop.eup %9624  ;;  %v4414_v52 = vmul.f32 0.6931472, %v9623_v13  ;;  %v3679_v6 = vmul.f32 1.442695, %v3330_v57  ;;  %v3339_v13 = vsub.f32 0.0, %v3083_v1  ;;  %v2153_v5 = vadd.f32 %v2152_v3, %v13689_v27 }
 0x5ac   :  { %v9627_v62 = vpop.eup %9626  ;;  %v4852_v56 = vadd.f32 %v4420_v45, %v2804_v18  ;;  %v4092_v48 = vadd.f32 1.0, %v9625_v15  ;;  %v3084_v18 = vand.u32 2147483647, %v14230_v22  ;;  %v5037_v15 = vld [vmem:[#allocation2 + $0x40] sm:$0xff]  ;;  %v2810_v40 = vmax.f32 %v14187_v11, 0.0 }
 0x5ad   :  { %v9629_v34 = vpop.eup %9628  ;;  %v4849_v44 = vadd.f32 %v4414_v52, %v2801_v59  ;;  %v4416_v41 = vmul.f32 0.6931472, %v9627_v62  ;;  %v2242_v52 = vadd.f32 %v2241_v51, %v13726_v20  ;;  %v2421_v62 = vpop.f32.mrf.mxu1  ;;  %v2819_v1 = vmax.f32 %v14189_v7, 0.0 }
 0x5ae   :  { %v9631_v49 = vpop.eup %9630  ;;  %7520 = vst [vmem:[%s16914_s12 + $0x278] sm:$0xff] %v4852_v56  ;;  %9636 = vlog2.f32 %v4092_v48  ;;  %v4089_v36 = vadd.f32 1.0, %v9629_v34  ;;  %v3340_v45 = vsub.f32 0.0, %v3084_v18  ;;  %v14256_v34 = vadd.f32 -5.0, %v2153_v5  ;;  %v2154_v51 = vpop.f32.mrf.mxu2 }
 0x5af   :  { %v9633_v33 = vpop.eup %9632  ;;  %7517 = vst [vmem:[%s16914_s12 + $0x260] sm:$0xff] %v4849_v44  ;;  %v4850_v25 = vadd.f32 %v4416_v41, %v2802_v63  ;;  %v4434_v4 = vmul.f32 0.6931472, %v9631_v49  ;;  %v2333_v63 = vadd.f32 %v2332_v14, %v13676_v9  ;;  %v2809_v41 = vmax.f32 %v14172_v16, 0.0  ;;  %v9991_v14 = vld [vmem:[%s16913_s11 + $0x40] sm:$0xff] }
 0x5b0   :  { %9638 = vlog2.f32 %v4089_v36  ;;  %v4090_v35 = vadd.f32 1.0, %v9633_v33  ;;  %v9635_v53 = vpop.eup %9634  ;;  %v3699_v48 = vmul.f32 1.442695, %v3340_v45  ;;  %v14259_v28 = vadd.f32 -5.0, %v2242_v52  ;;  %v9989_v36 = vld [vmem:[%s16914_s12 + $0x40] sm:$0xff] }
 0x5b1   :  { %7518 = vst [vmem:[%s16914_s12 + $0x268] sm:$0xff] %v4850_v25  ;;  %v4859_v32 = vadd.f32 %v4434_v4, %v2811_v55  ;;  %v4099_v8 = vadd.f32 1.0, %v9635_v53  ;;  %v3697_v55 = vmul.f32 1.442695, %v3339_v13  ;;  %v5293_v54 = vmul.f32 %v9989_v36, %v5037_v15 }
 0x5b2   :  { %9640 = vlog2.f32 %v4090_v35  ;;  %v3081_v33 = vand.u32 2147483647, %v14256_v34  ;;  %v14269_v24 = vadd.f32 -5.0, %v2333_v63  ;;  %v3082_v35 = vand.u32 2147483647, %v14259_v28 }
 0x5b3   :  { %7527 = vst [vmem:[%s16914_s12 + $0x2b0] sm:$0xff] %v4859_v32  ;;  %9642 = vpow2.f32 %v3683_v43  ;;  %v2422_v11 = vadd.f32 %v2421_v62, %v13685_v2  ;;  %v9990_v32 = vld [vmem:[%s16913_s11 + $0x58] sm:$0xff]  ;;  %v14285_v12 = vadd.f32 %v9991_v14, %v5293_v54  ;;  %v2155_v15 = vadd.f32 %v2154_v51, %v13689_v27 }
 0x5b4   :  { %v9637_v39 = vpop.eup %9636  ;;  %9644 = vpow2.f32 %v3677_v30  ;;  %v3337_v23 = vsub.f32 0.0, %v3081_v33  ;;  %v14276_v43 = vadd.f32 %v9990_v32, %v5296_v38  ;;  %v3338_v18 = vsub.f32 0.0, %v3082_v35 }
 0x5b5   :  { %v4436_v59 = vmul.f32 0.6931472, %v9637_v39  ;;  %9646 = vlog2.f32 %v4099_v8  ;;  %v3091_v7 = vand.u32 2147483647, %v14269_v24  ;;  %v14291_v37 = vadd.f32 -5.0, %v2422_v11  ;;  %v2243_v39 = vpop.f32.mrf.mxu3  ;;  %v2424_v52 = vpop.f32.mrf.mxu1 }
 0x5b6   :  { %v9639_v56 = vpop.eup %9638  ;;  %9648 = vpow2.f32 %v3679_v6  ;;  %v3693_v30 = vmul.f32 1.442695, %v3337_v23  ;;  %v3695_v47 = vmul.f32 1.442695, %v3338_v18  ;;  %v2820_v63 = vmax.f32 %v14214_v17, 0.0 }
 0x5b7   :  { %v4860_v44 = vadd.f32 %v4436_v59, %v2812_v29  ;;  %v4430_v46 = vmul.f32 0.6931472, %v9639_v56  ;;  %9650 = vpow2.f32 %v3697_v55  ;;  %v3347_v5 = vsub.f32 0.0, %v3091_v7  ;;  %v2335_v59 = vpop.f32.mrf.mxu0 }
 0x5b8   :  { %v9641_v49 = vpop.eup %9640  ;;  %9652 = vpow2.f32 %v3699_v48  ;;  %v3092_v56 = vand.u32 2147483647, %v14291_v37  ;;  %v14299_v48 = vadd.f32 -5.0, %v2155_v15  ;;  %v2425_v36 = vadd.f32 %v2424_v52, %v13685_v2 }
 0x5b9   :  { %v9643_v25 = vpop.eup %9642  ;;  %7528 = vst [vmem:[%s16914_s12 + $0x2b8] sm:$0xff] %v4860_v44  ;;  %v4857_v16 = vadd.f32 %v4430_v46, %v2809_v41  ;;  %v4432_v4 = vmul.f32 0.6931472, %v9641_v49  ;;  %v3713_v55 = vmul.f32 1.442695, %v3347_v5  ;;  %v2244_v44 = vadd.f32 %v2243_v39, %v13726_v20 }
 0x5ba   :  { %v9645_v42 = vpop.eup %9644  ;;  %v4100_v21 = vadd.f32 1.0, %v9643_v25  ;;  %v3348_v46 = vsub.f32 0.0, %v3092_v56  ;;  %v2336_v49 = vadd.f32 %v2335_v59, %v13676_v9  ;;  %v2817_v17 = vmax.f32 %v14216_v10, 0.0 }
 0x5bb   :  { %v9647_v19 = vpop.eup %9646  ;;  %7525 = vst [vmem:[%s16914_s12 + $0x2a0] sm:$0xff] %v4857_v16  ;;  %v4858_v57 = vadd.f32 %v4432_v4, %v2810_v40  ;;  %v4097_v3 = vadd.f32 1.0, %v9645_v42  ;;  %v3089_v33 = vand.u32 2147483647, %v14299_v48  ;;  %v14306_v42 = vadd.f32 -5.0, %v2244_v44 }
 0x5bc   :  { %v9649_v53 = vpop.eup %9648  ;;  %v4450_v29 = vmul.f32 0.6931472, %v9647_v19  ;;  %9654 = vlog2.f32 %v4100_v21  ;;  %v3715_v4 = vmul.f32 1.442695, %v3348_v46  ;;  %v14308_v21 = vadd.f32 -5.0, %v2336_v49 }
 0x5bd   :  { %7526 = vst [vmem:[%s16914_s12 + $0x2a8] sm:$0xff] %v4858_v57  ;;  %9656 = vlog2.f32 %v4097_v3  ;;  %v4098_v38 = vadd.f32 1.0, %v9649_v53  ;;  %v9651_v8 = vpop.eup %9650  ;;  %v2818_v11 = vmax.f32 %v14220_v31, 0.0  ;;  %v3345_v32 = vsub.f32 0.0, %v3089_v33  ;;  %v2246_v5 = vpop.f32.mrf.mxu3 }
 0x5be   :  { %v4867_v6 = vadd.f32 %v4450_v29, %v2819_v1  ;;  %9658 = vpow2.f32 %v3693_v30  ;;  %v9653_v13 = vpop.eup %9652  ;;  %v4107_v45 = vadd.f32 1.0, %v9651_v8  ;;  %v14311_v10 = vadd.f32 -5.0, %v2425_v36  ;;  %v2157_v8 = vpop.f32.mrf.mxu2 }
 0x5bf   :  { %9660 = vlog2.f32 %v4098_v38  ;;  %v4108_v62 = vadd.f32 1.0, %v9653_v13  ;;  %v3709_v30 = vmul.f32 1.442695, %v3345_v32  ;;  %v3090_v18 = vand.u32 2147483647, %v14306_v42  ;;  %v2337_v49 = vpop.f32.mrf.mxu0  ;;  %v2426_v36 = vpop.f32.mrf.mxu1 }
 0x5c0   :  { %7535 = vst [vmem:[%s16914_s12 + $0x2f0] sm:$0xff] %v4867_v6  ;;  %9662 = vpow2.f32 %v3695_v47  ;;  %v2827_v14 = vmax.f32 %v14224_v0, 0.0  ;;  %v3099_v7 = vand.u32 2147483647, %v14308_v21  ;;  %v5038_v47 = vld [vmem:[#allocation2 + $0x48] sm:$0xff]  ;;  %v2828_v39 = vmax.f32 %v14230_v22, 0.0 }
 0x5c1   :  { %9664 = vlog2.f32 %v4107_v45  ;;  %v3346_v45 = vsub.f32 0.0, %v3090_v18  ;;  %v2158_v56 = vadd.f32 %v2157_v8, %v13689_v27  ;;  %v9992_v22 = vld [vmem:[%s16914_s12 + $0x48] sm:$0xff]  ;;  %v2247_v46 = vadd.f32 %v2246_v5, %v13726_v20 }
 0x5c2   :  { %v9655_v41 = vpop.eup %9654  ;;  %9666 = vlog2.f32 %v4108_v62  ;;  %v3355_v0 = vsub.f32 0.0, %v3099_v7  ;;  %v3100_v62 = vand.u32 2147483647, %v14311_v10  ;;  %v5294_v44 = vmul.f32 %v9992_v22, %v5038_v47 }
 0x5c3   :  { %v9657_v54 = vpop.eup %9656  ;;  %v4452_v40 = vmul.f32 0.6931472, %v9655_v41  ;;  %9668 = vpow2.f32 %v3713_v55 }
 0x5c4   :  { %v9659_v25 = vpop.eup %9658  ;;  %v4446_v16 = vmul.f32 0.6931472, %v9657_v54  ;;  %9670 = vpow2.f32 %v3715_v4  ;;  %v3729_v41 = vmul.f32 1.442695, %v3355_v0  ;;  %v3356_v33 = vsub.f32 0.0, %v3100_v62 }
 0x5c5   :  { %v9661_v23 = vpop.eup %9660  ;;  %v4868_v35 = vadd.f32 %v4452_v40, %v2820_v63  ;;  %v4105_v19 = vadd.f32 1.0, %v9659_v25  ;;  %v3711_v63 = vmul.f32 1.442695, %v3346_v45  ;;  %v2825_v40 = vmax.f32 %v14256_v34, 0.0  ;;  %v9994_v45 = vld [vmem:[%s16914_s12 + $0x90] sm:$0xff] }
 0x5c6   :  { %v9663_v57 = vpop.eup %9662  ;;  %v4865_v1 = vadd.f32 %v4446_v16, %v2817_v17  ;;  %v4448_v3 = vmul.f32 0.6931472, %v9661_v23  ;;  %v14339_v16 = vadd.f32 -5.0, %v2158_v56  ;;  %v14341_v4 = vadd.f32 -5.0, %v2247_v46  ;;  %v2159_v0 = vpop.f32.mrf.mxu2 }
 0x5c7   :  { %v9665_v53 = vpop.eup %9664  ;;  %7536 = vst [vmem:[%s16914_s12 + $0x2f8] sm:$0xff] %v4868_v35  ;;  %9672 = vlog2.f32 %v4105_v19  ;;  %v4106_v29 = vadd.f32 1.0, %v9663_v57  ;;  %v3731_v35 = vmul.f32 1.442695, %v3356_v33  ;;  %v2427_v19 = vadd.f32 %v2426_v36, %v13685_v2 }
 0x5c8   :  { %v9667_v51 = vpop.eup %9666  ;;  %7533 = vst [vmem:[%s16914_s12 + $0x2e0] sm:$0xff] %v4865_v1  ;;  %v4866_v31 = vadd.f32 %v4448_v3, %v2818_v11  ;;  %v4466_v38 = vmul.f32 0.6931472, %v9665_v53  ;;  %v2338_v11 = vadd.f32 %v2337_v49, %v13676_v9  ;;  %v2826_v34 = vmax.f32 %v14259_v28, 0.0  ;;  %v9993_v53 = vld [vmem:[%s16913_s11 + $0x48] sm:$0xff] }
 0x5c9   :  { %v9669_v6 = vpop.eup %9668  ;;  %v4468_v13 = vmul.f32 0.6931472, %v9667_v51  ;;  %9674 = vlog2.f32 %v4106_v29  ;;  %v3097_v3 = vand.u32 2147483647, %v14339_v16  ;;  %v14350_v29 = vadd.f32 %v9993_v53, %v5294_v44 }
 0x5ca   :  { %7534 = vst [vmem:[%s16914_s12 + $0x2e8] sm:$0xff] %v4866_v31  ;;  %v4875_v15 = vadd.f32 %v4466_v38, %v2827_v14  ;;  %v4115_v59 = vadd.f32 1.0, %v9669_v6  ;;  %9676 = vpow2.f32 %v3709_v30  ;;  %v9671_v55 = vpop.eup %9670  ;;  %v5047_v30 = vld [vmem:[#allocation2 + $0x90] sm:$0xff]  ;;  %v3098_v51 = vand.u32 2147483647, %v14341_v4 }
 0x5cb   :  { %v4876_v52 = vadd.f32 %v4468_v13, %v2828_v39  ;;  %v4116_v17 = vadd.f32 1.0, %v9671_v55  ;;  %v2835_v14 = vmax.f32 %v14269_v24, 0.0  ;;  %v3353_v38 = vsub.f32 0.0, %v3097_v3  ;;  %v9995_v3 = vld [vmem:[%s16914_s12 + $0x98] sm:$0xff] }
 0x5cc   :  { %7543 = vst [vmem:[%s16914_s12 + $0x330] sm:$0xff] %v4875_v15  ;;  %9678 = vlog2.f32 %v4115_v59  ;;  %v14357_v7 = vadd.f32 -5.0, %v2338_v11  ;;  %v3354_v47 = vsub.f32 0.0, %v3098_v51  ;;  %v14359_v39 = vadd.f32 -5.0, %v2427_v19 }
 0x5cd   :  { %v9673_v54 = vpop.eup %9672  ;;  %7544 = vst [vmem:[%s16914_s12 + $0x338] sm:$0xff] %v4876_v52  ;;  %9680 = vpow2.f32 %v3711_v63  ;;  %v14364_v5 = vmul.f32 %v9994_v45, %v5047_v30  ;;  %v2836_v24 = vmax.f32 %v14291_v37, 0.0  ;;  %v3725_v59 = vmul.f32 1.442695, %v3353_v38  ;;  %v2248_v52 = vpop.f32.mrf.mxu3 }
 0x5ce   :  { %v4462_v25 = vmul.f32 0.6931472, %v9673_v54  ;;  %9682 = vpow2.f32 %v3729_v41  ;;  %v3727_v55 = vmul.f32 1.442695, %v3354_v47  ;;  %v3107_v22 = vand.u32 2147483647, %v14357_v7 }
 0x5cf   :  { %v9675_v23 = vpop.eup %9674  ;;  %9684 = vlog2.f32 %v4116_v17  ;;  %v2833_v41 = vmax.f32 %v14299_v48, 0.0  ;;  %v3108_v46 = vand.u32 2147483647, %v14359_v39  ;;  %v2160_v36 = vadd.f32 %v2159_v0, %v13689_v27  ;;  %v5048_v17 = vld [vmem:[#allocation2 + $0x98] sm:$0xff] }
 0x5d0   :  { %v9677_v32 = vpop.eup %9676  ;;  %v4873_v57 = vadd.f32 %v4462_v25, %v2825_v40  ;;  %v4464_v1 = vmul.f32 0.6931472, %v9675_v23  ;;  %9686 = vpow2.f32 %v3731_v35  ;;  %v3363_v37 = vsub.f32 0.0, %v3107_v22  ;;  %v2340_v40 = vpop.f32.mrf.mxu0 }
 0x5d1   :  { %v4113_v18 = vadd.f32 1.0, %v9677_v32  ;;  %v2249_v54 = vadd.f32 %v2248_v52, %v13726_v20  ;;  %v3364_v48 = vsub.f32 0.0, %v3108_v46  ;;  %v14378_v11 = vadd.f32 -5.0, %v2160_v36  ;;  %v8910_v52 = vld [vmem:[#allocation6 + $0x138] sm:$0xff] }
 0x5d2   :  { %v9679_v31 = vpop.eup %9678  ;;  %7541 = vst [vmem:[%s16914_s12 + $0x320] sm:$0xff] %v4873_v57  ;;  %v4874_v28 = vadd.f32 %v4464_v1, %v2826_v34  ;;  %v3745_v35 = vmul.f32 1.442695, %v3363_v37  ;;  %v2341_v34 = vadd.f32 %v2340_v40, %v13676_v9  ;;  %v2429_v1 = vpop.f32.mrf.mxu1  ;;  %v14389_v53 = vmul.f32 %v9995_v3, %v5048_v17  ;;  %6797 = vmatpush.bf16.msra.mxu2 %v8910_v52  ;;  %v9996_v40 = vld [vmem:[%s16914_s12 + $0x80] sm:$0xff] }
 0x5d3   :  { %v9681_v8 = vpop.eup %9680  ;;  %v4482_v6 = vmul.f32 0.6931472, %v9679_v31  ;;  %9688 = vlog2.f32 %v4113_v18  ;;  %v14380_v19 = vadd.f32 -5.0, %v2249_v54  ;;  %v3747_v57 = vmul.f32 1.442695, %v3364_v48  ;;  %v2162_v54 = vpop.f32.mrf.mxu2 }
 0x5d4   :  { %v9683_v13 = vpop.eup %9682  ;;  %7542 = vst [vmem:[%s16914_s12 + $0x328] sm:$0xff] %v4874_v28  ;;  %v4114_v15 = vadd.f32 1.0, %v9681_v8  ;;  %v2834_v30 = vmax.f32 %v14306_v42, 0.0  ;;  %v3105_v18 = vand.u32 2147483647, %v14378_v11  ;;  %v5045_v8 = vld [vmem:[#allocation2 + $0x80] sm:$0xff]  ;;  %v5797_v45 = vpack.c.bf16 %v14285_v12, %v14169_v26 }
 0x5d5   :  { %v9685_v63 = vpop.eup %9684  ;;  %v4883_v62 = vadd.f32 %v4482_v6, %v2835_v14  ;;  %v4123_v56 = vadd.f32 1.0, %v9683_v13  ;;  %v3106_v28 = vand.u32 2147483647, %v14380_v19  ;;  %v14394_v14 = vadd.f32 -5.0, %v2341_v34  ;;  %v8918_v26 = vld [vmem:[#allocation6 + $0x178] sm:$0xff] }
 0x5d6   :  { %v4484_v44 = vmul.f32 0.6931472, %v9685_v63  ;;  %9690 = vlog2.f32 %v4114_v15  ;;  %v9687_v49 = vpop.eup %9686  ;;  %v3361_v47 = vsub.f32 0.0, %v3105_v18  ;;  %v2430_v13 = vadd.f32 %v2429_v1, %v13685_v2  ;;  %6449 = vmatmul.bf16.vlgmr.msrb.gmra.mxu2 %v5797_v45  ;;  %6886 = vmatpush.bf16.msra.mxu3 %v8918_v26  ;;  %v9997_v1 = vld [vmem:[%s16914_s12 + $0x88] sm:$0xff] }
 0x5d7   :  { %7551 = vst [vmem:[%s16914_s12 + $0x370] sm:$0xff] %v4883_v62  ;;  %9692 = vlog2.f32 %v4123_v56  ;;  %v4124_v25 = vadd.f32 1.0, %v9687_v49  ;;  %v5798_v0 = vpack.c.bf16 %v14350_v29, %v14182_v58  ;;  %v3115_v22 = vand.u32 2147483647, %v14394_v14  ;;  %v5046_v58 = vld [vmem:[#allocation2 + $0x88] sm:$0xff] }
 0x5d8   :  { %v4884_v33 = vadd.f32 %v4484_v44, %v2836_v24  ;;  %9694 = vpow2.f32 %v3725_v59  ;;  %v2843_v24 = vmax.f32 %v14308_v21, 0.0  ;;  %v3362_v59 = vsub.f32 0.0, %v3106_v28 }
 0x5d9   :  { %v9689_v23 = vpop.eup %9688  ;;  %9696 = vpow2.f32 %v3727_v55  ;;  %v3741_v55 = vmul.f32 1.442695, %v3361_v47  ;;  %v14407_v21 = vadd.f32 -5.0, %v2430_v13  ;;  %6538 = vmatmul.bf16.vlgmr.msrb.gmra.mxu3 %v5798_v0  ;;  %v3371_v37 = vsub.f32 0.0, %v3115_v22 }
 0x5da   :  { %7552 = vst [vmem:[%s16914_s12 + $0x378] sm:$0xff] %v4884_v33  ;;  %v4478_v32 = vmul.f32 0.6931472, %v9689_v23  ;;  %9698 = vlog2.f32 %v4124_v25  ;;  %v5799_v36 = vpack.c.bf16 %v14239_v60, %v14081_v61  ;;  %v14417_v17 = vmul.f32 %v9996_v40, %v5045_v8  ;;  %v5063_v33 = vld [vmem:[#allocation2 + $0x110] sm:$0xff]  ;;  %v5053_v23 = vld [vmem:[#allocation2 + $0xc0] sm:$0xff]  ;;  %v2342_v8 = vpop.f32.mrf.mxu0  ;;  %v2431_v52 = vpop.f32.mrf.mxu1 }
 0x5db   :  { %9700 = vpow2.f32 %v3745_v35  ;;  %v3743_v48 = vmul.f32 1.442695, %v3362_v59  ;;  %v3761_v60 = vmul.f32 1.442695, %v3371_v37  ;;  %v2163_v34 = vadd.f32 %v2162_v54, %v13689_v27  ;;  %v8926_v37 = vld [vmem:[#allocation6 + $0x1b8] sm:$0xff] }
 0x5dc   :  { %v9691_v51 = vpop.eup %9690  ;;  %v4881_v31 = vadd.f32 %v4478_v32, %v2833_v41  ;;  %9702 = vpow2.f32 %v3747_v57  ;;  %v2844_v41 = vmax.f32 %v14311_v10, 0.0  ;;  %6627 = vmatmul.bf16.vlgmr.msrb.gmra.mxu0 %v5799_v36  ;;  %v3116_v32 = vand.u32 2147483647, %v14407_v21  ;;  %v10001_v54 = vld [vmem:[%s16914_s12 + $0x118] sm:$0xff] }
 0x5dd   :  { %v9693_v38 = vpop.eup %9692  ;;  %v4480_v6 = vmul.f32 0.6931472, %v9691_v51  ;;  %v5800_v57 = vpack.c.bf16 %v14276_v43, %v14090_v50  ;;  %v14429_v3 = vmul.f32 %v9997_v1, %v5046_v58  ;;  %v2251_v50 = vpop.f32.mrf.mxu3  ;;  %v9999_v43 = vld [vmem:[%s16914_s12 + $0xc0] sm:$0xff]  ;;  %v14442_v28 = vadd.f32 -5.0, %v2163_v34  ;;  %6975 = vmatpush.bf16.msra.mxu0 %v8926_v37 }
 0x5de   :  { %v9695_v42 = vpop.eup %9694  ;;  %7549 = vst [vmem:[%s16914_s12 + $0x360] sm:$0xff] %v4881_v31  ;;  %v4498_v15 = vmul.f32 0.6931472, %v9693_v38  ;;  %v5309_v51 = vmul.f32 %v9999_v43, %v5053_v23  ;;  %v3372_v31 = vsub.f32 0.0, %v3116_v32  ;;  %v2252_v38 = vadd.f32 %v2251_v50, %v13726_v20 }
 0x5df   :  { %v9697_v63 = vpop.eup %9696  ;;  %v4882_v62 = vadd.f32 %v4480_v6, %v2834_v30  ;;  %v4121_v56 = vadd.f32 1.0, %v9695_v42  ;;  %v9998_v30 = vld [vmem:[%s16914_s12 + $0x110] sm:$0xff]  ;;  %6716 = vmatmul.bf16.vlgmr.msrb.gmra.mxu1 %v5800_v57  ;;  %v2841_v47 = vmax.f32 %v14339_v16, 0.0  ;;  %v2842_v13 = vmax.f32 %v14341_v4, 0.0  ;;  %v10000_v16 = vld [vmem:[%s16913_s11 + $0xc0] sm:$0xff] }
 0x5e0   :  { %v9699_v12 = vpop.eup %9698  ;;  %v4891_v44 = vadd.f32 %v4498_v15, %v2843_v24  ;;  %v4122_v46 = vadd.f32 1.0, %v9697_v63  ;;  %v14434_v18 = vmul.f32 %v9998_v30, %v5063_v33  ;;  %v2343_v45 = vadd.f32 %v2342_v8, %v13676_v9 }
 0x5e1   :  { %v9701_v49 = vpop.eup %9700  ;;  %7550 = vst [vmem:[%s16914_s12 + $0x368] sm:$0xff] %v4882_v62  ;;  %v4500_v29 = vmul.f32 0.6931472, %v9699_v12  ;;  %9704 = vlog2.f32 %v4121_v56  ;;  %v2851_v15 = vmax.f32 %v14357_v7, 0.0  ;;  %v3763_v59 = vmul.f32 1.442695, %v3372_v31 }
 0x5e2   :  { %v9703_v10 = vpop.eup %9702  ;;  %7559 = vst [vmem:[%s16914_s12 + $0x3b0] sm:$0xff] %v4891_v44  ;;  %9706 = vlog2.f32 %v4122_v46  ;;  %v4131_v25 = vadd.f32 1.0, %v9701_v49  ;;  %v14449_v0 = vadd.f32 -5.0, %v2252_v38  ;;  %v5064_v62 = vld [vmem:[#allocation2 + $0x118] sm:$0xff]  ;;  %v14452_v22 = vadd.f32 -5.0, %v2343_v45 }
 0x5e3   :  { %v4892_v35 = vadd.f32 %v4500_v29, %v2844_v41  ;;  %v4132_v61 = vadd.f32 1.0, %v9703_v10  ;;  %9708 = vpow2.f32 %v3741_v55  ;;  %v3113_v55 = vand.u32 2147483647, %v14442_v28 }
 0x5e4   :  { %9710 = vlog2.f32 %v4131_v25  ;;  %v5565_v4 = vadd.f32 %v10000_v16, %v5309_v51  ;;  %v2432_v7 = vadd.f32 %v2431_v52, %v13685_v2  ;;  %v3114_v29 = vand.u32 2147483647, %v14449_v0  ;;  %v2164_v25 = vpop.f32.mrf.mxu2 }
 0x5e5   :  { %7560 = vst [vmem:[%s16914_s12 + $0x3b8] sm:$0xff] %v4892_v35  ;;  %9712 = vlog2.f32 %v4132_v61  ;;  %v3369_v58 = vsub.f32 0.0, %v3113_v55  ;;  %v14462_v10 = vmul.f32 %v10001_v54, %v5064_v62  ;;  %v2852_v40 = vmax.f32 %v14359_v39, 0.0  ;;  %v2253_v8 = vpop.f32.mrf.mxu3 }
 0x5e6   :  { %9714 = vpow2.f32 %v3743_v48  ;;  %v3370_v34 = vsub.f32 0.0, %v3114_v29  ;;  %v3123_v1 = vand.u32 2147483647, %v14452_v22  ;;  %v14479_v30 = vadd.f32 -5.0, %v2432_v7 }
 0x5e7   :  { %v9705_v6 = vpop.eup %9704  ;;  %9716 = vpow2.f32 %v3761_v60  ;;  %v3757_v61 = vmul.f32 1.442695, %v3369_v58  ;;  %v10002_v60 = vld [vmem:[%s16913_s11 + $0x80] sm:$0xff]  ;;  %v2165_v50 = vadd.f32 %v2164_v25, %v13689_v27  ;;  %v2859_v55 = vmax.f32 %v14394_v14, 0.0  ;;  %v10003_v14 = vld [vmem:[%s16914_s12 + $0xc8] sm:$0xff] }
 0x5e8   :  { %v9707_v42 = vpop.eup %9706  ;;  %v4494_v24 = vmul.f32 0.6931472, %v9705_v6  ;;  %9718 = vpow2.f32 %v3763_v59  ;;  %v5557_v32 = vadd.f32 %v10002_v60, %v14417_v17  ;;  %v2849_v17 = vmax.f32 %v14378_v11, 0.0  ;;  %v8934_v59 = vld [vmem:[#allocation6 + $0x1f8] sm:$0xff]  ;;  %v2345_v11 = vpop.f32.mrf.mxu0 }
 0x5e9   :  { %v9709_v63 = vpop.eup %9708  ;;  %v4496_v56 = vmul.f32 0.6931472, %v9707_v42  ;;  %v3759_v31 = vmul.f32 1.442695, %v3370_v34  ;;  %v3379_v38 = vsub.f32 0.0, %v3123_v1  ;;  %v2850_v6 = vmax.f32 %v14380_v19, 0.0  ;;  %v2434_v19 = vpop.f32.mrf.mxu1  ;;  %7064 = vmatpush.bf16.msra.mxu1 %v8934_v59 }
 0x5ea   :  { %v9711_v26 = vpop.eup %9710  ;;  %v4889_v12 = vadd.f32 %v4494_v24, %v2841_v47  ;;  %v4129_v44 = vadd.f32 1.0, %v9709_v63  ;;  %v5805_v43 = vpack.c.bf16 %v5565_v4, %v5557_v32  ;;  %v14488_v24 = vadd.f32 -5.0, %v2165_v50  ;;  %v5061_v32 = vld [vmem:[#allocation2 + $0x100] sm:$0xff]  ;;  %v5056_v59 = vld [vmem:[#allocation2 + $0xd8] sm:$0xff] }
 0x5eb   :  { %v9713_v41 = vpop.eup %9712  ;;  %v4890_v46 = vadd.f32 %v4496_v56, %v2842_v13  ;;  %v4514_v49 = vmul.f32 0.6931472, %v9711_v26  ;;  %v3124_v13 = vand.u32 2147483647, %v14479_v30  ;;  %v3777_v42 = vmul.f32 1.442695, %v3379_v38 }
 0x5ec   :  { %v9715_v36 = vpop.eup %9714  ;;  %7557 = vst [vmem:[%s16914_s12 + $0x3a0] sm:$0xff] %v4889_v12  ;;  %v4516_v33 = vmul.f32 0.6931472, %v9713_v41  ;;  %9720 = vlog2.f32 %v4129_v44  ;;  %6454 = vmatmul.bf16.gmra.mxu2 %v5805_v43  ;;  %v2346_v62 = vadd.f32 %v2345_v11, %v13676_v9  ;;  %v5054_v56 = vld [vmem:[#allocation2 + $0xc8] sm:$0xff]  ;;  %v3121_v16 = vand.u32 2147483647, %v14488_v24  ;;  %v2167_v11 = vpop.f32.mrf.mxu2 }
 0x5ed   :  { %v9717_v48 = vpop.eup %9716  ;;  %7558 = vst [vmem:[%s16914_s12 + $0x3a8] sm:$0xff] %v4890_v46  ;;  %v4899_v23 = vadd.f32 %v4514_v49, %v2851_v15  ;;  %v4130_v35 = vadd.f32 1.0, %v9715_v36  ;;  %v2254_v15 = vadd.f32 %v2253_v8, %v13726_v20  ;;  %v3380_v63 = vsub.f32 0.0, %v3124_v13  ;;  %v10006_v13 = vld [vmem:[%s16914_s12 + $0x100] sm:$0xff] }
 0x5ee   :  { %v4900_v57 = vadd.f32 %v4516_v33, %v2852_v40  ;;  %v4139_v39 = vadd.f32 1.0, %v9717_v48  ;;  %v9719_v51 = vpop.eup %9718  ;;  %v14496_v7 = vadd.f32 -5.0, %v2346_v62  ;;  %v2435_v41 = vadd.f32 %v2434_v19, %v13685_v2 }
 0x5ef   :  { %7567 = vst [vmem:[%s16914_s12 + $0x3f0] sm:$0xff] %v4899_v23  ;;  %9722 = vlog2.f32 %v4130_v35  ;;  %v4140_v47 = vadd.f32 1.0, %v9719_v51  ;;  %v14494_v4 = vadd.f32 -5.0, %v2254_v15  ;;  %v3779_v44 = vmul.f32 1.442695, %v3380_v63  ;;  %v10004_v51 = vld [vmem:[%s16913_s11 + $0xc8] sm:$0xff] }
 0x5f0   :  { %7568 = vst [vmem:[%s16914_s12 + $0x3f8] sm:$0xff] %v4900_v57  ;;  %9724 = vlog2.f32 %v4139_v39  ;;  %v3377_v58 = vsub.f32 0.0, %v3121_v16  ;;  %v5310_v37 = vmul.f32 %v10003_v14, %v5054_v56  ;;  %v2860_v40 = vmax.f32 %v14407_v21, 0.0 }
 0x5f1   :  { %9726 = vpow2.f32 %v3757_v61  ;;  %v3122_v29 = vand.u32 2147483647, %v14494_v4  ;;  %v3131_v33 = vand.u32 2147483647, %v14496_v7  ;;  %v14508_v1 = vadd.f32 -5.0, %v2435_v41 }
 0x5f2   :  { %v9721_v45 = vpop.eup %9720  ;;  %9728 = vpow2.f32 %v3759_v31  ;;  %v3773_v35 = vmul.f32 1.442695, %v3377_v58  ;;  %v5055_v31 = vld [vmem:[#allocation2 + $0xd0] sm:$0xff]  ;;  %v2857_v63 = vmax.f32 %v14442_v28, 0.0  ;;  %v2858_v56 = vmax.f32 %v14449_v0, 0.0  ;;  %v10010_v0 = vld [vmem:[%s16914_s12 + $0xd8] sm:$0xff] }
 0x5f3   :  { %v4510_v52 = vmul.f32 0.6931472, %v9721_v45  ;;  %9730 = vlog2.f32 %v4140_v47  ;;  %v3378_v61 = vsub.f32 0.0, %v3122_v29  ;;  %v3387_v34 = vsub.f32 0.0, %v3131_v33  ;;  %v10008_v28 = vld [vmem:[%s16913_s11 + $0x90] sm:$0xff]  ;;  %v10012_v33 = vld [vmem:[%s16913_s11 + $0xd8] sm:$0xff] }
 0x5f4   :  { %9732 = vpow2.f32 %v3777_v42  ;;  %v14526_v45 = vmul.f32 %v10006_v13, %v5061_v32  ;;  %v3132_v15 = vand.u32 2147483647, %v14508_v1  ;;  %v2168_v29 = vadd.f32 %v2167_v11, %v13689_v27  ;;  %v10014_v13 = vld [vmem:[%s16914_s12 + $0x190] sm:$0xff] }
 0x5f5   :  { %v9723_v26 = vpop.eup %9722  ;;  %v4897_v12 = vadd.f32 %v4510_v52, %v2849_v17  ;;  %9734 = vpow2.f32 %v3779_v44  ;;  %v3775_v43 = vmul.f32 1.442695, %v3378_v61  ;;  %v5566_v17 = vadd.f32 %v10004_v51, %v5310_v37  ;;  %v10009_v44 = vld [vmem:[%s16913_s11 + $0xd0] sm:$0xff] }
 0x5f6   :  { %v9725_v46 = vpop.eup %9724  ;;  %v4512_v49 = vmul.f32 0.6931472, %v9723_v26  ;;  %v3793_v8 = vmul.f32 1.442695, %v3387_v34  ;;  %v3388_v16 = vsub.f32 0.0, %v3132_v15  ;;  %v2256_v26 = vpop.f32.mrf.mxu3  ;;  %v5079_v61 = vld [vmem:[#allocation2 + $0x190] sm:$0xff] }
 0x5f7   :  { %v9727_v36 = vpop.eup %9726  ;;  %7565 = vst [vmem:[%s16914_s12 + $0x3e0] sm:$0xff] %v4897_v12  ;;  %v4530_v54 = vmul.f32 0.6931472, %v9725_v46  ;;  %v5559_v12 = vadd.f32 %v10008_v28, %v14364_v5  ;;  %v5312_v46 = vmul.f32 %v10010_v0, %v5056_v59  ;;  %v2257_v14 = vadd.f32 %v2256_v26, %v13726_v20  ;;  %v2436_v15 = vpop.f32.mrf.mxu1 }
 0x5f8   :  { %v9729_v25 = vpop.eup %9728  ;;  %v4898_v48 = vadd.f32 %v4512_v49, %v2850_v6  ;;  %v4137_v23 = vadd.f32 1.0, %v9727_v36  ;;  %v10005_v6 = vld [vmem:[%s16913_s11 + $0x88] sm:$0xff]  ;;  %v3795_v58 = vmul.f32 1.442695, %v3388_v16  ;;  %v14556_v32 = vadd.f32 -5.0, %v2168_v29 }
 0x5f9   :  { %v9731_v60 = vpop.eup %9730  ;;  %v4907_v57 = vadd.f32 %v4530_v54, %v2859_v55  ;;  %v4138_v39 = vadd.f32 1.0, %v9729_v25  ;;  %v5558_v47 = vadd.f32 %v10005_v6, %v14429_v3  ;;  %v10007_v3 = vld [vmem:[%s16914_s12 + $0xd0] sm:$0xff]  ;;  %v10011_v54 = vld [vmem:[%s16913_s11 + $0x98] sm:$0xff]  ;;  %v5568_v25 = vadd.f32 %v10012_v33, %v5312_v46  ;;  %v10013_v6 = vld [vmem:[%s16914_s12 + $0x108] sm:$0xff] }
 0x5fa   :  { %v9733_v50 = vpop.eup %9732  ;;  %7566 = vst [vmem:[%s16914_s12 + $0x3e8] sm:$0xff] %v4898_v48  ;;  %v4532_v21 = vmul.f32 0.6931472, %v9731_v60  ;;  %9736 = vlog2.f32 %v4137_v23  ;;  %v5311_v19 = vmul.f32 %v10007_v3, %v5055_v31  ;;  %v2347_v48 = vpop.f32.mrf.mxu0  ;;  %v2437_v28 = vadd.f32 %v2436_v15, %v13685_v2 }
 0x5fb   :  { %7575 = vst [vmem:[%s16914_s12 + $0x430] sm:$0xff] %v4907_v57  ;;  %9738 = vlog2.f32 %v4138_v39  ;;  %v4147_v38 = vadd.f32 1.0, %v9733_v50  ;;  %v9735_v52 = vpop.eup %9734  ;;  %v5806_v62 = vpack.c.bf16 %v5566_v17, %v5558_v47  ;;  %v14558_v57 = vadd.f32 -5.0, %v2257_v14  ;;  %v2169_v3 = vpop.f32.mrf.mxu2 }
 0x5fc   :  { %v4908_v42 = vadd.f32 %v4532_v21, %v2860_v40  ;;  %9740 = vpow2.f32 %v3773_v35  ;;  %v4148_v55 = vadd.f32 1.0, %v9735_v52  ;;  %v5567_v41 = vadd.f32 %v10009_v44, %v5311_v19  ;;  %v5062_v35 = vld [vmem:[#allocation2 + $0x108] sm:$0xff] }
 0x5fd   :  { %9742 = vlog2.f32 %v4147_v38  ;;  %6543 = vmatmul.bf16.gmra.mxu3 %v5806_v62  ;;  %v5560_v40 = vadd.f32 %v10011_v54, %v14389_v53  ;;  %v2348_v21 = vadd.f32 %v2347_v48, %v13676_v9  ;;  %v2867_v17 = vmax.f32 %v14452_v22, 0.0  ;;  %v5069_v48 = vld [vmem:[#allocation2 + $0x140] sm:$0xff] }
 0x5fe   :  { %7576 = vst [vmem:[%s16914_s12 + $0x438] sm:$0xff] %v4908_v42  ;;  %9744 = vpow2.f32 %v3775_v43  ;;  %v5807_v5 = vpack.c.bf16 %v5567_v41, %v5559_v12  ;;  %v3129_v38 = vand.u32 2147483647, %v14556_v32  ;;  %v14566_v47 = vmul.f32 %v10013_v6, %v5062_v35  ;;  %v2258_v12 = vpop.f32.mrf.mxu3 }
 0x5ff   :  { %9746 = vpow2.f32 %v3793_v8  ;;  %v5808_v53 = vpack.c.bf16 %v5568_v25, %v5560_v40  ;;  %v14571_v42 = vmul.f32 %v10014_v13, %v5079_v61  ;;  %v2868_v52 = vmax.f32 %v14479_v30, 0.0 }
 0x600   :  { %v9737_v49 = vpop.eup %9736  ;;  %9748 = vlog2.f32 %v4148_v55  ;;  %6632 = vmatmul.bf16.gmra.mxu0 %v5807_v5  ;;  %v3385_v62 = vsub.f32 0.0, %v3129_v38  ;;  %v14581_v55 = vadd.f32 -5.0, %v2348_v21  ;;  %v2170_v30 = vadd.f32 %v2169_v3, %v13689_v27  ;;  %v5080_v38 = vld [vmem:[#allocation2 + $0x198] sm:$0xff] }
 0x601   :  { %v9739_v37 = vpop.eup %9738  ;;  %v4526_v36 = vmul.f32 0.6931472, %v9737_v49  ;;  %9750 = vpow2.f32 %v3795_v58  ;;  %6721 = vmatmul.bf16.gmra.mxu1 %v5808_v53  ;;  %v2865_v41 = vmax.f32 %v14488_v24, 0.0  ;;  %v14590_v29 = vadd.f32 -5.0, %v2437_v28 }
 0x602   :  { %v9741_v23 = vpop.eup %9740  ;;  %v4528_v60 = vmul.f32 0.6931472, %v9739_v37  ;;  %v3789_v26 = vmul.f32 1.442695, %v3385_v62  ;;  %v2350_v49 = vpop.f32.mrf.mxu0  ;;  %v3139_v58 = vand.u32 2147483647, %v14581_v55  ;;  %v2259_v24 = vadd.f32 %v2258_v12, %v13726_v20 }
 0x603   :  { %v9743_v39 = vpop.eup %9742  ;;  %v4905_v34 = vadd.f32 %v4526_v36, %v2857_v63  ;;  %v4145_v50 = vadd.f32 1.0, %v9741_v23  ;;  %v14592_v14 = vadd.f32 -5.0, %v2170_v30  ;;  %v2866_v36 = vmax.f32 %v14494_v4, 0.0  ;;  %v8909_v12 = vld [vmem:[#allocation6 + $0x130] sm:$0xff] }
 0x604   :  { %v9745_v43 = vpop.eup %9744  ;;  %v4906_v51 = vadd.f32 %v4528_v60, %v2858_v56  ;;  %v4546_v31 = vmul.f32 0.6931472, %v9743_v39  ;;  %v3130_v56 = vand.u32 2147483647, %v14558_v57  ;;  %v3395_v40 = vsub.f32 0.0, %v3139_v58  ;;  %v10017_v58 = vld [vmem:[%s16913_s11 + $0x100] sm:$0xff]  ;;  %6798 = vmatpush.bf16.msra.mxu2 %v8909_v12 }
 0x605   :  { %v9747_v8 = vpop.eup %9746  ;;  %7573 = vst [vmem:[%s16914_s12 + $0x420] sm:$0xff] %v4905_v34  ;;  %9752 = vlog2.f32 %v4145_v50  ;;  %v4146_v22 = vadd.f32 1.0, %v9745_v43  ;;  %v3140_v33 = vand.u32 2147483647, %v14590_v29  ;;  %v2351_v25 = vadd.f32 %v2350_v49, %v13676_v9 }
 0x606   :  { %v9749_v59 = vpop.eup %9748  ;;  %7574 = vst [vmem:[%s16914_s12 + $0x428] sm:$0xff] %v4906_v51  ;;  %v4915_v11 = vadd.f32 %v4546_v31, %v2867_v17  ;;  %v4155_v63 = vadd.f32 1.0, %v9747_v8  ;;  %v3386_v46 = vsub.f32 0.0, %v3130_v56  ;;  %v2875_v35 = vmax.f32 %v14496_v7, 0.0  ;;  %v10015_v17 = vld [vmem:[%s16914_s12 + $0x140] sm:$0xff] }
 0x607   :  { %v4548_v19 = vmul.f32 0.6931472, %v9749_v59  ;;  %9754 = vlog2.f32 %v4146_v22  ;;  %v9751_v16 = vpop.eup %9750  ;;  %v3137_v61 = vand.u32 2147483647, %v14592_v14  ;;  %v14603_v60 = vadd.f32 -5.0, %v2259_v24  ;;  %v2439_v22 = vpop.f32.mrf.mxu1  ;;  %v5071_v24 = vld [vmem:[#allocation2 + $0x150] sm:$0xff] }
 0x608   :  { %7583 = vst [vmem:[%s16914_s12 + $0x470] sm:$0xff] %v4915_v11  ;;  %9756 = vlog2.f32 %v4155_v63  ;;  %v4156_v0 = vadd.f32 1.0, %v9751_v16  ;;  %v3791_v5 = vmul.f32 1.442695, %v3386_v46  ;;  %v3809_v50 = vmul.f32 1.442695, %v3395_v40 }
 0x609   :  { %v4916_v44 = vadd.f32 %v4548_v19, %v2868_v52  ;;  %9758 = vpow2.f32 %v3789_v26  ;;  %v3396_v53 = vsub.f32 0.0, %v3140_v33  ;;  %v3393_v43 = vsub.f32 0.0, %v3137_v61  ;;  %v10016_v16 = vld [vmem:[%s16914_s12 + $0x198] sm:$0xff] }
 0x60a   :  { %9760 = vlog2.f32 %v4156_v0  ;;  %v3138_v51 = vand.u32 2147483647, %v14603_v60  ;;  %v5325_v31 = vmul.f32 %v10015_v17, %v5069_v48  ;;  %v14612_v13 = vadd.f32 -5.0, %v2351_v25 }
 0x60b   :  { %v9753_v37 = vpop.eup %9752  ;;  %7584 = vst [vmem:[%s16914_s12 + $0x478] sm:$0xff] %v4916_v44  ;;  %9762 = vpow2.f32 %v3791_v5  ;;  %v3811_v6 = vmul.f32 1.442695, %v3396_v53  ;;  %v3805_v52 = vmul.f32 1.442695, %v3393_v43  ;;  %v2876_v62 = vmax.f32 %v14508_v1, 0.0 }
 0x60c   :  { %v4542_v54 = vmul.f32 0.6931472, %v9753_v37  ;;  %9764 = vpow2.f32 %v3809_v50  ;;  %v3394_v63 = vsub.f32 0.0, %v3138_v51  ;;  %v3147_v19 = vand.u32 2147483647, %v14612_v13  ;;  %v5070_v1 = vld [vmem:[#allocation2 + $0x148] sm:$0xff] }
 0x60d   :  { %v9755_v23 = vpop.eup %9754  ;;  %9766 = vpow2.f32 %v3811_v6  ;;  %v14622_v26 = vmul.f32 %v10016_v16, %v5080_v38  ;;  %v2440_v30 = vadd.f32 %v2439_v22, %v13685_v2  ;;  %v8917_v44 = vld [vmem:[#allocation6 + $0x170] sm:$0xff]  ;;  %v5573_v37 = vadd.f32 %v10017_v58, %v14526_v45  ;;  %v10019_v45 = vld [vmem:[%s16914_s12 + $0x148] sm:$0xff] }
 0x60e   :  { %v9757_v4 = vpop.eup %9756  ;;  %v4913_v39 = vadd.f32 %v4542_v54, %v2865_v41  ;;  %v4544_v34 = vmul.f32 0.6931472, %v9755_v23  ;;  %v3807_v28 = vmul.f32 1.442695, %v3394_v63  ;;  %v3403_v46 = vsub.f32 0.0, %v3147_v19  ;;  %6887 = vmatpush.bf16.msra.mxu3 %v8917_v44  ;;  %v10021_v53 = vld [vmem:[%s16913_s11 + $0x148] sm:$0xff]  ;;  %v2261_v19 = vpop.f32.mrf.mxu3 }
 0x60f   :  { %v4562_v21 = vmul.f32 0.6931472, %v9757_v4  ;;  %v9759_v7 = vpop.eup %9758  ;;  %v14628_v49 = vadd.f32 -5.0, %v2440_v30  ;;  %v2873_v40 = vmax.f32 %v14556_v32, 0.0  ;;  %v5326_v25 = vmul.f32 %v10019_v45, %v5070_v1  ;;  %v5072_v4 = vld [vmem:[#allocation2 + $0x158] sm:$0xff]  ;;  %v10020_v32 = vld [vmem:[%s16913_s11 + $0x108] sm:$0xff] }
 0x610   :  { %7581 = vst [vmem:[%s16914_s12 + $0x460] sm:$0xff] %v4913_v39  ;;  %v4914_v8 = vadd.f32 %v4544_v34, %v2866_v36  ;;  %v9761_v15 = vpop.eup %9760  ;;  %v4153_v11 = vadd.f32 1.0, %v9759_v7  ;;  %v10018_v36 = vld [vmem:[%s16913_s11 + $0x140] sm:$0xff]  ;;  %v3825_v33 = vmul.f32 1.442695, %v3403_v46  ;;  %v2874_v48 = vmax.f32 %v14558_v57, 0.0  ;;  %v2172_v39 = vpop.f32.mrf.mxu2 }
 0x611   :  { %v4923_v59 = vadd.f32 %v4562_v21, %v2875_v35  ;;  %v4564_v3 = vmul.f32 0.6931472, %v9761_v15  ;;  %v9763_v56 = vpop.eup %9762  ;;  %v5581_v5 = vadd.f32 %v10018_v36, %v5325_v31  ;;  %v3148_v35 = vand.u32 2147483647, %v14628_v49  ;;  %v10022_v57 = vld [vmem:[%s16914_s12 + $0x150] sm:$0xff]  ;;  %v10027_v1 = vld [vmem:[%s16913_s11 + $0x158] sm:$0xff]  ;;  %v2352_v46 = vpop.f32.mrf.mxu0 }
 0x612   :  { %7582 = vst [vmem:[%s16914_s12 + $0x468] sm:$0xff] %v4914_v8  ;;  %9768 = vlog2.f32 %v4153_v11  ;;  %v4154_v0 = vadd.f32 1.0, %v9763_v56  ;;  %v9765_v54 = vpop.eup %9764  ;;  %v5574_v50 = vadd.f32 %v10020_v32, %v14566_v47  ;;  %v5582_v21 = vadd.f32 %v10021_v53, %v5326_v25  ;;  %v10023_v7 = vld [vmem:[%s16913_s11 + $0x110] sm:$0xff] }
 0x613   :  { %7591 = vst [vmem:[%s16914_s12 + $0x4b0] sm:$0xff] %v4923_v59  ;;  %v4924_v41 = vadd.f32 %v4564_v3, %v2876_v62  ;;  %9770 = vpow2.f32 %v3805_v52  ;;  %v4163_v23 = vadd.f32 1.0, %v9765_v54  ;;  %v5813_v61 = vpack.c.bf16 %v5581_v5, %v5573_v37  ;;  %v9767_v34 = vpop.eup %9766  ;;  %v10024_v22 = vld [vmem:[%s16913_s11 + $0x150] sm:$0xff]  ;;  %v10025_v59 = vld [vmem:[%s16914_s12 + $0x158] sm:$0xff] }
 0x614   :  { %9772 = vpow2.f32 %v3807_v28  ;;  %v5327_v43 = vmul.f32 %v10022_v57, %v5071_v24  ;;  %v4164_v17 = vadd.f32 1.0, %v9767_v34  ;;  %v3404_v31 = vsub.f32 0.0, %v3148_v35  ;;  %v2441_v24 = vpop.f32.mrf.mxu1 }
 0x615   :  { %7592 = vst [vmem:[%s16914_s12 + $0x4b8] sm:$0xff] %v4924_v41  ;;  %9774 = vlog2.f32 %v4154_v0  ;;  %6459 = vmatmul.bf16.gmra.mxu2 %v5813_v61  ;;  %v5575_v47 = vadd.f32 %v10023_v7, %v14434_v18  ;;  %v5814_v6 = vpack.c.bf16 %v5582_v21, %v5574_v50  ;;  %v5328_v11 = vmul.f32 %v10025_v59, %v5072_v4  ;;  %v10026_v18 = vld [vmem:[%s16913_s11 + $0x118] sm:$0xff]  ;;  %v8925_v61 = vld [vmem:[#allocation6 + $0x1b0] sm:$0xff] }
 0x616   :  { %9776 = vpow2.f32 %v3825_v33  ;;  %v5583_v15 = vadd.f32 %v10024_v22, %v5327_v43  ;;  %v3827_v62 = vmul.f32 1.442695, %v3404_v31  ;;  %v5576_v3 = vadd.f32 %v10026_v18, %v14462_v10  ;;  %v5077_v10 = vld [vmem:[#allocation2 + $0x180] sm:$0xff]  ;;  %6976 = vmatpush.bf16.msra.mxu0 %v8925_v61 }
 0x617   :  { %9778 = vlog2.f32 %v4163_v23  ;;  %6548 = vmatmul.bf16.gmra.mxu3 %v5814_v6  ;;  %v5584_v12 = vadd.f32 %v10027_v1, %v5328_v11  ;;  %v2173_v41 = vadd.f32 %v2172_v39, %v13689_v27  ;;  %v2262_v0 = vadd.f32 %v2261_v19, %v13726_v20  ;;  %v10028_v39 = vld [vmem:[%s16914_s12 + $0x180] sm:$0xff] }
 0x618   :  { %v9769_v51 = vpop.eup %9768  ;;  %9780 = vlog2.f32 %v4164_v17  ;;  %v5815_v30 = vpack.c.bf16 %v5583_v15, %v5575_v47  ;;  %v2883_v37 = vmax.f32 %v14581_v55, 0.0  ;;  %v2353_v5 = vadd.f32 %v2352_v46, %v13676_v9  ;;  %v2174_v50 = vpop.f32.mrf.mxu2  ;;  %v10029_v46 = vld [vmem:[%s16914_s12 + $0x188] sm:$0xff] }
 0x619   :  { %v9771_v38 = vpop.eup %9770  ;;  %v4558_v8 = vmul.f32 0.6931472, %v9769_v51  ;;  %v5816_v36 = vpack.c.bf16 %v5584_v12, %v5576_v3  ;;  %v14680_v45 = vadd.f32 -5.0, %v2173_v41  ;;  %v14682_v23 = vadd.f32 -5.0, %v2262_v0  ;;  %v2355_v41 = vpop.f32.mrf.mxu0  ;;  %v5085_v0 = vld [vmem:[#allocation2 + $0x1c0] sm:$0xff] }
 0x61a   :  { %v9773_v52 = vpop.eup %9772  ;;  %v4161_v63 = vadd.f32 1.0, %v9771_v38  ;;  %6637 = vmatmul.bf16.gmra.mxu0 %v5815_v30  ;;  %v14684_v35 = vadd.f32 -5.0, %v2353_v5  ;;  %v2442_v55 = vadd.f32 %v2441_v24, %v13685_v2  ;;  %v14690_v34 = vmul.f32 %v10028_v39, %v5077_v10  ;;  %v5078_v38 = vld [vmem:[#allocation2 + $0x188] sm:$0xff]  ;;  %v5095_v10 = vld [vmem:[#allocation2 + $0x210] sm:$0xff]  ;;  %v5093_v24 = vld [vmem:[#allocation2 + $0x200] sm:$0xff] }
 0x61b   :  { %v9775_v56 = vpop.eup %9774  ;;  %v4921_v16 = vadd.f32 %v4558_v8, %v2873_v40  ;;  %v4162_v28 = vadd.f32 1.0, %v9773_v52  ;;  %6726 = vmatmul.bf16.gmra.mxu1 %v5816_v36  ;;  %v3145_v32 = vand.u32 2147483647, %v14680_v45  ;;  %v2881_v57 = vmax.f32 %v14592_v14, 0.0  ;;  %v10030_v39 = vld [vmem:[%s16914_s12 + $0x1c0] sm:$0xff] }
 0x61c   :  { %v4560_v44 = vmul.f32 0.6931472, %v9775_v56  ;;  %9782 = vlog2.f32 %v4161_v63  ;;  %v9777_v58 = vpop.eup %9776  ;;  %v3146_v43 = vand.u32 2147483647, %v14682_v23  ;;  %v2882_v17 = vmax.f32 %v14603_v60, 0.0  ;;  %v2263_v63 = vpop.f32.mrf.mxu3 }
 0x61d   :  { %7589 = vst [vmem:[%s16914_s12 + $0x4a0] sm:$0xff] %v4921_v16  ;;  %9784 = vlog2.f32 %v4162_v28  ;;  %v9779_v54 = vpop.eup %9778  ;;  %v4171_v33 = vadd.f32 1.0, %v9777_v58  ;;  %v3401_v31 = vsub.f32 0.0, %v3145_v32  ;;  %v3155_v7 = vand.u32 2147483647, %v14684_v35  ;;  %v10031_v32 = vld [vmem:[%s16914_s12 + $0x210] sm:$0xff] }
 0x61e   :  { %v4922_v40 = vadd.f32 %v4560_v44, %v2874_v48  ;;  %9786 = vpow2.f32 %v3827_v62  ;;  %v4578_v25 = vmul.f32 0.6931472, %v9779_v54  ;;  %v9781_v4 = vpop.eup %9780  ;;  %v2884_v48 = vmax.f32 %v14590_v29, 0.0  ;;  %v8933_v44 = vld [vmem:[#allocation6 + $0x1f0] sm:$0xff] }
 0x61f   :  { %9788 = vlog2.f32 %v4171_v33  ;;  %v4580_v21 = vmul.f32 0.6931472, %v9781_v4  ;;  %v14701_v47 = vadd.f32 -5.0, %v2442_v55  ;;  %v3402_v14 = vsub.f32 0.0, %v3146_v43  ;;  %7065 = vmatpush.bf16.msra.mxu1 %v8933_v44 }
 0x620   :  { %7590 = vst [vmem:[%s16914_s12 + $0x4a8] sm:$0xff] %v4922_v40  ;;  %v4931_v53 = vadd.f32 %v4578_v25, %v2883_v37  ;;  %v2175_v22 = vadd.f32 %v2174_v50, %v13689_v27  ;;  %v2891_v60 = vmax.f32 %v14612_v13, 0.0  ;;  %v3821_v11 = vmul.f32 1.442695, %v3401_v31  ;;  %v5096_v37 = vld [vmem:[#allocation2 + $0x218] sm:$0xff]  ;;  %v2444_v25 = vpop.f32.mrf.mxu1 }
 0x621   :  { %v4932_v8 = vadd.f32 %v4580_v21, %v2884_v48  ;;  %v3411_v52 = vsub.f32 0.0, %v3155_v7  ;;  %v3823_v3 = vmul.f32 1.442695, %v3402_v14  ;;  %v3156_v19 = vand.u32 2147483647, %v14701_v47 }
 0x622   :  { %v9783_v51 = vpop.eup %9782  ;;  %7599 = vst [vmem:[%s16914_s12 + $0x4f0] sm:$0xff] %v4931_v53  ;;  %9790 = vpow2.f32 %v3821_v11  ;;  %v14712_v30 = vadd.f32 -5.0, %v2175_v22  ;;  %v2264_v12 = vadd.f32 %v2263_v63, %v13726_v20  ;;  %v14721_v58 = vmul.f32 %v10029_v46, %v5078_v38  ;;  %v10032_v53 = vld [vmem:[%s16914_s12 + $0x218] sm:$0xff]  ;;  %v10034_v22 = vld [vmem:[%s16913_s11 + $0x1c0] sm:$0xff] }
 0x623   :  { %v9785_v29 = vpop.eup %9784  ;;  %v4574_v6 = vmul.f32 0.6931472, %v9783_v51  ;;  %7600 = vst [vmem:[%s16914_s12 + $0x4f8] sm:$0xff] %v4932_v8  ;;  %v3841_v28 = vmul.f32 1.442695, %v3411_v52  ;;  %v3412_v1 = vsub.f32 0.0, %v3156_v19  ;;  %v2356_v5 = vadd.f32 %v2355_v41, %v13676_v9 }
 0x624   :  { %v9787_v15 = vpop.eup %9786  ;;  %v4576_v59 = vmul.f32 0.6931472, %v9785_v29  ;;  %v3153_v36 = vand.u32 2147483647, %v14712_v30  ;;  %v14728_v33 = vadd.f32 -5.0, %v2264_v12  ;;  %v2445_v4 = vadd.f32 %v2444_v25, %v13685_v2  ;;  %v10033_v51 = vld [vmem:[%s16914_s12 + $0x200] sm:$0xff] }
 0x625   :  { %v4929_v62 = vadd.f32 %v4574_v6, %v2881_v57  ;;  %v4172_v18 = vadd.f32 1.0, %v9787_v15  ;;  %v9789_v56 = vpop.eup %9788  ;;  %v3843_v40 = vmul.f32 1.442695, %v3412_v1  ;;  %v14730_v61 = vadd.f32 -5.0, %v2356_v5  ;;  %v10035_v52 = vld [vmem:[%s16913_s11 + $0x180] sm:$0xff]  ;;  %v5088_v46 = vld [vmem:[#allocation2 + $0x1d8] sm:$0xff] }
 0x626   :  { %v4930_v16 = vadd.f32 %v4576_v59, %v2882_v17  ;;  %v4594_v13 = vmul.f32 0.6931472, %v9789_v56  ;;  %v3409_v55 = vsub.f32 0.0, %v3153_v36  ;;  %v5341_v48 = vmul.f32 %v10030_v39, %v5085_v0  ;;  %v5087_v56 = vld [vmem:[#allocation2 + $0x1d0] sm:$0xff] }
 0x627   :  { %7597 = vst [vmem:[%s16914_s12 + $0x4e0] sm:$0xff] %v4929_v62  ;;  %9792 = vlog2.f32 %v4172_v18  ;;  %v14739_v50 = vmul.f32 %v10031_v32, %v5095_v10  ;;  %v14744_v21 = vmul.f32 %v10032_v53, %v5096_v37  ;;  %v3154_v57 = vand.u32 2147483647, %v14728_v33  ;;  %v5086_v62 = vld [vmem:[#allocation2 + $0x1c8] sm:$0xff]  ;;  %v10038_v36 = vld [vmem:[%s16914_s12 + $0x1d0] sm:$0xff]  ;;  %v10042_v32 = vld [vmem:[%s16914_s12 + $0x1d8] sm:$0xff] }
 0x628   :  { %7598 = vst [vmem:[%s16914_s12 + $0x4e8] sm:$0xff] %v4930_v16  ;;  %9794 = vpow2.f32 %v3823_v3  ;;  %v4939_v54 = vadd.f32 %v4594_v13, %v2891_v60  ;;  %v9791_v43 = vpop.eup %9790  ;;  %v14753_v17 = vmul.f32 %v10033_v51, %v5093_v24  ;;  %v3837_v31 = vmul.f32 1.442695, %v3409_v55  ;;  %v2177_v24 = vpop.f32.mrf.mxu2  ;;  %v10040_v55 = vld [vmem:[%s16913_s11 + $0x190] sm:$0xff] }
 0x629   :  { %9796 = vpow2.f32 %v3841_v28  ;;  %v3163_v7 = vand.u32 2147483647, %v14730_v61  ;;  %v14756_v29 = vadd.f32 -5.0, %v2445_v4  ;;  %v2892_v8 = vmax.f32 %v14628_v49, 0.0  ;;  %v10041_v39 = vld [vmem:[%s16913_s11 + $0x1d0] sm:$0xff]  ;;  %v2266_v51 = vpop.f32.mrf.mxu3 }
 0x62a   :  { %7607 = vst [vmem:[%s16914_s12 + $0x530] sm:$0xff] %v4939_v54  ;;  %9798 = vpow2.f32 %v3843_v40  ;;  %v4169_v6 = vadd.f32 1.0, %v9791_v43  ;;  %v3410_v14 = vsub.f32 0.0, %v3154_v57  ;;  %v5597_v15 = vadd.f32 %v10034_v22, %v5341_v48  ;;  %v10039_v40 = vld [vmem:[%s16913_s11 + $0x1c8] sm:$0xff]  ;;  %v10043_v57 = vld [vmem:[%s16913_s11 + $0x198] sm:$0xff] }
 0x62b   :  { %9800 = vpow2.f32 %v3837_v31  ;;  %v3419_v11 = vsub.f32 0.0, %v3163_v7  ;;  %v5589_v63 = vadd.f32 %v10035_v52, %v14690_v34  ;;  %v3164_v19 = vand.u32 2147483647, %v14756_v29  ;;  %v10036_v34 = vld [vmem:[%s16914_s12 + $0x1c8] sm:$0xff] }
 0x62c   :  { %9802 = vlog2.f32 %v4169_v6  ;;  %v3839_v3 = vmul.f32 1.442695, %v3410_v14  ;;  %v2889_v28 = vmax.f32 %v14680_v45, 0.0  ;;  %v5342_v0 = vmul.f32 %v10036_v34, %v5086_v62  ;;  %v10037_v45 = vld [vmem:[%s16913_s11 + $0x188] sm:$0xff]  ;;  %v10044_v14 = vld [vmem:[%s16913_s11 + $0x1d8] sm:$0xff]  ;;  %v5111_v62 = vld [vmem:[#allocation2 + $0x290] sm:$0xff] }
 0x62d   :  { %v9793_v38 = vpop.eup %9792  ;;  %v5821_v1 = vpack.c.bf16 %v5597_v15, %v5589_v63  ;;  %v3857_v44 = vmul.f32 1.442695, %v3419_v11  ;;  %v3420_v41 = vsub.f32 0.0, %v3164_v19  ;;  %v5590_v37 = vadd.f32 %v10037_v45, %v14721_v58  ;;  %v2357_v15 = vpop.f32.mrf.mxu0 }
 0x62e   :  { %v9795_v59 = vpop.eup %9794  ;;  %v4596_v60 = vmul.f32 0.6931472, %v9793_v38  ;;  %v5343_v5 = vmul.f32 %v10038_v36, %v5087_v56  ;;  %v5598_v25 = vadd.f32 %v10039_v40, %v5342_v0  ;;  %v5591_v4 = vadd.f32 %v10040_v55, %v14571_v42  ;;  %v2446_v0 = vpop.f32.mrf.mxu1  ;;  %v5101_v55 = vld [vmem:[#allocation2 + $0x240] sm:$0xff] }
 0x62f   :  { %v9797_v18 = vpop.eup %9796  ;;  %v4170_v49 = vadd.f32 1.0, %v9795_v59  ;;  %6464 = vmatmul.bf16.gmra.mxu2 %v5821_v1  ;;  %v3859_v54 = vmul.f32 1.442695, %v3420_v41  ;;  %v5344_v53 = vmul.f32 %v10042_v32, %v5088_v46  ;;  %v5592_v43 = vadd.f32 %v10043_v57, %v14622_v26  ;;  %v10045_v41 = vld [vmem:[%s16914_s12 + $0x208] sm:$0xff]  ;;  %v5112_v32 = vld [vmem:[#allocation2 + $0x298] sm:$0xff] }
 0x630   :  { %v4940_v16 = vadd.f32 %v4596_v60, %v2892_v8  ;;  %v4179_v13 = vadd.f32 1.0, %v9797_v18  ;;  %v9799_v12 = vpop.eup %9798  ;;  %v5599_v48 = vadd.f32 %v10041_v39, %v5343_v5  ;;  %v5822_v7 = vpack.c.bf16 %v5598_v25, %v5590_v37  ;;  %v5094_v60 = vld [vmem:[#allocation2 + $0x208] sm:$0xff] }
 0x631   :  { %9804 = vlog2.f32 %v4170_v49  ;;  %v4180_v10 = vadd.f32 1.0, %v9799_v12  ;;  %v9801_v58 = vpop.eup %9800  ;;  %v2178_v38 = vadd.f32 %v2177_v24, %v13689_v27  ;;  %v5600_v22 = vadd.f32 %v10044_v14, %v5344_v53  ;;  %v10046_v24 = vld [vmem:[%s16914_s12 + $0x290] sm:$0xff]  ;;  %v2268_v14 = vpop.f32.mrf.mxu3 }
 0x632   :  { %7608 = vst [vmem:[%s16914_s12 + $0x538] sm:$0xff] %v4940_v16  ;;  %9806 = vlog2.f32 %v4179_v13  ;;  %v9803_v42 = vpop.eup %9802  ;;  %v4177_v31 = vadd.f32 1.0, %v9801_v58  ;;  %v5823_v6 = vpack.c.bf16 %v5599_v48, %v5591_v4  ;;  %6553 = vmatmul.bf16.gmra.mxu3 %v5822_v7  ;;  %v2267_v11 = vadd.f32 %v2266_v51, %v13726_v20  ;;  %v2179_v51 = vpop.f32.mrf.mxu2 }
 0x633   :  { %9808 = vpow2.f32 %v3839_v3  ;;  %v4590_v8 = vmul.f32 0.6931472, %v9803_v42  ;;  %v14802_v26 = vadd.f32 -5.0, %v2178_v38  ;;  %v2358_v52 = vadd.f32 %v2357_v15, %v13676_v9 }
 0x634   :  { %9810 = vlog2.f32 %v4180_v10  ;;  %v2890_v49 = vmax.f32 %v14682_v23, 0.0  ;;  %6642 = vmatmul.bf16.gmra.mxu0 %v5823_v6  ;;  %v5824_v19 = vpack.c.bf16 %v5600_v22, %v5592_v43  ;;  %v2899_v16 = vmax.f32 %v14684_v35, 0.0  ;;  %v10048_v22 = vld [vmem:[%s16914_s12 + $0x298] sm:$0xff] }
 0x635   :  { %9812 = vpow2.f32 %v3857_v44  ;;  %v4937_v18 = vadd.f32 %v4590_v8, %v2889_v28  ;;  %v3161_v1 = vand.u32 2147483647, %v14802_v26  ;;  %v14809_v12 = vadd.f32 -5.0, %v2267_v11 }
 0x636   :  { %9814 = vpow2.f32 %v3859_v54  ;;  %v14814_v34 = vmul.f32 %v10045_v41, %v5094_v60  ;;  %6731 = vmatmul.bf16.gmra.mxu1 %v5824_v19  ;;  %v14819_v35 = vadd.f32 -5.0, %v2358_v52  ;;  %v2900_v45 = vmax.f32 %v14701_v47, 0.0 }
 0x637   :  { %v9805_v59 = vpop.eup %9804  ;;  %9816 = vlog2.f32 %v4177_v31  ;;  %7605 = vst [vmem:[%s16914_s12 + $0x520] sm:$0xff] %v4937_v18  ;;  %v3417_v36 = vsub.f32 0.0, %v3161_v1  ;;  %v14825_v54 = vmul.f32 %v10046_v24, %v5111_v62  ;;  %v3162_v25 = vand.u32 2147483647, %v14809_v12  ;;  %v5102_v1 = vld [vmem:[#allocation2 + $0x248] sm:$0xff] }
 0x638   :  { %v9807_v63 = vpop.eup %9806  ;;  %v4592_v3 = vmul.f32 0.6931472, %v9805_v59  ;;  %v2897_v58 = vmax.f32 %v14712_v30, 0.0  ;;  %v3171_v43 = vand.u32 2147483647, %v14819_v35  ;;  %v2447_v42 = vadd.f32 %v2446_v0, %v13685_v2  ;;  %v10047_v30 = vld [vmem:[%s16914_s12 + $0x240] sm:$0xff] }
 0x639   :  { %v9809_v56 = vpop.eup %9808  ;;  %v4610_v13 = vmul.f32 0.6931472, %v9807_v63  ;;  %v3853_v48 = vmul.f32 1.442695, %v3417_v36  ;;  %v3418_v57 = vsub.f32 0.0, %v3162_v25  ;;  %v2180_v31 = vadd.f32 %v2179_v51, %v13689_v27  ;;  %v10050_v25 = vld [vmem:[%s16914_s12 + $0x248] sm:$0xff] }
 0x63a   :  { %v9811_v44 = vpop.eup %9810  ;;  %v4938_v23 = vadd.f32 %v4592_v3, %v2890_v49  ;;  %v4178_v28 = vadd.f32 1.0, %v9809_v56  ;;  %v5357_v7 = vmul.f32 %v10047_v30, %v5101_v55  ;;  %v3427_v6 = vsub.f32 0.0, %v3171_v43  ;;  %v2360_v49 = vpop.f32.mrf.mxu0 }
 0x63b   :  { %v9813_v46 = vpop.eup %9812  ;;  %v4947_v10 = vadd.f32 %v4610_v13, %v2899_v16  ;;  %v4612_v37 = vmul.f32 0.6931472, %v9811_v44  ;;  %v3855_v8 = vmul.f32 1.442695, %v3418_v57  ;;  %v14847_v15 = vmul.f32 %v10048_v22, %v5112_v32  ;;  %v10049_v16 = vld [vmem:[%s16913_s11 + $0x240] sm:$0xff] }
 0x63c   :  { %v9815_v5 = vpop.eup %9814  ;;  %7606 = vst [vmem:[%s16914_s12 + $0x528] sm:$0xff] %v4938_v23  ;;  %9818 = vlog2.f32 %v4178_v28  ;;  %v4187_v40 = vadd.f32 1.0, %v9813_v46  ;;  %v14849_v59 = vadd.f32 -5.0, %v2447_v42  ;;  %v14851_v60 = vadd.f32 -5.0, %v2180_v31  ;;  %v2449_v23 = vpop.f32.mrf.mxu1 }
 0x63d   :  { %v9817_v4 = vpop.eup %9816  ;;  %7615 = vst [vmem:[%s16914_s12 + $0x570] sm:$0xff] %v4947_v10  ;;  %v4948_v47 = vadd.f32 %v4612_v37, %v2900_v45  ;;  %v4188_v39 = vadd.f32 1.0, %v9815_v5  ;;  %v2269_v11 = vadd.f32 %v2268_v14, %v13726_v20  ;;  %v2898_v63 = vmax.f32 %v14728_v33, 0.0  ;;  %v8908_v45 = vld [vmem:[#allocation6 + $0x128] sm:$0xff] }
 0x63e   :  { %v4606_v53 = vmul.f32 0.6931472, %v9817_v4  ;;  %9820 = vlog2.f32 %v4187_v40  ;;  %v2907_v62 = vmax.f32 %v14730_v61, 0.0  ;;  %v3873_v18 = vmul.f32 1.442695, %v3427_v6  ;;  %v8916_v37 = vld [vmem:[#allocation6 + $0x168] sm:$0xff]  ;;  %6799 = vmatpush.bf16.msra.mxu2 %v8908_v45  ;;  %v2271_v45 = vpop.f32.mrf.mxu3 }
 0x63f   :  { %7616 = vst [vmem:[%s16914_s12 + $0x578] sm:$0xff] %v4948_v47  ;;  %9822 = vlog2.f32 %v4188_v39  ;;  %v2908_v19 = vmax.f32 %v14756_v29, 0.0  ;;  %v3172_v56 = vand.u32 2147483647, %v14849_v59  ;;  %v14864_v13 = vadd.f32 %v10049_v16, %v5357_v7  ;;  %6888 = vmatpush.bf16.msra.mxu3 %v8916_v37 }
 0x640   :  { %v4945_v38 = vadd.f32 %v4606_v53, %v2897_v58  ;;  %9824 = vpow2.f32 %v3853_v48  ;;  %v3169_v33 = vand.u32 2147483647, %v14851_v60  ;;  %v14867_v61 = vadd.f32 -5.0, %v2269_v11  ;;  %v10052_v11 = vld [vmem:[%s16913_s11 + $0x208] sm:$0xff] }
 0x641   :  { %9826 = vpow2.f32 %v3855_v8  ;;  %v2361_v41 = vadd.f32 %v2360_v49, %v13676_v9  ;;  %v3428_v46 = vsub.f32 0.0, %v3172_v56  ;;  %v2450_v10 = vadd.f32 %v2449_v23, %v13685_v2  ;;  %v10051_v8 = vld [vmem:[%s16913_s11 + $0x200] sm:$0xff]  ;;  %v10054_v56 = vld [vmem:[%s16914_s12 + $0x250] sm:$0xff] }
 0x642   :  { %v9819_v52 = vpop.eup %9818  ;;  %7613 = vst [vmem:[%s16914_s12 + $0x560] sm:$0xff] %v4945_v38  ;;  %9828 = vpow2.f32 %v3873_v18  ;;  %v3425_v24 = vsub.f32 0.0, %v3169_v33  ;;  %v3170_v40 = vand.u32 2147483647, %v14867_v61  ;;  %v5358_v55 = vmul.f32 %v10050_v25, %v5102_v1  ;;  %v10056_v33 = vld [vmem:[%s16914_s12 + $0x258] sm:$0xff] }
 0x643   :  { %v4608_v3 = vmul.f32 0.6931472, %v9819_v52  ;;  %v3875_v58 = vmul.f32 1.442695, %v3428_v46  ;;  %v14878_v39 = vadd.f32 -5.0, %v2361_v41  ;;  %v14880_v43 = vadd.f32 -5.0, %v2450_v10 }
 0x644   :  { %v9821_v44 = vpop.eup %9820  ;;  %v3869_v53 = vmul.f32 1.442695, %v3425_v24  ;;  %v3426_v57 = vsub.f32 0.0, %v3170_v40  ;;  %v2905_v51 = vmax.f32 %v14802_v26, 0.0  ;;  %v2906_v42 = vmax.f32 %v14809_v12, 0.0  ;;  %v5103_v26 = vld [vmem:[#allocation2 + $0x250] sm:$0xff] }
 0x645   :  { %v9823_v28 = vpop.eup %9822  ;;  %v4946_v29 = vadd.f32 %v4608_v3, %v2898_v63  ;;  %v4626_v0 = vmul.f32 0.6931472, %v9821_v44  ;;  %v3179_v38 = vand.u32 2147483647, %v14878_v39  ;;  %v5605_v6 = vadd.f32 %v10051_v8, %v14753_v17  ;;  %v5104_v63 = vld [vmem:[#allocation2 + $0x258] sm:$0xff]  ;;  %v10053_v17 = vld [vmem:[%s16913_s11 + $0x248] sm:$0xff] }
 0x646   :  { %v9825_v36 = vpop.eup %9824  ;;  %v4628_v5 = vmul.f32 0.6931472, %v9823_v28  ;;  %v3871_v7 = vmul.f32 1.442695, %v3426_v57  ;;  %v3180_v22 = vand.u32 2147483647, %v14880_v43  ;;  %v5606_v52 = vadd.f32 %v10052_v11, %v14814_v34 }
 0x647   :  { %7614 = vst [vmem:[%s16914_s12 + $0x568] sm:$0xff] %v4946_v29  ;;  %v4955_v4 = vadd.f32 %v4626_v0, %v2907_v62  ;;  %v4185_v47 = vadd.f32 1.0, %v9825_v36  ;;  %v9827_v48 = vpop.eup %9826  ;;  %v2182_v62 = vpop.f32.mrf.mxu2  ;;  %v3435_v18 = vsub.f32 0.0, %v3179_v38  ;;  %v5829_v49 = vpack.c.bf16 %v14864_v13, %v5605_v6  ;;  %v10055_v34 = vld [vmem:[%s16913_s11 + $0x210] sm:$0xff]  ;;  %v5109_v36 = vld [vmem:[#allocation2 + $0x280] sm:$0xff]  ;;  %v10059_v24 = vld [vmem:[%s16913_s11 + $0x258] sm:$0xff] }
 0x648   :  { %v4956_v32 = vadd.f32 %v4628_v5, %v2908_v19  ;;  %v4186_v31 = vadd.f32 1.0, %v9827_v48  ;;  %v9829_v30 = vpop.eup %9828  ;;  %v5614_v3 = vadd.f32 %v10053_v17, %v5358_v55  ;;  %v3436_v19 = vsub.f32 0.0, %v3180_v22  ;;  %v10057_v29 = vld [vmem:[%s16913_s11 + $0x250] sm:$0xff]  ;;  %v2362_v48 = vpop.f32.mrf.mxu0  ;;  %v10060_v38 = vld [vmem:[%s16914_s12 + $0x280] sm:$0xff] }
 0x649   :  { %7623 = vst [vmem:[%s16914_s12 + $0x5b0] sm:$0xff] %v4955_v4  ;;  %9830 = vlog2.f32 %v4185_v47  ;;  %v4195_v14 = vadd.f32 1.0, %v9829_v30  ;;  %v5359_v16 = vmul.f32 %v10054_v56, %v5103_v26  ;;  %v5607_v1 = vadd.f32 %v10055_v34, %v14739_v50  ;;  %6469 = vmatmul.bf16.gmra.mxu2 %v5829_v49  ;;  %v10058_v50 = vld [vmem:[%s16913_s11 + $0x218] sm:$0xff]  ;;  %v5110_v4 = vld [vmem:[#allocation2 + $0x288] sm:$0xff] }
 0x64a   :  { %7624 = vst [vmem:[%s16914_s12 + $0x5b8] sm:$0xff] %v4956_v32  ;;  %9832 = vpow2.f32 %v3875_v58  ;;  %v3889_v13 = vmul.f32 1.442695, %v3435_v18  ;;  %v5830_v44 = vpack.c.bf16 %v5614_v3, %v5606_v52  ;;  %v5360_v41 = vmul.f32 %v10056_v33, %v5104_v63  ;;  %v8924_v3 = vld [vmem:[#allocation6 + $0x1a8] sm:$0xff]  ;;  %v2273_v33 = vpop.f32.mrf.mxu3 }
 0x64b   :  { %9834 = vlog2.f32 %v4186_v31  ;;  %v3891_v28 = vmul.f32 1.442695, %v3436_v19  ;;  %v5615_v0 = vadd.f32 %v10057_v29, %v5359_v16  ;;  %v5608_v46 = vadd.f32 %v10058_v50, %v14744_v21  ;;  %6977 = vmatpush.bf16.msra.mxu0 %v8924_v3  ;;  %v5128_v3 = vld [vmem:[#allocation2 + $0x318] sm:$0xff] }
 0x64c   :  { %9836 = vpow2.f32 %v3869_v53  ;;  %v2183_v10 = vadd.f32 %v2182_v62, %v13689_v27  ;;  %6558 = vmatmul.bf16.gmra.mxu3 %v5830_v44  ;;  %v5616_v40 = vadd.f32 %v10059_v24, %v5360_v41  ;;  %v2272_v25 = vadd.f32 %v2271_v45, %v13726_v20  ;;  %v2451_v62 = vpop.f32.mrf.mxu1 }
 0x64d   :  { %9838 = vlog2.f32 %v4195_v14  ;;  %v5831_v21 = vpack.c.bf16 %v5615_v0, %v5607_v1  ;;  %v14933_v8 = vmul.f32 %v10060_v38, %v5109_v36  ;;  %v2915_v52 = vmax.f32 %v14819_v35, 0.0  ;;  %v8932_v36 = vld [vmem:[#allocation6 + $0x1e8] sm:$0xff] }
 0x64e   :  { %9840 = vpow2.f32 %v3871_v7  ;;  %v14926_v58 = vadd.f32 -5.0, %v2183_v10  ;;  %v5832_v31 = vpack.c.bf16 %v5616_v40, %v5608_v46  ;;  %v14928_v30 = vadd.f32 -5.0, %v2272_v25  ;;  %7066 = vmatpush.bf16.msra.mxu1 %v8932_v36  ;;  %v10065_v36 = vld [vmem:[%s16913_s11 + $0x280] sm:$0xff] }
 0x64f   :  { %v9831_v23 = vpop.eup %9830  ;;  %9842 = vpow2.f32 %v3889_v13  ;;  %6647 = vmatmul.bf16.gmra.mxu0 %v5831_v21  ;;  %v2184_v19 = vpop.f32.mrf.mxu2  ;;  %v2916_v12 = vmax.f32 %v14849_v59, 0.0  ;;  %v2363_v35 = vadd.f32 %v2362_v48, %v13676_v9  ;;  %v2913_v0 = vmax.f32 %v14851_v60, 0.0  ;;  %v5117_v21 = vld [vmem:[#allocation2 + $0x2c0] sm:$0xff] }
 0x650   :  { %v9833_v37 = vpop.eup %9832  ;;  %v4622_v5 = vmul.f32 0.6931472, %v9831_v23  ;;  %9844 = vpow2.f32 %v3891_v28  ;;  %v3177_v26 = vand.u32 2147483647, %v14926_v58  ;;  %6736 = vmatmul.bf16.gmra.mxu1 %v5832_v31  ;;  %v3178_v17 = vand.u32 2147483647, %v14928_v30  ;;  %v2365_v60 = vpop.f32.mrf.mxu0 }
 0x651   :  { %v9835_v55 = vpop.eup %9834  ;;  %v4196_v47 = vadd.f32 1.0, %v9833_v37  ;;  %v14957_v23 = vadd.f32 -5.0, %v2363_v35  ;;  %v2185_v59 = vadd.f32 %v2184_v19, %v13689_v27  ;;  %v2274_v46 = vadd.f32 %v2273_v33, %v13726_v20 }
 0x652   :  { %v9837_v32 = vpop.eup %9836  ;;  %v4953_v53 = vadd.f32 %v4622_v5, %v2905_v51  ;;  %v4624_v57 = vmul.f32 0.6931472, %v9835_v55  ;;  %v10061_v51 = vld [vmem:[%s16914_s12 + $0x288] sm:$0xff]  ;;  %v3433_v49 = vsub.f32 0.0, %v3177_v26  ;;  %v3434_v44 = vsub.f32 0.0, %v3178_v17  ;;  %v5127_v26 = vld [vmem:[#allocation2 + $0x310] sm:$0xff] }
 0x653   :  { %v9839_v7 = vpop.eup %9838  ;;  %9846 = vlog2.f32 %v4196_v47  ;;  %v4193_v6 = vadd.f32 1.0, %v9837_v32  ;;  %v14939_v22 = vmul.f32 %v10061_v51, %v5110_v4  ;;  %v2914_v45 = vmax.f32 %v14867_v61, 0.0 }
 0x654   :  { %v9841_v14 = vpop.eup %9840  ;;  %7621 = vst [vmem:[%s16914_s12 + $0x5a0] sm:$0xff] %v4953_v53  ;;  %v4954_v11 = vadd.f32 %v4624_v57, %v2906_v42  ;;  %v4642_v63 = vmul.f32 0.6931472, %v9839_v7  ;;  %v2452_v42 = vadd.f32 %v2451_v62, %v13685_v2  ;;  %v3885_v13 = vmul.f32 1.442695, %v3433_v49 }
 0x655   :  { %9848 = vlog2.f32 %v4193_v6  ;;  %v4194_v18 = vadd.f32 1.0, %v9841_v14  ;;  %v9843_v56 = vpop.eup %9842  ;;  %v3887_v50 = vmul.f32 1.442695, %v3434_v44  ;;  %v3187_v37 = vand.u32 2147483647, %v14957_v23 }
 0x656   :  { %7622 = vst [vmem:[%s16914_s12 + $0x5a8] sm:$0xff] %v4954_v11  ;;  %v4963_v16 = vadd.f32 %v4642_v63, %v2915_v52  ;;  %v9845_v34 = vpop.eup %9844  ;;  %v4203_v1 = vadd.f32 1.0, %v9843_v56  ;;  %v14959_v28 = vadd.f32 -5.0, %v2452_v42  ;;  %v2923_v24 = vmax.f32 %v14878_v39, 0.0  ;;  %v10062_v11 = vld [vmem:[%s16914_s12 + $0x2c0] sm:$0xff]  ;;  %v10063_v42 = vld [vmem:[%s16914_s12 + $0x310] sm:$0xff] }
 0x657   :  { %9850 = vlog2.f32 %v4194_v18  ;;  %v4204_v41 = vadd.f32 1.0, %v9845_v34  ;;  %v14968_v25 = vadd.f32 -5.0, %v2185_v59  ;;  %v3443_v47 = vsub.f32 0.0, %v3187_v37 }
 0x658   :  { %7631 = vst [vmem:[%s16914_s12 + $0x5f0] sm:$0xff] %v4963_v16  ;;  %9852 = vlog2.f32 %v4203_v1  ;;  %v3188_v40 = vand.u32 2147483647, %v14959_v28  ;;  %v2924_v48 = vmax.f32 %v14880_v43, 0.0  ;;  %v14972_v57 = vadd.f32 -5.0, %v2274_v46 }
 0x659   :  { %v9847_v29 = vpop.eup %9846  ;;  %9854 = vlog2.f32 %v4204_v41  ;;  %v3185_v53 = vand.u32 2147483647, %v14968_v25  ;;  %v3905_v7 = vmul.f32 1.442695, %v3443_v47  ;;  %v2366_v38 = vadd.f32 %v2365_v60, %v13676_v9 }
 0x65a   :  { %v4644_v10 = vmul.f32 0.6931472, %v9847_v29  ;;  %9856 = vpow2.f32 %v3885_v13  ;;  %v3444_v32 = vsub.f32 0.0, %v3188_v40  ;;  %v3186_v43 = vand.u32 2147483647, %v14972_v57  ;;  %v5118_v29 = vld [vmem:[#allocation2 + $0x2c8] sm:$0xff] }
 0x65b   :  { %v9849_v5 = vpop.eup %9848  ;;  %9858 = vpow2.f32 %v3887_v50  ;;  %v3441_v51 = vsub.f32 0.0, %v3185_v53  ;;  %v5373_v52 = vmul.f32 %v10062_v11, %v5117_v21  ;;  %v14985_v49 = vadd.f32 -5.0, %v2366_v38  ;;  %v10069_v38 = vld [vmem:[%s16913_s11 + $0x288] sm:$0xff]  ;;  %v10072_v11 = vld [vmem:[%s16913_s11 + $0x2d0] sm:$0xff] }
 0x65c   :  { %v4964_v55 = vadd.f32 %v4644_v10, %v2916_v12  ;;  %v4638_v4 = vmul.f32 0.6931472, %v9849_v5  ;;  %v3907_v14 = vmul.f32 1.442695, %v3444_v32  ;;  %9860 = vpow2.f32 %v3905_v7  ;;  %v2454_v12 = vpop.f32.mrf.mxu1  ;;  %v10068_v32 = vld [vmem:[%s16914_s12 + $0x2d0] sm:$0xff] }
 0x65d   :  { %v9851_v61 = vpop.eup %9850  ;;  %v3901_v56 = vmul.f32 1.442695, %v3441_v51  ;;  %v3442_v16 = vsub.f32 0.0, %v3186_v43  ;;  %v14990_v34 = vmul.f32 %v10063_v42, %v5127_v26  ;;  %v3195_v44 = vand.u32 2147483647, %v14985_v49  ;;  %v10071_v51 = vld [vmem:[%s16913_s11 + $0x290] sm:$0xff] }
 0x65e   :  { %7632 = vst [vmem:[%s16914_s12 + $0x5f8] sm:$0xff] %v4964_v55  ;;  %v4961_v39 = vadd.f32 %v4638_v4, %v2913_v0  ;;  %v4640_v31 = vmul.f32 0.6931472, %v9851_v61  ;;  %v9853_v6 = vpop.eup %9852  ;;  %9862 = vpow2.f32 %v3907_v14  ;;  %v10064_v0 = vld [vmem:[%s16914_s12 + $0x318] sm:$0xff]  ;;  %v2455_v10 = vadd.f32 %v2454_v12, %v13685_v2 }
 0x65f   :  { %v9855_v63 = vpop.eup %9854  ;;  %v4658_v18 = vmul.f32 0.6931472, %v9853_v6  ;;  %9864 = vpow2.f32 %v3901_v56  ;;  %v3903_v59 = vmul.f32 1.442695, %v3442_v16  ;;  %v14999_v50 = vmul.f32 %v10064_v0, %v5128_v3 }
 0x660   :  { %7629 = vst [vmem:[%s16914_s12 + $0x5e0] sm:$0xff] %v4961_v39  ;;  %v4962_v62 = vadd.f32 %v4640_v31, %v2914_v45  ;;  %v9857_v17 = vpop.eup %9856  ;;  %v4660_v19 = vmul.f32 0.6931472, %v9855_v63  ;;  %v3451_v46 = vsub.f32 0.0, %v3195_v44  ;;  %v5119_v45 = vld [vmem:[#allocation2 + $0x2d0] sm:$0xff]  ;;  %v2921_v37 = vmax.f32 %v14926_v58, 0.0 }
 0x661   :  { %v9859_v35 = vpop.eup %9858  ;;  %v4971_v1 = vadd.f32 %v4658_v18, %v2923_v24  ;;  %v4201_v13 = vadd.f32 1.0, %v9857_v17  ;;  %v5621_v5 = vadd.f32 %v10065_v36, %v14933_v8  ;;  %v10066_v24 = vld [vmem:[%s16913_s11 + $0x2c0] sm:$0xff]  ;;  %v15016_v4 = vadd.f32 -5.0, %v2455_v10  ;;  %v10067_v58 = vld [vmem:[%s16914_s12 + $0x2c8] sm:$0xff]  ;;  %v5120_v39 = vld [vmem:[#allocation2 + $0x2d8] sm:$0xff] }
 0x662   :  { %7630 = vst [vmem:[%s16914_s12 + $0x5e8] sm:$0xff] %v4962_v62  ;;  %v4972_v33 = vadd.f32 %v4660_v19, %v2924_v48  ;;  %v4202_v41 = vadd.f32 1.0, %v9859_v35  ;;  %v5629_v40 = vadd.f32 %v10066_v24, %v5373_v52  ;;  %v9861_v60 = vpop.eup %9860  ;;  %v3921_v55 = vmul.f32 1.442695, %v3451_v46  ;;  %v10073_v17 = vld [vmem:[%s16914_s12 + $0x2d8] sm:$0xff] }
 0x663   :  { %7639 = vst [vmem:[%s16914_s12 + $0x630] sm:$0xff] %v4971_v1  ;;  %9866 = vlog2.f32 %v4201_v13  ;;  %v5374_v47 = vmul.f32 %v10067_v58, %v5118_v29  ;;  %v2922_v61 = vmax.f32 %v14928_v30, 0.0  ;;  %v4211_v48 = vadd.f32 1.0, %v9861_v60  ;;  %v10070_v30 = vld [vmem:[%s16913_s11 + $0x2c8] sm:$0xff]  ;;  %v5125_v1 = vld [vmem:[#allocation2 + $0x300] sm:$0xff] }
 0x664   :  { %7640 = vst [vmem:[%s16914_s12 + $0x638] sm:$0xff] %v4972_v33  ;;  %9868 = vlog2.f32 %v4202_v41  ;;  %v9863_v21 = vpop.eup %9862  ;;  %v5837_v8 = vpack.c.bf16 %v5629_v40, %v5621_v5  ;;  %v5375_v53 = vmul.f32 %v10068_v32, %v5119_v45  ;;  %v3196_v7 = vand.u32 2147483647, %v15016_v4  ;;  %v10075_v33 = vld [vmem:[%s16913_s11 + $0x2d8] sm:$0xff]  ;;  %v10076_v60 = vld [vmem:[%s16914_s12 + $0x300] sm:$0xff] }
 0x665   :  { %9870 = vpow2.f32 %v3903_v59  ;;  %v4212_v31 = vadd.f32 1.0, %v9863_v21  ;;  %v5622_v6 = vadd.f32 %v10069_v38, %v14939_v22  ;;  %v9865_v26 = vpop.eup %9864  ;;  %v5630_v14 = vadd.f32 %v10070_v30, %v5374_v47  ;;  %v2187_v22 = vpop.f32.mrf.mxu2 }
 0x666   :  { %9872 = vpow2.f32 %v3921_v55  ;;  %6474 = vmatmul.bf16.gmra.mxu2 %v5837_v8  ;;  %v5623_v43 = vadd.f32 %v10071_v51, %v14825_v54  ;;  %v5631_v52 = vadd.f32 %v10072_v11, %v5375_v53  ;;  %v4209_v62 = vadd.f32 1.0, %v9865_v26  ;;  %v10074_v54 = vld [vmem:[%s16913_s11 + $0x298] sm:$0xff]  ;;  %v2276_v59 = vpop.f32.mrf.mxu3  ;;  %v5126_v55 = vld [vmem:[#allocation2 + $0x308] sm:$0xff]  ;;  %v2456_v21 = vpop.f32.mrf.mxu1 }
 0x667   :  { %9874 = vlog2.f32 %v4211_v48  ;;  %v3452_v18 = vsub.f32 0.0, %v3196_v7  ;;  %v5376_v3 = vmul.f32 %v10073_v17, %v5120_v39  ;;  %v5838_v16 = vpack.c.bf16 %v5630_v14, %v5622_v6  ;;  %v10077_v6 = vld [vmem:[%s16914_s12 + $0x308] sm:$0xff] }
 0x668   :  { %9876 = vlog2.f32 %v4212_v31  ;;  %v5839_v12 = vpack.c.bf16 %v5631_v52, %v5623_v43  ;;  %v5624_v35 = vadd.f32 %v10074_v54, %v14847_v15  ;;  %v2188_v46 = vadd.f32 %v2187_v22, %v13689_v27  ;;  %v2367_v15 = vpop.f32.mrf.mxu0 }
 0x669   :  { %v9867_v63 = vpop.eup %9866  ;;  %9878 = vlog2.f32 %v4209_v62  ;;  %v3923_v44 = vmul.f32 1.442695, %v3452_v18  ;;  %v5632_v41 = vadd.f32 %v10075_v33, %v5376_v3  ;;  %6563 = vmatmul.bf16.gmra.mxu3 %v5838_v16  ;;  %v2277_v10 = vadd.f32 %v2276_v59, %v13726_v20  ;;  %v5133_v3 = vld [vmem:[#allocation2 + $0x340] sm:$0xff] }
 0x66a   :  { %v9869_v19 = vpop.eup %9868  ;;  %v4654_v56 = vmul.f32 0.6931472, %v9867_v63  ;;  %6652 = vmatmul.bf16.gmra.mxu0 %v5839_v12  ;;  %v2368_v24 = vadd.f32 %v2367_v15, %v13676_v9  ;;  %v15061_v47 = vadd.f32 -5.0, %v2188_v46  ;;  %v2931_v48 = vmax.f32 %v14957_v23, 0.0  ;;  %v5143_v15 = vld [vmem:[#allocation2 + $0x390] sm:$0xff] }
 0x66b   :  { %v9871_v42 = vpop.eup %9870  ;;  %v4656_v13 = vmul.f32 0.6931472, %v9869_v19  ;;  %9880 = vpow2.f32 %v3923_v44  ;;  %v5840_v5 = vpack.c.bf16 %v5632_v41, %v5624_v35  ;;  %v15067_v32 = vadd.f32 -5.0, %v2277_v10  ;;  %v10078_v41 = vld [vmem:[%s16914_s12 + $0x340] sm:$0xff] }
 0x66c   :  { %v4969_v29 = vadd.f32 %v4654_v56, %v2921_v37  ;;  %v4210_v0 = vadd.f32 1.0, %v9871_v42  ;;  %v9873_v45 = vpop.eup %9872  ;;  %v15056_v37 = vmul.f32 %v10076_v60, %v5125_v1  ;;  %v15069_v53 = vadd.f32 -5.0, %v2368_v24 }
 0x66d   :  { %v4970_v36 = vadd.f32 %v4656_v13, %v2922_v61  ;;  %v9875_v40 = vpop.eup %9874  ;;  %v4219_v58 = vadd.f32 1.0, %v9873_v45  ;;  %6741 = vmatmul.bf16.gmra.mxu1 %v5840_v5  ;;  %v2932_v39 = vmax.f32 %v14959_v28, 0.0  ;;  %v3193_v7 = vand.u32 2147483647, %v15061_v47  ;;  %v2189_v52 = vpop.f32.mrf.mxu2  ;;  %v5144_v45 = vld [vmem:[#allocation2 + $0x398] sm:$0xff] }
 0x66e   :  { %7637 = vst [vmem:[%s16914_s12 + $0x620] sm:$0xff] %v4969_v29  ;;  %9882 = vlog2.f32 %v4210_v0  ;;  %v9877_v61 = vpop.eup %9876  ;;  %v4674_v8 = vmul.f32 0.6931472, %v9875_v40  ;;  %v15076_v26 = vmul.f32 %v10077_v6, %v5126_v55  ;;  %v2929_v30 = vmax.f32 %v14968_v25, 0.0  ;;  %v2278_v17 = vpop.f32.mrf.mxu3  ;;  %v10079_v40 = vld [vmem:[%s16913_s11 + $0x300] sm:$0xff]  ;;  %v10082_v6 = vld [vmem:[%s16914_s12 + $0x398] sm:$0xff] }
 0x66f   :  { %7638 = vst [vmem:[%s16914_s12 + $0x628] sm:$0xff] %v4970_v36  ;;  %v4676_v31 = vmul.f32 0.6931472, %v9877_v61  ;;  %9884 = vlog2.f32 %v4219_v58  ;;  %v9879_v38 = vpop.eup %9878  ;;  %v3194_v14 = vand.u32 2147483647, %v15067_v32  ;;  %v3449_v11 = vsub.f32 0.0, %v3193_v7  ;;  %v2459_v24 = vpop.f32.mrf.mxu1 }
 0x670   :  { %v4979_v23 = vadd.f32 %v4674_v8, %v2931_v48  ;;  %v4670_v43 = vmul.f32 0.6931472, %v9879_v38  ;;  %v3203_v28 = vand.u32 2147483647, %v15069_v53  ;;  %v2930_v63 = vmax.f32 %v14972_v57, 0.0  ;;  %v2370_v10 = vpop.f32.mrf.mxu0  ;;  %v8915_v61 = vld [vmem:[#allocation6 + $0x160] sm:$0xff] }
 0x671   :  { %v4980_v51 = vadd.f32 %v4676_v31, %v2932_v39  ;;  %v9881_v22 = vpop.eup %9880  ;;  %v3450_v62 = vsub.f32 0.0, %v3194_v14  ;;  %v2457_v18 = vadd.f32 %v2456_v21, %v13685_v2  ;;  %v2190_v25 = vadd.f32 %v2189_v52, %v13689_v27  ;;  %v8907_v21 = vld [vmem:[#allocation6 + $0x120] sm:$0xff]  ;;  %v10081_v7 = vld [vmem:[%s16914_s12 + $0x390] sm:$0xff]  ;;  %6889 = vmatpush.bf16.msra.mxu3 %v8915_v61 }
 0x672   :  { %7647 = vst [vmem:[%s16914_s12 + $0x670] sm:$0xff] %v4979_v23  ;;  %v4977_v56 = vadd.f32 %v4670_v43, %v2929_v30  ;;  %v4220_v16 = vadd.f32 1.0, %v9881_v22  ;;  %v3917_v12 = vmul.f32 1.442695, %v3449_v11  ;;  %v3459_v54 = vsub.f32 0.0, %v3203_v28  ;;  %v5141_v30 = vld [vmem:[#allocation2 + $0x380] sm:$0xff]  ;;  %6800 = vmatpush.bf16.msra.mxu2 %v8907_v21 }
 0x673   :  { %7648 = vst [vmem:[%s16914_s12 + $0x678] sm:$0xff] %v4980_v51  ;;  %v3919_v42 = vmul.f32 1.442695, %v3450_v62  ;;  %v15090_v1 = vadd.f32 -5.0, %v2457_v18  ;;  %v15092_v57 = vadd.f32 -5.0, %v2190_v25  ;;  %v2279_v33 = vadd.f32 %v2278_v17, %v13726_v20  ;;  %v10089_v21 = vld [vmem:[%s16914_s12 + $0x358] sm:$0xff] }
 0x674   :  { %v9883_v19 = vpop.eup %9882  ;;  %7645 = vst [vmem:[%s16914_s12 + $0x660] sm:$0xff] %v4977_v56  ;;  %9886 = vlog2.f32 %v4220_v16  ;;  %v3937_v44 = vmul.f32 1.442695, %v3459_v54  ;;  %v5389_v59 = vmul.f32 %v10078_v41, %v5133_v3  ;;  %v2939_v0 = vmax.f32 %v14985_v49, 0.0  ;;  %v5134_v54 = vld [vmem:[#allocation2 + $0x348] sm:$0xff] }
 0x675   :  { %v4672_v35 = vmul.f32 0.6931472, %v9883_v19  ;;  %v9885_v13 = vpop.eup %9884  ;;  %9888 = vpow2.f32 %v3917_v12  ;;  %v3204_v36 = vand.u32 2147483647, %v15090_v1  ;;  %v3201_v5 = vand.u32 2147483647, %v15092_v57 }
 0x676   :  { %v4690_v46 = vmul.f32 0.6931472, %v9885_v13  ;;  %9890 = vpow2.f32 %v3919_v42  ;;  %v5637_v60 = vadd.f32 %v10079_v40, %v15056_v37  ;;  %v15111_v55 = vadd.f32 -5.0, %v2279_v33  ;;  %v10080_v37 = vld [vmem:[%s16913_s11 + $0x340] sm:$0xff] }
 0x677   :  { %v4978_v29 = vadd.f32 %v4672_v35, %v2930_v63  ;;  %9892 = vpow2.f32 %v3937_v44  ;;  %v2371_v58 = vadd.f32 %v2370_v10, %v13676_v9  ;;  %v3460_v48 = vsub.f32 0.0, %v3204_v36  ;;  %v10083_v19 = vld [vmem:[%s16914_s12 + $0x380] sm:$0xff]  ;;  %v5135_v44 = vld [vmem:[#allocation2 + $0x350] sm:$0xff]  ;;  %v2192_v36 = vpop.f32.mrf.mxu2 }
 0x678   :  { %v4987_v49 = vadd.f32 %v4690_v46, %v2939_v0  ;;  %v3457_v8 = vsub.f32 0.0, %v3201_v5  ;;  %v2460_v39 = vadd.f32 %v2459_v24, %v13685_v2  ;;  %v5645_v31 = vadd.f32 %v10080_v37, %v5389_v59  ;;  %v10084_v46 = vld [vmem:[%s16914_s12 + $0x348] sm:$0xff] }
 0x679   :  { %7646 = vst [vmem:[%s16914_s12 + $0x668] sm:$0xff] %v4978_v29  ;;  %v15121_v38 = vmul.f32 %v10081_v7, %v5143_v15  ;;  %v15126_v23 = vmul.f32 %v10082_v6, %v5144_v45  ;;  %v3202_v14 = vand.u32 2147483647, %v15111_v55  ;;  %v15132_v51 = vadd.f32 -5.0, %v2371_v58  ;;  %v5136_v29 = vld [vmem:[#allocation2 + $0x358] sm:$0xff]  ;;  %v10085_v15 = vld [vmem:[%s16913_s11 + $0x308] sm:$0xff] }
 0x67a   :  { %7655 = vst [vmem:[%s16914_s12 + $0x6b0] sm:$0xff] %v4987_v49  ;;  %v9887_v43 = vpop.eup %9886  ;;  %v3939_v11 = vmul.f32 1.442695, %v3460_v48  ;;  %v3933_v28 = vmul.f32 1.442695, %v3457_v8  ;;  %v15134_v52 = vadd.f32 -5.0, %v2460_v39  ;;  %v5845_v22 = vpack.c.bf16 %v5645_v31, %v5637_v60  ;;  %v2281_v48 = vpop.f32.mrf.mxu3 }
 0x67b   :  { %v9889_v63 = vpop.eup %9888  ;;  %v2940_v62 = vmax.f32 %v15016_v4, 0.0  ;;  %v4692_v18 = vmul.f32 0.6931472, %v9887_v43  ;;  %v3458_v25 = vsub.f32 0.0, %v3202_v14  ;;  %v3211_v17 = vand.u32 2147483647, %v15132_v51 }
 0x67c   :  { %v9891_v3 = vpop.eup %9890  ;;  %v15141_v56 = vmul.f32 %v10083_v19, %v5141_v30  ;;  %v4217_v16 = vadd.f32 1.0, %v9889_v63  ;;  %9894 = vpow2.f32 %v3939_v11  ;;  %v3212_v12 = vand.u32 2147483647, %v15134_v52  ;;  %6479 = vmatmul.bf16.gmra.mxu2 %v5845_v22  ;;  %v10087_v60 = vld [vmem:[%s16913_s11 + $0x348] sm:$0xff]  ;;  %v10088_v58 = vld [vmem:[%s16913_s11 + $0x310] sm:$0xff]  ;;  %v10091_v31 = vld [vmem:[%s16913_s11 + $0x318] sm:$0xff]  ;;  %v2372_v19 = vpop.f32.mrf.mxu0 }
 0x67d   :  { %v9893_v35 = vpop.eup %9892  ;;  %v4988_v42 = vadd.f32 %v4692_v18, %v2940_v62  ;;  %v4218_v4 = vadd.f32 1.0, %v9891_v3  ;;  %9896 = vpow2.f32 %v3933_v28  ;;  %v3935_v13 = vmul.f32 1.442695, %v3458_v25  ;;  %v10090_v39 = vld [vmem:[%s16913_s11 + $0x350] sm:$0xff]  ;;  %v10092_v43 = vld [vmem:[%s16913_s11 + $0x358] sm:$0xff] }
 0x67e   :  { %9898 = vlog2.f32 %v4217_v16  ;;  %v4227_v33 = vadd.f32 1.0, %v9893_v35  ;;  %v3467_v41 = vsub.f32 0.0, %v3211_v17  ;;  %v3468_v59 = vsub.f32 0.0, %v3212_v12  ;;  %v5149_v16 = vld [vmem:[#allocation2 + $0x3c0] sm:$0xff] }
 0x67f   :  { %7656 = vst [vmem:[%s16914_s12 + $0x6b8] sm:$0xff] %v4988_v42  ;;  %v2937_v0 = vmax.f32 %v15061_v47, 0.0  ;;  %9900 = vlog2.f32 %v4218_v4  ;;  %v5390_v10 = vmul.f32 %v10084_v46, %v5134_v54  ;;  %v5638_v45 = vadd.f32 %v10085_v15, %v15076_v26  ;;  %v10086_v47 = vld [vmem:[%s16914_s12 + $0x350] sm:$0xff]  ;;  %v5142_v54 = vld [vmem:[#allocation2 + $0x388] sm:$0xff]  ;;  %v2461_v15 = vpop.f32.mrf.mxu1 }
 0x680   :  { %9902 = vlog2.f32 %v4227_v33  ;;  %v3953_v5 = vmul.f32 1.442695, %v3467_v41  ;;  %v3955_v24 = vmul.f32 1.442695, %v3468_v59  ;;  %v5391_v40 = vmul.f32 %v10086_v47, %v5135_v44 }
 0x681   :  { %9904 = vpow2.f32 %v3935_v13  ;;  %v5646_v49 = vadd.f32 %v10087_v60, %v5390_v10  ;;  %v5639_v26 = vadd.f32 %v10088_v58, %v14990_v34  ;;  %v5392_v61 = vmul.f32 %v10089_v21, %v5136_v29 }
 0x682   :  { %v9895_v8 = vpop.eup %9894  ;;  %9906 = vpow2.f32 %v3953_v5  ;;  %v5647_v37 = vadd.f32 %v10090_v39, %v5391_v40  ;;  %v5640_v7 = vadd.f32 %v10091_v31, %v14999_v50  ;;  %v2193_v34 = vadd.f32 %v2192_v36, %v13689_v27  ;;  %v2283_v31 = vpop.f32.mrf.mxu3 }
 0x683   :  { %v9897_v6 = vpop.eup %9896  ;;  %v4228_v30 = vadd.f32 1.0, %v9895_v8  ;;  %9908 = vpow2.f32 %v3955_v24  ;;  %v5846_v14 = vpack.c.bf16 %v5646_v49, %v5638_v45  ;;  %v5648_v11 = vadd.f32 %v10092_v43, %v5392_v61  ;;  %v2194_v8 = vpop.f32.mrf.mxu2 }
 0x684   :  { %v9899_v28 = vpop.eup %9898  ;;  %v4225_v22 = vadd.f32 1.0, %v9897_v6  ;;  %v5847_v63 = vpack.c.bf16 %v5647_v37, %v5639_v26  ;;  %v15179_v62 = vadd.f32 -5.0, %v2193_v34  ;;  %v2282_v18 = vadd.f32 %v2281_v48, %v13726_v20  ;;  %v8923_v48 = vld [vmem:[#allocation6 + $0x1a0] sm:$0xff] }
 0x685   :  { %v9901_v25 = vpop.eup %9900  ;;  %v4686_v50 = vmul.f32 0.6931472, %v9899_v28  ;;  %v2938_v17 = vmax.f32 %v15067_v32, 0.0  ;;  %9910 = vlog2.f32 %v4228_v30  ;;  %6568 = vmatmul.bf16.gmra.mxu3 %v5846_v14  ;;  %v5848_v3 = vpack.c.bf16 %v5648_v11, %v5640_v7  ;;  %v10095_v7 = vld [vmem:[%s16913_s11 + $0x3c0] sm:$0xff]  ;;  %6978 = vmatpush.bf16.msra.mxu0 %v8923_v48 }
 0x686   :  { %v9903_v12 = vpop.eup %9902  ;;  %v4688_v35 = vmul.f32 0.6931472, %v9901_v25  ;;  %v2947_v42 = vmax.f32 %v15069_v53, 0.0  ;;  %9912 = vlog2.f32 %v4225_v22  ;;  %6657 = vmatmul.bf16.gmra.mxu0 %v5847_v63  ;;  %v3209_v4 = vand.u32 2147483647, %v15179_v62  ;;  %v10093_v53 = vld [vmem:[%s16914_s12 + $0x3c0] sm:$0xff] }
 0x687   :  { %v9905_v13 = vpop.eup %9904  ;;  %v4985_v44 = vadd.f32 %v4686_v50, %v2937_v0  ;;  %v4706_v33 = vmul.f32 0.6931472, %v9903_v12  ;;  %6746 = vmatmul.bf16.gmra.mxu1 %v5848_v3  ;;  %v15185_v41 = vadd.f32 -5.0, %v2282_v18  ;;  %v2373_v32 = vadd.f32 %v2372_v19, %v13676_v9  ;;  %v10094_v0 = vld [vmem:[%s16914_s12 + $0x388] sm:$0xff]  ;;  %v10096_v14 = vld [vmem:[%s16913_s11 + $0x380] sm:$0xff]  ;;  %v2375_v3 = vpop.f32.mrf.mxu0 }
 0x688   :  { %v9907_v59 = vpop.eup %9906  ;;  %v4986_v29 = vadd.f32 %v4688_v35, %v2938_v17  ;;  %v4226_v46 = vadd.f32 1.0, %v9905_v13  ;;  %v3465_v10 = vsub.f32 0.0, %v3209_v4  ;;  %v5405_v45 = vmul.f32 %v10093_v53, %v5149_v16  ;;  %v8931_v17 = vld [vmem:[#allocation6 + $0x1e0] sm:$0xff] }
 0x689   :  { %v9909_v36 = vpop.eup %9908  ;;  %v15194_v5 = vmul.f32 %v10094_v0, %v5142_v54  ;;  %7653 = vst [vmem:[%s16914_s12 + $0x6a0] sm:$0xff] %v4985_v44  ;;  %v4995_v24 = vadd.f32 %v4706_v33, %v2947_v42  ;;  %v2948_v47 = vmax.f32 %v15090_v1, 0.0  ;;  %v4235_v40 = vadd.f32 1.0, %v9907_v59  ;;  %7067 = vmatpush.bf16.msra.mxu1 %v8931_v17  ;;  %v5150_v0 = vld [vmem:[#allocation2 + $0x3c8] sm:$0xff] }
 0x68a   :  { %7654 = vst [vmem:[%s16914_s12 + $0x6a8] sm:$0xff] %v4986_v29  ;;  %v2945_v60 = vmax.f32 %v15092_v57, 0.0  ;;  %9914 = vlog2.f32 %v4226_v46  ;;  %v4236_v49 = vadd.f32 1.0, %v9909_v36  ;;  %v3949_v58 = vmul.f32 1.442695, %v3465_v10  ;;  %v5159_v46 = vld [vmem:[#allocation2 + $0x410] sm:$0xff]  ;;  %v2464_v36 = vpop.f32.mrf.mxu1 }
 0x68b   :  { %v9911_v26 = vpop.eup %9910  ;;  %7663 = vst [vmem:[%s16914_s12 + $0x6f0] sm:$0xff] %v4995_v24  ;;  %9916 = vlog2.f32 %v4235_v40  ;;  %v3210_v21 = vand.u32 2147483647, %v15185_v41  ;;  %v15208_v61 = vadd.f32 -5.0, %v2373_v32  ;;  %v2462_v1 = vadd.f32 %v2461_v15, %v13685_v2  ;;  %v5160_v24 = vld [vmem:[#allocation2 + $0x418] sm:$0xff]  ;;  %v10102_v17 = vld [vmem:[%s16913_s11 + $0x3c8] sm:$0xff] }
 0x68c   :  { %v9913_v39 = vpop.eup %9912  ;;  %v4708_v37 = vmul.f32 0.6931472, %v9911_v26  ;;  %9918 = vlog2.f32 %v4236_v49  ;;  %v2195_v57 = vadd.f32 %v2194_v8, %v13689_v27  ;;  %v5661_v34 = vadd.f32 %v10095_v7, %v5405_v45  ;;  %v10099_v7 = vld [vmem:[%s16914_s12 + $0x418] sm:$0xff] }
 0x68d   :  { %v4702_v6 = vmul.f32 0.6931472, %v9913_v39  ;;  %9920 = vpow2.f32 %v3949_v58  ;;  %v3466_v30 = vsub.f32 0.0, %v3210_v21  ;;  %v5653_v43 = vadd.f32 %v10096_v14, %v15141_v56  ;;  %v10098_v39 = vld [vmem:[%s16914_s12 + $0x3c8] sm:$0xff] }
 0x68e   :  { %v4996_v11 = vadd.f32 %v4708_v37, %v2948_v47  ;;  %v3219_v28 = vand.u32 2147483647, %v15208_v61  ;;  %v15220_v22 = vadd.f32 -5.0, %v2462_v1  ;;  %v15222_v63 = vadd.f32 -5.0, %v2195_v57  ;;  %v5157_v47 = vld [vmem:[#allocation2 + $0x400] sm:$0xff]  ;;  %v5151_v57 = vld [vmem:[#allocation2 + $0x3d0] sm:$0xff] }
 0x68f   :  { %v4993_v18 = vadd.f32 %v4702_v6, %v2945_v60  ;;  %v3951_v25 = vmul.f32 1.442695, %v3466_v30  ;;  %v2284_v50 = vadd.f32 %v2283_v31, %v13726_v20  ;;  %v5853_v19 = vpack.c.bf16 %v5661_v34, %v5653_v43  ;;  %v10100_v6 = vld [vmem:[%s16914_s12 + $0x400] sm:$0xff] }
 0x690   :  { %v9915_v16 = vpop.eup %9914  ;;  %7664 = vst [vmem:[%s16914_s12 + $0x6f8] sm:$0xff] %v4996_v11  ;;  %v2946_v56 = vmax.f32 %v15111_v55, 0.0  ;;  %v2955_v12 = vmax.f32 %v15132_v51, 0.0  ;;  %v3475_v54 = vsub.f32 0.0, %v3219_v28  ;;  %v3220_v35 = vand.u32 2147483647, %v15220_v22 }
 0x691   :  { %v9917_v42 = vpop.eup %9916  ;;  %7661 = vst [vmem:[%s16914_s12 + $0x6e0] sm:$0xff] %v4993_v18  ;;  %v4704_v4 = vmul.f32 0.6931472, %v9915_v16  ;;  %9922 = vpow2.f32 %v3951_v25  ;;  %v3217_v13 = vand.u32 2147483647, %v15222_v63  ;;  %v15235_v44 = vadd.f32 -5.0, %v2284_v50  ;;  %6484 = vmatmul.bf16.gmra.mxu2 %v5853_v19 }
 0x692   :  { %v9919_v33 = vpop.eup %9918  ;;  %v4722_v55 = vmul.f32 0.6931472, %v9917_v42  ;;  %v3969_v32 = vmul.f32 1.442695, %v3475_v54  ;;  %v3476_v51 = vsub.f32 0.0, %v3220_v35  ;;  %v2376_v59 = vadd.f32 %v2375_v3, %v13676_v9  ;;  %v10101_v25 = vld [vmem:[%s16913_s11 + $0x388] sm:$0xff] }
 0x693   :  { %v9921_v29 = vpop.eup %9920  ;;  %v4994_v10 = vadd.f32 %v4704_v4, %v2946_v56  ;;  %v2956_v15 = vmax.f32 %v15134_v52, 0.0  ;;  %v4724_v53 = vmul.f32 0.6931472, %v9919_v33  ;;  %v3473_v45 = vsub.f32 0.0, %v3217_v13  ;;  %v10097_v52 = vld [vmem:[%s16914_s12 + $0x410] sm:$0xff]  ;;  %v5152_v56 = vld [vmem:[#allocation2 + $0x3d8] sm:$0xff]  ;;  %v2197_v4 = vpop.f32.mrf.mxu2 }
 0x694   :  { %v5003_v40 = vadd.f32 %v4722_v55, %v2955_v12  ;;  %v4233_v60 = vadd.f32 1.0, %v9921_v29  ;;  %9924 = vpow2.f32 %v3969_v32  ;;  %v3971_v49 = vmul.f32 1.442695, %v3476_v51  ;;  %v10103_v19 = vld [vmem:[%s16914_s12 + $0x3d0] sm:$0xff] }
 0x695   :  { %7662 = vst [vmem:[%s16914_s12 + $0x6e8] sm:$0xff] %v4994_v10  ;;  %v5004_v58 = vadd.f32 %v4724_v53, %v2956_v15  ;;  %v3965_v26 = vmul.f32 1.442695, %v3473_v45  ;;  %v3218_v21 = vand.u32 2147483647, %v15235_v44  ;;  %v15243_v1 = vadd.f32 -5.0, %v2376_v59 }
 0x696   :  { %v15248_v48 = vmul.f32 %v10097_v52, %v5159_v46  ;;  %7671 = vst [vmem:[%s16914_s12 + $0x730] sm:$0xff] %v5003_v40  ;;  %9926 = vlog2.f32 %v4233_v60  ;;  %v2465_v8 = vadd.f32 %v2464_v36, %v13685_v2  ;;  %v5406_v37 = vmul.f32 %v10098_v39, %v5150_v0  ;;  %v10104_v33 = vld [vmem:[%s16913_s11 + $0x390] sm:$0xff]  ;;  %v10106_v46 = vld [vmem:[%s16914_s12 + $0x3d8] sm:$0xff]  ;;  %v5158_v53 = vld [vmem:[#allocation2 + $0x408] sm:$0xff] }
 0x697   :  { %v9923_v31 = vpop.eup %9922  ;;  %v15260_v34 = vmul.f32 %v10099_v7, %v5160_v24  ;;  %v15265_v30 = vmul.f32 %v10100_v6, %v5157_v47  ;;  %7672 = vst [vmem:[%s16914_s12 + $0x738] sm:$0xff] %v5004_v58  ;;  %9928 = vpow2.f32 %v3971_v49  ;;  %v3474_v14 = vsub.f32 0.0, %v3218_v21  ;;  %v2286_v24 = vpop.f32.mrf.mxu3  ;;  %v5165_v58 = vld [vmem:[#allocation2 + $0x440] sm:$0xff]  ;;  %v10108_v52 = vld [vmem:[%s16913_s11 + $0x3d8] sm:$0xff] }
 0x698   :  { %v4234_v43 = vadd.f32 1.0, %v9923_v31  ;;  %9930 = vpow2.f32 %v3965_v26  ;;  %v3227_v11 = vand.u32 2147483647, %v15243_v1  ;;  %v15271_v28 = vadd.f32 -5.0, %v2465_v8  ;;  %v2377_v6 = vpop.f32.mrf.mxu0 }
 0x699   :  { %v3967_v18 = vmul.f32 1.442695, %v3474_v14  ;;  %v5654_v50 = vadd.f32 %v10101_v25, %v15194_v5  ;;  %v5662_v3 = vadd.f32 %v10102_v17, %v5406_v37  ;;  %v5407_v16 = vmul.f32 %v10103_v19, %v5151_v57 }
 0x69a   :  { %v9925_v12 = vpop.eup %9924  ;;  %v2953_v54 = vmax.f32 %v15179_v62, 0.0  ;;  %9932 = vlog2.f32 %v4234_v43  ;;  %v3483_v35 = vsub.f32 0.0, %v3227_v11  ;;  %v3228_v42 = vand.u32 2147483647, %v15271_v28  ;;  %v10105_v62 = vld [vmem:[%s16913_s11 + $0x3d0] sm:$0xff] }
 0x69b   :  { %v4243_v5 = vadd.f32 1.0, %v9925_v12  ;;  %9934 = vpow2.f32 %v3967_v18  ;;  %v5854_v13 = vpack.c.bf16 %v5662_v3, %v5654_v50  ;;  %v5655_v55 = vadd.f32 %v10104_v33, %v15121_v38  ;;  %v10107_v38 = vld [vmem:[%s16913_s11 + $0x398] sm:$0xff]  ;;  %v10110_v18 = vld [vmem:[%s16914_s12 + $0x440] sm:$0xff]  ;;  %v2466_v3 = vpop.f32.mrf.mxu1 }
 0x69c   :  { %v9927_v32 = vpop.eup %9926  ;;  %v3985_v51 = vmul.f32 1.442695, %v3483_v35  ;;  %v3484_v59 = vsub.f32 0.0, %v3228_v42  ;;  %v5663_v29 = vadd.f32 %v10105_v62, %v5407_v16  ;;  %v5408_v10 = vmul.f32 %v10106_v46, %v5152_v56 }
 0x69d   :  { %v9929_v15 = vpop.eup %9928  ;;  %v4718_v45 = vmul.f32 0.6931472, %v9927_v32  ;;  %9936 = vlog2.f32 %v4243_v5  ;;  %6573 = vmatmul.bf16.gmra.mxu3 %v5854_v13  ;;  %v5656_v36 = vadd.f32 %v10107_v38, %v15126_v23  ;;  %v2198_v0 = vadd.f32 %v2197_v4, %v13689_v27  ;;  %v10109_v23 = vld [vmem:[%s16914_s12 + $0x408] sm:$0xff]  ;;  %v2199_v5 = vpop.f32.mrf.mxu2 }
 0x69e   :  { %v9931_v47 = vpop.eup %9930  ;;  %v4244_v40 = vadd.f32 1.0, %v9929_v15  ;;  %9938 = vpow2.f32 %v3985_v51  ;;  %v3987_v60 = vmul.f32 1.442695, %v3484_v59  ;;  %v5855_v49 = vpack.c.bf16 %v5663_v29, %v5655_v55 }
 0x69f   :  { %v5001_v26 = vadd.f32 %v4718_v45, %v2953_v54  ;;  %v4241_v21 = vadd.f32 1.0, %v9931_v47  ;;  %v5664_v8 = vadd.f32 %v10108_v52, %v5408_v10  ;;  %v15303_v39 = vadd.f32 -5.0, %v2198_v0  ;;  %v2288_v15 = vpop.f32.mrf.mxu3  ;;  %v5173_v0 = vld [vmem:[#allocation2 + $0x480] sm:$0xff] }
 0x6a0   :  { %v9933_v37 = vpop.eup %9932  ;;  %v15308_v57 = vmul.f32 %v10109_v23, %v5158_v53  ;;  %v2954_v31 = vmax.f32 %v15185_v41, 0.0  ;;  %9940 = vlog2.f32 %v4244_v40  ;;  %6662 = vmatmul.bf16.gmra.mxu0 %v5855_v49  ;;  %v2287_v7 = vadd.f32 %v2286_v24, %v13726_v20  ;;  %v5166_v49 = vld [vmem:[#allocation2 + $0x448] sm:$0xff]  ;;  %v8906_v23 = vld [vmem:[#allocation6 + $0x118] sm:$0xff] }
 0x6a1   :  { %v9935_v14 = vpop.eup %9934  ;;  %7669 = vst [vmem:[%s16914_s12 + $0x720] sm:$0xff] %v5001_v26  ;;  %v4720_v43 = vmul.f32 0.6931472, %v9933_v37  ;;  %9942 = vlog2.f32 %v4241_v21  ;;  %v5856_v11 = vpack.c.bf16 %v5664_v8, %v5656_v36  ;;  %v5421_v25 = vmul.f32 %v10110_v18, %v5165_v58  ;;  %v15350_v8 = vpop.f32.mrf.mxu0  ;;  %6801 = vmatpush.bf16.msra.mxu2 %v8906_v23 }
 0x6a2   :  { %v2963_v41 = vmax.f32 %v15208_v61, 0.0  ;;  %v4242_v50 = vadd.f32 1.0, %v9935_v14  ;;  %9944 = vpow2.f32 %v3987_v60  ;;  %v3225_v17 = vand.u32 2147483647, %v15303_v39  ;;  %v8922_v14 = vld [vmem:[#allocation6 + $0x198] sm:$0xff] }
 0x6a3   :  { %v9937_v19 = vpop.eup %9936  ;;  %v5002_v16 = vadd.f32 %v4720_v43, %v2954_v31  ;;  %6751 = vmatmul.bf16.gmra.mxu1 %v5856_v11  ;;  %v15320_v56 = vadd.f32 -5.0, %v2287_v7  ;;  %v2378_v12 = vadd.f32 %v2377_v6, %v13676_v9  ;;  %v2467_v54 = vadd.f32 %v2466_v3, %v13685_v2  ;;  %v10111_v9 = vld [vmem:[%s16913_s11 + $0x440] sm:$0xff]  ;;  %v15352_v37 = vpop.f32.mrf.mxu1  ;;  %v8914_v31 = vld [vmem:[#allocation6 + $0x158] sm:$0xff]  ;;  %6979 = vmatpush.bf16.msra.mxu0 %v8922_v14 }
 0x6a4   :  { %v9939_v35 = vpop.eup %9938  ;;  %v4738_v42 = vmul.f32 0.6931472, %v9937_v19  ;;  %v2964_v4 = vmax.f32 %v15220_v22, 0.0  ;;  %9946 = vlog2.f32 %v4242_v50  ;;  %v3481_v61 = vsub.f32 0.0, %v3225_v17  ;;  %v10113_v43 = vld [vmem:[%s16914_s12 + $0x480] sm:$0xff]  ;;  %6890 = vmatpush.bf16.msra.mxu3 %v8914_v31  ;;  %v8930_v50 = vld [vmem:[#allocation6 + $0x1d8] sm:$0xff] }
 0x6a5   :  { %7670 = vst [vmem:[%s16914_s12 + $0x728] sm:$0xff] %v5002_v16  ;;  %v2961_v13 = vmax.f32 %v15222_v63, 0.0  ;;  %v4251_v33 = vadd.f32 1.0, %v9939_v35  ;;  %v3226_v55 = vand.u32 2147483647, %v15320_v56  ;;  %v5677_v2 = vadd.f32 %v10111_v9, %v5421_v25  ;;  %v10114_v16 = vld [vmem:[%s16914_s12 + $0x448] sm:$0xff]  ;;  %7068 = vmatpush.bf16.msra.mxu1 %v8930_v50 }
 0x6a6   :  { %v9941_v32 = vpop.eup %9940  ;;  %v5011_v51 = vadd.f32 %v4738_v42, %v2963_v41  ;;  %v3981_v22 = vmul.f32 1.442695, %v3481_v61  ;;  %v15333_v59 = vadd.f32 -5.0, %v2378_v12  ;;  %v15335_v62 = vadd.f32 -5.0, %v2467_v54  ;;  %v6450_v41 = vpop.f32.mrf.mxu2  ;;  %v5167_v54 = vld [vmem:[#allocation2 + $0x450] sm:$0xff]  ;;  %v10121_v31 = vld [vmem:[%s16913_s11 + $0x418] sm:$0xff] }
 0x6a7   :  { %v9943_v29 = vpop.eup %9942  ;;  %v4740_v46 = vmul.f32 0.6931472, %v9941_v32  ;;  %9948 = vlog2.f32 %v4251_v33  ;;  %v3482_v10 = vsub.f32 0.0, %v3226_v55  ;;  %v2200_v63 = vadd.f32 %v2199_v5, %v13689_v27  ;;  %v10112_v27 = vld [vmem:[%s16913_s11 + $0x400] sm:$0xff]  ;;  %v10115_v55 = vld [vmem:[%s16913_s11 + $0x408] sm:$0xff] }
 0x6a8   :  { %v9945_v53 = vpop.eup %9944  ;;  %7679 = vst [vmem:[%s16914_s12 + $0x770] sm:$0xff] %v5011_v51  ;;  %v4734_v45 = vmul.f32 0.6931472, %v9943_v29  ;;  %v2962_v38 = vmax.f32 %v15235_v44, 0.0  ;;  %9950 = vpow2.f32 %v3981_v22  ;;  %v3235_v36 = vand.u32 2147483647, %v15333_v59 }
 0x6a9   :  { %v5012_v24 = vadd.f32 %v4740_v46, %v2964_v4  ;;  %v4252_v47 = vadd.f32 1.0, %v9945_v53  ;;  %v3983_v40 = vmul.f32 1.442695, %v3482_v10  ;;  %v5669_v60 = vadd.f32 %v10112_v27, %v15265_v30  ;;  %v10116_v32 = vld [vmem:[%s16913_s11 + $0x448] sm:$0xff]  ;;  %v10117_v22 = vld [vmem:[%s16914_s12 + $0x450] sm:$0xff]  ;;  %v5168_v46 = vld [vmem:[#allocation2 + $0x458] sm:$0xff] }
 0x6aa   :  { %v9947_v58 = vpop.eup %9946  ;;  %v5009_v26 = vadd.f32 %v4734_v45, %v2961_v13  ;;  %v3491_v21 = vsub.f32 0.0, %v3235_v36  ;;  %v3236_v52 = vand.u32 2147483647, %v15335_v62  ;;  %v15348_v44 = vadd.f32 -5.0, %v2200_v63  ;;  %v15390_v10 = vld [vmem:[%s16911_s9] ss:$0 sm:$0xff] }
 0x6ab   :  { %7680 = vst [vmem:[%s16914_s12 + $0x778] sm:$0xff] %v5012_v24  ;;  %v4736_v7 = vmul.f32 0.6931472, %v9947_v58  ;;  %9952 = vlog2.f32 %v4252_v47  ;;  %v2289_v30 = vadd.f32 %v2288_v15, %v13726_v20  ;;  %v5861_v6 = vpack.c.bf16 %v5677_v2, %v5669_v60  ;;  %v6539_v2 = vpop.f32.mrf.mxu3  ;;  %v15403_v27 = vpop.f32.mrf.mxu1  ;;  %v10120_v58 = vld [vmem:[%s16914_s12 + $0x458] sm:$0xff] }
 0x6ac   :  { %v15361_v11 = vmul.f32 %v10113_v43, %v5173_v0  ;;  %7677 = vst [vmem:[%s16914_s12 + $0x760] sm:$0xff] %v5009_v26  ;;  %9954 = vpow2.f32 %v3983_v40  ;;  %v4001_v18 = vmul.f32 1.442695, %v3491_v21  ;;  %v3492_v25 = vsub.f32 0.0, %v3236_v52  ;;  %v10118_v0 = vld [vmem:[%s16913_s11 + $0x410] sm:$0xff]  ;;  %v6630_v40 = vpop.f32.mrf.mxu0  ;;  %v5181_v21 = vld [vmem:[#allocation2 + $0x4c0] sm:$0xff] }
 0x6ad   :  { %v9949_v20 = vpop.eup %9948  ;;  %v5010_v17 = vadd.f32 %v4736_v7, %v2962_v38  ;;  %v3233_v3 = vand.u32 2147483647, %v15348_v44  ;;  %v15367_v19 = vadd.f32 -5.0, %v2289_v30  ;;  %6489 = vmatmul.bf16.gmra.mxu2 %v5861_v6  ;;  %v5422_v12 = vmul.f32 %v10114_v16, %v5166_v49  ;;  %v10122_v43 = vld [vmem:[%s16913_s11 + $0x458] sm:$0xff] }
 0x6ae   :  { %v9951_v35 = vpop.eup %9950  ;;  %v2971_v42 = vmax.f32 %v15243_v1, 0.0  ;;  %v4754_v4 = vmul.f32 0.6931472, %v9949_v20  ;;  %9956 = vpow2.f32 %v4001_v18  ;;  %v4003_v61 = vmul.f32 1.442695, %v3492_v25  ;;  %v6452_v6 = vpop.f32.mrf.mxu2 }
 0x6af   :  { %7678 = vst [vmem:[%s16914_s12 + $0x768] sm:$0xff] %v5010_v17  ;;  %v4249_v5 = vadd.f32 1.0, %v9951_v35  ;;  %v3489_v13 = vsub.f32 0.0, %v3233_v3  ;;  %v3234_v33 = vand.u32 2147483647, %v15367_v19  ;;  %v5670_v9 = vadd.f32 %v10115_v55, %v15308_v57  ;;  %v5182_v35 = vld [vmem:[#allocation2 + $0x4c8] sm:$0xff] }
 0x6b0   :  { %v5019_v1 = vadd.f32 %v4754_v4, %v2971_v42  ;;  %9958 = vpow2.f32 %v4003_v61  ;;  %v5678_v51 = vadd.f32 %v10116_v32, %v5422_v12  ;;  %v5423_v29 = vmul.f32 %v10117_v22, %v5167_v54  ;;  %v5174_v42 = vld [vmem:[#allocation2 + $0x488] sm:$0xff]  ;;  %v5183_v55 = vld [vmem:[#allocation2 + $0x4d0] sm:$0xff] }
 0x6b1   :  { %v9953_v57 = vpop.eup %9952  ;;  %v2972_v63 = vmax.f32 %v15271_v28, 0.0  ;;  %9960 = vlog2.f32 %v4249_v5  ;;  %v3997_v15 = vmul.f32 1.442695, %v3489_v13  ;;  %v3490_v53 = vsub.f32 0.0, %v3234_v33  ;;  %v10119_v28 = vld [vmem:[%s16913_s11 + $0x450] sm:$0xff]  ;;  %v10124_v13 = vld [vmem:[%s16913_s11 + $0x4c0] sm:$0xff] }
 0x6b2   :  { %v9955_v45 = vpop.eup %9954  ;;  %7687 = vst [vmem:[%s16914_s12 + $0x7b0] sm:$0xff] %v5019_v1  ;;  %v4756_v38 = vmul.f32 0.6931472, %v9953_v57  ;;  %v5862_v36 = vpack.c.bf16 %v5678_v51, %v5670_v9  ;;  %v5671_v24 = vadd.f32 %v10118_v0, %v15248_v48  ;;  %v5679_v47 = vadd.f32 %v10119_v28, %v5423_v29  ;;  %v8905_v1 = vld [vmem:[#allocation6 + $0x110] sm:$0xff] }
 0x6b3   :  { %v4250_v60 = vadd.f32 1.0, %v9955_v45  ;;  %9962 = vpow2.f32 %v3997_v15  ;;  %v3999_v49 = vmul.f32 1.442695, %v3490_v53  ;;  %v5424_v26 = vmul.f32 %v10120_v58, %v5168_v46  ;;  %v6541_v54 = vpop.f32.mrf.mxu3  ;;  %v8913_v32 = vld [vmem:[#allocation6 + $0x150] sm:$0xff]  ;;  %v10126_v15 = vld [vmem:[%s16914_s12 + $0x4c8] sm:$0xff]  ;;  %6802 = vmatpush.bf16.msra.mxu2 %v8905_v1 }
 0x6b4   :  { %v9957_v52 = vpop.eup %9956  ;;  %v5020_v23 = vadd.f32 %v4756_v38, %v2972_v63  ;;  %6578 = vmatmul.bf16.gmra.mxu3 %v5862_v36  ;;  %v5863_v48 = vpack.c.bf16 %v5679_v47, %v5671_v24  ;;  %v5672_v7 = vadd.f32 %v10121_v31, %v15260_v34  ;;  %v6451_v30 = vadd.f32 %v15390_v10, %v6450_v41  ;;  %v10123_v41 = vld [vmem:[%s16914_s12 + $0x4c0] sm:$0xff]  ;;  %v5175_v51 = vld [vmem:[#allocation2 + $0x490] sm:$0xff]  ;;  %v6633_v57 = vpop.f32.mrf.mxu0 }
 0x6b5   :  { %9964 = vlog2.f32 %v4250_v60  ;;  %v4259_v14 = vadd.f32 1.0, %v9957_v52  ;;  %v5680_v18 = vadd.f32 %v10122_v43, %v5424_v26  ;;  %v6453_v25 = vadd.f32 %v15390_v10, %v6452_v6  ;;  %v15436_v63 = vpop.f32.mrf.mxu1  ;;  %v8929_v45 = vld [vmem:[#allocation6 + $0x1d0] sm:$0xff]  ;;  %6891 = vmatpush.bf16.msra.mxu3 %v8913_v32 }
 0x6b6   :  { %v9959_v50 = vpop.eup %9958  ;;  %7688 = vst [vmem:[%s16914_s12 + $0x7b8] sm:$0xff] %v5020_v23  ;;  %9966 = vpow2.f32 %v3999_v49  ;;  %6667 = vmatmul.bf16.gmra.mxu0 %v5863_v48  ;;  %v6540_v34 = vadd.f32 %v6539_v2, %v6451_v30  ;;  %v5437_v20 = vmul.f32 %v10123_v41, %v5181_v21  ;;  %v2969_v3 = vmax.f32 %v15303_v39, 0.0  ;;  %v10125_v39 = vld [vmem:[%s16913_s11 + $0x480] sm:$0xff]  ;;  %v5184_v49 = vld [vmem:[#allocation2 + $0x4d8] sm:$0xff]  ;;  %v6455_v58 = vpop.f32.mrf.mxu2  ;;  %v10129_v21 = vld [vmem:[%s16914_s12 + $0x490] sm:$0xff]  ;;  %7069 = vmatpush.bf16.msra.mxu1 %v8929_v45 }
 0x6b7   :  { %v9961_v17 = vpop.eup %9960  ;;  %9968 = vlog2.f32 %v4259_v14  ;;  %v4260_v16 = vadd.f32 1.0, %v9959_v50  ;;  %v5864_v12 = vpack.c.bf16 %v5680_v18, %v5672_v7  ;;  %v6542_v5 = vadd.f32 %v6541_v54, %v6453_v25  ;;  %v5176_v48 = vld [vmem:[#allocation2 + $0x498] sm:$0xff]  ;;  %v10130_v30 = vld [vmem:[%s16913_s11 + $0x4c8] sm:$0xff] }
 0x6b8   :  { %v4750_v4 = vmul.f32 0.6931472, %v9961_v17  ;;  %v15425_v61 = vadd.f32 %v15350_v8, %v6540_v34  ;;  %v5693_v33 = vadd.f32 %v10124_v13, %v5437_v20  ;;  %v5685_v2 = vadd.f32 %v10125_v39, %v15361_v11  ;;  %v8921_v8 = vld [vmem:[#allocation6 + $0x190] sm:$0xff]  ;;  %v10127_v11 = vld [vmem:[%s16914_s12 + $0x488] sm:$0xff]  ;;  %v10132_v50 = vld [vmem:[%s16914_s12 + $0x4d8] sm:$0xff] }
 0x6b9   :  { %v9963_v9 = vpop.eup %9962  ;;  %9970 = vlog2.f32 %v4260_v16  ;;  %6756 = vmatmul.bf16.gmra.mxu1 %v5864_v12  ;;  %v15434_v46 = vadd.f32 %v6630_v40, %v6542_v5  ;;  %v5438_v53 = vmul.f32 %v10126_v15, %v5182_v35  ;;  %v5430_v36 = vmul.f32 %v10127_v11, %v5174_v42  ;;  %v10128_v40 = vld [vmem:[%s16914_s12 + $0x4d0] sm:$0xff]  ;;  %6980 = vmatpush.bf16.msra.mxu0 %v8921_v8  ;;  %v5197_v12 = vld [vmem:[#allocation2 + $0x540] sm:$0xff]  ;;  %v10134_v54 = vld [vmem:[%s16914_s12 + $0x498] sm:$0xff] }
 0x6ba   :  { %v5017_v22 = vadd.f32 %v4750_v4, %v2969_v3  ;;  %v4257_v29 = vadd.f32 1.0, %v9963_v9  ;;  %v5869_v0 = vpack.c.bf16 %v5693_v33, %v5685_v2  ;;  %v2970_v28 = vmax.f32 %v15320_v56, 0.0  ;;  %v5189_v4 = vld [vmem:[#allocation2 + $0x500] sm:$0xff]  ;;  %v10135_v33 = vld [vmem:[%s16913_s11 + $0x490] sm:$0xff]  ;;  %v10136_v8 = vld [vmem:[%s16913_s11 + $0x4d8] sm:$0xff] }
 0x6bb   :  { %v9965_v38 = vpop.eup %9964  ;;  %v5439_v60 = vmul.f32 %v10128_v40, %v5183_v55  ;;  %v5431_v52 = vmul.f32 %v10129_v21, %v5175_v51  ;;  %v2979_v23 = vmax.f32 %v15333_v59, 0.0  ;;  %v5694_v6 = vadd.f32 %v10130_v30, %v5438_v53  ;;  %v10131_v59 = vld [vmem:[%s16913_s11 + $0x488] sm:$0xff]  ;;  %v6544_v41 = vpop.f32.mrf.mxu3  ;;  %v10139_v11 = vld [vmem:[%s16913_s11 + $0x498] sm:$0xff] }
 0x6bc   :  { %v9967_v24 = vpop.eup %9966  ;;  %7685 = vst [vmem:[%s16914_s12 + $0x7a0] sm:$0xff] %v5017_v22  ;;  %v4752_v47 = vmul.f32 0.6931472, %v9965_v38  ;;  %9972 = vlog2.f32 %v4257_v29  ;;  %v6456_v14 = vadd.f32 %v15390_v10, %v6455_v58  ;;  %v2980_v18 = vmax.f32 %v15335_v62, 0.0  ;;  %v10133_v62 = vld [vmem:[%s16913_s11 + $0x4d0] sm:$0xff]  ;;  %v6635_v39 = vpop.f32.mrf.mxu0  ;;  %v10137_v22 = vld [vmem:[%s16914_s12 + $0x540] sm:$0xff] }
 0x6bd   :  { %v9969_v26 = vpop.eup %9968  ;;  %v4258_v56 = vadd.f32 1.0, %v9967_v24  ;;  %6494 = vmatmul.bf16.gmra.mxu2 %v5869_v0  ;;  %v5686_v25 = vadd.f32 %v10131_v59, %v5430_v36  ;;  %v5440_v34 = vmul.f32 %v10132_v50, %v5184_v49  ;;  %v5695_v3 = vadd.f32 %v10133_v62, %v5439_v60  ;;  %v15483_v2 = vpop.f32.mrf.mxu1  ;;  %v10140_v60 = vld [vmem:[%s16913_s11 + $0x540] sm:$0xff]  ;;  %v5198_v58 = vld [vmem:[#allocation2 + $0x548] sm:$0xff] }
 0x6be   :  { %v5018_v31 = vadd.f32 %v4752_v47, %v2970_v28  ;;  %v4770_v7 = vmul.f32 0.6931472, %v9969_v26  ;;  %v6545_v16 = vadd.f32 %v6544_v41, %v6456_v14  ;;  %v5432_v35 = vmul.f32 %v10134_v54, %v5176_v48  ;;  %v6457_v15 = vpop.f32.mrf.mxu2  ;;  %v10142_v30 = vld [vmem:[%s16914_s12 + $0x548] sm:$0xff]  ;;  %v5191_v14 = vld [vmem:[#allocation2 + $0x510] sm:$0xff]  ;;  %v10147_v54 = vld [vmem:[%s16914_s12 + $0x558] sm:$0xff] }
 0x6bf   :  { %v9971_v43 = vpop.eup %9970  ;;  %9974 = vlog2.f32 %v4258_v56  ;;  %v5870_v13 = vpack.c.bf16 %v5694_v6, %v5686_v25  ;;  %v5687_v55 = vadd.f32 %v10135_v33, %v5431_v52  ;;  %v2977_v1 = vmax.f32 %v15348_v44, 0.0  ;;  %v10138_v44 = vld [vmem:[%s16914_s12 + $0x500] sm:$0xff]  ;;  %v5190_v52 = vld [vmem:[#allocation2 + $0x508] sm:$0xff]  ;;  %v5199_v56 = vld [vmem:[#allocation2 + $0x550] sm:$0xff] }
 0x6c0   :  { %7686 = vst [vmem:[%s16914_s12 + $0x7a8] sm:$0xff] %v5018_v31  ;;  %v5027_v20 = vadd.f32 %v4770_v7, %v2979_v23  ;;  %v4772_v17 = vmul.f32 0.6931472, %v9971_v43  ;;  %v15481_v9 = vadd.f32 %v6633_v57, %v6545_v16  ;;  %v5696_v51 = vadd.f32 %v10136_v8, %v5440_v34  ;;  %v10144_v25 = vld [vmem:[%s16914_s12 + $0x550] sm:$0xff]  ;;  %v5200_v34 = vld [vmem:[#allocation2 + $0x558] sm:$0xff]  ;;  %v10146_v16 = vld [vmem:[%s16913_s11 + $0x548] sm:$0xff] }
 0x6c1   :  { %v5453_v29 = vmul.f32 %v10137_v22, %v5197_v12  ;;  %v5871_v57 = vpack.c.bf16 %v5695_v3, %v5687_v55  ;;  %v5445_v45 = vmul.f32 %v10138_v44, %v5189_v4  ;;  %v5688_v36 = vadd.f32 %v10139_v11, %v5432_v35  ;;  %v5192_v3 = vld [vmem:[#allocation2 + $0x518] sm:$0xff]  ;;  %v10148_v4 = vld [vmem:[%s16913_s11 + $0x508] sm:$0xff]  ;;  %v5205_v8 = vld [vmem:[#allocation2 + $0x580] sm:$0xff] }
 0x6c2   :  { %v9973_v42 = vpop.eup %9972  ;;  %7695 = vst [vmem:[%s16914_s12 + $0x7f0] sm:$0xff] %v5027_v20  ;;  %v5028_v5 = vadd.f32 %v4772_v17, %v2980_v18  ;;  %v6458_v0 = vadd.f32 %v15390_v10, %v6457_v15  ;;  %v2978_v24 = vmax.f32 %v15367_v19, 0.0  ;;  %v10141_v19 = vld [vmem:[%s16913_s11 + $0x500] sm:$0xff]  ;;  %v5454_v6 = vmul.f32 %v10142_v30, %v5198_v58  ;;  %v10143_v18 = vld [vmem:[%s16914_s12 + $0x508] sm:$0xff]  ;;  %v10145_v17 = vld [vmem:[%s16914_s12 + $0x510] sm:$0xff] }
 0x6c3   :  { %v4766_v32 = vmul.f32 0.6931472, %v9973_v42  ;;  %v5872_v47 = vpack.c.bf16 %v5696_v51, %v5688_v36  ;;  %v6546_v40 = vpop.f32.mrf.mxu3  ;;  %v5709_v49 = vadd.f32 %v10140_v60, %v5453_v29  ;;  %v5701_v23 = vadd.f32 %v10141_v19, %v5445_v45  ;;  %v10151_v22 = vld [vmem:[%s16913_s11 + $0x510] sm:$0xff]  ;;  %v10152_v44 = vld [vmem:[%s16913_s11 + $0x558] sm:$0xff]  ;;  %v5206_v19 = vld [vmem:[#allocation2 + $0x588] sm:$0xff] }
 0x6c4   :  { %7696 = vst [vmem:[%s16914_s12 + $0x7f8] sm:$0xff] %v5028_v5  ;;  %6583 = vmatmul.bf16.gmra.mxu3 %v5870_v13  ;;  %v6547_v21 = vadd.f32 %v6546_v40, %v6458_v0  ;;  %v6638_v31 = vpop.f32.mrf.mxu0  ;;  %v5446_v59 = vmul.f32 %v10143_v18, %v5190_v52  ;;  %v5455_v50 = vmul.f32 %v10144_v25, %v5199_v56  ;;  %v10149_v13 = vld [vmem:[%s16913_s11 + $0x550] sm:$0xff]  ;;  %v5214_v52 = vld [vmem:[#allocation2 + $0x5c8] sm:$0xff] }
 0x6c5   :  { %v9975_v53 = vpop.eup %9974  ;;  %v5025_v38 = vadd.f32 %v4766_v32, %v2977_v1  ;;  %v15517_v7 = vpop.f32.mrf.mxu1  ;;  %v5877_v43 = vpack.c.bf16 %v5709_v49, %v5701_v23  ;;  %v5447_v62 = vmul.f32 %v10145_v17, %v5191_v14  ;;  %v5710_v12 = vadd.f32 %v10146_v16, %v5454_v6  ;;  %v10150_v1 = vld [vmem:[%s16914_s12 + $0x518] sm:$0xff]  ;;  %v5215_v56 = vld [vmem:[#allocation2 + $0x5d0] sm:$0xff]  ;;  %v8904_v6 = vld [vmem:[#allocation6 + $0x108] sm:$0xff] }
 0x6c6   :  { %v4768_v28 = vmul.f32 0.6931472, %v9975_v53  ;;  %6672 = vmatmul.bf16.gmra.mxu0 %v5871_v57  ;;  %v15515_v48 = vadd.f32 %v6635_v39, %v6547_v21  ;;  %v6460_v41 = vpop.f32.mrf.mxu2  ;;  %v5456_v35 = vmul.f32 %v10147_v54, %v5200_v34  ;;  %v5702_v5 = vadd.f32 %v10148_v4, %v5446_v59  ;;  %v5213_v39 = vld [vmem:[#allocation2 + $0x5c0] sm:$0xff]  ;;  %v8912_v14 = vld [vmem:[#allocation6 + $0x148] sm:$0xff]  ;;  %6803 = vmatpush.bf16.msra.mxu2 %v8904_v6  ;;  %v10160_v16 = vld [vmem:[%s16914_s12 + $0x5d0] sm:$0xff] }
 0x6c7   :  { %7693 = vst [vmem:[%s16914_s12 + $0x7e0] sm:$0xff] %v5025_v38  ;;  %v6461_v20 = vadd.f32 %v15390_v10, %v6460_v41  ;;  %v5711_v33 = vadd.f32 %v10149_v13, %v5455_v50  ;;  %v5448_v32 = vmul.f32 %v10150_v1, %v5192_v3  ;;  %v5703_v29 = vadd.f32 %v10151_v22, %v5447_v62  ;;  %v10153_v38 = vld [vmem:[%s16914_s12 + $0x5c0] sm:$0xff]  ;;  %v10158_v50 = vld [vmem:[%s16914_s12 + $0x5c8] sm:$0xff]  ;;  %v5216_v54 = vld [vmem:[#allocation2 + $0x5d8] sm:$0xff] }
 0x6c8   :  { %v5026_v26 = vadd.f32 %v4768_v28, %v2978_v24  ;;  %v5878_v51 = vpack.c.bf16 %v5710_v12, %v5702_v5  ;;  %v5712_v45 = vadd.f32 %v10152_v44, %v5456_v35  ;;  %v5469_v11 = vmul.f32 %v10153_v38, %v5213_v39  ;;  %v10154_v24 = vld [vmem:[%s16914_s12 + $0x580] sm:$0xff]  ;;  %v8928_v41 = vld [vmem:[#allocation6 + $0x1c8] sm:$0xff]  ;;  %6892 = vmatpush.bf16.msra.mxu3 %v8912_v14  ;;  %v10161_v4 = vld [vmem:[%s16914_s12 + $0x590] sm:$0xff] }
 0x6c9   :  { %6761 = vmatmul.bf16.gmra.mxu1 %v5872_v47  ;;  %v5879_v36 = vpack.c.bf16 %v5711_v33, %v5703_v29  ;;  %v5461_v28 = vmul.f32 %v10154_v24, %v5205_v8  ;;  %v10155_v47 = vld [vmem:[%s16913_s11 + $0x518] sm:$0xff]  ;;  %v5470_v34 = vmul.f32 %v10158_v50, %v5214_v52  ;;  %v10159_v62 = vld [vmem:[%s16914_s12 + $0x588] sm:$0xff]  ;;  %v5471_v12 = vmul.f32 %v10160_v16, %v5215_v56  ;;  %v10165_v22 = vld [vmem:[%s16913_s11 + $0x5d0] sm:$0xff] }
 0x6ca   :  { %7694 = vst [vmem:[%s16914_s12 + $0x7e8] sm:$0xff] %v5026_v26  ;;  %v5704_v40 = vadd.f32 %v10155_v47, %v5448_v32  ;;  %v10156_v26 = vld [vmem:[%s16913_s11 + $0x5c0] sm:$0xff]  ;;  %v5462_v3 = vmul.f32 %v10159_v62, %v5206_v19  ;;  %7070 = vmatpush.bf16.msra.mxu1 %v8928_v41  ;;  %v5208_v13 = vld [vmem:[#allocation2 + $0x598] sm:$0xff]  ;;  %v10162_v33 = vld [vmem:[%s16913_s11 + $0x5c8] sm:$0xff] }
 0x6cb   :  { %v6549_v42 = vpop.f32.mrf.mxu3  ;;  %v5725_v21 = vadd.f32 %v10156_v26, %v5469_v11  ;;  %v10163_v39 = vld [vmem:[%s16914_s12 + $0x5d8] sm:$0xff]  ;;  %v10164_v8 = vld [vmem:[%s16913_s11 + $0x588] sm:$0xff]  ;;  %v5727_v29 = vadd.f32 %v10165_v22, %v5471_v12  ;;  %v5229_v44 = vld [vmem:[#allocation2 + $0x640] sm:$0xff] }
 0x6cc   :  { %v6550_v55 = vadd.f32 %v6549_v42, %v6461_v20  ;;  %v6640_v15 = vpop.f32.mrf.mxu0  ;;  %v5880_v49 = vpack.c.bf16 %v5712_v45, %v5704_v40  ;;  %v5207_v20 = vld [vmem:[#allocation2 + $0x590] sm:$0xff]  ;;  %v5472_v1 = vmul.f32 %v10163_v39, %v5216_v54  ;;  %v10166_v45 = vld [vmem:[%s16914_s12 + $0x598] sm:$0xff]  ;;  %v5221_v11 = vld [vmem:[#allocation2 + $0x600] sm:$0xff] }
 0x6cd   :  { %6499 = vmatmul.bf16.gmra.mxu2 %v5877_v43  ;;  %v15552_v53 = vpop.f32.mrf.mxu1  ;;  %v8920_v43 = vld [vmem:[#allocation6 + $0x188] sm:$0xff]  ;;  %v5463_v5 = vmul.f32 %v10161_v4, %v5207_v20  ;;  %v5464_v38 = vmul.f32 %v10166_v45, %v5208_v13  ;;  %v10170_v19 = vld [vmem:[%s16914_s12 + $0x600] sm:$0xff]  ;;  %v10171_v56 = vld [vmem:[%s16913_s11 + $0x598] sm:$0xff] }
 0x6ce   :  { %v15550_v57 = vadd.f32 %v6638_v31, %v6550_v55  ;;  %v6462_v0 = vpop.f32.mrf.mxu2  ;;  %v10157_v31 = vld [vmem:[%s16913_s11 + $0x580] sm:$0xff]  ;;  %6981 = vmatpush.bf16.msra.mxu0 %v8920_v43  ;;  %v5726_v55 = vadd.f32 %v10162_v33, %v5470_v34  ;;  %v5230_v50 = vld [vmem:[#allocation2 + $0x648] sm:$0xff]  ;;  %v5231_v62 = vld [vmem:[#allocation2 + $0x650] sm:$0xff] }
 0x6cf   :  { %v6463_v60 = vadd.f32 %v15390_v10, %v6462_v0  ;;  %v5717_v30 = vadd.f32 %v10157_v31, %v5461_v28  ;;  %v10167_v0 = vld [vmem:[%s16913_s11 + $0x590] sm:$0xff]  ;;  %v5720_v31 = vadd.f32 %v10171_v56, %v5464_v38  ;;  %v10172_v43 = vld [vmem:[%s16913_s11 + $0x640] sm:$0xff]  ;;  %v5222_v41 = vld [vmem:[#allocation2 + $0x608] sm:$0xff] }
 0x6d0   :  { %v5719_v24 = vadd.f32 %v10167_v0, %v5463_v5  ;;  %v10173_v20 = vld [vmem:[%s16913_s11 + $0x600] sm:$0xff]  ;;  %v10174_v54 = vld [vmem:[%s16914_s12 + $0x648] sm:$0xff]  ;;  %v10176_v33 = vld [vmem:[%s16914_s12 + $0x650] sm:$0xff] }
 0x6d1   :  { %v5885_v17 = vpack.c.bf16 %v5725_v21, %v5717_v30  ;;  %v10175_v5 = vld [vmem:[%s16914_s12 + $0x608] sm:$0xff]  ;;  %v5232_v39 = vld [vmem:[#allocation2 + $0x658] sm:$0xff]  ;;  %v10181_v0 = vld [vmem:[%s16913_s11 + $0x650] sm:$0xff] }
 0x6d2   :  { %v5887_v21 = vpack.c.bf16 %v5727_v29, %v5719_v24  ;;  %v5478_v13 = vmul.f32 %v10175_v5, %v5222_v41  ;;  %v5224_v22 = vld [vmem:[#allocation2 + $0x618] sm:$0xff]  ;;  %v10178_v29 = vld [vmem:[%s16913_s11 + $0x648] sm:$0xff] }
 0x6d3   :  { %v6551_v58 = vpop.f32.mrf.mxu3  ;;  %v5238_v5 = vld [vmem:[#allocation2 + $0x688] sm:$0xff] }
 0x6d4   :  { %6588 = vmatmul.bf16.gmra.mxu3 %v5878_v51  ;;  %v6552_v23 = vadd.f32 %v6551_v58, %v6463_v60  ;;  %v6643_v59 = vpop.f32.mrf.mxu0  ;;  %v5718_v51 = vadd.f32 %v10164_v8, %v5462_v3  ;;  %v10168_v60 = vld [vmem:[%s16913_s11 + $0x5d8] sm:$0xff]  ;;  %v10169_v58 = vld [vmem:[%s16914_s12 + $0x640] sm:$0xff]  ;;  %v10177_v8 = vld [vmem:[%s16914_s12 + $0x610] sm:$0xff] }
 0x6d5   :  { %v15575_v25 = vpop.f32.mrf.mxu1  ;;  %v5485_v26 = vmul.f32 %v10169_v58, %v5229_v44  ;;  %v10179_v44 = vld [vmem:[%s16914_s12 + $0x658] sm:$0xff] }
 0x6d6   :  { %6677 = vmatmul.bf16.gmra.mxu0 %v5879_v36  ;;  %v15573_v18 = vadd.f32 %v6640_v15, %v6552_v23  ;;  %v6465_v35 = vpop.f32.mrf.mxu2  ;;  %v5886_v36 = vpack.c.bf16 %v5726_v55, %v5718_v51  ;;  %v5477_v23 = vmul.f32 %v10170_v19, %v5221_v11  ;;  %v5487_v55 = vmul.f32 %v10176_v33, %v5231_v62  ;;  %v10180_v11 = vld [vmem:[%s16913_s11 + $0x608] sm:$0xff]  ;;  %v5247_v33 = vld [vmem:[#allocation2 + $0x6d0] sm:$0xff] }
 0x6d7   :  { %v6466_v42 = vadd.f32 %v15390_v10, %v6465_v35  ;;  %v5486_v35 = vmul.f32 %v10174_v54, %v5230_v50  ;;  %v5488_v45 = vmul.f32 %v10179_v44, %v5232_v39 }
 0x6d8   :  { %v5743_v24 = vadd.f32 %v10181_v0, %v5487_v55  ;;  %v10189_v55 = vld [vmem:[%s16913_s11 + $0x680] sm:$0xff] }
 0x6d9   :  { %6766 = vmatmul.bf16.gmra.mxu1 %v5880_v49  ;;  %v5728_v49 = vadd.f32 %v10168_v60, %v5472_v1  ;;  %v5245_v60 = vld [vmem:[#allocation2 + $0x6c0] sm:$0xff] }
 0x6db   :  { %v6554_v32 = vpop.f32.mrf.mxu3  ;;  %v5888_v6 = vpack.c.bf16 %v5728_v49, %v5720_v31  ;;  %v10182_v49 = vld [vmem:[%s16914_s12 + $0x618] sm:$0xff] }
 0x6dc   :  { %v6555_v15 = vadd.f32 %v6554_v32, %v6466_v42  ;;  %v6645_v47 = vpop.f32.mrf.mxu0  ;;  %v5223_v42 = vld [vmem:[#allocation2 + $0x610] sm:$0xff]  ;;  %v5480_v58 = vmul.f32 %v10182_v49, %v5224_v22 }
 0x6dd   :  { %6504 = vmatmul.bf16.gmra.mxu2 %v5885_v17  ;;  %v15610_v40 = vpop.f32.mrf.mxu1  ;;  %v5733_v17 = vadd.f32 %v10173_v20, %v5477_v23  ;;  %v5479_v51 = vmul.f32 %v10177_v8, %v5223_v42  ;;  %v10187_v20 = vld [vmem:[%s16913_s11 + $0x618] sm:$0xff]  ;;  %v8919_v8 = vld [vmem:[#allocation6 + $0x180] sm:$0xff] }
 0x6de   :  { %v15608_v28 = vadd.f32 %v6643_v59, %v6555_v15  ;;  %v6467_v52 = vpop.f32.mrf.mxu2  ;;  %v5741_v59 = vadd.f32 %v10172_v43, %v5485_v26  ;;  %v5742_v15 = vadd.f32 %v10178_v29, %v5486_v35  ;;  %v5237_v26 = vld [vmem:[#allocation2 + $0x680] sm:$0xff]  ;;  %6982 = vmatpush.bf16.msra.mxu0 %v8919_v8 }
 0x6df   :  { %v6468_v30 = vadd.f32 %v15390_v10, %v6467_v52  ;;  %v10183_v52 = vld [vmem:[%s16913_s11 + $0x610] sm:$0xff]  ;;  %v10188_v35 = vld [vmem:[%s16913_s11 + $0x6c0] sm:$0xff] }
 0x6e0   :  { %v5893_v4 = vpack.c.bf16 %v5741_v59, %v5733_v17  ;;  %v5735_v19 = vadd.f32 %v10183_v52, %v5479_v51  ;;  %v5736_v17 = vadd.f32 %v10187_v20, %v5480_v58  ;;  %v5240_v52 = vld [vmem:[#allocation2 + $0x698] sm:$0xff]  ;;  %v5261_v20 = vld [vmem:[#allocation2 + $0x740] sm:$0xff] }
 0x6e2   :  { %v5895_v59 = vpack.c.bf16 %v5743_v24, %v5735_v19  ;;  %v10192_v24 = vld [vmem:[%s16914_s12 + $0x6d0] sm:$0xff]  ;;  %v10194_v19 = vld [vmem:[%s16913_s11 + $0x6c8] sm:$0xff] }
 0x6e3   :  { %v6556_v14 = vpop.f32.mrf.mxu3 }
 0x6e4   :  { %6593 = vmatmul.bf16.gmra.mxu3 %v5886_v36  ;;  %v6557_v34 = vadd.f32 %v6556_v14, %v6468_v30  ;;  %v6648_v16 = vpop.f32.mrf.mxu0  ;;  %v5734_v36 = vadd.f32 %v10180_v11, %v5478_v13  ;;  %v10184_v30 = vld [vmem:[%s16913_s11 + $0x658] sm:$0xff]  ;;  %v10185_v14 = vld [vmem:[%s16914_s12 + $0x6c0] sm:$0xff] }
 0x6e5   :  { %v15633_v12 = vpop.f32.mrf.mxu1  ;;  %v5501_v43 = vmul.f32 %v10185_v14, %v5245_v60  ;;  %v5248_v60 = vld [vmem:[#allocation2 + $0x6d8] sm:$0xff] }
 0x6e6   :  { %6682 = vmatmul.bf16.gmra.mxu0 %v5887_v21  ;;  %v15631_v3 = vadd.f32 %v6645_v47, %v6557_v34  ;;  %v6470_v1 = vpop.f32.mrf.mxu2  ;;  %v5894_v21 = vpack.c.bf16 %v5742_v15, %v5734_v36  ;;  %v10186_v34 = vld [vmem:[%s16914_s12 + $0x680] sm:$0xff]  ;;  %v10190_v15 = vld [vmem:[%s16914_s12 + $0x6c8] sm:$0xff] }
 0x6e7   :  { %v6471_v32 = vadd.f32 %v15390_v10, %v6470_v1  ;;  %v5493_v41 = vmul.f32 %v10186_v34, %v5237_v26  ;;  %v5757_v42 = vadd.f32 %v10188_v35, %v5501_v43  ;;  %v8903_v1 = vld [vmem:[#allocation6 + $0x100] sm:$0xff]  ;;  %v10191_v36 = vld [vmem:[%s16914_s12 + $0x688] sm:$0xff]  ;;  %v10193_v26 = vld [vmem:[%s16914_s12 + $0x690] sm:$0xff] }
 0x6e8   :  { %6804 = vmatpush.bf16.msra.mxu2 %v8903_v1  ;;  %v5494_v0 = vmul.f32 %v10191_v36, %v5238_v5  ;;  %v10196_v43 = vld [vmem:[%s16913_s11 + $0x688] sm:$0xff]  ;;  %v10199_v35 = vld [vmem:[%s16913_s11 + $0x690] sm:$0xff] }
 0x6e9   :  { %6771 = vmatmul.bf16.gmra.mxu1 %v5888_v6  ;;  %v5744_v6 = vadd.f32 %v10184_v30, %v5488_v45  ;;  %v5749_v39 = vadd.f32 %v10189_v55, %v5493_v41  ;;  %v8927_v45 = vld [vmem:[#allocation6 + $0x1c0] sm:$0xff]  ;;  %v10195_v30 = vld [vmem:[%s16914_s12 + $0x6d8] sm:$0xff] }
 0x6ea   :  { %7071 = vmatpush.bf16.msra.mxu1 %v8927_v45  ;;  %v10201_v55 = vld [vmem:[%s16914_s12 + $0x740] sm:$0xff] }
 0x6eb   :  { %v6559_v38 = vpop.f32.mrf.mxu3  ;;  %v5901_v11 = vpack.c.bf16 %v5757_v42, %v5749_v39  ;;  %v5517_v39 = vmul.f32 %v10201_v55, %v5261_v20  ;;  %v10207_v20 = vld [vmem:[%s16914_s12 + $0x708] sm:$0xff] }
 0x6ec   :  { %v6560_v47 = vadd.f32 %v6559_v38, %v6471_v32  ;;  %v6650_v56 = vpop.f32.mrf.mxu0  ;;  %v8911_v32 = vld [vmem:[#allocation6 + $0x140] sm:$0xff]  ;;  %v5239_v38 = vld [vmem:[#allocation2 + $0x690] sm:$0xff] }
 0x6ed   :  { %6509 = vmatmul.bf16.gmra.mxu2 %v5893_v4  ;;  %v15668_v31 = vpop.f32.mrf.mxu1  ;;  %v5246_v4 = vld [vmem:[#allocation2 + $0x6c8] sm:$0xff]  ;;  %6893 = vmatpush.bf16.msra.mxu3 %v8911_v32 }
 0x6ee   :  { %v15666_v23 = vadd.f32 %v6648_v16, %v6560_v47  ;;  %v6472_v50 = vpop.f32.mrf.mxu2  ;;  %v5896_v16 = vpack.c.bf16 %v5744_v6, %v5736_v17  ;;  %v5502_v44 = vmul.f32 %v10190_v15, %v5246_v4  ;;  %v5503_v47 = vmul.f32 %v10192_v24, %v5247_v33  ;;  %v10198_v17 = vld [vmem:[%s16914_s12 + $0x698] sm:$0xff] }
 0x6ef   :  { %v6473_v62 = vadd.f32 %v15390_v10, %v6472_v50  ;;  %v5504_v6 = vmul.f32 %v10195_v30, %v5248_v60  ;;  %v10197_v50 = vld [vmem:[%s16913_s11 + $0x6d0] sm:$0xff] }
 0x6f0   :  { %v5759_v34 = vadd.f32 %v10197_v50, %v5503_v47  ;;  %v5262_v47 = vld [vmem:[#allocation2 + $0x748] sm:$0xff] }
 0x6f1   :  { %v5042_v50 = vld [vmem:[#allocation2 + $0x68] sm:$0xff] }
 0x6f3   :  { %v6561_v54 = vpop.f32.mrf.mxu3 }
 0x6f4   :  { %6598 = vmatmul.bf16.gmra.mxu3 %v5894_v21  ;;  %v6562_v13 = vadd.f32 %v6561_v54, %v6473_v62  ;;  %v6653_v22 = vpop.f32.mrf.mxu0  ;;  %v5495_v21 = vmul.f32 %v10193_v26, %v5239_v38  ;;  %v5496_v62 = vmul.f32 %v10198_v17, %v5240_v52  ;;  %v5043_v52 = vld [vmem:[#allocation2 + $0x70] sm:$0xff] }
 0x6f5   :  { %v15691_v29 = vpop.f32.mrf.mxu1 }
 0x6f6   :  { %6687 = vmatmul.bf16.gmra.mxu0 %v5895_v59  ;;  %v15689_v51 = vadd.f32 %v6650_v56, %v6562_v13  ;;  %v6475_v49 = vpop.f32.mrf.mxu2  ;;  %v5758_v56 = vadd.f32 %v10194_v19, %v5502_v44  ;;  %v5750_v59 = vadd.f32 %v10196_v43, %v5494_v0  ;;  %v5751_v42 = vadd.f32 %v10199_v35, %v5495_v21  ;;  %v10200_v13 = vld [vmem:[%s16913_s11 + $0x6d8] sm:$0xff]  ;;  %v10204_v0 = vld [vmem:[%s16913_s11 + $0x740] sm:$0xff]  ;;  %v5263_v21 = vld [vmem:[#allocation2 + $0x750] sm:$0xff] }
 0x6f7   :  { %v6476_v58 = vadd.f32 %v15390_v10, %v6475_v49  ;;  %v5760_v33 = vadd.f32 %v10200_v13, %v5504_v6  ;;  %v10203_v44 = vld [vmem:[%s16913_s11 + $0x698] sm:$0xff]  ;;  %v5773_v24 = vadd.f32 %v10204_v0, %v5517_v39  ;;  %v5254_v49 = vld [vmem:[#allocation2 + $0x708] sm:$0xff]  ;;  %v5255_v43 = vld [vmem:[#allocation2 + $0x710] sm:$0xff] }
 0x6f8   :  { %v5902_v54 = vpack.c.bf16 %v5758_v56, %v5750_v59  ;;  %v5903_v1 = vpack.c.bf16 %v5759_v34, %v5751_v42  ;;  %v5752_v45 = vadd.f32 %v10203_v44, %v5496_v62  ;;  %v5044_v19 = vld [vmem:[#allocation2 + $0x78] sm:$0xff]  ;;  %v5041_v56 = vld [vmem:[#allocation2 + $0x60] sm:$0xff]  ;;  %v10206_v6 = vld [vmem:[%s16914_s12 + $0x748] sm:$0xff]  ;;  %v5510_v17 = vmul.f32 %v10207_v20, %v5254_v49 }
 0x6f9   :  { %6776 = vmatmul.bf16.gmra.mxu1 %v5896_v16  ;;  %v5253_v16 = vld [vmem:[#allocation2 + $0x700] sm:$0xff]  ;;  %v5035_v59 = vld [vmem:[#allocation2 + $0x30] sm:$0xff]  ;;  %v5036_v62 = vld [vmem:[#allocation2 + $0x38] sm:$0xff] }
 0x6fa   :  { %v5264_v42 = vld [vmem:[#allocation2 + $0x758] sm:$0xff]  ;;  %v5034_v13 = vld [vmem:[#allocation2 + $0x28] sm:$0xff]  ;;  %v10212_v44 = vld [vmem:[%s16914_s12 + $0x710] sm:$0xff] }
 0x6fb   :  { %v6564_v14 = vpop.f32.mrf.mxu3  ;;  %v10210_v39 = vld [vmem:[%s16914_s12 + $0x78] sm:$0xff] }
 0x6fc   :  { %v6565_v41 = vadd.f32 %v6564_v14, %v6476_v58  ;;  %v6655_v5 = vpop.f32.mrf.mxu0  ;;  %v10205_v58 = vld [vmem:[%s16913_s11 + $0x700] sm:$0xff]  ;;  %v5518_v14 = vmul.f32 %v10206_v6, %v5262_v47 }
 0x6fd   :  { %6514 = vmatmul.bf16.gmra.mxu2 %v5901_v11  ;;  %v15732_v32 = vpop.f32.mrf.mxu1  ;;  %v5904_v11 = vpack.c.bf16 %v5760_v33, %v5752_v45  ;;  %v10209_v33 = vld [vmem:[%s16914_s12 + $0x70] sm:$0xff]  ;;  %v5511_v45 = vmul.f32 %v10212_v44, %v5255_v43 }
 0x6fe   :  { %v15724_v4 = vadd.f32 %v6653_v22, %v6565_v41  ;;  %v6477_v8 = vpop.f32.mrf.mxu2  ;;  %v10202_v22 = vld [vmem:[%s16914_s12 + $0x700] sm:$0xff]  ;;  %v5299_v55 = vmul.f32 %v10209_v33, %v5043_v52 }
 0x6ff   :  { %v5509_v15 = vmul.f32 %v10202_v22, %v5253_v16  ;;  %v6478_v38 = vadd.f32 %v15390_v10, %v6477_v8  ;;  %v5033_v16 = vld [vmem:[#allocation2 + $0x20] sm:$0xff] }
 0x700   :  { %v10211_v8 = vld [vmem:[%s16914_s12 + $0x60] sm:$0xff] }
 0x701   :  { %v5765_v26 = vadd.f32 %v10205_v58, %v5509_v15  ;;  %v5297_v22 = vmul.f32 %v10211_v8, %v5041_v56  ;;  %v10216_v58 = vld [vmem:[%s16914_s12 + $0x38] sm:$0xff]  ;;  %v5269_v8 = vld [vmem:[#allocation2 + $0x780] sm:$0xff] }
 0x703   :  { %v6566_v36 = vpop.f32.mrf.mxu3  ;;  %v5909_v41 = vpack.c.bf16 %v5773_v24, %v5765_v26  ;;  %v10214_v24 = vld [vmem:[%s16913_s11 + $0x748] sm:$0xff]  ;;  %v5292_v26 = vmul.f32 %v10216_v58, %v5036_v62 }
 0x704   :  { %6603 = vmatmul.bf16.gmra.mxu3 %v5902_v54  ;;  %v6567_v60 = vadd.f32 %v6566_v36, %v6478_v38  ;;  %v6658_v34 = vpop.f32.mrf.mxu0  ;;  %v10208_v54 = vld [vmem:[%s16914_s12 + $0x750] sm:$0xff]  ;;  %v5256_v38 = vld [vmem:[#allocation2 + $0x718] sm:$0xff]  ;;  %v5774_v47 = vadd.f32 %v10214_v24, %v5518_v14  ;;  %v10219_v14 = vld [vmem:[%s16914_s12 + $0x28] sm:$0xff] }
 0x705   :  { %v5519_v35 = vmul.f32 %v10208_v54, %v5263_v21  ;;  %v15774_v0 = vpop.f32.mrf.mxu1  ;;  %v10217_v21 = vld [vmem:[%s16914_s12 + $0x20] sm:$0xff]  ;;  %v5290_v43 = vmul.f32 %v10219_v14, %v5034_v13  ;;  %v10222_v54 = vld [vmem:[%s16914_s12 + $0x718] sm:$0xff] }
 0x706   :  { %6692 = vmatmul.bf16.gmra.mxu0 %v5903_v1  ;;  %v15747_v30 = vadd.f32 %v6655_v5, %v6567_v60  ;;  %v6480_v5 = vpop.f32.mrf.mxu2  ;;  %v5300_v1 = vmul.f32 %v10210_v39, %v5044_v19  ;;  %v10215_v60 = vld [vmem:[%s16914_s12 + $0x30] sm:$0xff]  ;;  %v5289_v52 = vmul.f32 %v10217_v21, %v5033_v16  ;;  %v10218_v19 = vld [vmem:[%s16914_s12 + $0x758] sm:$0xff]  ;;  %v5277_v16 = vld [vmem:[#allocation2 + $0x7c0] sm:$0xff] }
 0x707   :  { %v6481_v15 = vadd.f32 %v15390_v10, %v6480_v5  ;;  %v5291_v49 = vmul.f32 %v10215_v60, %v5035_v59  ;;  %v5520_v56 = vmul.f32 %v10218_v19, %v5264_v42  ;;  %v10220_v59 = vld [vmem:[%s16913_s11 + $0x708] sm:$0xff]  ;;  %v5512_v42 = vmul.f32 %v10222_v54, %v5256_v38  ;;  %v10223_v5 = vld [vmem:[%s16913_s11 + $0x70] sm:$0xff]  ;;  %v10229_v60 = vld [vmem:[%s16913_s11 + $0x758] sm:$0xff] }
 0x708   :  { %v15806_v13 = vadd.f32 %v10223_v5, %v5299_v55  ;;  %v10227_v38 = vld [vmem:[%s16913_s11 + $0x710] sm:$0xff]  ;;  %v10233_v19 = vld [vmem:[%s16913_s11 + $0x28] sm:$0xff] }
 0x709   :  { %6781 = vmatmul.bf16.gmra.mxu1 %v5904_v11  ;;  %v10213_v11 = vld [vmem:[%s16914_s12 + $0x68] sm:$0xff] }
 0x70a   :  { %v5298_v36 = vmul.f32 %v10213_v11, %v5042_v50  ;;  %v5766_v50 = vadd.f32 %v10220_v59, %v5510_v17  ;;  %v10224_v17 = vld [vmem:[%s16913_s11 + $0x78] sm:$0xff] }
 0x70b   :  { %v6569_v6 = vpop.f32.mrf.mxu3  ;;  %v15811_v33 = vadd.f32 %v10224_v17, %v5300_v1  ;;  %v5767_v1 = vadd.f32 %v10227_v38, %v5511_v45  ;;  %v5270_v38 = vld [vmem:[#allocation2 + $0x788] sm:$0xff] }
 0x70c   :  { %v6570_v62 = vadd.f32 %v6569_v6, %v6481_v15  ;;  %v10226_v15 = vld [vmem:[%s16913_s11 + $0x68] sm:$0xff]  ;;  %v5910_v55 = vpack.c.bf16 %v5774_v47, %v5766_v50  ;;  %v10230_v47 = vld [vmem:[%s16914_s12 + $0x7c0] sm:$0xff]  ;;  %v10235_v50 = vld [vmem:[%s16913_s11 + $0x718] sm:$0xff] }
 0x70d   :  { %6519 = vmatmul.bf16.gmra.mxu2 %v5909_v41  ;;  %v10221_v41 = vld [vmem:[%s16913_s11 + $0x750] sm:$0xff]  ;;  %v15821_v44 = vadd.f32 %v10226_v15, %v5298_v36  ;;  %v5776_v36 = vadd.f32 %v10229_v60, %v5520_v56  ;;  %v5533_v58 = vmul.f32 %v10230_v47, %v5277_v16  ;;  %v15852_v56 = vadd.f32 %v10233_v19, %v5290_v43  ;;  %v15872_v15 = vpop.f32.mrf.mxu1  ;;  %v10239_v19 = vld [vmem:[%s16914_s12 + $0x788] sm:$0xff] }
 0x70e   :  { %v5775_v20 = vadd.f32 %v10221_v41, %v5519_v35  ;;  %v10225_v35 = vld [vmem:[%s16913_s11 + $0x60] sm:$0xff]  ;;  %v15826_v11 = vadd.f32 %v6658_v34, %v6570_v62  ;;  %v10231_v34 = vld [vmem:[%s16913_s11 + $0x38] sm:$0xff]  ;;  %v6482_v14 = vpop.f32.mrf.mxu2  ;;  %v6660_v41 = vpop.f32.mrf.mxu0  ;;  %v5279_v60 = vld [vmem:[#allocation2 + $0x7d0] sm:$0xff] }
 0x70f   :  { %v15816_v39 = vadd.f32 %v10225_v35, %v5297_v22  ;;  %v10228_v22 = vld [vmem:[%s16913_s11 + $0x30] sm:$0xff]  ;;  %v15842_v45 = vadd.f32 %v10231_v34, %v5292_v26  ;;  %v10234_v26 = vld [vmem:[%s16914_s12 + $0x780] sm:$0xff]  ;;  %v6483_v62 = vadd.f32 %v15390_v10, %v6482_v14 }
 0x710   :  { %v15831_v24 = vadd.f32 %v10228_v22, %v5291_v49  ;;  %v10232_v49 = vld [vmem:[%s16913_s11 + $0x20] sm:$0xff]  ;;  %v5911_v6 = vpack.c.bf16 %v5775_v20, %v5767_v1  ;;  %v5525_v59 = vmul.f32 %v10234_v26, %v5269_v8  ;;  %v5802_v20 = vpack.c.bf16 %v15821_v44, %v15852_v56  ;;  %v5278_v8 = vld [vmem:[#allocation2 + $0x7c8] sm:$0xff]  ;;  %v10240_v14 = vld [vmem:[%s16914_s12 + $0x7d0] sm:$0xff] }
 0x711   :  { %v15847_v21 = vadd.f32 %v10232_v49, %v5289_v52  ;;  %v5768_v52 = vadd.f32 %v10235_v50, %v5512_v42  ;;  %v5804_v54 = vpack.c.bf16 %v15811_v33, %v15842_v45  ;;  %v10236_v42 = vld [vmem:[%s16913_s11 + $0x7c0] sm:$0xff]  ;;  %v5535_v26 = vmul.f32 %v10240_v14, %v5279_v60  ;;  %v5058_v56 = vld [vmem:[#allocation2 + $0xe8] sm:$0xff] }
 0x712   :  { %v5803_v16 = vpack.c.bf16 %v15806_v13, %v15831_v24  ;;  %v5789_v35 = vadd.f32 %v10236_v42, %v5533_v58  ;;  %v10237_v1 = vld [vmem:[%s16913_s11 + $0x780] sm:$0xff]  ;;  %v5271_v58 = vld [vmem:[#allocation2 + $0x790] sm:$0xff]  ;;  %v10255_v33 = vld [vmem:[%s16914_s12 + $0xa8] sm:$0xff] }
 0x713   :  { %v5801_v43 = vpack.c.bf16 %v15816_v39, %v15847_v21  ;;  %v5912_v5 = vpack.c.bf16 %v5776_v36, %v5768_v52  ;;  %v6571_v17 = vpop.f32.mrf.mxu3  ;;  %v5781_v22 = vadd.f32 %v10237_v1, %v5525_v59  ;;  %v10238_v36 = vld [vmem:[%s16914_s12 + $0x7c8] sm:$0xff]  ;;  %v5280_v59 = vld [vmem:[#allocation2 + $0x7d8] sm:$0xff]  ;;  %v10251_v39 = vld [vmem:[%s16914_s12 + $0xa0] sm:$0xff] }
 0x714   :  { %6608 = vmatmul.bf16.gmra.mxu3 %v5910_v55  ;;  %v6572_v55 = vadd.f32 %v6571_v17, %v6483_v62  ;;  %v5534_v34 = vmul.f32 %v10238_v36, %v5278_v8  ;;  %v10242_v17 = vld [vmem:[%s16913_s11 + $0x7c8] sm:$0xff]  ;;  %v10243_v8 = vld [vmem:[%s16914_s12 + $0x7d8] sm:$0xff]  ;;  %v5059_v24 = vld [vmem:[#allocation2 + $0xf0] sm:$0xff] }
 0x715   :  { %v5917_v49 = vpack.c.bf16 %v5789_v35, %v5781_v22  ;;  %v10245_v22 = vld [vmem:[%s16913_s11 + $0x7d0] sm:$0xff] }
 0x716   :  { %6697 = vmatmul.bf16.gmra.mxu0 %v5911_v6  ;;  %v15877_v47 = vadd.f32 %v6660_v41, %v6572_v55  ;;  %v5526_v6 = vmul.f32 %v10239_v19, %v5270_v38  ;;  %v6485_v50 = vpop.f32.mrf.mxu2  ;;  %v10241_v41 = vld [vmem:[%s16914_s12 + $0x790] sm:$0xff]  ;;  %v5790_v42 = vadd.f32 %v10242_v17, %v5534_v34  ;;  %v5536_v55 = vmul.f32 %v10243_v8, %v5280_v59  ;;  %v10244_v38 = vld [vmem:[%s16913_s11 + $0x788] sm:$0xff]  ;;  %v10246_v34 = vld [vmem:[%s16914_s12 + $0x798] sm:$0xff] }
 0x717   :  { %v6486_v52 = vadd.f32 %v15390_v10, %v6485_v50  ;;  %v5527_v62 = vmul.f32 %v10241_v41, %v5271_v58  ;;  %v5791_v60 = vadd.f32 %v10245_v22, %v5535_v26  ;;  %v10247_v59 = vld [vmem:[%s16913_s11 + $0x790] sm:$0xff]  ;;  %v10248_v50 = vld [vmem:[%s16913_s11 + $0x7d8] sm:$0xff] }
 0x718   :  { %v5782_v1 = vadd.f32 %v10244_v38, %v5526_v6  ;;  %v5792_v26 = vadd.f32 %v10248_v50, %v5536_v55  ;;  %v10252_v50 = vld [vmem:[%s16913_s11 + $0xe0] sm:$0xff] }
 0x719   :  { %6786 = vmatmul.bf16.gmra.mxu1 %v5912_v5  ;;  %v5272_v5 = vld [vmem:[#allocation2 + $0x798] sm:$0xff]  ;;  %v5783_v6 = vadd.f32 %v10247_v59, %v5527_v62 }
 0x71a   :  { %v5528_v58 = vmul.f32 %v10246_v34, %v5272_v5  ;;  %v5918_v14 = vpack.c.bf16 %v5790_v42, %v5782_v1  ;;  %v5049_v34 = vld [vmem:[#allocation2 + $0xa0] sm:$0xff] }
 0x71b   :  { %v5919_v17 = vpack.c.bf16 %v5791_v60, %v5783_v6  ;;  %v5057_v60 = vld [vmem:[#allocation2 + $0xe0] sm:$0xff]  ;;  %v5305_v21 = vmul.f32 %v10251_v39, %v5049_v34 }
 0x71d   :  { %6524 = vmatmul.bf16.gmra.mxu2 %v5917_v49  ;;  %v6663_v35 = vpop.f32.mrf.mxu0 }
 0x71e   :  { %v6487_v8 = vpop.f32.mrf.mxu2 }
 0x71f   :  { %v6488_v42 = vadd.f32 %v15390_v10, %v6487_v8  ;;  %v10253_v8 = vld [vmem:[%s16913_s11 + $0xa0] sm:$0xff] }
 0x720   :  { %v6574_v36 = vpop.f32.mrf.mxu3  ;;  %v15907_v19 = vpop.f32.mrf.mxu1  ;;  %v5561_v13 = vadd.f32 %v10253_v8, %v5305_v21  ;;  %v10259_v21 = vld [vmem:[%s16914_s12 + $0xf8] sm:$0xff]  ;;  %v5073_v8 = vld [vmem:[#allocation2 + $0x160] sm:$0xff] }
 0x721   :  { %v6575_v49 = vadd.f32 %v6574_v36, %v6486_v52  ;;  %v10249_v52 = vld [vmem:[%s16913_s11 + $0x798] sm:$0xff] }
 0x722   :  { %v5784_v5 = vadd.f32 %v10249_v52, %v5528_v58  ;;  %v10254_v52 = vld [vmem:[%s16914_s12 + $0xe8] sm:$0xff] }
 0x723   :  { %v15915_v41 = vadd.f32 %v6663_v35, %v6575_v49  ;;  %v10250_v49 = vld [vmem:[%s16914_s12 + $0xe0] sm:$0xff] }
 0x724   :  { %6613 = vmatmul.bf16.gmra.mxu3 %v5918_v14  ;;  %v5920_v38 = vpack.c.bf16 %v5792_v26, %v5784_v5  ;;  %v5313_v14 = vmul.f32 %v10250_v49, %v5057_v60  ;;  %v5314_v5 = vmul.f32 %v10254_v52, %v5058_v56  ;;  %v10257_v60 = vld [vmem:[%s16914_s12 + $0xb0] sm:$0xff]  ;;  %v5065_v52 = vld [vmem:[#allocation2 + $0x120] sm:$0xff] }
 0x725   :  { %v6665_v1 = vpop.f32.mrf.mxu0 }
 0x726   :  { %6702 = vmatmul.bf16.gmra.mxu0 %v5919_v17  ;;  %v5569_v44 = vadd.f32 %v10252_v50, %v5313_v14  ;;  %v5050_v17 = vld [vmem:[#allocation2 + $0xa8] sm:$0xff] }
 0x727   :  { %v5306_v45 = vmul.f32 %v10255_v33, %v5050_v17  ;;  %v10258_v14 = vld [vmem:[%s16913_s11 + $0xe8] sm:$0xff] }
 0x728   :  { %v6576_v62 = vpop.f32.mrf.mxu3  ;;  %v15923_v35 = vpop.f32.mrf.mxu1 }
 0x729   :  { %6791 = vmatmul.bf16.gmra.mxu1 %v5920_v38  ;;  %v6577_v22 = vadd.f32 %v6576_v62, %v6488_v42  ;;  %v5051_v42 = vld [vmem:[#allocation2 + $0xb0] sm:$0xff]  ;;  %v5809_v62 = vpack.c.bf16 %v5569_v44, %v5561_v13  ;;  %v10260_v44 = vld [vmem:[%s16913_s11 + $0xa8] sm:$0xff]  ;;  %v10262_v13 = vld [vmem:[%s16914_s12 + $0xb8] sm:$0xff] }
 0x72a   :  { %v5307_v34 = vmul.f32 %v10257_v60, %v5051_v42  ;;  %v5562_v56 = vadd.f32 %v10260_v44, %v5306_v45  ;;  %v5074_v44 = vld [vmem:[#allocation2 + $0x168] sm:$0xff] }
 0x72b   :  { %v15921_v36 = vadd.f32 %v6665_v1, %v6577_v22  ;;  %v10256_v1 = vld [vmem:[%s16914_s12 + $0xf0] sm:$0xff] }
 0x72c   :  { %v5315_v22 = vmul.f32 %v10256_v1, %v5059_v24 }
 0x72d   :  { %6805 = vmatmul.bf16.vlgmr.msra.gmra.mxu2 %v5801_v43 }
 0x730   :  { %v6490_v55 = vpop.f32.mrf.mxu2 }
 0x731   :  { %v6491_v59 = vadd.f32 %v15390_v10, %v6490_v55  ;;  %v5060_v55 = vld [vmem:[#allocation2 + $0xf8] sm:$0xff] }
 0x733   :  { %v6668_v58 = vpop.f32.mrf.mxu0 }
 0x734   :  { %6894 = vmatmul.bf16.vlgmr.msra.gmra.mxu3 %v5802_v20 }
 0x736   :  { %v15938_v43 = vpop.f32.mrf.mxu1  ;;  %6983 = vmatmul.bf16.vlgmr.msra.gmra.mxu0 %v5803_v16 }
 0x737   :  { %v6579_v6 = vpop.f32.mrf.mxu3 }
 0x738   :  { %v6580_v20 = vadd.f32 %v6579_v6, %v6491_v59  ;;  %v6492_v26 = vpop.f32.mrf.mxu2  ;;  %v5570_v59 = vadd.f32 %v10258_v14, %v5314_v5  ;;  %v5316_v6 = vmul.f32 %v10259_v21, %v5060_v55  ;;  %v10267_v14 = vld [vmem:[%s16913_s11 + $0xb8] sm:$0xff] }
 0x739   :  { %7072 = vmatmul.bf16.vlgmr.msra.gmra.mxu1 %v5804_v54  ;;  %v6493_v54 = vadd.f32 %v15390_v10, %v6492_v26 }
 0x73a   :  { %v15952_v16 = vadd.f32 %v6668_v58, %v6580_v20  ;;  %v5052_v58 = vld [vmem:[#allocation2 + $0xb8] sm:$0xff]  ;;  %v10261_v20 = vld [vmem:[%s16913_s11 + $0xf0] sm:$0xff]  ;;  %v5810_v42 = vpack.c.bf16 %v5570_v59, %v5562_v56 }
 0x73b   :  { %v6670_v38 = vpop.f32.mrf.mxu0  ;;  %v5571_v26 = vadd.f32 %v10261_v20, %v5315_v22  ;;  %v5308_v24 = vmul.f32 %v10262_v13, %v5052_v58  ;;  %v10265_v22 = vld [vmem:[%s16914_s12 + $0x160] sm:$0xff]  ;;  %v5075_v13 = vld [vmem:[#allocation2 + $0x170] sm:$0xff] }
 0x73c   :  { %v5329_v55 = vmul.f32 %v10265_v22, %v5073_v8  ;;  %v10266_v58 = vld [vmem:[%s16914_s12 + $0x120] sm:$0xff] }
 0x73d   :  { %6810 = vmatmul.bf16.gmra.mxu2 %v5809_v62  ;;  %v10263_v62 = vld [vmem:[%s16913_s11 + $0xb0] sm:$0xff]  ;;  %v5564_v59 = vadd.f32 %v10267_v14, %v5308_v24 }
 0x73e   :  { %v15967_v49 = vpop.f32.mrf.mxu1  ;;  %v5563_v33 = vadd.f32 %v10263_v62, %v5307_v34  ;;  %v5321_v34 = vmul.f32 %v10266_v58, %v5065_v52  ;;  %v10270_v52 = vld [vmem:[%s16914_s12 + $0x168] sm:$0xff]  ;;  %v5067_v62 = vld [vmem:[#allocation2 + $0x130] sm:$0xff]  ;;  %v5076_v58 = vld [vmem:[#allocation2 + $0x178] sm:$0xff] }
 0x73f   :  { %v6581_v39 = vpop.f32.mrf.mxu3 }
 0x740   :  { %v6582_v50 = vadd.f32 %v6581_v39, %v6493_v54  ;;  %v6495_v17 = vpop.f32.mrf.mxu2  ;;  %v10264_v54 = vld [vmem:[%s16913_s11 + $0xf8] sm:$0xff] }
 0x741   :  { %v5572_v1 = vadd.f32 %v10264_v54, %v5316_v6  ;;  %v6496_v60 = vadd.f32 %v15390_v10, %v6495_v17  ;;  %v10269_v17 = vld [vmem:[%s16913_s11 + $0x120] sm:$0xff] }
 0x742   :  { %v15984_v5 = vadd.f32 %v6670_v38, %v6582_v50  ;;  %v5811_v38 = vpack.c.bf16 %v5571_v26, %v5563_v33  ;;  %v10268_v50 = vld [vmem:[%s16913_s11 + $0x160] sm:$0xff]  ;;  %v5066_v26 = vld [vmem:[#allocation2 + $0x128] sm:$0xff]  ;;  %v5577_v8 = vadd.f32 %v10269_v17, %v5321_v34  ;;  %v10274_v34 = vld [vmem:[%s16914_s12 + $0x130] sm:$0xff] }
 0x743   :  { %v6673_v45 = vpop.f32.mrf.mxu0  ;;  %v5812_v21 = vpack.c.bf16 %v5572_v1, %v5564_v59  ;;  %v5585_v10 = vadd.f32 %v10268_v50, %v5329_v55  ;;  %v10271_v1 = vld [vmem:[%s16914_s12 + $0x128] sm:$0xff]  ;;  %v16021_v55 = vld [vmem:[%s16911_s9] ss:$0 sm:$0xff]  ;;  %v5323_v14 = vmul.f32 %v10274_v34, %v5067_v62  ;;  %v5068_v59 = vld [vmem:[#allocation2 + $0x138] sm:$0xff] }
 0x744   :  { %6899 = vmatmul.bf16.gmra.mxu3 %v5810_v42  ;;  %v5330_v42 = vmul.f32 %v10270_v52, %v5074_v44  ;;  %v5322_v22 = vmul.f32 %v10271_v1, %v5066_v26  ;;  %v10276_v44 = vld [vmem:[%s16914_s12 + $0x178] sm:$0xff]  ;;  %v10277_v26 = vld [vmem:[%s16913_s11 + $0x128] sm:$0xff]  ;;  %v5089_v62 = vld [vmem:[#allocation2 + $0x1e0] sm:$0xff] }
 0x745   :  { %v5817_v54 = vpack.c.bf16 %v5585_v10, %v5577_v8  ;;  %v10278_v8 = vld [vmem:[%s16913_s11 + $0x170] sm:$0xff]  ;;  %v5081_v1 = vld [vmem:[#allocation2 + $0x1a0] sm:$0xff] }
 0x746   :  { %v16002_v39 = vpop.f32.mrf.mxu1  ;;  %6988 = vmatmul.bf16.gmra.mxu0 %v5811_v38  ;;  %v10273_v38 = vld [vmem:[%s16914_s12 + $0x170] sm:$0xff]  ;;  %v5578_v17 = vadd.f32 %v10277_v26, %v5322_v22 }
 0x747   :  { %v6584_v6 = vpop.f32.mrf.mxu3  ;;  %v10280_v22 = vld [vmem:[%s16913_s11 + $0x130] sm:$0xff] }
 0x748   :  { %v6585_v56 = vadd.f32 %v6584_v6, %v6496_v60  ;;  %v6497_v20 = vpop.f32.mrf.mxu2  ;;  %v5331_v60 = vmul.f32 %v10273_v38, %v5075_v13  ;;  %v10275_v6 = vld [vmem:[%s16913_s11 + $0x168] sm:$0xff] }
 0x749   :  { %7077 = vmatmul.bf16.gmra.mxu1 %v5812_v21  ;;  %v5586_v50 = vadd.f32 %v10275_v6, %v5330_v42  ;;  %v10279_v42 = vld [vmem:[%s16914_s12 + $0x138] sm:$0xff] }
 0x74a   :  { %v16010_v24 = vadd.f32 %v6673_v45, %v6585_v56  ;;  %v6498_v45 = vadd.f32 %v16021_v55, %v6497_v20  ;;  %v5332_v56 = vmul.f32 %v10276_v44, %v5076_v58  ;;  %v5587_v13 = vadd.f32 %v10278_v8, %v5331_v60  ;;  %v10281_v60 = vld [vmem:[%s16913_s11 + $0x178] sm:$0xff]  ;;  %v10283_v44 = vld [vmem:[%s16914_s12 + $0x1a0] sm:$0xff] }
 0x74b   :  { %v6675_v33 = vpop.f32.mrf.mxu0  ;;  %v5579_v58 = vadd.f32 %v10280_v22, %v5323_v14  ;;  %v5337_v14 = vmul.f32 %v10283_v44, %v5081_v1  ;;  %v5082_v22 = vld [vmem:[#allocation2 + $0x1a8] sm:$0xff]  ;;  %v10286_v1 = vld [vmem:[%s16913_s11 + $0x1a0] sm:$0xff] }
 0x74c   :  { %v5588_v6 = vadd.f32 %v10281_v60, %v5332_v56 }
 0x74d   :  { %6815 = vmatmul.bf16.gmra.mxu2 %v5817_v54  ;;  %v5324_v54 = vmul.f32 %v10279_v42, %v5068_v59 }
 0x74e   :  { %v16030_v21 = vpop.f32.mrf.mxu1 }
 0x74f   :  { %v6586_v10 = vpop.f32.mrf.mxu3 }
 0x750   :  { %v6587_v20 = vadd.f32 %v6586_v10, %v6498_v45  ;;  %v6500_v52 = vpop.f32.mrf.mxu2  ;;  %v5818_v45 = vpack.c.bf16 %v5586_v50, %v5578_v17  ;;  %v10282_v10 = vld [vmem:[%s16914_s12 + $0x1e0] sm:$0xff] }
 0x751   :  { %v5345_v59 = vmul.f32 %v10282_v10, %v5089_v62  ;;  %v6501_v50 = vadd.f32 %v16021_v55, %v6500_v52  ;;  %v5090_v62 = vld [vmem:[#allocation2 + $0x1e8] sm:$0xff] }
 0x752   :  { %v16047_v38 = vadd.f32 %v6675_v33, %v6587_v20  ;;  %v5819_v33 = vpack.c.bf16 %v5587_v13, %v5579_v58  ;;  %v10284_v20 = vld [vmem:[%s16913_s11 + $0x138] sm:$0xff]  ;;  %v10285_v13 = vld [vmem:[%s16913_s11 + $0x1e0] sm:$0xff]  ;;  %v5091_v58 = vld [vmem:[#allocation2 + $0x1f0] sm:$0xff] }
 0x753   :  { %v6678_v34 = vpop.f32.mrf.mxu0  ;;  %v5580_v26 = vadd.f32 %v10284_v20, %v5324_v54  ;;  %v5601_v52 = vadd.f32 %v10285_v13, %v5345_v59  ;;  %v5593_v54 = vadd.f32 %v10286_v1, %v5337_v14  ;;  %v10292_v1 = vld [vmem:[%s16914_s12 + $0x1f8] sm:$0xff] }
 0x754   :  { %6904 = vmatmul.bf16.gmra.mxu3 %v5818_v45 }
 0x755   :  { %v5820_v17 = vpack.c.bf16 %v5588_v6, %v5580_v26  ;;  %v10287_v6 = vld [vmem:[%s16914_s12 + $0x1e8] sm:$0xff]  ;;  %v5825_v44 = vpack.c.bf16 %v5601_v52, %v5593_v54  ;;  %v5084_v52 = vld [vmem:[#allocation2 + $0x1b8] sm:$0xff] }
 0x756   :  { %v16065_v56 = vpop.f32.mrf.mxu1  ;;  %6993 = vmatmul.bf16.gmra.mxu0 %v5819_v33  ;;  %v5346_v10 = vmul.f32 %v10287_v6, %v5090_v62  ;;  %v5083_v33 = vld [vmem:[#allocation2 + $0x1b0] sm:$0xff]  ;;  %v10293_v6 = vld [vmem:[%s16913_s11 + $0x1a8] sm:$0xff] }
 0x757   :  { %v6589_v8 = vpop.f32.mrf.mxu3 }
 0x758   :  { %v6590_v42 = vadd.f32 %v6589_v8, %v6501_v50  ;;  %v6502_v45 = vpop.f32.mrf.mxu2  ;;  %v10288_v50 = vld [vmem:[%s16914_s12 + $0x1a8] sm:$0xff]  ;;  %v10290_v8 = vld [vmem:[%s16914_s12 + $0x1b0] sm:$0xff] }
 0x759   :  { %7082 = vmatmul.bf16.gmra.mxu1 %v5820_v17  ;;  %v5338_v20 = vmul.f32 %v10288_v50, %v5082_v22  ;;  %v6503_v26 = vadd.f32 %v16021_v55, %v6502_v45  ;;  %v5092_v17 = vld [vmem:[#allocation2 + $0x1f8] sm:$0xff]  ;;  %v5339_v13 = vmul.f32 %v10290_v8, %v5083_v33  ;;  %v5105_v8 = vld [vmem:[#allocation2 + $0x260] sm:$0xff] }
 0x75a   :  { %v16073_v60 = vadd.f32 %v6678_v34, %v6590_v42  ;;  %v10289_v34 = vld [vmem:[%s16914_s12 + $0x1f0] sm:$0xff]  ;;  %v10291_v42 = vld [vmem:[%s16913_s11 + $0x1e8] sm:$0xff]  ;;  %v5348_v54 = vmul.f32 %v10292_v1, %v5092_v17 }
 0x75b   :  { %v6680_v59 = vpop.f32.mrf.mxu0  ;;  %v5347_v14 = vmul.f32 %v10289_v34, %v5091_v58  ;;  %v5602_v45 = vadd.f32 %v10291_v42, %v5346_v10  ;;  %v5594_v33 = vadd.f32 %v10293_v6, %v5338_v20  ;;  %v10295_v10 = vld [vmem:[%s16914_s12 + $0x1b8] sm:$0xff]  ;;  %v10296_v20 = vld [vmem:[%s16913_s11 + $0x1b0] sm:$0xff] }
 0x75c   :  { %v5340_v42 = vmul.f32 %v10295_v10, %v5084_v52 }
 0x75d   :  { %6820 = vmatmul.bf16.gmra.mxu2 %v5825_v44  ;;  %v10294_v44 = vld [vmem:[%s16913_s11 + $0x1f0] sm:$0xff] }
 0x75e   :  { %v16088_v62 = vpop.f32.mrf.mxu1  ;;  %v5603_v50 = vadd.f32 %v10294_v44, %v5347_v14  ;;  %v10297_v14 = vld [vmem:[%s16913_s11 + $0x1f8] sm:$0xff]  ;;  %v10298_v44 = vld [vmem:[%s16914_s12 + $0x260] sm:$0xff] }
 0x75f   :  { %16915 = vst [vmem:[#allocation9_spill] sm:$0xff] %v16088_v62  ;;  %v6591_v22 = vpop.f32.mrf.mxu3  ;;  %v5097_v62 = vld [vmem:[#allocation2 + $0x220] sm:$0xff]  ;;  %v5604_v6 = vadd.f32 %v10297_v14, %v5348_v54  ;;  %v5361_v52 = vmul.f32 %v10298_v44, %v5105_v8  ;;  %v5106_v8 = vld [vmem:[#allocation2 + $0x268] sm:$0xff] }
 0x760   :  { %v6592_v58 = vadd.f32 %v6591_v22, %v6503_v26  ;;  %v6505_v34 = vpop.f32.mrf.mxu2  ;;  %v5826_v26 = vpack.c.bf16 %v5602_v45, %v5594_v33  ;;  %v5595_v22 = vadd.f32 %v10296_v20, %v5339_v13  ;;  %v10300_v33 = vld [vmem:[%s16913_s11 + $0x1b8] sm:$0xff]  ;;  %v5098_v44 = vld [vmem:[#allocation2 + $0x228] sm:$0xff] }
 0x761   :  { %v6506_v45 = vadd.f32 %v16021_v55, %v6505_v34  ;;  %v5596_v10 = vadd.f32 %v10300_v33, %v5340_v42 }
 0x762   :  { %v16105_v17 = vadd.f32 %v6680_v59, %v6592_v58  ;;  %v5827_v59 = vpack.c.bf16 %v5603_v50, %v5595_v22  ;;  %v10299_v58 = vld [vmem:[%s16914_s12 + $0x220] sm:$0xff] }
 0x763   :  { %v6683_v1 = vpop.f32.mrf.mxu0  ;;  %v5353_v13 = vmul.f32 %v10299_v58, %v5097_v62  ;;  %v5828_v20 = vpack.c.bf16 %v5604_v6, %v5596_v10  ;;  %v10301_v50 = vld [vmem:[%s16913_s11 + $0x260] sm:$0xff]  ;;  %v5107_v58 = vld [vmem:[#allocation2 + $0x270] sm:$0xff]  ;;  %v10303_v6 = vld [vmem:[%s16914_s12 + $0x268] sm:$0xff] }
 0x764   :  { %16916 = vst [vmem:[#allocation10_spill] sm:$0xff] %v16105_v17  ;;  %6909 = vmatmul.bf16.gmra.mxu3 %v5826_v26  ;;  %v5617_v34 = vadd.f32 %v10301_v50, %v5361_v52  ;;  %v10302_v62 = vld [vmem:[%s16913_s11 + $0x220] sm:$0xff]  ;;  %v5099_v10 = vld [vmem:[#allocation2 + $0x230] sm:$0xff] }
 0x765   :  { %v5609_v42 = vadd.f32 %v10302_v62, %v5353_v13  ;;  %v5113_v17 = vld [vmem:[#allocation2 + $0x2a0] sm:$0xff] }
 0x766   :  { %v16123_v54 = vpop.f32.mrf.mxu1  ;;  %6998 = vmatmul.bf16.gmra.mxu0 %v5827_v59  ;;  %v5362_v59 = vmul.f32 %v10303_v6, %v5106_v8  ;;  %v10306_v8 = vld [vmem:[%s16914_s12 + $0x230] sm:$0xff] }
 0x767   :  { %16917 = vst [vmem:[#allocation11_spill] sm:$0xff] %v16123_v54  ;;  %v6594_v14 = vpop.f32.mrf.mxu3  ;;  %v5833_v50 = vpack.c.bf16 %v5617_v34, %v5609_v42  ;;  %v5355_v62 = vmul.f32 %v10306_v8, %v5099_v10  ;;  %v5100_v34 = vld [vmem:[#allocation2 + $0x238] sm:$0xff]  ;;  %v10310_v8 = vld [vmem:[%s16913_s11 + $0x270] sm:$0xff] }
 0x768   :  { %v6595_v26 = vadd.f32 %v6594_v14, %v6506_v45  ;;  %v6507_v22 = vpop.f32.mrf.mxu2  ;;  %v10304_v45 = vld [vmem:[%s16914_s12 + $0x228] sm:$0xff] }
 0x769   :  { %7087 = vmatmul.bf16.gmra.mxu1 %v5828_v20  ;;  %v5354_v20 = vmul.f32 %v10304_v45, %v5098_v44  ;;  %v6508_v14 = vadd.f32 %v16021_v55, %v6507_v22  ;;  %v10307_v44 = vld [vmem:[%s16913_s11 + $0x268] sm:$0xff] }
 0x76a   :  { %v16131_v33 = vadd.f32 %v6683_v1, %v6595_v26  ;;  %v10305_v1 = vld [vmem:[%s16914_s12 + $0x270] sm:$0xff]  ;;  %v5108_v26 = vld [vmem:[#allocation2 + $0x278] sm:$0xff]  ;;  %v5618_v22 = vadd.f32 %v10307_v44, %v5362_v59 }
 0x76b   :  { %v6685_v52 = vpop.f32.mrf.mxu0  ;;  %v5363_v13 = vmul.f32 %v10305_v1, %v5107_v58  ;;  %v10308_v58 = vld [vmem:[%s16914_s12 + $0x278] sm:$0xff]  ;;  %v10309_v1 = vld [vmem:[%s16913_s11 + $0x228] sm:$0xff] }
 0x76c   :  { %16918 = vst [vmem:[#allocation12_spill] sm:$0xff] %v16131_v33  ;;  %v5364_v45 = vmul.f32 %v10308_v58, %v5108_v26  ;;  %v5610_v10 = vadd.f32 %v10309_v1, %v5354_v20  ;;  %v5121_v33 = vld [vmem:[#allocation2 + $0x2e0] sm:$0xff]  ;;  %v10311_v59 = vld [vmem:[%s16914_s12 + $0x238] sm:$0xff]  ;;  %v10312_v20 = vld [vmem:[%s16913_s11 + $0x230] sm:$0xff] }
 0x76d   :  { %6825 = vmatmul.bf16.gmra.mxu2 %v5833_v50  ;;  %v5356_v44 = vmul.f32 %v10311_v59, %v5100_v34 }
 0x76e   :  { %v16146_v42 = vpop.f32.mrf.mxu1 }
 0x76f   :  { %16919 = vst [vmem:[#allocation13_spill] sm:$0xff] %v16146_v42  ;;  %v6596_v6 = vpop.f32.mrf.mxu3  ;;  %v5619_v42 = vadd.f32 %v10310_v8, %v5363_v13  ;;  %v10313_v13 = vld [vmem:[%s16913_s11 + $0x278] sm:$0xff]  ;;  %v10314_v8 = vld [vmem:[%s16914_s12 + $0x2e0] sm:$0xff] }
 0x770   :  { %v6597_v50 = vadd.f32 %v6596_v6, %v6508_v14  ;;  %v6510_v54 = vpop.f32.mrf.mxu2  ;;  %v5834_v14 = vpack.c.bf16 %v5618_v22, %v5610_v10  ;;  %v5611_v6 = vadd.f32 %v10312_v20, %v5355_v62  ;;  %v5620_v1 = vadd.f32 %v10313_v13, %v5364_v45  ;;  %v10316_v10 = vld [vmem:[%s16913_s11 + $0x238] sm:$0xff] }
 0x771   :  { %v5377_v34 = vmul.f32 %v10314_v8, %v5121_v33  ;;  %v6511_v22 = vadd.f32 %v16021_v55, %v6510_v54  ;;  %v5612_v59 = vadd.f32 %v10316_v10, %v5356_v44  ;;  %v10317_v33 = vld [vmem:[%s16913_s11 + $0x2e0] sm:$0xff]  ;;  %v5114_v8 = vld [vmem:[#allocation2 + $0x2a8] sm:$0xff] }
 0x772   :  { %v16163_v26 = vadd.f32 %v6685_v52, %v6597_v50  ;;  %v5835_v52 = vpack.c.bf16 %v5619_v42, %v5611_v6  ;;  %v10315_v50 = vld [vmem:[%s16914_s12 + $0x2a0] sm:$0xff]  ;;  %v5122_v42 = vld [vmem:[#allocation2 + $0x2e8] sm:$0xff] }
 0x773   :  { %v6688_v58 = vpop.f32.mrf.mxu0  ;;  %v5369_v62 = vmul.f32 %v10315_v50, %v5113_v17  ;;  %v5836_v20 = vpack.c.bf16 %v5620_v1, %v5612_v59  ;;  %v5633_v54 = vadd.f32 %v10317_v33, %v5377_v34  ;;  %v10318_v17 = vld [vmem:[%s16913_s11 + $0x2a0] sm:$0xff]  ;;  %v5123_v50 = vld [vmem:[#allocation2 + $0x2f0] sm:$0xff]  ;;  %v10319_v1 = vld [vmem:[%s16914_s12 + $0x2e8] sm:$0xff] }
 0x774   :  { %16920 = vst [vmem:[#allocation14_spill] sm:$0xff] %v16163_v26  ;;  %6914 = vmatmul.bf16.gmra.mxu3 %v5834_v14  ;;  %v5115_v59 = vld [vmem:[#allocation2 + $0x2b0] sm:$0xff]  ;;  %v5129_v26 = vld [vmem:[#allocation2 + $0x320] sm:$0xff] }
 0x775   :  { %v5625_v44 = vadd.f32 %v10318_v17, %v5369_v62 }
 0x776   :  { %v16181_v45 = vpop.f32.mrf.mxu1  ;;  %7003 = vmatmul.bf16.gmra.mxu0 %v5835_v52  ;;  %v5378_v52 = vmul.f32 %v10319_v1, %v5122_v42  ;;  %v10322_v42 = vld [vmem:[%s16914_s12 + $0x2b0] sm:$0xff] }
 0x777   :  { %16921 = vst [vmem:[#allocation15_spill] sm:$0xff] %v16181_v45  ;;  %v6599_v13 = vpop.f32.mrf.mxu3  ;;  %v5841_v33 = vpack.c.bf16 %v5633_v54, %v5625_v44  ;;  %v5371_v17 = vmul.f32 %v10322_v42, %v5115_v59  ;;  %v5116_v54 = vld [vmem:[#allocation2 + $0x2b8] sm:$0xff]  ;;  %v10326_v42 = vld [vmem:[%s16913_s11 + $0x2f0] sm:$0xff] }
 0x778   :  { %v6600_v14 = vadd.f32 %v6599_v13, %v6511_v22  ;;  %v6512_v6 = vpop.f32.mrf.mxu2  ;;  %v10320_v22 = vld [vmem:[%s16914_s12 + $0x2a8] sm:$0xff] }
 0x779   :  { %7092 = vmatmul.bf16.gmra.mxu1 %v5836_v20  ;;  %v5370_v20 = vmul.f32 %v10320_v22, %v5114_v8  ;;  %v6513_v13 = vadd.f32 %v16021_v55, %v6512_v6  ;;  %v10323_v8 = vld [vmem:[%s16913_s11 + $0x2e8] sm:$0xff] }
 0x77a   :  { %v16189_v10 = vadd.f32 %v6688_v58, %v6600_v14  ;;  %v10321_v58 = vld [vmem:[%s16914_s12 + $0x2f0] sm:$0xff]  ;;  %v5124_v14 = vld [vmem:[#allocation2 + $0x2f8] sm:$0xff]  ;;  %v5634_v6 = vadd.f32 %v10323_v8, %v5378_v52 }
 0x77b   :  { %v6690_v34 = vpop.f32.mrf.mxu0  ;;  %v5379_v62 = vmul.f32 %v10321_v58, %v5123_v50  ;;  %v10324_v50 = vld [vmem:[%s16914_s12 + $0x2f8] sm:$0xff]  ;;  %v10325_v58 = vld [vmem:[%s16913_s11 + $0x2a8] sm:$0xff] }
 0x77c   :  { %16922 = vst [vmem:[#allocation16_spill] sm:$0xff] %v16189_v10  ;;  %v5380_v22 = vmul.f32 %v10324_v50, %v5124_v14  ;;  %v5626_v59 = vadd.f32 %v10325_v58, %v5370_v20  ;;  %v5137_v10 = vld [vmem:[#allocation2 + $0x360] sm:$0xff]  ;;  %v10327_v52 = vld [vmem:[%s16914_s12 + $0x2b8] sm:$0xff]  ;;  %v10328_v20 = vld [vmem:[%s16913_s11 + $0x2b0] sm:$0xff] }
 0x77d   :  { %6830 = vmatmul.bf16.gmra.mxu2 %v5841_v33  ;;  %v5372_v8 = vmul.f32 %v10327_v52, %v5116_v54 }
 0x77e   :  { %v16204_v44 = vpop.f32.mrf.mxu1 }
 0x77f   :  { %16923 = vst [vmem:[#allocation17_spill] sm:$0xff] %v16204_v44  ;;  %v6601_v1 = vpop.f32.mrf.mxu3  ;;  %v5635_v44 = vadd.f32 %v10326_v42, %v5379_v62  ;;  %v10329_v62 = vld [vmem:[%s16913_s11 + $0x2f8] sm:$0xff]  ;;  %v10330_v42 = vld [vmem:[%s16914_s12 + $0x360] sm:$0xff] }
 0x780   :  { %v6602_v33 = vadd.f32 %v6601_v1, %v6513_v13  ;;  %v6515_v45 = vpop.f32.mrf.mxu2  ;;  %v5842_v13 = vpack.c.bf16 %v5634_v6, %v5626_v59  ;;  %v5627_v1 = vadd.f32 %v10328_v20, %v5371_v17  ;;  %v5636_v58 = vadd.f32 %v10329_v62, %v5380_v22  ;;  %v10332_v59 = vld [vmem:[%s16913_s11 + $0x2b8] sm:$0xff] }
 0x781   :  { %v5393_v54 = vmul.f32 %v10330_v42, %v5137_v10  ;;  %v6516_v6 = vadd.f32 %v16021_v55, %v6515_v45  ;;  %v5628_v52 = vadd.f32 %v10332_v59, %v5372_v8  ;;  %v10333_v10 = vld [vmem:[%s16913_s11 + $0x360] sm:$0xff]  ;;  %v5130_v42 = vld [vmem:[#allocation2 + $0x328] sm:$0xff] }
 0x782   :  { %v16221_v14 = vadd.f32 %v6690_v34, %v6602_v33  ;;  %v5843_v34 = vpack.c.bf16 %v5635_v44, %v5627_v1  ;;  %v10331_v33 = vld [vmem:[%s16914_s12 + $0x320] sm:$0xff]  ;;  %v5138_v44 = vld [vmem:[#allocation2 + $0x368] sm:$0xff] }
 0x783   :  { %v6693_v50 = vpop.f32.mrf.mxu0  ;;  %v5385_v17 = vmul.f32 %v10331_v33, %v5129_v26  ;;  %v5844_v20 = vpack.c.bf16 %v5636_v58, %v5628_v52  ;;  %v5649_v45 = vadd.f32 %v10333_v10, %v5393_v54  ;;  %v10334_v26 = vld [vmem:[%s16913_s11 + $0x320] sm:$0xff]  ;;  %v5139_v33 = vld [vmem:[#allocation2 + $0x370] sm:$0xff]  ;;  %v10335_v58 = vld [vmem:[%s16914_s12 + $0x368] sm:$0xff] }
 0x784   :  { %16924 = vst [vmem:[#allocation18_spill] sm:$0xff] %v16221_v14  ;;  %6919 = vmatmul.bf16.gmra.mxu3 %v5842_v13  ;;  %v5131_v52 = vld [vmem:[#allocation2 + $0x330] sm:$0xff]  ;;  %v5145_v14 = vld [vmem:[#allocation2 + $0x3a0] sm:$0xff] }
 0x785   :  { %v5641_v8 = vadd.f32 %v10334_v26, %v5385_v17 }
 0x786   :  { %v16239_v22 = vpop.f32.mrf.mxu1  ;;  %7008 = vmatmul.bf16.gmra.mxu0 %v5843_v34  ;;  %v5394_v34 = vmul.f32 %v10335_v58, %v5138_v44  ;;  %v10338_v44 = vld [vmem:[%s16914_s12 + $0x330] sm:$0xff] }
 0x787   :  { %16925 = vst [vmem:[#allocation19_spill] sm:$0xff] %v16239_v22  ;;  %v6604_v62 = vpop.f32.mrf.mxu3  ;;  %v5849_v10 = vpack.c.bf16 %v5649_v45, %v5641_v8  ;;  %v5387_v26 = vmul.f32 %v10338_v44, %v5131_v52  ;;  %v5132_v45 = vld [vmem:[#allocation2 + $0x338] sm:$0xff]  ;;  %v10342_v44 = vld [vmem:[%s16913_s11 + $0x370] sm:$0xff] }
 0x788   :  { %v6605_v13 = vadd.f32 %v6604_v62, %v6516_v6  ;;  %v6517_v1 = vpop.f32.mrf.mxu2  ;;  %v10336_v6 = vld [vmem:[%s16914_s12 + $0x328] sm:$0xff] }
 0x789   :  { %7097 = vmatmul.bf16.gmra.mxu1 %v5844_v20  ;;  %v5386_v20 = vmul.f32 %v10336_v6, %v5130_v42  ;;  %v6518_v62 = vadd.f32 %v16021_v55, %v6517_v1  ;;  %v10339_v42 = vld [vmem:[%s16913_s11 + $0x368] sm:$0xff] }
 0x78a   :  { %v16247_v59 = vadd.f32 %v6693_v50, %v6605_v13  ;;  %v10337_v50 = vld [vmem:[%s16914_s12 + $0x370] sm:$0xff]  ;;  %v5140_v13 = vld [vmem:[#allocation2 + $0x378] sm:$0xff]  ;;  %v5650_v1 = vadd.f32 %v10339_v42, %v5394_v34 }
 0x78b   :  { %v6695_v54 = vpop.f32.mrf.mxu0  ;;  %v5395_v17 = vmul.f32 %v10337_v50, %v5139_v33  ;;  %v10340_v33 = vld [vmem:[%s16914_s12 + $0x378] sm:$0xff]  ;;  %v10341_v50 = vld [vmem:[%s16913_s11 + $0x328] sm:$0xff] }
 0x78c   :  { %16926 = vst [vmem:[#allocation20_spill] sm:$0xff] %v16247_v59  ;;  %v5396_v6 = vmul.f32 %v10340_v33, %v5140_v13  ;;  %v5642_v52 = vadd.f32 %v10341_v50, %v5386_v20  ;;  %v5153_v59 = vld [vmem:[#allocation2 + $0x3e0] sm:$0xff]  ;;  %v10343_v34 = vld [vmem:[%s16914_s12 + $0x338] sm:$0xff]  ;;  %v10344_v20 = vld [vmem:[%s16913_s11 + $0x330] sm:$0xff] }
 0x78d   :  { %6835 = vmatmul.bf16.gmra.mxu2 %v5849_v10  ;;  %v5388_v42 = vmul.f32 %v10343_v34, %v5132_v45 }
 0x78e   :  { %v16262_v8 = vpop.f32.mrf.mxu1 }
 0x78f   :  { %16927 = vst [vmem:[#allocation21_spill] sm:$0xff] %v16262_v8  ;;  %v6606_v58 = vpop.f32.mrf.mxu3  ;;  %v5651_v8 = vadd.f32 %v10342_v44, %v5395_v17  ;;  %v10345_v17 = vld [vmem:[%s16913_s11 + $0x378] sm:$0xff]  ;;  %v10346_v44 = vld [vmem:[%s16914_s12 + $0x3e0] sm:$0xff] }
 0x790   :  { %v6607_v10 = vadd.f32 %v6606_v58, %v6518_v62  ;;  %v6520_v22 = vpop.f32.mrf.mxu2  ;;  %v5850_v62 = vpack.c.bf16 %v5650_v1, %v5642_v52  ;;  %v5643_v58 = vadd.f32 %v10344_v20, %v5387_v26  ;;  %v5652_v50 = vadd.f32 %v10345_v17, %v5396_v6  ;;  %v10348_v52 = vld [vmem:[%s16913_s11 + $0x338] sm:$0xff] }
 0x791   :  { %v5409_v45 = vmul.f32 %v10346_v44, %v5153_v59  ;;  %v6521_v1 = vadd.f32 %v16021_v55, %v6520_v22  ;;  %v5644_v34 = vadd.f32 %v10348_v52, %v5388_v42  ;;  %v10349_v59 = vld [vmem:[%s16913_s11 + $0x3e0] sm:$0xff]  ;;  %v5146_v44 = vld [vmem:[#allocation2 + $0x3a8] sm:$0xff] }
 0x792   :  { %v16279_v13 = vadd.f32 %v6695_v54, %v6607_v10  ;;  %v5851_v54 = vpack.c.bf16 %v5651_v8, %v5643_v58  ;;  %v10347_v10 = vld [vmem:[%s16914_s12 + $0x3a0] sm:$0xff]  ;;  %v5154_v8 = vld [vmem:[#allocation2 + $0x3e8] sm:$0xff] }
 0x793   :  { %v6698_v33 = vpop.f32.mrf.mxu0  ;;  %v5401_v26 = vmul.f32 %v10347_v10, %v5145_v14  ;;  %v5852_v20 = vpack.c.bf16 %v5652_v50, %v5644_v34  ;;  %v5665_v22 = vadd.f32 %v10349_v59, %v5409_v45  ;;  %v10350_v14 = vld [vmem:[%s16913_s11 + $0x3a0] sm:$0xff]  ;;  %v5155_v10 = vld [vmem:[#allocation2 + $0x3f0] sm:$0xff]  ;;  %v10351_v50 = vld [vmem:[%s16914_s12 + $0x3e8] sm:$0xff] }
 0x794   :  { %16928 = vst [vmem:[#allocation22_spill] sm:$0xff] %v16279_v13  ;;  %6924 = vmatmul.bf16.gmra.mxu3 %v5850_v62  ;;  %v5147_v34 = vld [vmem:[#allocation2 + $0x3b0] sm:$0xff]  ;;  %v5161_v13 = vld [vmem:[#allocation2 + $0x420] sm:$0xff] }
 0x795   :  { %v5657_v42 = vadd.f32 %v10350_v14, %v5401_v26 }
 0x796   :  { %v16297_v6 = vpop.f32.mrf.mxu1  ;;  %7013 = vmatmul.bf16.gmra.mxu0 %v5851_v54  ;;  %v5410_v54 = vmul.f32 %v10351_v50, %v5154_v8  ;;  %v10354_v8 = vld [vmem:[%s16914_s12 + $0x3b0] sm:$0xff] }
 0x797   :  { %16929 = vst [vmem:[#allocation23_spill] sm:$0xff] %v16297_v6  ;;  %v6609_v17 = vpop.f32.mrf.mxu3  ;;  %v5857_v59 = vpack.c.bf16 %v5665_v22, %v5657_v42  ;;  %v5403_v14 = vmul.f32 %v10354_v8, %v5147_v34  ;;  %v5148_v22 = vld [vmem:[#allocation2 + $0x3b8] sm:$0xff]  ;;  %v10358_v8 = vld [vmem:[%s16913_s11 + $0x3f0] sm:$0xff] }
 0x798   :  { %v6610_v62 = vadd.f32 %v6609_v17, %v6521_v1  ;;  %v6522_v58 = vpop.f32.mrf.mxu2  ;;  %v10352_v1 = vld [vmem:[%s16914_s12 + $0x3a8] sm:$0xff] }
 0x799   :  { %7102 = vmatmul.bf16.gmra.mxu1 %v5852_v20  ;;  %v5402_v20 = vmul.f32 %v10352_v1, %v5146_v44  ;;  %v6523_v17 = vadd.f32 %v16021_v55, %v6522_v58  ;;  %v10355_v44 = vld [vmem:[%s16913_s11 + $0x3e8] sm:$0xff] }
 0x79a   :  { %v16305_v52 = vadd.f32 %v6698_v33, %v6610_v62  ;;  %v10353_v33 = vld [vmem:[%s16914_s12 + $0x3f0] sm:$0xff]  ;;  %v5156_v62 = vld [vmem:[#allocation2 + $0x3f8] sm:$0xff]  ;;  %v5666_v58 = vadd.f32 %v10355_v44, %v5410_v54 }
 0x79b   :  { %v6700_v45 = vpop.f32.mrf.mxu0  ;;  %v5411_v26 = vmul.f32 %v10353_v33, %v5155_v10  ;;  %v10356_v10 = vld [vmem:[%s16914_s12 + $0x3f8] sm:$0xff]  ;;  %v10357_v33 = vld [vmem:[%s16913_s11 + $0x3a8] sm:$0xff] }
 0x79c   :  { %16930 = vst [vmem:[#allocation24_spill] sm:$0xff] %v16305_v52  ;;  %v5412_v1 = vmul.f32 %v10356_v10, %v5156_v62  ;;  %v5658_v34 = vadd.f32 %v10357_v33, %v5402_v20  ;;  %v5169_v52 = vld [vmem:[#allocation2 + $0x460] sm:$0xff]  ;;  %v10359_v54 = vld [vmem:[%s16914_s12 + $0x3b8] sm:$0xff]  ;;  %v10360_v20 = vld [vmem:[%s16913_s11 + $0x3b0] sm:$0xff] }
 0x79d   :  { %6840 = vmatmul.bf16.gmra.mxu2 %v5857_v59  ;;  %v5404_v44 = vmul.f32 %v10359_v54, %v5148_v22 }
 0x79e   :  { %v16320_v42 = vpop.f32.mrf.mxu1 }
 0x79f   :  { %16931 = vst [vmem:[#allocation25_spill] sm:$0xff] %v16320_v42  ;;  %v6611_v50 = vpop.f32.mrf.mxu3  ;;  %v5667_v42 = vadd.f32 %v10358_v8, %v5411_v26  ;;  %v10361_v26 = vld [vmem:[%s16913_s11 + $0x3f8] sm:$0xff]  ;;  %v10362_v8 = vld [vmem:[%s16914_s12 + $0x460] sm:$0xff] }
 0x7a0   :  { %v6612_v59 = vadd.f32 %v6611_v50, %v6523_v17  ;;  %v6525_v6 = vpop.f32.mrf.mxu2  ;;  %v5858_v17 = vpack.c.bf16 %v5666_v58, %v5658_v34  ;;  %v5659_v50 = vadd.f32 %v10360_v20, %v5403_v14  ;;  %v5668_v33 = vadd.f32 %v10361_v26, %v5412_v1  ;;  %v10364_v34 = vld [vmem:[%s16913_s11 + $0x3b8] sm:$0xff] }
 0x7a1   :  { %v5425_v22 = vmul.f32 %v10362_v8, %v5169_v52  ;;  %v6526_v58 = vadd.f32 %v16021_v55, %v6525_v6  ;;  %v5660_v54 = vadd.f32 %v10364_v34, %v5404_v44  ;;  %v10365_v52 = vld [vmem:[%s16913_s11 + $0x460] sm:$0xff]  ;;  %v5162_v8 = vld [vmem:[#allocation2 + $0x428] sm:$0xff] }
 0x7a2   :  { %v16337_v62 = vadd.f32 %v6700_v45, %v6612_v59  ;;  %v5859_v45 = vpack.c.bf16 %v5667_v42, %v5659_v50  ;;  %v10363_v59 = vld [vmem:[%s16914_s12 + $0x420] sm:$0xff]  ;;  %v5170_v42 = vld [vmem:[#allocation2 + $0x468] sm:$0xff] }
 0x7a3   :  { %v6703_v10 = vpop.f32.mrf.mxu0  ;;  %v5417_v14 = vmul.f32 %v10363_v59, %v5161_v13  ;;  %v5860_v20 = vpack.c.bf16 %v5668_v33, %v5660_v54  ;;  %v5681_v6 = vadd.f32 %v10365_v52, %v5425_v22  ;;  %v10366_v13 = vld [vmem:[%s16913_s11 + $0x420] sm:$0xff]  ;;  %v5171_v59 = vld [vmem:[#allocation2 + $0x470] sm:$0xff]  ;;  %v10367_v33 = vld [vmem:[%s16914_s12 + $0x468] sm:$0xff] }
 0x7a4   :  { %6929 = vmatmul.bf16.gmra.mxu3 %v5858_v17  ;;  %v5163_v54 = vld [vmem:[#allocation2 + $0x430] sm:$0xff] }
 0x7a5   :  { %v5673_v44 = vadd.f32 %v10366_v13, %v5417_v14 }
 0x7a6   :  { %v16355_v1 = vpop.f32.mrf.mxu1  ;;  %7018 = vmatmul.bf16.gmra.mxu0 %v5859_v45  ;;  %v5426_v45 = vmul.f32 %v10367_v33, %v5170_v42  ;;  %v10370_v42 = vld [vmem:[%s16914_s12 + $0x430] sm:$0xff] }
 0x7a7   :  { %16932 = vst [vmem:[#allocation26_spill] sm:$0xff] %v16355_v1  ;;  %v6614_v26 = vpop.f32.mrf.mxu3  ;;  %v5865_v52 = vpack.c.bf16 %v5681_v6, %v5673_v44  ;;  %v5419_v13 = vmul.f32 %v10370_v42, %v5163_v54  ;;  %v5164_v6 = vld [vmem:[#allocation2 + $0x438] sm:$0xff]  ;;  %v5185_v1 = vld [vmem:[#allocation2 + $0x4e0] sm:$0xff] }
 0x7a8   :  { %v6615_v17 = vadd.f32 %v6614_v26, %v6526_v58  ;;  %v6527_v50 = vpop.f32.mrf.mxu2  ;;  %v10368_v58 = vld [vmem:[%s16914_s12 + $0x428] sm:$0xff] }
 0x7a9   :  { %7107 = vmatmul.bf16.gmra.mxu1 %v5860_v20  ;;  %v5418_v20 = vmul.f32 %v10368_v58, %v5162_v8  ;;  %v6528_v26 = vadd.f32 %v16021_v55, %v6527_v50  ;;  %v10371_v8 = vld [vmem:[%s16913_s11 + $0x468] sm:$0xff] }
 0x7aa   :  { %v16363_v34 = vadd.f32 %v6703_v10, %v6615_v17  ;;  %v10369_v10 = vld [vmem:[%s16914_s12 + $0x470] sm:$0xff]  ;;  %v5172_v17 = vld [vmem:[#allocation2 + $0x478] sm:$0xff]  ;;  %v5682_v55 = vadd.f32 %v10371_v8, %v5426_v45  ;;  %v10373_v58 = vld [vmem:[%s16913_s11 + $0x428] sm:$0xff] }
 0x7ab   :  { %v6705_v22 = vpop.f32.mrf.mxu0  ;;  %v5427_v14 = vmul.f32 %v10369_v10, %v5171_v59  ;;  %v10372_v59 = vld [vmem:[%s16914_s12 + $0x478] sm:$0xff]  ;;  %v5674_v54 = vadd.f32 %v10373_v58, %v5418_v20  ;;  %v10374_v10 = vld [vmem:[%s16913_s11 + $0x470] sm:$0xff] }
 0x7ac   :  { %16933 = vst [vmem:[#allocation27_spill] sm:$0xff] %v16363_v34  ;;  %v5428_v33 = vmul.f32 %v10372_v59, %v5172_v17  ;;  %v10375_v45 = vld [vmem:[%s16914_s12 + $0x438] sm:$0xff]  ;;  %v5177_v34 = vld [vmem:[#allocation2 + $0x4a0] sm:$0xff]  ;;  %v10376_v20 = vld [vmem:[%s16913_s11 + $0x430] sm:$0xff]  ;;  %v6718_v59 = vadd.f32 %v15352_v37, %v15425_v61 }
 0x7ad   :  { %6845 = vmatmul.bf16.gmra.mxu2 %v5865_v52  ;;  %v5683_v42 = vadd.f32 %v10374_v10, %v5427_v14  ;;  %v5420_v8 = vmul.f32 %v10375_v45, %v5164_v6  ;;  %v10377_v58 = vld [vmem:[%s16913_s11 + $0x478] sm:$0xff] }
 0x7ae   :  { %v16378_v44 = vpop.f32.mrf.mxu1  ;;  %v5684_v10 = vadd.f32 %v10377_v58, %v5428_v33  ;;  %v10380_v37 = vld [vmem:[%s16913_s11 + $0x438] sm:$0xff] }
 0x7af   :  { %16934 = vst [vmem:[#allocation28_spill] sm:$0xff] %v16378_v44  ;;  %v6616_v50 = vpop.f32.mrf.mxu3  ;;  %v5676_v61 = vadd.f32 %v10380_v37, %v5420_v8  ;;  %v5187_v8 = vld [vmem:[#allocation2 + $0x4f0] sm:$0xff] }
 0x7b0   :  { %v6617_v52 = vadd.f32 %v6616_v50, %v6528_v26  ;;  %v6806_v44 = vpop.f32.mrf.mxu2  ;;  %v5866_v26 = vpack.c.bf16 %v5682_v55, %v5674_v54  ;;  %v5675_v50 = vadd.f32 %v10376_v20, %v5419_v13  ;;  %v10379_v13 = vld [vmem:[%s16914_s12 + $0x4a0] sm:$0xff] }
 0x7b1   :  { %v5433_v54 = vmul.f32 %v10379_v13, %v5177_v34  ;;  %v5868_v33 = vpack.c.bf16 %v5684_v10, %v5676_v61  ;;  %v10382_v34 = vld [vmem:[%s16913_s11 + $0x4a0] sm:$0xff]  ;;  %v6720_v10 = vadd.f32 %v15403_v27, %v15434_v46  ;;  %v5179_v13 = vld [vmem:[#allocation2 + $0x4b0] sm:$0xff]  ;;  %v10384_v61 = vld [vmem:[%s16914_s12 + $0x4a8] sm:$0xff] }
 0x7b2   :  { %v16395_v17 = vadd.f32 %v6705_v22, %v6617_v52  ;;  %v10378_v22 = vld [vmem:[%s16914_s12 + $0x4e0] sm:$0xff]  ;;  %v5867_v55 = vpack.c.bf16 %v5683_v42, %v5675_v50  ;;  %v6807_v52 = vadd.f32 %v6806_v44, %v6718_v59  ;;  %v5186_v44 = vld [vmem:[#allocation2 + $0x4e8] sm:$0xff]  ;;  %v5188_v46 = vld [vmem:[#allocation2 + $0x4f8] sm:$0xff] }
 0x7b3   :  { %v6984_v14 = vpop.f32.mrf.mxu0  ;;  %v5441_v6 = vmul.f32 %v10378_v22, %v5185_v1  ;;  %v10381_v1 = vld [vmem:[%s16913_s11 + $0x4e0] sm:$0xff]  ;;  %v5178_v59 = vld [vmem:[#allocation2 + $0x4a8] sm:$0xff]  ;;  %v5689_v58 = vadd.f32 %v10382_v34, %v5433_v54  ;;  %v10388_v34 = vld [vmem:[%s16914_s12 + $0x4f8] sm:$0xff] }
 0x7b4   :  { %6934 = vmatmul.bf16.gmra.mxu3 %v5866_v26 }
 0x7b5   :  { %v5697_v42 = vadd.f32 %v10381_v1, %v5441_v6  ;;  %v10386_v1 = vld [vmem:[%s16914_s12 + $0x4b0] sm:$0xff] }
 0x7b6   :  { %v7073_v45 = vpop.f32.mrf.mxu1  ;;  %7023 = vmatmul.bf16.gmra.mxu0 %v5867_v55  ;;  %v10383_v55 = vld [vmem:[%s16914_s12 + $0x4e8] sm:$0xff] }
 0x7b7   :  { %v6895_v20 = vpop.f32.mrf.mxu3  ;;  %v5442_v6 = vmul.f32 %v10383_v55, %v5186_v44  ;;  %v5873_v37 = vpack.c.bf16 %v5697_v42, %v5689_v58  ;;  %v5435_v44 = vmul.f32 %v10386_v1, %v5179_v13  ;;  %v5180_v42 = vld [vmem:[#allocation2 + $0x4b8] sm:$0xff]  ;;  %v5444_v58 = vmul.f32 %v10388_v34, %v5188_v46  ;;  %v10390_v55 = vld [vmem:[%s16913_s11 + $0x4f0] sm:$0xff] }
 0x7b8   :  { %v6896_v26 = vadd.f32 %v6895_v20, %v6807_v52  ;;  %v6808_v50 = vpop.f32.mrf.mxu2  ;;  %v10392_v1 = vld [vmem:[%s16913_s11 + $0x4b0] sm:$0xff] }
 0x7b9   :  { %7112 = vmatmul.bf16.gmra.mxu1 %v5868_v33  ;;  %v5434_v33 = vmul.f32 %v10384_v61, %v5178_v59  ;;  %v6809_v54 = vadd.f32 %v6808_v50, %v6720_v10  ;;  %v5201_v61 = vld [vmem:[#allocation2 + $0x560] sm:$0xff] }
 0x7ba   :  { %v6985_v22 = vadd.f32 %v6984_v14, %v6896_v26  ;;  %v10385_v14 = vld [vmem:[%s16914_s12 + $0x4f0] sm:$0xff] }
 0x7bb   :  { %v6986_v52 = vpop.f32.mrf.mxu0  ;;  %v5443_v27 = vmul.f32 %v10385_v14, %v5187_v8  ;;  %v5193_v14 = vld [vmem:[#allocation2 + $0x520] sm:$0xff] }
 0x7bc   :  { %v7074_v20 = vadd.f32 %v7073_v45, %v6985_v22  ;;  %v10387_v45 = vld [vmem:[%s16913_s11 + $0x4e8] sm:$0xff] }
 0x7bd   :  { %6850 = vmatmul.bf16.gmra.mxu2 %v5873_v37  ;;  %v5698_v50 = vadd.f32 %v10387_v45, %v5442_v6  ;;  %v10389_v22 = vld [vmem:[%s16913_s11 + $0x4a8] sm:$0xff]  ;;  %v5699_v13 = vadd.f32 %v10390_v55, %v5443_v27  ;;  %v10391_v6 = vld [vmem:[%s16914_s12 + $0x4b8] sm:$0xff]  ;;  %v6723_v45 = vadd.f32 %v15436_v63, %v15481_v9 }
 0x7be   :  { %7153 = vst [vmem:[%s16912_s10] sm:$0xff] %v7074_v20  ;;  %v7075_v26 = vpop.f32.mrf.mxu1  ;;  %v5690_v10 = vadd.f32 %v10389_v22, %v5434_v33  ;;  %v5436_v20 = vmul.f32 %v10391_v6, %v5180_v42  ;;  %v5691_v33 = vadd.f32 %v10392_v1, %v5435_v44  ;;  %v10393_v27 = vld [vmem:[%s16913_s11 + $0x4f8] sm:$0xff]  ;;  %v10394_v42 = vld [vmem:[%s16914_s12 + $0x560] sm:$0xff]  ;;  %v5203_v1 = vld [vmem:[#allocation2 + $0x570] sm:$0xff] }
 0x7bf   :  { %v6897_v59 = vpop.f32.mrf.mxu3  ;;  %v5700_v34 = vadd.f32 %v10393_v27, %v5444_v58  ;;  %v10395_v44 = vld [vmem:[%s16914_s12 + $0x520] sm:$0xff]  ;;  %v10396_v9 = vld [vmem:[%s16913_s11 + $0x4b8] sm:$0xff]  ;;  %v10399_v27 = vld [vmem:[%s16914_s12 + $0x568] sm:$0xff] }
 0x7c0   :  { %v6898_v8 = vadd.f32 %v6897_v59, %v6809_v54  ;;  %v6811_v37 = vpop.f32.mrf.mxu2  ;;  %v5874_v54 = vpack.c.bf16 %v5698_v50, %v5690_v10  ;;  %v5449_v63 = vmul.f32 %v10395_v44, %v5193_v14  ;;  %v5692_v10 = vadd.f32 %v10396_v9, %v5436_v20  ;;  %v10398_v20 = vld [vmem:[%s16913_s11 + $0x520] sm:$0xff]  ;;  %v10402_v9 = vld [vmem:[%s16914_s12 + $0x530] sm:$0xff] }
 0x7c1   :  { %v6812_v22 = vadd.f32 %v6811_v37, %v6723_v45  ;;  %v6725_v45 = vadd.f32 %v15483_v2, %v15515_v48  ;;  %v5204_v48 = vld [vmem:[#allocation2 + $0x578] sm:$0xff] }
 0x7c2   :  { %v6987_v46 = vadd.f32 %v6986_v52, %v6898_v8  ;;  %v5457_v52 = vmul.f32 %v10394_v42, %v5201_v61  ;;  %v5875_v8 = vpack.c.bf16 %v5699_v13, %v5691_v33  ;;  %v10397_v13 = vld [vmem:[%s16913_s11 + $0x560] sm:$0xff]  ;;  %v5202_v61 = vld [vmem:[#allocation2 + $0x568] sm:$0xff]  ;;  %v5195_v42 = vld [vmem:[#allocation2 + $0x530] sm:$0xff] }
 0x7c3   :  { %v6989_v59 = vpop.f32.mrf.mxu0 }
 0x7c4   :  { %v7076_v50 = vadd.f32 %v7075_v26, %v6987_v46  ;;  %6939 = vmatmul.bf16.gmra.mxu3 %v5874_v54  ;;  %v5876_v26 = vpack.c.bf16 %v5700_v34, %v5692_v10  ;;  %v5713_v37 = vadd.f32 %v10397_v13, %v5457_v52  ;;  %v5194_v46 = vld [vmem:[#allocation2 + $0x528] sm:$0xff]  ;;  %v5705_v54 = vadd.f32 %v10398_v20, %v5449_v63 }
 0x7c5   :  { %v5458_v34 = vmul.f32 %v10399_v27, %v5202_v61  ;;  %v5451_v10 = vmul.f32 %v10402_v9, %v5195_v42  ;;  %v10404_v61 = vld [vmem:[%s16914_s12 + $0x578] sm:$0xff]  ;;  %v5209_v42 = vld [vmem:[#allocation2 + $0x5a0] sm:$0xff] }
 0x7c6   :  { %7154 = vst [vmem:[%s16912_s10 + $0x8] sm:$0xff] %v7076_v50  ;;  %v7078_v58 = vpop.f32.mrf.mxu1  ;;  %7028 = vmatmul.bf16.gmra.mxu0 %v5875_v8  ;;  %v5881_v50 = vpack.c.bf16 %v5713_v37, %v5705_v54  ;;  %v10400_v8 = vld [vmem:[%s16914_s12 + $0x528] sm:$0xff]  ;;  %v10406_v54 = vld [vmem:[%s16913_s11 + $0x570] sm:$0xff]  ;;  %v10407_v27 = vld [vmem:[%s16914_s12 + $0x538] sm:$0xff] }
 0x7c7   :  { %v6900_v55 = vpop.f32.mrf.mxu3  ;;  %v10410_v9 = vld [vmem:[%s16914_s12 + $0x5e0] sm:$0xff] }
 0x7c8   :  { %v6901_v6 = vadd.f32 %v6900_v55, %v6812_v22  ;;  %v6813_v14 = vpop.f32.mrf.mxu2  ;;  %v5450_v22 = vmul.f32 %v10400_v8, %v5194_v46  ;;  %v10405_v46 = vld [vmem:[%s16913_s11 + $0x528] sm:$0xff] }
 0x7c9   :  { %7117 = vmatmul.bf16.gmra.mxu1 %v5876_v26  ;;  %v6814_v63 = vadd.f32 %v6813_v14, %v6725_v45  ;;  %v5196_v26 = vld [vmem:[#allocation2 + $0x538] sm:$0xff]  ;;  %v5217_v45 = vld [vmem:[#allocation2 + $0x5e0] sm:$0xff] }
 0x7ca   :  { %v6990_v33 = vadd.f32 %v6989_v59, %v6901_v6  ;;  %v10401_v59 = vld [vmem:[%s16914_s12 + $0x570] sm:$0xff]  ;;  %v5460_v6 = vmul.f32 %v10404_v61, %v5204_v48  ;;  %v5706_v20 = vadd.f32 %v10405_v46, %v5450_v22 }
 0x7cb   :  { %v6991_v52 = vpop.f32.mrf.mxu0  ;;  %v5459_v2 = vmul.f32 %v10401_v59, %v5203_v1 }
 0x7cc   :  { %v7079_v44 = vadd.f32 %v7078_v58, %v6990_v33  ;;  %v10403_v58 = vld [vmem:[%s16913_s11 + $0x568] sm:$0xff] }
 0x7cd   :  { %6855 = vmatmul.bf16.gmra.mxu2 %v5881_v50  ;;  %v5714_v13 = vadd.f32 %v10403_v58, %v5458_v34  ;;  %v5715_v1 = vadd.f32 %v10406_v54, %v5459_v2  ;;  %v5452_v34 = vmul.f32 %v10407_v27, %v5196_v26  ;;  %v10409_v2 = vld [vmem:[%s16913_s11 + $0x578] sm:$0xff] }
 0x7ce   :  { %7155 = vst [vmem:[%s16912_s10 + $0x10] sm:$0xff] %v7079_v44  ;;  %v7080_v55 = vpop.f32.mrf.mxu1  ;;  %v10408_v44 = vld [vmem:[%s16913_s11 + $0x530] sm:$0xff]  ;;  %v5716_v48 = vadd.f32 %v10409_v2, %v5460_v6 }
 0x7cf   :  { %v6902_v37 = vpop.f32.mrf.mxu3  ;;  %v5882_v8 = vpack.c.bf16 %v5714_v13, %v5706_v20  ;;  %v5707_v22 = vadd.f32 %v10408_v44, %v5451_v10  ;;  %v10411_v10 = vld [vmem:[%s16914_s12 + $0x5a0] sm:$0xff]  ;;  %v5218_v20 = vld [vmem:[#allocation2 + $0x5e8] sm:$0xff] }
 0x7d0   :  { %v6903_v14 = vadd.f32 %v6902_v37, %v6814_v63  ;;  %v6816_v33 = vpop.f32.mrf.mxu2  ;;  %v6728_v63 = vadd.f32 %v15517_v7, %v15550_v57  ;;  %v5465_v7 = vmul.f32 %v10411_v10, %v5209_v42  ;;  %v10412_v57 = vld [vmem:[%s16913_s11 + $0x538] sm:$0xff] }
 0x7d1   :  { %v5883_v58 = vpack.c.bf16 %v5715_v1, %v5707_v22  ;;  %v5708_v37 = vadd.f32 %v10412_v57, %v5452_v34  ;;  %v5219_v34 = vld [vmem:[#allocation2 + $0x5f0] sm:$0xff]  ;;  %v5212_v10 = vld [vmem:[#allocation2 + $0x5b8] sm:$0xff]  ;;  %v10419_v57 = vld [vmem:[%s16913_s11 + $0x5e8] sm:$0xff] }
 0x7d2   :  { %v6992_v50 = vadd.f32 %v6991_v52, %v6903_v14  ;;  %v5473_v52 = vmul.f32 %v10410_v9, %v5217_v45  ;;  %v6817_v13 = vadd.f32 %v6816_v33, %v6728_v63  ;;  %v10413_v14 = vld [vmem:[%s16913_s11 + $0x5e0] sm:$0xff]  ;;  %v5210_v33 = vld [vmem:[#allocation2 + $0x5a8] sm:$0xff]  ;;  %v5211_v22 = vld [vmem:[#allocation2 + $0x5b0] sm:$0xff] }
 0x7d3   :  { %v6994_v59 = vpop.f32.mrf.mxu0  ;;  %v10414_v45 = vld [vmem:[%s16913_s11 + $0x5a0] sm:$0xff] }
 0x7d4   :  { %v7081_v26 = vadd.f32 %v7080_v55, %v6992_v50  ;;  %6944 = vmatmul.bf16.gmra.mxu3 %v5882_v8  ;;  %v5884_v55 = vpack.c.bf16 %v5716_v48, %v5708_v37  ;;  %v5729_v46 = vadd.f32 %v10413_v14, %v5473_v52  ;;  %v5721_v27 = vadd.f32 %v10414_v45, %v5465_v7  ;;  %v10415_v8 = vld [vmem:[%s16914_s12 + $0x5e8] sm:$0xff]  ;;  %v5233_v45 = vld [vmem:[#allocation2 + $0x660] sm:$0xff] }
 0x7d5   :  { %v6730_v50 = vadd.f32 %v15552_v53, %v15573_v18  ;;  %v5474_v44 = vmul.f32 %v10415_v8, %v5218_v20  ;;  %v10416_v48 = vld [vmem:[%s16914_s12 + $0x5a8] sm:$0xff]  ;;  %v5220_v18 = vld [vmem:[#allocation2 + $0x5f8] sm:$0xff] }
 0x7d6   :  { %7156 = vst [vmem:[%s16912_s10 + $0x18] sm:$0xff] %v7081_v26  ;;  %v7083_v61 = vpop.f32.mrf.mxu1  ;;  %7033 = vmatmul.bf16.gmra.mxu0 %v5883_v58  ;;  %v5889_v2 = vpack.c.bf16 %v5729_v46, %v5721_v27  ;;  %v5466_v9 = vmul.f32 %v10416_v48, %v5210_v33  ;;  %v10418_v58 = vld [vmem:[%s16914_s12 + $0x5b0] sm:$0xff]  ;;  %v10421_v46 = vld [vmem:[%s16913_s11 + $0x5a8] sm:$0xff]  ;;  %v10423_v27 = vld [vmem:[%s16914_s12 + $0x5b8] sm:$0xff] }
 0x7d7   :  { %v6905_v6 = vpop.f32.mrf.mxu3  ;;  %v5730_v37 = vadd.f32 %v10419_v57, %v5474_v44  ;;  %v10424_v44 = vld [vmem:[%s16913_s11 + $0x5b0] sm:$0xff] }
 0x7d8   :  { %v6906_v54 = vadd.f32 %v6905_v6, %v6817_v13  ;;  %v6818_v1 = vpop.f32.mrf.mxu2  ;;  %v5467_v13 = vmul.f32 %v10418_v58, %v5211_v22  ;;  %v5722_v20 = vadd.f32 %v10421_v46, %v5466_v9  ;;  %v10425_v9 = vld [vmem:[%s16913_s11 + $0x5f8] sm:$0xff]  ;;  %v10427_v58 = vld [vmem:[%s16914_s12 + $0x620] sm:$0xff]  ;;  %v5226_v46 = vld [vmem:[#allocation2 + $0x628] sm:$0xff] }
 0x7d9   :  { %7122 = vmatmul.bf16.gmra.mxu1 %v5884_v55  ;;  %v6819_v26 = vadd.f32 %v6818_v1, %v6730_v50  ;;  %v10420_v55 = vld [vmem:[%s16914_s12 + $0x5f8] sm:$0xff] }
 0x7da   :  { %v6995_v42 = vadd.f32 %v6994_v59, %v6906_v54  ;;  %v10417_v59 = vld [vmem:[%s16914_s12 + $0x5f0] sm:$0xff]  ;;  %v5476_v6 = vmul.f32 %v10420_v55, %v5220_v18  ;;  %v5890_v8 = vpack.c.bf16 %v5730_v37, %v5722_v20  ;;  %v5723_v22 = vadd.f32 %v10424_v44, %v5467_v13  ;;  %v10429_v37 = vld [vmem:[%s16913_s11 + $0x660] sm:$0xff]  ;;  %v5234_v55 = vld [vmem:[#allocation2 + $0x668] sm:$0xff] }
 0x7db   :  { %v6996_v63 = vpop.f32.mrf.mxu0  ;;  %v5475_v53 = vmul.f32 %v10417_v59, %v5219_v34  ;;  %v10422_v54 = vld [vmem:[%s16913_s11 + $0x5f0] sm:$0xff]  ;;  %v5468_v34 = vmul.f32 %v10423_v27, %v5212_v10  ;;  %v10430_v20 = vld [vmem:[%s16913_s11 + $0x620] sm:$0xff]  ;;  %v10431_v27 = vld [vmem:[%s16914_s12 + $0x668] sm:$0xff] }
 0x7dc   :  { %v7084_v52 = vadd.f32 %v7083_v61, %v6995_v42  ;;  %v5225_v42 = vld [vmem:[#allocation2 + $0x620] sm:$0xff]  ;;  %v10432_v44 = vld [vmem:[%s16914_s12 + $0x628] sm:$0xff] }
 0x7dd   :  { %6860 = vmatmul.bf16.gmra.mxu2 %v5889_v2  ;;  %v5731_v1 = vadd.f32 %v10422_v54, %v5475_v53  ;;  %v6733_v2 = vadd.f32 %v15575_v25, %v15608_v28  ;;  %v5481_v25 = vmul.f32 %v10427_v58, %v5225_v42  ;;  %v10428_v28 = vld [vmem:[%s16913_s11 + $0x5b8] sm:$0xff]  ;;  %v5227_v42 = vld [vmem:[#allocation2 + $0x630] sm:$0xff] }
 0x7de   :  { %7157 = vst [vmem:[%s16912_s10 + $0x20] sm:$0xff] %v7084_v52  ;;  %v7085_v7 = vpop.f32.mrf.mxu1  ;;  %v5732_v52 = vadd.f32 %v10425_v9, %v5476_v6  ;;  %v5724_v13 = vadd.f32 %v10428_v28, %v5468_v34  ;;  %v5490_v34 = vmul.f32 %v10431_v27, %v5234_v55  ;;  %v5249_v55 = vld [vmem:[#allocation2 + $0x6e0] sm:$0xff] }
 0x7df   :  { %v6907_v61 = vpop.f32.mrf.mxu3  ;;  %v5891_v53 = vpack.c.bf16 %v5731_v1, %v5723_v22  ;;  %v5737_v54 = vadd.f32 %v10430_v20, %v5481_v25  ;;  %v5235_v1 = vld [vmem:[#allocation2 + $0x670] sm:$0xff]  ;;  %v5482_v22 = vmul.f32 %v10432_v44, %v5226_v46  ;;  %v10436_v25 = vld [vmem:[%s16914_s12 + $0x678] sm:$0xff]  ;;  %v5241_v46 = vld [vmem:[#allocation2 + $0x6a0] sm:$0xff] }
 0x7e0   :  { %v6908_v14 = vadd.f32 %v6907_v61, %v6819_v26  ;;  %v6821_v33 = vpop.f32.mrf.mxu2  ;;  %v10426_v26 = vld [vmem:[%s16914_s12 + $0x660] sm:$0xff] }
 0x7e1   :  { %v6822_v18 = vadd.f32 %v6821_v33, %v6733_v2 }
 0x7e2   :  { %v6997_v50 = vadd.f32 %v6996_v63, %v6908_v14  ;;  %v5489_v63 = vmul.f32 %v10426_v26, %v5233_v45  ;;  %v6735_v45 = vadd.f32 %v15610_v40, %v15631_v3  ;;  %v5236_v3 = vld [vmem:[#allocation2 + $0x678] sm:$0xff] }
 0x7e3   :  { %v6999_v48 = vpop.f32.mrf.mxu0  ;;  %v5492_v28 = vmul.f32 %v10436_v25, %v5236_v3  ;;  %v10446_v25 = vld [vmem:[%s16913_s11 + $0x6a0] sm:$0xff] }
 0x7e4   :  { %v7086_v59 = vadd.f32 %v7085_v7, %v6997_v50  ;;  %6949 = vmatmul.bf16.gmra.mxu3 %v5890_v8  ;;  %v5892_v7 = vpack.c.bf16 %v5732_v52, %v5724_v13  ;;  %v5745_v61 = vadd.f32 %v10429_v37, %v5489_v63  ;;  %v10434_v52 = vld [vmem:[%s16914_s12 + $0x630] sm:$0xff]  ;;  %v5228_v63 = vld [vmem:[#allocation2 + $0x638] sm:$0xff] }
 0x7e5   :  { %v5483_v26 = vmul.f32 %v10434_v52, %v5227_v42 }
 0x7e6   :  { %7158 = vst [vmem:[%s16912_s10 + $0x28] sm:$0xff] %v7086_v59  ;;  %v7088_v10 = vpop.f32.mrf.mxu1  ;;  %7038 = vmatmul.bf16.gmra.mxu0 %v5891_v53  ;;  %v5897_v8 = vpack.c.bf16 %v5745_v61, %v5737_v54  ;;  %v10435_v53 = vld [vmem:[%s16913_s11 + $0x668] sm:$0xff] }
 0x7e7   :  { %v6910_v57 = vpop.f32.mrf.mxu3 }
 0x7e8   :  { %v6911_v6 = vadd.f32 %v6910_v57, %v6822_v18  ;;  %v6823_v14 = vpop.f32.mrf.mxu2  ;;  %v5746_v18 = vadd.f32 %v10435_v53, %v5490_v34  ;;  %v10438_v57 = vld [vmem:[%s16913_s11 + $0x670] sm:$0xff]  ;;  %v10441_v34 = vld [vmem:[%s16913_s11 + $0x678] sm:$0xff] }
 0x7e9   :  { %7127 = vmatmul.bf16.gmra.mxu1 %v5892_v7  ;;  %v6824_v9 = vadd.f32 %v6823_v14, %v6735_v45  ;;  %v6738_v45 = vadd.f32 %v15633_v12, %v15666_v23  ;;  %v5748_v42 = vadd.f32 %v10441_v34, %v5492_v28  ;;  %v10444_v23 = vld [vmem:[%s16913_s11 + $0x638] sm:$0xff] }
 0x7ea   :  { %v7000_v33 = vadd.f32 %v6999_v48, %v6911_v6  ;;  %v10433_v48 = vld [vmem:[%s16914_s12 + $0x670] sm:$0xff]  ;;  %v10439_v6 = vld [vmem:[%s16914_s12 + $0x638] sm:$0xff] }
 0x7eb   :  { %v7001_v50 = vpop.f32.mrf.mxu0  ;;  %v5491_v40 = vmul.f32 %v10433_v48, %v5235_v1  ;;  %v5484_v14 = vmul.f32 %v10439_v6, %v5228_v63  ;;  %v10440_v1 = vld [vmem:[%s16913_s11 + $0x630] sm:$0xff] }
 0x7ec   :  { %v7089_v2 = vadd.f32 %v7088_v10, %v7000_v33  ;;  %v10437_v10 = vld [vmem:[%s16913_s11 + $0x628] sm:$0xff]  ;;  %v5739_v33 = vadd.f32 %v10440_v1, %v5483_v26  ;;  %v10445_v26 = vld [vmem:[%s16913_s11 + $0x6e0] sm:$0xff]  ;;  %v10449_v1 = vld [vmem:[%s16914_s12 + $0x6f0] sm:$0xff] }
 0x7ed   :  { %6865 = vmatmul.bf16.gmra.mxu2 %v5897_v8  ;;  %v5738_v7 = vadd.f32 %v10437_v10, %v5482_v22  ;;  %v5747_v37 = vadd.f32 %v10438_v57, %v5491_v40  ;;  %v10442_v8 = vld [vmem:[%s16914_s12 + $0x6e0] sm:$0xff]  ;;  %v5740_v48 = vadd.f32 %v10444_v23, %v5484_v14  ;;  %v10447_v57 = vld [vmem:[%s16914_s12 + $0x6e8] sm:$0xff]  ;;  %v10454_v23 = vld [vmem:[%s16913_s11 + $0x6f0] sm:$0xff] }
 0x7ee   :  { %7159 = vst [vmem:[%s16912_s10 + $0x30] sm:$0xff] %v7089_v2  ;;  %v7090_v59 = vpop.f32.mrf.mxu1  ;;  %v10448_v14 = vld [vmem:[%s16914_s12 + $0x6a8] sm:$0xff] }
 0x7ef   :  { %v6912_v58 = vpop.f32.mrf.mxu3  ;;  %v5898_v54 = vpack.c.bf16 %v5746_v18, %v5738_v7  ;;  %v5899_v22 = vpack.c.bf16 %v5747_v37, %v5739_v33  ;;  %v5900_v3 = vpack.c.bf16 %v5748_v42, %v5740_v48  ;;  %v6740_v7 = vadd.f32 %v15668_v31, %v15689_v51  ;;  %v5252_v51 = vld [vmem:[#allocation2 + $0x6f8] sm:$0xff]  ;;  %v10450_v33 = vld [vmem:[%s16914_s12 + $0x6b0] sm:$0xff]  ;;  %v10451_v42 = vld [vmem:[%s16913_s11 + $0x6e8] sm:$0xff] }
 0x7f0   :  { %v6913_v13 = vadd.f32 %v6912_v58, %v6824_v9  ;;  %v6826_v61 = vpop.f32.mrf.mxu2  ;;  %v10443_v9 = vld [vmem:[%s16914_s12 + $0x6a0] sm:$0xff]  ;;  %v5242_v58 = vld [vmem:[#allocation2 + $0x6a8] sm:$0xff] }
 0x7f1   :  { %v6827_v2 = vadd.f32 %v6826_v61, %v6738_v45  ;;  %v5497_v12 = vmul.f32 %v10443_v9, %v5241_v46  ;;  %v5243_v61 = vld [vmem:[#allocation2 + $0x6b0] sm:$0xff]  ;;  %v5498_v46 = vmul.f32 %v10448_v14, %v5242_v58  ;;  %v10453_v9 = vld [vmem:[%s16913_s11 + $0x6a8] sm:$0xff] }
 0x7f2   :  { %v7002_v20 = vadd.f32 %v7001_v50, %v6913_v13  ;;  %v5505_v50 = vmul.f32 %v10442_v8, %v5249_v55  ;;  %v5251_v13 = vld [vmem:[#allocation2 + $0x6f0] sm:$0xff]  ;;  %v5499_v45 = vmul.f32 %v10450_v33, %v5243_v61 }
 0x7f3   :  { %v7004_v27 = vpop.f32.mrf.mxu0  ;;  %v5753_v28 = vadd.f32 %v10446_v25, %v5497_v12  ;;  %v5507_v31 = vmul.f32 %v10449_v1, %v5251_v13  ;;  %v5754_v12 = vadd.f32 %v10453_v9, %v5498_v46  ;;  %v6743_v25 = vadd.f32 %v15691_v29, %v15724_v4  ;;  %v10457_v13 = vld [vmem:[%s16913_s11 + $0x6f8] sm:$0xff]  ;;  %v10461_v1 = vld [vmem:[%s16913_s11 + $0x760] sm:$0xff]  ;;  %v5259_v9 = vld [vmem:[#allocation2 + $0x730] sm:$0xff] }
 0x7f4   :  { %v7091_v44 = vadd.f32 %v7090_v59, %v7002_v20  ;;  %6954 = vmatmul.bf16.gmra.mxu3 %v5898_v54  ;;  %v5761_v63 = vadd.f32 %v10445_v26, %v5505_v50  ;;  %v5250_v59 = vld [vmem:[#allocation2 + $0x6e8] sm:$0xff]  ;;  %v10460_v4 = vld [vmem:[%s16913_s11 + $0x6b8] sm:$0xff] }
 0x7f5   :  { %v5506_v37 = vmul.f32 %v10447_v57, %v5250_v59  ;;  %v5763_v48 = vadd.f32 %v10454_v23, %v5507_v31 }
 0x7f6   :  { %7160 = vst [vmem:[%s16912_s10 + $0x38] sm:$0xff] %v7091_v44  ;;  %v7093_v40 = vpop.f32.mrf.mxu1  ;;  %7043 = vmatmul.bf16.gmra.mxu0 %v5899_v22  ;;  %v5905_v6 = vpack.c.bf16 %v5761_v63, %v5753_v28  ;;  %v10452_v44 = vld [vmem:[%s16914_s12 + $0x6f8] sm:$0xff]  ;;  %v5257_v63 = vld [vmem:[#allocation2 + $0x720] sm:$0xff] }
 0x7f7   :  { %v6915_v52 = vpop.f32.mrf.mxu3  ;;  %v5762_v8 = vadd.f32 %v10451_v42, %v5506_v37  ;;  %v5508_v22 = vmul.f32 %v10452_v44, %v5252_v51  ;;  %v5266_v51 = vld [vmem:[#allocation2 + $0x768] sm:$0xff]  ;;  %v6745_v44 = vadd.f32 %v15732_v32, %v15747_v30  ;;  %v5268_v30 = vld [vmem:[#allocation2 + $0x778] sm:$0xff] }
 0x7f8   :  { %v6916_v53 = vadd.f32 %v6915_v52, %v6827_v2  ;;  %v6828_v18 = vpop.f32.mrf.mxu2  ;;  %v10455_v52 = vld [vmem:[%s16914_s12 + $0x6b8] sm:$0xff] }
 0x7f9   :  { %7132 = vmatmul.bf16.gmra.mxu1 %v5900_v3  ;;  %v6829_v54 = vadd.f32 %v6828_v18, %v6740_v7  ;;  %v5265_v3 = vld [vmem:[#allocation2 + $0x760] sm:$0xff]  ;;  %v10456_v18 = vld [vmem:[%s16913_s11 + $0x6b0] sm:$0xff] }
 0x7fa   :  { %v7005_v10 = vadd.f32 %v7004_v27, %v6916_v53  ;;  %v5244_v27 = vld [vmem:[#allocation2 + $0x6b8] sm:$0xff]  ;;  %v5906_v53 = vpack.c.bf16 %v5762_v8, %v5754_v12  ;;  %v5755_v58 = vadd.f32 %v10456_v18, %v5499_v45  ;;  %v10458_v7 = vld [vmem:[%s16914_s12 + $0x760] sm:$0xff]  ;;  %v5267_v8 = vld [vmem:[#allocation2 + $0x770] sm:$0xff] }
 0x7fb   :  { %v7006_v55 = vpop.f32.mrf.mxu0  ;;  %v5500_v26 = vmul.f32 %v10455_v52, %v5244_v27  ;;  %v5521_v57 = vmul.f32 %v10458_v7, %v5265_v3  ;;  %v5258_v27 = vld [vmem:[#allocation2 + $0x728] sm:$0xff] }
 0x7fc   :  { %v7094_v20 = vadd.f32 %v7093_v40, %v7005_v10  ;;  %v5764_v10 = vadd.f32 %v10457_v13, %v5508_v22  ;;  %v5907_v61 = vpack.c.bf16 %v5763_v48, %v5755_v58  ;;  %v10463_v22 = vld [vmem:[%s16914_s12 + $0x768] sm:$0xff]  ;;  %v10468_v13 = vld [vmem:[%s16914_s12 + $0x778] sm:$0xff] }
 0x7fd   :  { %6870 = vmatmul.bf16.gmra.mxu2 %v5905_v6  ;;  %v10459_v6 = vld [vmem:[%s16914_s12 + $0x720] sm:$0xff]  ;;  %v5756_v14 = vadd.f32 %v10460_v4, %v5500_v26  ;;  %v5777_v31 = vadd.f32 %v10461_v1, %v5521_v57  ;;  %v10464_v48 = vld [vmem:[%s16914_s12 + $0x728] sm:$0xff]  ;;  %v10465_v26 = vld [vmem:[%s16914_s12 + $0x770] sm:$0xff] }
 0x7fe   :  { %7161 = vst [vmem:[%s16912_s10 + $0x40] sm:$0xff] %v7094_v20  ;;  %v7095_v34 = vpop.f32.mrf.mxu1  ;;  %v5513_v29 = vmul.f32 %v10459_v6, %v5257_v63  ;;  %v5523_v32 = vmul.f32 %v10465_v26, %v5267_v8  ;;  %v10466_v63 = vld [vmem:[%s16914_s12 + $0x730] sm:$0xff]  ;;  %v10467_v58 = vld [vmem:[%s16913_s11 + $0x768] sm:$0xff]  ;;  %v10471_v4 = vld [vmem:[%s16914_s12 + $0x738] sm:$0xff] }
 0x7ff   :  { %v6917_v50 = vpop.f32.mrf.mxu3  ;;  %v5908_v20 = vpack.c.bf16 %v5764_v10, %v5756_v14  ;;  %v5524_v10 = vmul.f32 %v10468_v13, %v5268_v30  ;;  %v10469_v57 = vld [vmem:[%s16913_s11 + $0x728] sm:$0xff]  ;;  %v10472_v1 = vld [vmem:[%s16913_s11 + $0x730] sm:$0xff]  ;;  %v10478_v30 = vld [vmem:[%s16913_s11 + $0x7a0] sm:$0xff] }
 0x800   :  { %v6918_v2 = vadd.f32 %v6917_v50, %v6829_v54  ;;  %v6831_v40 = vpop.f32.mrf.mxu2 }
 0x802   :  { %v7007_v59 = vadd.f32 %v7006_v55, %v6918_v2  ;;  %v6832_v55 = vadd.f32 %v6831_v40, %v6743_v25  ;;  %v5522_v2 = vmul.f32 %v10463_v22, %v5266_v51  ;;  %v5514_v40 = vmul.f32 %v10464_v48, %v5258_v27  ;;  %v10475_v22 = vld [vmem:[%s16914_s12 + $0x7a0] sm:$0xff] }
 0x803   :  { %v7009_v28 = vpop.f32.mrf.mxu0  ;;  %v6748_v51 = vadd.f32 %v15774_v0, %v15826_v11  ;;  %v10476_v11 = vld [vmem:[%s16913_s11 + $0x738] sm:$0xff]  ;;  %v10477_v48 = vld [vmem:[%s16913_s11 + $0x7e0] sm:$0xff] }
 0x804   :  { %v7096_v37 = vadd.f32 %v7095_v34, %v7007_v59  ;;  %6959 = vmatmul.bf16.gmra.mxu3 %v5906_v53  ;;  %v10462_v34 = vld [vmem:[%s16913_s11 + $0x720] sm:$0xff]  ;;  %v5515_v59 = vmul.f32 %v10466_v63, %v5259_v9  ;;  %v5260_v53 = vld [vmem:[#allocation2 + $0x738] sm:$0xff]  ;;  %v5778_v25 = vadd.f32 %v10467_v58, %v5522_v2  ;;  %v10479_v58 = vld [vmem:[%s16914_s12 + $0x7e8] sm:$0xff] }
 0x805   :  { %v5769_v42 = vadd.f32 %v10462_v34, %v5513_v29  ;;  %v5281_v29 = vld [vmem:[#allocation2 + $0x7e0] sm:$0xff]  ;;  %v5516_v14 = vmul.f32 %v10471_v4, %v5260_v53  ;;  %v5276_v4 = vld [vmem:[#allocation2 + $0x7b8] sm:$0xff] }
 0x806   :  { %7162 = vst [vmem:[%s16912_s10 + $0x48] sm:$0xff] %v7096_v37  ;;  %v7098_v46 = vpop.f32.mrf.mxu1  ;;  %7048 = vmatmul.bf16.gmra.mxu0 %v5907_v61  ;;  %v5770_v37 = vadd.f32 %v10469_v57, %v5514_v40  ;;  %v10470_v61 = vld [vmem:[%s16913_s11 + $0x770] sm:$0xff]  ;;  %v10474_v34 = vld [vmem:[%s16914_s12 + $0x7e0] sm:$0xff] }
 0x807   :  { %v6920_v54 = vpop.f32.mrf.mxu3  ;;  %v5913_v23 = vpack.c.bf16 %v5777_v31, %v5769_v42  ;;  %v5771_v31 = vadd.f32 %v10472_v1, %v5515_v59  ;;  %v5537_v42 = vmul.f32 %v10474_v34, %v5281_v29  ;;  %v5772_v2 = vadd.f32 %v10476_v11, %v5516_v14  ;;  %v5283_v59 = vld [vmem:[#allocation2 + $0x7f0] sm:$0xff]  ;;  %v10484_v1 = vld [vmem:[%s16914_s12 + $0x7f8] sm:$0xff] }
 0x808   :  { %v6921_v33 = vadd.f32 %v6920_v54, %v6832_v55  ;;  %v6833_v45 = vpop.f32.mrf.mxu2  ;;  %v5779_v55 = vadd.f32 %v10470_v61, %v5523_v32  ;;  %v5914_v54 = vpack.c.bf16 %v5778_v25, %v5770_v37  ;;  %v5274_v32 = vld [vmem:[#allocation2 + $0x7a8] sm:$0xff] }
 0x809   :  { %7137 = vmatmul.bf16.gmra.mxu1 %v5908_v20  ;;  %v6834_v52 = vadd.f32 %v6833_v45, %v6745_v44  ;;  %v10473_v45 = vld [vmem:[%s16913_s11 + $0x778] sm:$0xff]  ;;  %v5793_v40 = vadd.f32 %v10477_v48, %v5537_v42 }
 0x80a   :  { %v7010_v50 = vadd.f32 %v7009_v28, %v6921_v33  ;;  %v5780_v27 = vadd.f32 %v10473_v45, %v5524_v10 }
 0x80b   :  { %v7011_v12 = vpop.f32.mrf.mxu0 }
 0x80c   :  { %v7099_v3 = vadd.f32 %v7098_v46, %v7010_v50  ;;  %v5273_v46 = vld [vmem:[#allocation2 + $0x7a0] sm:$0xff]  ;;  %v5915_v50 = vpack.c.bf16 %v5779_v55, %v5771_v31  ;;  %v10481_v55 = vld [vmem:[%s16914_s12 + $0x7f0] sm:$0xff] }
 0x80d   :  { %6875 = vmatmul.bf16.gmra.mxu2 %v5913_v23  ;;  %v5529_v0 = vmul.f32 %v10475_v22, %v5273_v46  ;;  %v10483_v46 = vld [vmem:[%s16913_s11 + $0x7e8] sm:$0xff] }
 0x80e   :  { %7163 = vst [vmem:[%s16912_s10 + $0x50] sm:$0xff] %v7099_v3  ;;  %v7100_v18 = vpop.f32.mrf.mxu1  ;;  %v5282_v3 = vld [vmem:[#allocation2 + $0x7e8] sm:$0xff] }
 0x80f   :  { %v6922_v28 = vpop.f32.mrf.mxu3  ;;  %v5785_v63 = vadd.f32 %v10478_v30, %v5529_v0  ;;  %v5538_v25 = vmul.f32 %v10479_v58, %v5282_v3  ;;  %v10488_v0 = vld [vmem:[%s16913_s11 + $0x7b0] sm:$0xff] }
 0x810   :  { %v6923_v7 = vadd.f32 %v6922_v28, %v6834_v52  ;;  %v6836_v6 = vpop.f32.mrf.mxu2  ;;  %v5275_v28 = vld [vmem:[#allocation2 + $0x7b0] sm:$0xff] }
 0x811   :  { %v6837_v44 = vadd.f32 %v6836_v6, %v6748_v51  ;;  %v5921_v10 = vpack.c.bf16 %v5793_v40, %v5785_v63  ;;  %v10482_v6 = vld [vmem:[%s16914_s12 + $0x7b0] sm:$0xff] }
 0x812   :  { %v7012_v20 = vadd.f32 %v7011_v12, %v6923_v7  ;;  %v5916_v12 = vpack.c.bf16 %v5780_v27, %v5772_v2  ;;  %v10480_v7 = vld [vmem:[%s16914_s12 + $0x7a8] sm:$0xff]  ;;  %v5531_v29 = vmul.f32 %v10482_v6, %v5275_v28  ;;  %v10486_v27 = vld [vmem:[%s16913_s11 + $0x7f0] sm:$0xff]  ;;  %v6753_v2 = vadd.f32 %v15907_v19, %v15915_v41 }
 0x813   :  { %v7014_v33 = vpop.f32.mrf.mxu0  ;;  %v5530_v57 = vmul.f32 %v10480_v7, %v5274_v32 }
 0x814   :  { %v7101_v8 = vadd.f32 %v7100_v18, %v7012_v20  ;;  %6964 = vmatmul.bf16.gmra.mxu3 %v5914_v54  ;;  %v6750_v18 = vadd.f32 %v15872_v15, %v15877_v47  ;;  %v5539_v15 = vmul.f32 %v10481_v55, %v5283_v59  ;;  %v5284_v47 = vld [vmem:[#allocation2 + $0x7f8] sm:$0xff]  ;;  %v5794_v20 = vadd.f32 %v10483_v46, %v5538_v25 }
 0x815   :  { %v5540_v31 = vmul.f32 %v10484_v1, %v5284_v47  ;;  %v5787_v11 = vadd.f32 %v10488_v0, %v5531_v29 }
 0x816   :  { %7164 = vst [vmem:[%s16912_s10 + $0x58] sm:$0xff] %v7101_v8  ;;  %v7103_v9 = vpop.f32.mrf.mxu1  ;;  %7053 = vmatmul.bf16.gmra.mxu0 %v5915_v50  ;;  %v5795_v34 = vadd.f32 %v10486_v27, %v5539_v15  ;;  %v10487_v8 = vld [vmem:[%s16914_s12 + $0x7b8] sm:$0xff] }
 0x817   :  { %v6925_v23 = vpop.f32.mrf.mxu3  ;;  %v5532_v50 = vmul.f32 %v10487_v8, %v5276_v4  ;;  %v6760_v4 = vadd.f32 %v15967_v49, %v15984_v5 }
 0x818   :  { %v6926_v52 = vadd.f32 %v6925_v23, %v6837_v44  ;;  %v6838_v26 = vpop.f32.mrf.mxu2  ;;  %v5923_v40 = vpack.c.bf16 %v5795_v34, %v5787_v11 }
 0x819   :  { %7142 = vmatmul.bf16.gmra.mxu1 %v5916_v12  ;;  %v6839_v61 = vadd.f32 %v6838_v26, %v6750_v18  ;;  %v10489_v12 = vld [vmem:[%s16913_s11 + $0x7f8] sm:$0xff] }
 0x81a   :  { %v7015_v53 = vadd.f32 %v7014_v33, %v6926_v52  ;;  %v10485_v33 = vld [vmem:[%s16913_s11 + $0x7a8] sm:$0xff]  ;;  %v5796_v23 = vadd.f32 %v10489_v12, %v5540_v31  ;;  %v10490_v52 = vld [vmem:[%s16913_s11 + $0x7b8] sm:$0xff]  ;;  %v6768_v12 = vadd.f32 %v16065_v56, %v16073_v60 }
 0x81b   :  { %v7016_v13 = vpop.f32.mrf.mxu0  ;;  %v5786_v45 = vadd.f32 %v10485_v33, %v5530_v57  ;;  %v5788_v26 = vadd.f32 %v10490_v52, %v5532_v50  ;;  %v6765_v50 = vadd.f32 %v16030_v21, %v16047_v38 }
 0x81c   :  { %v7104_v37 = vadd.f32 %v7103_v9, %v7015_v53  ;;  %v6755_v53 = vadd.f32 %v15923_v35, %v15921_v36 }
 0x81d   :  { %6880 = vmatmul.bf16.gmra.mxu2 %v5921_v10  ;;  %v5922_v22 = vpack.c.bf16 %v5794_v20, %v5786_v45  ;;  %v5924_v41 = vpack.c.bf16 %v5796_v23, %v5788_v26 }
 0x81e   :  { %7165 = vst [vmem:[%s16912_s10 + $0x60] sm:$0xff] %v7104_v37  ;;  %v7105_v14 = vpop.f32.mrf.mxu1  ;;  %v6758_v37 = vadd.f32 %v15938_v43, %v15952_v16 }
 0x81f   :  { %v6927_v54 = vpop.f32.mrf.mxu3 }
 0x820   :  { %v6928_v51 = vadd.f32 %v6927_v54, %v6839_v61  ;;  %v6841_v42 = vpop.f32.mrf.mxu2 }
 0x821   :  { %v6842_v3 = vadd.f32 %v6841_v42, %v6753_v2 }
 0x822   :  { %v7017_v44 = vadd.f32 %v7016_v13, %v6928_v51  ;;  %v6763_v51 = vadd.f32 %v16002_v39, %v16010_v24 }
 0x823   :  { %v7019_v9 = vpop.f32.mrf.mxu0 }
 0x824   :  { %v7106_v48 = vadd.f32 %v7105_v14, %v7017_v44  ;;  %6969 = vmatmul.bf16.gmra.mxu3 %v5922_v22 }
 0x826   :  { %7166 = vst [vmem:[%s16912_s10 + $0x68] sm:$0xff] %v7106_v48  ;;  %v7108_v19 = vpop.f32.mrf.mxu1  ;;  %7058 = vmatmul.bf16.gmra.mxu0 %v5923_v40 }
 0x827   :  { %v6930_v32 = vpop.f32.mrf.mxu3 }
 0x828   :  { %v6931_v30 = vadd.f32 %v6930_v32, %v6842_v3  ;;  %v6843_v63 = vpop.f32.mrf.mxu2 }
 0x829   :  { %7147 = vmatmul.bf16.gmra.mxu1 %v5924_v41  ;;  %v6844_v25 = vadd.f32 %v6843_v63, %v6755_v53  ;;  %v16936_v41 = vld [vmem:[#allocation9_spill] sm:$0xff] }
 0x82a   :  { %v7020_v59 = vadd.f32 %v7019_v9, %v6931_v30 }
 0x82b   :  { %v7021_v18 = vpop.f32.mrf.mxu0 }
 0x82c   :  { %v7109_v58 = vadd.f32 %v7108_v19, %v7020_v59  ;;  %v16935_v19 = vld [vmem:[#allocation10_spill] sm:$0xff] }
 0x82d   :  { %v6770_v32 = vadd.f32 %v16936_v41, %v16935_v19 }
 0x82e   :  { %7167 = vst [vmem:[%s16912_s10 + $0x70] sm:$0xff] %v7109_v58  ;;  %v7110_v28 = vpop.f32.mrf.mxu1 }
 0x82f   :  { %v6932_v13 = vpop.f32.mrf.mxu3 }
 0x830   :  { %v6933_v10 = vadd.f32 %v6932_v13, %v6844_v25  ;;  %v6846_v7 = vpop.f32.mrf.mxu2  ;;  %v16937_v25 = vld [vmem:[#allocation12_spill] sm:$0xff] }
 0x831   :  { %v6847_v15 = vadd.f32 %v6846_v7, %v6758_v37 }
 0x832   :  { %v7022_v57 = vadd.f32 %v7021_v18, %v6933_v10 }
 0x833   :  { %v7024_v61 = vpop.f32.mrf.mxu0 }
 0x834   :  { %v7111_v55 = vadd.f32 %v7110_v28, %v7022_v57  ;;  %v16938_v28 = vld [vmem:[#allocation11_spill] sm:$0xff] }
 0x835   :  { %v6773_v13 = vadd.f32 %v16938_v28, %v16937_v25 }
 0x836   :  { %7168 = vst [vmem:[%s16912_s10 + $0x78] sm:$0xff] %v7111_v55  ;;  %v7113_v36 = vpop.f32.mrf.mxu1 }
 0x837   :  { %v6935_v35 = vpop.f32.mrf.mxu3 }
 0x838   :  { %v6936_v47 = vadd.f32 %v6935_v35, %v6847_v15  ;;  %v6848_v6 = vpop.f32.mrf.mxu2  ;;  %v16939_v35 = vld [vmem:[#allocation14_spill] sm:$0xff] }
 0x839   :  { %v6849_v20 = vadd.f32 %v6848_v6, %v6760_v4 }
 0x83a   :  { %v7025_v29 = vadd.f32 %v7024_v61, %v6936_v47  ;;  %v16940_v47 = vld [vmem:[#allocation13_spill] sm:$0xff] }
 0x83b   :  { %v7026_v14 = vpop.f32.mrf.mxu0  ;;  %v6775_v6 = vadd.f32 %v16940_v47, %v16939_v35 }
 0x83c   :  { %v7114_v46 = vadd.f32 %v7113_v36, %v7025_v29 }
 0x83e   :  { %7169 = vst [vmem:[%s16912_s10 + $0x80] sm:$0xff] %v7114_v46  ;;  %v7115_v43 = vpop.f32.mrf.mxu1 }
 0x83f   :  { %v6937_v16 = vpop.f32.mrf.mxu3 }
 0x840   :  { %v6938_v54 = vadd.f32 %v6937_v16, %v6849_v20  ;;  %v6851_v1 = vpop.f32.mrf.mxu2 }
 0x841   :  { %v6852_v27 = vadd.f32 %v6851_v1, %v6763_v51  ;;  %v16941_v1 = vld [vmem:[#allocation16_spill] sm:$0xff] }
 0x842   :  { %v7027_v31 = vadd.f32 %v7026_v14, %v6938_v54 }
 0x843   :  { %v7029_v33 = vpop.f32.mrf.mxu0 }
 0x844   :  { %v7116_v45 = vadd.f32 %v7115_v43, %v7027_v31  ;;  %v16942_v31 = vld [vmem:[#allocation15_spill] sm:$0xff] }
 0x845   :  { %v6778_v51 = vadd.f32 %v16942_v31, %v16941_v1 }
 0x846   :  { %7170 = vst [vmem:[%s16912_s10 + $0x88] sm:$0xff] %v7116_v45  ;;  %v7118_v49 = vpop.f32.mrf.mxu1 }
 0x847   :  { %v6940_v5 = vpop.f32.mrf.mxu3 }
 0x848   :  { %v6941_v34 = vadd.f32 %v6940_v5, %v6852_v27  ;;  %v6853_v42 = vpop.f32.mrf.mxu2 }
 0x849   :  { %v6854_v0 = vadd.f32 %v6853_v42, %v6765_v50  ;;  %v16943_v50 = vld [vmem:[#allocation18_spill] sm:$0xff] }
 0x84a   :  { %v7030_v8 = vadd.f32 %v7029_v33, %v6941_v34 }
 0x84b   :  { %v7031_v44 = vpop.f32.mrf.mxu0 }
 0x84c   :  { %v7119_v22 = vadd.f32 %v7118_v49, %v7030_v8 }
 0x84e   :  { %7171 = vst [vmem:[%s16912_s10 + $0x90] sm:$0xff] %v7119_v22  ;;  %v7120_v39 = vpop.f32.mrf.mxu1 }
 0x84f   :  { %v6942_v24 = vpop.f32.mrf.mxu3 }
 0x850   :  { %v6943_v11 = vadd.f32 %v6942_v24, %v6854_v0  ;;  %v6856_v2 = vpop.f32.mrf.mxu2 }
 0x851   :  { %v6857_v40 = vadd.f32 %v6856_v2, %v6768_v12 }
 0x852   :  { %v7032_v9 = vadd.f32 %v7031_v44, %v6943_v11  ;;  %v16944_v44 = vld [vmem:[#allocation17_spill] sm:$0xff] }
 0x853   :  { %v7034_v23 = vpop.f32.mrf.mxu0  ;;  %v6780_v22 = vadd.f32 %v16944_v44, %v16943_v50 }
 0x854   :  { %v7121_v48 = vadd.f32 %v7120_v39, %v7032_v9 }
 0x856   :  { %7172 = vst [vmem:[%s16912_s10 + $0x98] sm:$0xff] %v7121_v48  ;;  %v7123_v21 = vpop.f32.mrf.mxu1  ;;  %v16945_v48 = vld [vmem:[#allocation20_spill] sm:$0xff] }
 0x857   :  { %v6945_v38 = vpop.f32.mrf.mxu3 }
 0x858   :  { %v6946_v3 = vadd.f32 %v6945_v38, %v6857_v40  ;;  %v6858_v52 = vpop.f32.mrf.mxu2  ;;  %v16946_v40 = vld [vmem:[#allocation19_spill] sm:$0xff] }
 0x859   :  { %v6859_v59 = vadd.f32 %v6858_v52, %v6770_v32 }
 0x85a   :  { %v7035_v26 = vadd.f32 %v7034_v23, %v6946_v3 }
 0x85b   :  { %v7036_v30 = vpop.f32.mrf.mxu0 }
 0x85c   :  { %v7124_v63 = vadd.f32 %v7123_v21, %v7035_v26  ;;  %v6783_v21 = vadd.f32 %v16946_v40, %v16945_v48 }
 0x85e   :  { %7173 = vst [vmem:[%s16912_s10 + $0xa0] sm:$0xff] %v7124_v63  ;;  %v7125_v56 = vpop.f32.mrf.mxu1  ;;  %v16947_v63 = vld [vmem:[#allocation22_spill] sm:$0xff] }
 0x85f   :  { %v6947_v60 = vpop.f32.mrf.mxu3 }
 0x860   :  { %v6948_v53 = vadd.f32 %v6947_v60, %v6859_v59  ;;  %v6861_v18 = vpop.f32.mrf.mxu2  ;;  %v16948_v59 = vld [vmem:[#allocation21_spill] sm:$0xff] }
 0x861   :  { %v6862_v57 = vadd.f32 %v6861_v18, %v6773_v13 }
 0x862   :  { %v7037_v58 = vadd.f32 %v7036_v30, %v6948_v53 }
 0x863   :  { %v7039_v10 = vpop.f32.mrf.mxu0 }
 0x864   :  { %v7126_v7 = vadd.f32 %v7125_v56, %v7037_v58  ;;  %v6785_v56 = vadd.f32 %v16948_v59, %v16947_v63 }
 0x866   :  { %7174 = vst [vmem:[%s16912_s10 + $0xa8] sm:$0xff] %v7126_v7  ;;  %v7128_v37 = vpop.f32.mrf.mxu1  ;;  %v16949_v7 = vld [vmem:[#allocation24_spill] sm:$0xff] }
 0x867   :  { %v6950_v61 = vpop.f32.mrf.mxu3 }
 0x868   :  { %v6951_v55 = vadd.f32 %v6950_v61, %v6862_v57  ;;  %v6863_v15 = vpop.f32.mrf.mxu2  ;;  %v16950_v57 = vld [vmem:[#allocation23_spill] sm:$0xff] }
 0x869   :  { %v6864_v14 = vadd.f32 %v6863_v15, %v6775_v6 }
 0x86a   :  { %v7040_v36 = vadd.f32 %v7039_v10, %v6951_v55 }
 0x86b   :  { %v7041_v29 = vpop.f32.mrf.mxu0 }
 0x86c   :  { %v7129_v4 = vadd.f32 %v7128_v37, %v7040_v36  ;;  %v6788_v37 = vadd.f32 %v16950_v57, %v16949_v7 }
 0x86e   :  { %7175 = vst [vmem:[%s16912_s10 + $0xb0] sm:$0xff] %v7129_v4  ;;  %v7130_v46 = vpop.f32.mrf.mxu1  ;;  %v16951_v4 = vld [vmem:[#allocation25_spill] sm:$0xff] }
 0x86f   :  { %v6952_v20 = vpop.f32.mrf.mxu3 }
 0x870   :  { %v6953_v43 = vadd.f32 %v6952_v20, %v6864_v14  ;;  %v6866_v16 = vpop.f32.mrf.mxu2  ;;  %v6790_v14 = vadd.f32 %v16951_v4, %v16337_v62 }
 0x871   :  { %v6867_v27 = vadd.f32 %v6866_v16, %v6778_v51 }
 0x872   :  { %v7042_v54 = vadd.f32 %v7041_v29, %v6953_v43 }
 0x873   :  { %v7044_v33 = vpop.f32.mrf.mxu0 }
 0x874   :  { %v7131_v45 = vadd.f32 %v7130_v46, %v7042_v54 }
 0x876   :  { %7176 = vst [vmem:[%s16912_s10 + $0xb8] sm:$0xff] %v7131_v45  ;;  %v7133_v49 = vpop.f32.mrf.mxu1  ;;  %v16953_v45 = vld [vmem:[#allocation26_spill] sm:$0xff] }
 0x877   :  { %v6955_v5 = vpop.f32.mrf.mxu3 }
 0x878   :  { %v6956_v34 = vadd.f32 %v6955_v5, %v6867_v27  ;;  %v6868_v42 = vpop.f32.mrf.mxu2 }
 0x879   :  { %v6869_v24 = vadd.f32 %v6868_v42, %v6780_v22  ;;  %v16954_v22 = vld [vmem:[#allocation28_spill] sm:$0xff] }
 0x87a   :  { %v7045_v8 = vadd.f32 %v7044_v33, %v6956_v34  ;;  %v16952_v33 = vld [vmem:[#allocation27_spill] sm:$0xff] }
 0x87b   :  { %v7046_v0 = vpop.f32.mrf.mxu0  ;;  %v6793_v27 = vadd.f32 %v16953_v45, %v16952_v33 }
 0x87c   :  { %v7134_v39 = vadd.f32 %v7133_v49, %v7045_v8 }
 0x87e   :  { %7177 = vst [vmem:[%s16912_s10 + $0xc0] sm:$0xff] %v7134_v39  ;;  %v7135_v11 = vpop.f32.mrf.mxu1 }
 0x87f   :  { %v6957_v2 = vpop.f32.mrf.mxu3 }
 0x880   :  { %v6958_v9 = vadd.f32 %v6957_v2, %v6869_v24  ;;  %v6871_v12 = vpop.f32.mrf.mxu2 }
 0x881   :  { %v6872_v52 = vadd.f32 %v6871_v12, %v6783_v21 }
 0x882   :  { %v7047_v23 = vadd.f32 %v7046_v0, %v6958_v9  ;;  %v6795_v0 = vadd.f32 %v16954_v22, %v16395_v17 }
 0x883   :  { %v7049_v38 = vpop.f32.mrf.mxu0 }
 0x884   :  { %v7136_v3 = vadd.f32 %v7135_v11, %v7047_v23 }
 0x886   :  { %7178 = vst [vmem:[%s16912_s10 + $0xc8] sm:$0xff] %v7136_v3  ;;  %v7138_v26 = vpop.f32.mrf.mxu1 }
 0x887   :  { %v6960_v19 = vpop.f32.mrf.mxu3 }
 0x888   :  { %v6961_v41 = vadd.f32 %v6960_v19, %v6872_v52  ;;  %v6873_v32 = vpop.f32.mrf.mxu2 }
 0x889   :  { %v6874_v18 = vadd.f32 %v6873_v32, %v6785_v56 }
 0x88a   :  { %v7050_v30 = vadd.f32 %v7049_v38, %v6961_v41 }
 0x88b   :  { %v7051_v60 = vpop.f32.mrf.mxu0 }
 0x88c   :  { %v7139_v53 = vadd.f32 %v7138_v26, %v7050_v30 }
 0x88e   :  { %7179 = vst [vmem:[%s16912_s10 + $0xd0] sm:$0xff] %v7139_v53  ;;  %v7140_v58 = vpop.f32.mrf.mxu1 }
 0x88f   :  { %v6962_v25 = vpop.f32.mrf.mxu3 }
 0x890   :  { %v6963_v28 = vadd.f32 %v6962_v25, %v6874_v18  ;;  %v6876_v13 = vpop.f32.mrf.mxu2 }
 0x891   :  { %v6877_v15 = vadd.f32 %v6876_v13, %v6788_v37 }
 0x892   :  { %v7052_v10 = vadd.f32 %v7051_v60, %v6963_v28 }
 0x893   :  { %v7054_v61 = vpop.f32.mrf.mxu0 }
 0x894   :  { %v7141_v55 = vadd.f32 %v7140_v58, %v7052_v10 }
 0x896   :  { %7180 = vst [vmem:[%s16912_s10 + $0xd8] sm:$0xff] %v7141_v55  ;;  %v7143_v36 = vpop.f32.mrf.mxu1 }
 0x897   :  { %v6965_v35 = vpop.f32.mrf.mxu3 }
 0x898   :  { %v6966_v47 = vadd.f32 %v6965_v35, %v6877_v15  ;;  %v6878_v6 = vpop.f32.mrf.mxu2 }
 0x899   :  { %v6879_v20 = vadd.f32 %v6878_v6, %v6790_v14 }
 0x89a   :  { %v7055_v29 = vadd.f32 %v7054_v61, %v6966_v47 }
 0x89b   :  { %v7056_v43 = vpop.f32.mrf.mxu0 }
 0x89c   :  { %v7144_v46 = vadd.f32 %v7143_v36, %v7055_v29 }
 0x89e   :  { %7181 = vst [vmem:[%s16912_s10 + $0xe0] sm:$0xff] %v7144_v46  ;;  %v7145_v16 = vpop.f32.mrf.mxu1 }
 0x89f   :  { %v6967_v54 = vpop.f32.mrf.mxu3 }
 0x8a0   :  { %v6968_v1 = vadd.f32 %v6967_v54, %v6879_v20  ;;  %v6881_v31 = vpop.f32.mrf.mxu2 }
 0x8a1   :  { %v6882_v5 = vadd.f32 %v6881_v31, %v6793_v27 }
 0x8a2   :  { %v7057_v51 = vadd.f32 %v7056_v43, %v6968_v1 }
 0x8a3   :  { %v7059_v62 = vpop.f32.mrf.mxu0 }
 0x8a4   :  { %v7146_v49 = vadd.f32 %v7145_v16, %v7057_v51 }
 0x8a6   :  { %7182 = vst [vmem:[%s16912_s10 + $0xe8] sm:$0xff] %v7146_v49  ;;  %v7148_v8 = vpop.f32.mrf.mxu1 }
 0x8a7   :  { %v6970_v34 = vpop.f32.mrf.mxu3 }
 0x8a8   :  { %v6971_v42 = vadd.f32 %v6970_v34, %v6882_v5  ;;  %v6883_v50 = vpop.f32.mrf.mxu2 }
 0x8a9   :  { %v6884_v24 = vadd.f32 %v6883_v50, %v6795_v0 }
 0x8aa   :  { %v7060_v44 = vadd.f32 %v7059_v62, %v6971_v42 }
 0x8ab   :  { %v7061_v9 = vpop.f32.mrf.mxu0 }
 0x8ac   :  { %v7149_v39 = vadd.f32 %v7148_v8, %v7060_v44 }
 0x8ae   :  { %7183 = vst [vmem:[%s16912_s10 + $0xf0] sm:$0xff] %v7149_v39  ;;  %v7150_v23 = vpop.f32.mrf.mxu1 }
 0x8af   :  { %v6972_v11 = vpop.f32.mrf.mxu3 }
 0x8b0   :  { %v6973_v2 = vadd.f32 %v6972_v11, %v6884_v24 }
 0x8b2   :  { %v7062_v12 = vadd.f32 %v7061_v9, %v6973_v2 }
 0x8b4   :  { %v7151_v48 = vadd.f32 %v7150_v23, %v7062_v12 }
 0x8b6   :  { %7184 = vst [vmem:[%s16912_s10 + $0xf8] sm:$0xff] %v7151_v48 }
 0x8b7   :  { %7709 = vsyncpa [#allocation3], 1 }
 0x8b8   :  { %7710 = vsyncpa [#allocation5], 1 }

</bundles_post_ra>
